<compile_context>
chip_gen: v7x
topology: tpu7x:2x2x1
jax: 0.10.0
libtpu: 0.0.40
codegen_flags: <defaults>
</compile_context>

<pallas_src>
import functools

import jax
import jax.numpy as jnp
from jax.experimental import pallas as pl
from jax.experimental.pallas import tpu as pltpu


def _round_up(x, m):
    return ((x + m - 1) // m) * m


def _pick_time_block(T, max_tb=16):
    """Largest divisor of T that is <= max_tb (timesteps per grid step)."""
    tb = min(T, max_tb)
    while T % tb:
        tb -= 1
    return tb


# ---------------------------------------------------------------------------
# Fused bidirectional GRU recurrence kernel (one layer, TB timesteps / step).
# ---------------------------------------------------------------------------
def _bigru_layer_kernel(gi_ref, whh_ref, bhn_ref, out_f_ref, out_b_ref,
                        h_mm_ref, h_ref, *, tb, bp, hp):
    """One grid step = TB timesteps of the fused fwd+bwd GRU recurrence.

    gi_ref   : (TB, 2Bp, 3Hp) bf16  precomputed x@W_ih^T + b_ih (+ b_hr/b_hz fold)
               rows [0:Bp]   = fwd direction at time  t0+i
               rows [Bp:2Bp] = bwd direction at time  T-1-(t0+i)  (pre-reversed)
    whh_ref  : (2Hp, 3Hp) bf16  stacked [W_hh_f^T ; W_hh_b^T]
    bhn_ref  : (2Bp, Hp)  f32   b_hn per direction (must stay inside r*(...))
    out_f_ref: (TB, Bp, Hp) bf16  streamed fwd hidden states
    out_b_ref: (TB, Bp, Hp) bf16  streamed bwd hidden states (original time order)
    h_mm_ref : (2Bp, 2Hp) bf16  block-diagonal matmul operand (off-diag stays 0)
    h_ref    : (2Bp, Hp)  f32   stacked [h_fwd ; h_bwd], carried in f32
    """
    @pl.when(pl.program_id(0) == 0)
    def _():
        h_mm_ref[...] = jnp.zeros_like(h_mm_ref)
        h_ref[...] = jnp.zeros_like(h_ref)

    def step(i, carry):
        gi = gi_ref[i].astype(jnp.float32)                        # (2Bp, 3Hp)
        # One fused K=2Hp MXU matmul covers both directions.
        gh = jnp.dot(h_mm_ref[...], whh_ref[...],
                     preferred_element_type=jnp.float32)           # (2Bp, 3Hp)
        r = jax.nn.sigmoid(gi[:, 0:hp] + gh[:, 0:hp])
        z = jax.nn.sigmoid(gi[:, hp:2 * hp] + gh[:, hp:2 * hp])
        n = jnp.tanh(gi[:, 2 * hp:3 * hp]
                     + r * (gh[:, 2 * hp:3 * hp] + bhn_ref[...]))
        h_new = (1.0 - z) * n + z * h_ref[...]                     # (2Bp, Hp) f32
        h_ref[...] = h_new

        h_bf = h_new.astype(jnp.bfloat16)
        # Refresh the block-diagonal matmul operand (tile-aligned sub-stores).
        h_mm_ref[0:bp, 0:hp] = h_bf[0:bp]
        h_mm_ref[bp:2 * bp, hp:2 * hp] = h_bf[bp:2 * bp]
        # Stream outputs: fwd in forward order, bwd reversed within the block.
        out_f_ref[i] = h_bf[0:bp]
        out_b_ref[tb - 1 - i] = h_bf[bp:2 * bp]
        return carry

    jax.lax.fori_loop(0, tb, step, 0, unroll=True)


def _bigru_layer(gi_cat, w_hh_cat, bhn, *, seq_len, time_block, batch_pad,
                 hidden_pad):
    """Run the fused fwd+bwd recurrence for one layer.

    Returns (out_f, out_b), each (T, Bp, Hp) bf16; out_b is in original time
    order (out_b[t] = backward hidden at time t).
    """
    T, TB, Bp, Hp = seq_len, time_block, batch_pad, hidden_pad
    nb = T // TB
    kernel = functools.partial(_bigru_layer_kernel, tb=TB, bp=Bp, hp=Hp)
    return pl.pallas_call(
        kernel,
        out_shape=(jax.ShapeDtypeStruct((T, Bp, Hp), jnp.bfloat16),
                   jax.ShapeDtypeStruct((T, Bp, Hp), jnp.bfloat16)),
        grid_spec=pltpu.PrefetchScalarGridSpec(
            num_scalar_prefetch=0,
            grid=(nb,),
            in_specs=[
                # Single merged gi DMA per block (both directions).
                pl.BlockSpec((TB, 2 * Bp, 3 * Hp), lambda t: (t, 0, 0)),
                pl.BlockSpec((2 * Hp, 3 * Hp), lambda t: (0, 0)),
                pl.BlockSpec((2 * Bp, Hp), lambda t: (0, 0)),
            ],
            out_specs=(
                pl.BlockSpec((TB, Bp, Hp), lambda t: (t, 0, 0)),
                pl.BlockSpec((TB, Bp, Hp), lambda t: (nb - 1 - t, 0, 0)),
            ),
            scratch_shapes=[
                pltpu.VMEM((2 * Bp, 2 * Hp), jnp.bfloat16),   # block-diag h (MXU)
                pltpu.VMEM((2 * Bp, Hp), jnp.float32),        # stacked h (f32)
            ],
        ),
        compiler_params=pltpu.CompilerParams(
            dimension_semantics=("arbitrary",)),              # serial recurrence
    )(gi_cat, w_hh_cat, bhn)


# ---------------------------------------------------------------------------
# Parameter init (PyTorch nn.GRU layout) and one-time kernel-layout prep.
# ---------------------------------------------------------------------------
def init_bigru_params(key, input_size, hidden_size, num_layers):
    """Deterministic init matching PyTorch nn.GRU parameter shapes/init."""
    H = hidden_size
    k = 1.0 / jnp.sqrt(jnp.float32(H))
    params = []
    for layer in range(num_layers):
        in_sz = input_size if layer == 0 else 2 * hidden_size
        p = {}
        for d in ("f", "b"):
            key, k1, k2, k3, k4 = jax.random.split(key, 5)
            p[f"w_ih_{d}"] = jax.random.uniform(k1, (3 * H, in_sz), jnp.float32, -k, k)
            p[f"w_hh_{d}"] = jax.random.uniform(k2, (3 * H, H), jnp.float32, -k, k)
            p[f"b_ih_{d}"] = jax.random.uniform(k3, (3 * H,), jnp.float32, -k, k)
            p[f"b_hh_{d}"] = jax.random.uniform(k4, (3 * H,), jnp.float32, -k, k)
        params.append(p)
    return params


def _pad_gate_cols(w_t, H, Hp):
    """(rows, 3H) -> (rows, 3Hp): pad each r/z/n gate block to Hp lanes."""
    rows = w_t.shape[0]
    w3 = w_t.reshape(rows, 3, H)
    w3 = jnp.pad(w3, ((0, 0), (0, 0), (0, Hp - H)))
    return w3.reshape(rows, 3 * Hp)


def prep_bigru_params(raw_params, hidden_size):
    """One-time transform: transpose, gate-pad to Hp, fold biases, cast bf16."""
    H = hidden_size
    Hp = _round_up(H, 128)
    prepped = []
    for layer, p in enumerate(raw_params):
        first = (layer == 0)

        # Stacked hidden->hidden weight: (2Hp, 3Hp) = [W_hh_f^T ; W_hh_b^T].
        whh_rows = []
        bias_rows = []
        bhn_rows = []
        for d in ("f", "b"):
            w = _pad_gate_cols(p[f"w_hh_{d}"].T, H, Hp)           # (H, 3Hp)
            whh_rows.append(jnp.pad(w, ((0, Hp - H), (0, 0))))    # (Hp, 3Hp)
            b_ih, b_hh = p[f"b_ih_{d}"], p[f"b_hh_{d}"]
            # Fold b_hr/b_hz into the precomputed gi bias; keep b_hn separate.
            b = b_ih + jnp.concatenate([b_hh[:2 * H], jnp.zeros((H,), jnp.float32)])
            bias_rows.append(_pad_gate_cols(b.reshape(1, 3 * H), H, Hp))      # (1, 3Hp)
            bhn_rows.append(jnp.pad(b_hh[2 * H:].reshape(1, H),
                                    ((0, 0), (0, Hp - H))))                   # (1, Hp)
        q = {
            "w_hh_cat": jnp.concatenate(whh_rows, axis=0).astype(jnp.bfloat16),  # (2Hp,3Hp)
            "bias_gi": jnp.concatenate(bias_rows, axis=0),                       # (2, 3Hp) f32
            "b_hn": jnp.concatenate(bhn_rows, axis=0),                           # (2, Hp)  f32
        }

        if first:
            cols = [_pad_gate_cols(p[f"w_ih_{d}"].T, H, Hp) for d in ("f", "b")]  # (I, 3Hp)
            q["w_ih_cat"] = jnp.concatenate(cols, axis=1).astype(jnp.bfloat16)    # (I, 6Hp)
        else:
            # Previous layer gives separate fwd/bwd feature halves; split the
            # input weight so no concat/padded-2Hp layout is needed.
            def block(d, half):
                sub = p[f"w_ih_{d}"][:, half * H:(half + 1) * H]   # (3H, H)
                sub_t = _pad_gate_cols(sub.T, H, Hp)               # (H, 3Hp)
                return jnp.pad(sub_t, ((0, Hp - H), (0, 0)))       # (Hp, 3Hp)
            q["w_from_f_cat"] = jnp.concatenate(
                [block("f", 0), block("b", 0)], axis=1).astype(jnp.bfloat16)  # (Hp, 6Hp)
            q["w_from_b_cat"] = jnp.concatenate(
                [block("f", 1), block("b", 1)], axis=1).astype(jnp.bfloat16)  # (Hp, 6Hp)
        prepped.append(q)
    return prepped, Hp


# ---------------------------------------------------------------------------
# Forward pass.
# ---------------------------------------------------------------------------
def bigru_forward(x_btf, prepped, *, hidden_size, hidden_pad, num_layers):
    """x_btf: (B, T, input_size) f32, batch_first. Returns (B, T, 2*hidden_size) f32."""
    H, Hp = hidden_size, hidden_pad
    B, T, _ = x_btf.shape
    Bp = _round_up(max(B, 16), 16)         # bf16 blocks want sublane multiple of 16
    TB = _pick_time_block(T)

    def make_gi(gi6, q):
        # gi6: (T*Bp, 6Hp) f32, cols [0:3Hp]=fwd dir, [3Hp:6Hp]=bwd dir.
        gi6 = gi6.reshape(T, Bp, 2, 3 * Hp) + q["bias_gi"]
        gi_f = gi6[:, :, 0, :]
        gi_b = gi6[:, :, 1, :][::-1]       # pre-reverse bwd direction in time
        return jnp.concatenate([gi_f, gi_b], axis=1).astype(jnp.bfloat16)  # (T,2Bp,3Hp)

    # time-major + batch padded to full (bf16) sublanes
    x = jnp.transpose(x_btf, (1, 0, 2)).astype(jnp.float32)      # (T, B, I)
    x = jnp.pad(x, ((0, 0), (0, Bp - B), (0, 0)))                # (T, Bp, I)
    flat = x.reshape(T * Bp, x.shape[-1]).astype(jnp.bfloat16)

    out_f = out_b = None
    for layer in range(num_layers):
        q = prepped[layer]
        # Hoisted input projection for all timesteps, both directions fused.
        if layer == 0:
            gi6 = jnp.dot(flat, q["w_ih_cat"], preferred_element_type=jnp.float32)
        else:
            ff = out_f.reshape(T * Bp, Hp)
            fb = out_b.reshape(T * Bp, Hp)
            gi6 = (jnp.dot(ff, q["w_from_f_cat"], preferred_element_type=jnp.float32)
                   + jnp.dot(fb, q["w_from_b_cat"], preferred_element_type=jnp.float32))
        gi_cat = make_gi(gi6, q)                                  # (T, 2Bp, 3Hp) bf16
        bhn = jnp.repeat(q["b_hn"], Bp, axis=0)                   # (2Bp, Hp) f32

        out_f, out_b = _bigru_layer(gi_cat, q["w_hh_cat"], bhn,
                                    seq_len=T, time_block=TB,
                                    batch_pad=Bp, hidden_pad=Hp)
        # (eval mode: no inter-layer dropout)

    out = jnp.concatenate([out_f[:, :B, :H], out_b[:, :B, :H]], axis=-1)
    return jnp.transpose(out, (1, 0, 2)).astype(jnp.float32)


# ---------------------------------------------------------------------------
# Pure-JAX f32 reference (matches PyTorch nn.GRU math) for a sanity check.
# ---------------------------------------------------------------------------
def bigru_reference(x_btf, raw_params, hidden_size, num_layers):
    H = hidden_size
    B, T, _ = x_btf.shape
    layer_in = jnp.transpose(x_btf, (1, 0, 2))
    for layer in range(num_layers):
        p = raw_params[layer]
        outs = []
        for d, rev in (("f", False), ("b", True)):
            w_ih, w_hh = p[f"w_ih_{d}"], p[f"w_hh_{d}"]
            b_ih, b_hh = p[f"b_ih_{d}"], p[f"b_hh_{d}"]
            xs = layer_in[::-1] if rev else layer_in

            def cell(h, x_t, w_ih=w_ih, w_hh=w_hh, b_ih=b_ih, b_hh=b_hh):
                gi = x_t @ w_ih.T + b_ih
                gh = h @ w_hh.T + b_hh
                r = jax.nn.sigmoid(gi[:, :H] + gh[:, :H])
                z = jax.nn.sigmoid(gi[:, H:2 * H] + gh[:, H:2 * H])
                n = jnp.tanh(gi[:, 2 * H:] + r * gh[:, 2 * H:])
                h_new = (1.0 - z) * n + z * h
                return h_new, h_new

            h0 = jnp.zeros((B, H), jnp.float32)
            _, ys = jax.lax.scan(cell, h0, xs)
            outs.append(ys[::-1] if rev else ys)
        layer_in = jnp.concatenate(outs, axis=-1)
    return jnp.transpose(layer_in, (1, 0, 2))


if __name__ == "__main__":
    batch = 2
    seq_len = 8
    input_size = 16
    hidden_size = 32
    num_layers = 2

    key = jax.random.PRNGKey(0)
    kx, kp = jax.random.split(key)
    x = jax.random.normal(kx, (batch, seq_len, input_size), jnp.float32)

    raw_params = init_bigru_params(kp, input_size, hidden_size, num_layers)
    prepped, Hp = prep_bigru_params(raw_params, hidden_size)

    fwd = jax.jit(functools.partial(
        bigru_forward, hidden_size=hidden_size, hidden_pad=Hp,
        num_layers=num_layers))

    out = jax.block_until_ready(fwd(x, prepped))

    assert out.shape == (batch, seq_len, 2 * hidden_size), out.shape
    assert out.dtype == jnp.float32
    assert bool(jnp.all(jnp.isfinite(out)))

    # bf16 matmul operands / bf16 inter-layer activations => ~1e-2-level diffs
    # vs the f32 reference are expected; use a generous tolerance.
    ref = bigru_reference(x, raw_params, hidden_size, num_layers)
    max_err = float(jnp.max(jnp.abs(out - ref)))
    assert max_err < 0.1, f"max abs err vs f32 reference: {max_err}"

    print("KERNEL_OK")
</pallas_src>

<mosaic_0001>
module attributes {stable_mosaic.version = 11 : i64} {
  func.func @_bigru_layer_kernel(%arg0: i32, %arg1: memref<8x32x384xbf16, #tpu.memory_space<vmem>>, %arg2: memref<256x384xbf16, #tpu.memory_space<vmem>>, %arg3: memref<32x128xf32, #tpu.memory_space<vmem>>, %arg4: memref<8x16x128xbf16, #tpu.memory_space<vmem>>, %arg5: memref<8x16x128xbf16, #tpu.memory_space<vmem>>, %arg6: memref<32x256xbf16, #tpu.memory_space<vmem>>, %arg7: memref<32x128xf32, #tpu.memory_space<vmem>>) attributes {dimension_semantics = [#tpu.dimension_semantics<arbitrary>], iteration_bounds = array<i64: 1>, scalar_prefetch = 0 : i64, scratch_operands = 2 : i64, tpu.core_type = #tpu.core_type<tc>, window_params = [{transform_indices = @transform_0, window_bounds = array<i64: 8, 32, 384>}, {pipeline_mode = #tpu.pipeline_mode<synchronous>, transform_indices = @transform_1, window_bounds = array<i64: 256, 384>}, {pipeline_mode = #tpu.pipeline_mode<synchronous>, transform_indices = @transform_2, window_bounds = array<i64: 32, 128>}, {transform_indices = @transform_3, window_bounds = array<i64: 8, 16, 128>}, {transform_indices = @transform_4, window_bounds = array<i64: 8, 16, 128>}]} {
    %c0_i32 = arith.constant 0 : i32
    %0 = arith.cmpi eq, %arg0, %c0_i32 : i32
    %1 = arith.extui %0 : i1 to i32
    %c0_i32_0 = arith.constant 0 : i32
    %2 = arith.cmpi ne, %1, %c0_i32_0 : i32
    scf.if %2 {
      %cst_198 = arith.constant 0.000000e+00 : bf16
      %427 = vector.broadcast %cst_198 : bf16 to vector<32x256xbf16>
      %c0_199 = arith.constant 0 : index
      %c0_200 = arith.constant 0 : index
      %428 = vector.load %arg6[%c0_199, %c0_200] : memref<32x256xbf16, #tpu.memory_space<vmem>>, vector<32x256xbf16>
      tpu.vector_store %arg6[%c0_199, %c0_200], %427 {strides = array<i32>} : memref<32x256xbf16, #tpu.memory_space<vmem>>, vector<32x256xbf16>,
      %cst_201 = arith.constant 0.000000e+00 : f32
      %429 = vector.broadcast %cst_201 : f32 to vector<32x128xf32>
      %c0_202 = arith.constant 0 : index
      %c0_203 = arith.constant 0 : index
      %430 = vector.load %arg7[%c0_202, %c0_203] : memref<32x128xf32, #tpu.memory_space<vmem>>, vector<32x128xf32>
      tpu.vector_store %arg7[%c0_202, %c0_203], %429 {strides = array<i32>} : memref<32x128xf32, #tpu.memory_space<vmem>>, vector<32x128xf32>,
    } else {
    }
    %c0_i32_1 = arith.constant 0 : i32
    %3 = arith.index_cast %c0_i32_1 : i32 to index
    %c0 = arith.constant 0 : index
    %c0_2 = arith.constant 0 : index
    %4 = vector.load %arg1[%3, %c0, %c0_2] : memref<8x32x384xbf16, #tpu.memory_space<vmem>>, vector<1x32x384xbf16>
    %5 = vector.shape_cast %4 : vector<1x32x384xbf16> to vector<32x384xbf16>
    %6 = arith.extf %5 : vector<32x384xbf16> to vector<32x384xf32>
    %c0_3 = arith.constant 0 : index
    %c0_4 = arith.constant 0 : index
    %7 = vector.load %arg6[%c0_3, %c0_4] : memref<32x256xbf16, #tpu.memory_space<vmem>>, vector<32x256xbf16>
    %c0_5 = arith.constant 0 : index
    %c0_6 = arith.constant 0 : index
    %8 = vector.load %arg2[%c0_5, %c0_6] : memref<256x384xbf16, #tpu.memory_space<vmem>>, vector<256x384xbf16>
    %cst = arith.constant dense<0.000000e+00> : vector<32x384xf32>
    %9 = tpu.matmul %7, %8, %cst {dimension_numbers = #tpu.dot_dimension_numbers<[1], [0], [0], [1], [0, 0, 1, 1], [], []>} : vector<32x256xbf16>, vector<256x384xbf16>, vector<32x384xf32> -> vector<32x384xf32>
    %10 = vector.extract_strided_slice %6 {offsets = [0, 0], sizes = [32, 128], strides = [1, 1]} : vector<32x384xf32> to vector<32x128xf32>
    %11 = vector.extract_strided_slice %9 {offsets = [0, 0], sizes = [32, 128], strides = [1, 1]} : vector<32x384xf32> to vector<32x128xf32>
    %12 = arith.addf %10, %11 : vector<32x128xf32>
    %13 = arith.negf %12 : vector<32x128xf32>
    %14 = math.exp %13 : vector<32x128xf32>
    %cst_7 = arith.constant 1.000000e+00 : f32
    %15 = vector.broadcast %cst_7 : f32 to vector<32x128xf32>
    %16 = arith.addf %15, %14 : vector<32x128xf32>
    %17 = arith.divf %15, %16 : vector<32x128xf32>
    %18 = vector.extract_strided_slice %6 {offsets = [0, 128], sizes = [32, 128], strides = [1, 1]} : vector<32x384xf32> to vector<32x128xf32>
    %19 = vector.extract_strided_slice %9 {offsets = [0, 128], sizes = [32, 128], strides = [1, 1]} : vector<32x384xf32> to vector<32x128xf32>
    %20 = arith.addf %18, %19 : vector<32x128xf32>
    %21 = arith.negf %20 : vector<32x128xf32>
    %22 = math.exp %21 : vector<32x128xf32>
    %cst_8 = arith.constant 1.000000e+00 : f32
    %23 = vector.broadcast %cst_8 : f32 to vector<32x128xf32>
    %24 = arith.addf %23, %22 : vector<32x128xf32>
    %25 = arith.divf %23, %24 : vector<32x128xf32>
    %26 = vector.extract_strided_slice %6 {offsets = [0, 256], sizes = [32, 128], strides = [1, 1]} : vector<32x384xf32> to vector<32x128xf32>
    %27 = vector.extract_strided_slice %9 {offsets = [0, 256], sizes = [32, 128], strides = [1, 1]} : vector<32x384xf32> to vector<32x128xf32>
    %c0_9 = arith.constant 0 : index
    %c0_10 = arith.constant 0 : index
    %28 = vector.load %arg3[%c0_9, %c0_10] : memref<32x128xf32, #tpu.memory_space<vmem>>, vector<32x128xf32>
    %29 = arith.addf %27, %28 : vector<32x128xf32>
    %30 = arith.mulf %17, %29 : vector<32x128xf32>
    %31 = arith.addf %26, %30 : vector<32x128xf32>
    %32 = math.tanh %31 : vector<32x128xf32>
    %cst_11 = arith.constant 1.000000e+00 : f32
    %33 = vector.broadcast %cst_11 : f32 to vector<32x128xf32>
    %34 = arith.subf %33, %25 : vector<32x128xf32>
    %35 = arith.mulf %34, %32 : vector<32x128xf32>
    %c0_12 = arith.constant 0 : index
    %c0_13 = arith.constant 0 : index
    %36 = vector.load %arg7[%c0_12, %c0_13] : memref<32x128xf32, #tpu.memory_space<vmem>>, vector<32x128xf32>
    %37 = arith.mulf %25, %36 : vector<32x128xf32>
    %38 = arith.addf %35, %37 : vector<32x128xf32>
    %c0_14 = arith.constant 0 : index
    %c0_15 = arith.constant 0 : index
    %39 = vector.load %arg7[%c0_14, %c0_15] : memref<32x128xf32, #tpu.memory_space<vmem>>, vector<32x128xf32>
    tpu.vector_store %arg7[%c0_14, %c0_15], %38 {strides = array<i32>} : memref<32x128xf32, #tpu.memory_space<vmem>>, vector<32x128xf32>,
    %40 = arith.truncf %38 : vector<32x128xf32> to vector<32x128xbf16>
    %41 = vector.extract_strided_slice %40 {offsets = [0, 0], sizes = [16, 128], strides = [1, 1]} : vector<32x128xbf16> to vector<16x128xbf16>
    %c0_16 = arith.constant 0 : index
    %c0_17 = arith.constant 0 : index
    %42 = vector.load %arg6[%c0_16, %c0_17] : memref<32x256xbf16, #tpu.memory_space<vmem>>, vector<16x128xbf16>
    tpu.vector_store %arg6[%c0_16, %c0_17], %41 {strides = array<i32>} : memref<32x256xbf16, #tpu.memory_space<vmem>>, vector<16x128xbf16>,
    %43 = vector.extract_strided_slice %40 {offsets = [16, 0], sizes = [16, 128], strides = [1, 1]} : vector<32x128xbf16> to vector<16x128xbf16>
    %c16 = arith.constant 16 : index
    %c128 = arith.constant 128 : index
    %44 = vector.load %arg6[%c16, %c128] : memref<32x256xbf16, #tpu.memory_space<vmem>>, vector<16x128xbf16>
    tpu.vector_store %arg6[%c16, %c128], %43 {strides = array<i32>} : memref<32x256xbf16, #tpu.memory_space<vmem>>, vector<16x128xbf16>,
    %45 = vector.extract_strided_slice %40 {offsets = [0, 0], sizes = [16, 128], strides = [1, 1]} : vector<32x128xbf16> to vector<16x128xbf16>
    %46 = arith.index_cast %c0_i32_1 : i32 to index
    %c0_18 = arith.constant 0 : index
    %c0_19 = arith.constant 0 : index
    %47 = vector.load %arg4[%46, %c0_18, %c0_19] : memref<8x16x128xbf16, #tpu.memory_space<vmem>>, vector<1x16x128xbf16>
    %48 = vector.shape_cast %47 : vector<1x16x128xbf16> to vector<16x128xbf16>
    %49 = vector.shape_cast %45 : vector<16x128xbf16> to vector<1x16x128xbf16>
    tpu.vector_store %arg4[%46, %c0_18, %c0_19], %49 {strides = array<i32>} : memref<8x16x128xbf16, #tpu.memory_space<vmem>>, vector<1x16x128xbf16>,
    %50 = vector.extract_strided_slice %40 {offsets = [16, 0], sizes = [16, 128], strides = [1, 1]} : vector<32x128xbf16> to vector<16x128xbf16>
    %c7_i32 = arith.constant 7 : i32
    %51 = arith.subi %c7_i32, %c0_i32_1 : i32
    %52 = arith.index_cast %51 : i32 to index
    %c0_20 = arith.constant 0 : index
    %c0_21 = arith.constant 0 : index
    %53 = vector.load %arg5[%52, %c0_20, %c0_21] : memref<8x16x128xbf16, #tpu.memory_space<vmem>>, vector<1x16x128xbf16>
    %54 = vector.shape_cast %53 : vector<1x16x128xbf16> to vector<16x128xbf16>
    %55 = vector.shape_cast %50 : vector<16x128xbf16> to vector<1x16x128xbf16>
    tpu.vector_store %arg5[%52, %c0_20, %c0_21], %55 {strides = array<i32>} : memref<8x16x128xbf16, #tpu.memory_space<vmem>>, vector<1x16x128xbf16>,
    %c1_i32 = arith.constant 1 : i32
    %56 = arith.index_cast %c1_i32 : i32 to index
    %c0_22 = arith.constant 0 : index
    %c0_23 = arith.constant 0 : index
    %57 = vector.load %arg1[%56, %c0_22, %c0_23] : memref<8x32x384xbf16, #tpu.memory_space<vmem>>, vector<1x32x384xbf16>
    %58 = vector.shape_cast %57 : vector<1x32x384xbf16> to vector<32x384xbf16>
    %59 = arith.extf %58 : vector<32x384xbf16> to vector<32x384xf32>
    %c0_24 = arith.constant 0 : index
    %c0_25 = arith.constant 0 : index
    %60 = vector.load %arg6[%c0_24, %c0_25] : memref<32x256xbf16, #tpu.memory_space<vmem>>, vector<32x256xbf16>
    %c0_26 = arith.constant 0 : index
    %c0_27 = arith.constant 0 : index
    %61 = vector.load %arg2[%c0_26, %c0_27] : memref<256x384xbf16, #tpu.memory_space<vmem>>, vector<256x384xbf16>
    %cst_28 = arith.constant dense<0.000000e+00> : vector<32x384xf32>
    %62 = tpu.matmul %60, %61, %cst_28 {dimension_numbers = #tpu.dot_dimension_numbers<[1], [0], [0], [1], [0, 0, 1, 1], [], []>} : vector<32x256xbf16>, vector<256x384xbf16>, vector<32x384xf32> -> vector<32x384xf32>
    %63 = vector.extract_strided_slice %59 {offsets = [0, 0], sizes = [32, 128], strides = [1, 1]} : vector<32x384xf32> to vector<32x128xf32>
    %64 = vector.extract_strided_slice %62 {offsets = [0, 0], sizes = [32, 128], strides = [1, 1]} : vector<32x384xf32> to vector<32x128xf32>
    %65 = arith.addf %63, %64 : vector<32x128xf32>
    %66 = arith.negf %65 : vector<32x128xf32>
    %67 = math.exp %66 : vector<32x128xf32>
    %cst_29 = arith.constant 1.000000e+00 : f32
    %68 = vector.broadcast %cst_29 : f32 to vector<32x128xf32>
    %69 = arith.addf %68, %67 : vector<32x128xf32>
    %70 = arith.divf %68, %69 : vector<32x128xf32>
    %71 = vector.extract_strided_slice %59 {offsets = [0, 128], sizes = [32, 128], strides = [1, 1]} : vector<32x384xf32> to vector<32x128xf32>
    %72 = vector.extract_strided_slice %62 {offsets = [0, 128], sizes = [32, 128], strides = [1, 1]} : vector<32x384xf32> to vector<32x128xf32>
    %73 = arith.addf %71, %72 : vector<32x128xf32>
    %74 = arith.negf %73 : vector<32x128xf32>
    %75 = math.exp %74 : vector<32x128xf32>
    %cst_30 = arith.constant 1.000000e+00 : f32
    %76 = vector.broadcast %cst_30 : f32 to vector<32x128xf32>
    %77 = arith.addf %76, %75 : vector<32x128xf32>
    %78 = arith.divf %76, %77 : vector<32x128xf32>
    %79 = vector.extract_strided_slice %59 {offsets = [0, 256], sizes = [32, 128], strides = [1, 1]} : vector<32x384xf32> to vector<32x128xf32>
    %80 = vector.extract_strided_slice %62 {offsets = [0, 256], sizes = [32, 128], strides = [1, 1]} : vector<32x384xf32> to vector<32x128xf32>
    %c0_31 = arith.constant 0 : index
    %c0_32 = arith.constant 0 : index
    %81 = vector.load %arg3[%c0_31, %c0_32] : memref<32x128xf32, #tpu.memory_space<vmem>>, vector<32x128xf32>
    %82 = arith.addf %80, %81 : vector<32x128xf32>
    %83 = arith.mulf %70, %82 : vector<32x128xf32>
    %84 = arith.addf %79, %83 : vector<32x128xf32>
    %85 = math.tanh %84 : vector<32x128xf32>
    %cst_33 = arith.constant 1.000000e+00 : f32
    %86 = vector.broadcast %cst_33 : f32 to vector<32x128xf32>
    %87 = arith.subf %86, %78 : vector<32x128xf32>
    %88 = arith.mulf %87, %85 : vector<32x128xf32>
    %c0_34 = arith.constant 0 : index
    %c0_35 = arith.constant 0 : index
    %89 = vector.load %arg7[%c0_34, %c0_35] : memref<32x128xf32, #tpu.memory_space<vmem>>, vector<32x128xf32>
    %90 = arith.mulf %78, %89 : vector<32x128xf32>
    %91 = arith.addf %88, %90 : vector<32x128xf32>
    %c0_36 = arith.constant 0 : index
    %c0_37 = arith.constant 0 : index
    %92 = vector.load %arg7[%c0_36, %c0_37] : memref<32x128xf32, #tpu.memory_space<vmem>>, vector<32x128xf32>
    tpu.vector_store %arg7[%c0_36, %c0_37], %91 {strides = array<i32>} : memref<32x128xf32, #tpu.memory_space<vmem>>, vector<32x128xf32>,
    %93 = arith.truncf %91 : vector<32x128xf32> to vector<32x128xbf16>
    %94 = vector.extract_strided_slice %93 {offsets = [0, 0], sizes = [16, 128], strides = [1, 1]} : vector<32x128xbf16> to vector<16x128xbf16>
    %c0_38 = arith.constant 0 : index
    %c0_39 = arith.constant 0 : index
    %95 = vector.load %arg6[%c0_38, %c0_39] : memref<32x256xbf16, #tpu.memory_space<vmem>>, vector<16x128xbf16>
    tpu.vector_store %arg6[%c0_38, %c0_39], %94 {strides = array<i32>} : memref<32x256xbf16, #tpu.memory_space<vmem>>, vector<16x128xbf16>,
    %96 = vector.extract_strided_slice %93 {offsets = [16, 0], sizes = [16, 128], strides = [1, 1]} : vector<32x128xbf16> to vector<16x128xbf16>
    %c16_40 = arith.constant 16 : index
    %c128_41 = arith.constant 128 : index
    %97 = vector.load %arg6[%c16_40, %c128_41] : memref<32x256xbf16, #tpu.memory_space<vmem>>, vector<16x128xbf16>
    tpu.vector_store %arg6[%c16_40, %c128_41], %96 {strides = array<i32>} : memref<32x256xbf16, #tpu.memory_space<vmem>>, vector<16x128xbf16>,
    %98 = vector.extract_strided_slice %93 {offsets = [0, 0], sizes = [16, 128], strides = [1, 1]} : vector<32x128xbf16> to vector<16x128xbf16>
    %99 = arith.index_cast %c1_i32 : i32 to index
    %c0_42 = arith.constant 0 : index
    %c0_43 = arith.constant 0 : index
    %100 = vector.load %arg4[%99, %c0_42, %c0_43] : memref<8x16x128xbf16, #tpu.memory_space<vmem>>, vector<1x16x128xbf16>
    %101 = vector.shape_cast %100 : vector<1x16x128xbf16> to vector<16x128xbf16>
    %102 = vector.shape_cast %98 : vector<16x128xbf16> to vector<1x16x128xbf16>
    tpu.vector_store %arg4[%99, %c0_42, %c0_43], %102 {strides = array<i32>} : memref<8x16x128xbf16, #tpu.memory_space<vmem>>, vector<1x16x128xbf16>,
    %103 = vector.extract_strided_slice %93 {offsets = [16, 0], sizes = [16, 128], strides = [1, 1]} : vector<32x128xbf16> to vector<16x128xbf16>
    %c7_i32_44 = arith.constant 7 : i32
    %104 = arith.subi %c7_i32_44, %c1_i32 : i32
    %105 = arith.index_cast %104 : i32 to index
    %c0_45 = arith.constant 0 : index
    %c0_46 = arith.constant 0 : index
    %106 = vector.load %arg5[%105, %c0_45, %c0_46] : memref<8x16x128xbf16, #tpu.memory_space<vmem>>, vector<1x16x128xbf16>
    %107 = vector.shape_cast %106 : vector<1x16x128xbf16> to vector<16x128xbf16>
    %108 = vector.shape_cast %103 : vector<16x128xbf16> to vector<1x16x128xbf16>
    tpu.vector_store %arg5[%105, %c0_45, %c0_46], %108 {strides = array<i32>} : memref<8x16x128xbf16, #tpu.memory_space<vmem>>, vector<1x16x128xbf16>,
    %c2_i32 = arith.constant 2 : i32
    %109 = arith.index_cast %c2_i32 : i32 to index
    %c0_47 = arith.constant 0 : index
    %c0_48 = arith.constant 0 : index
    %110 = vector.load %arg1[%109, %c0_47, %c0_48] : memref<8x32x384xbf16, #tpu.memory_space<vmem>>, vector<1x32x384xbf16>
    %111 = vector.shape_cast %110 : vector<1x32x384xbf16> to vector<32x384xbf16>
    %112 = arith.extf %111 : vector<32x384xbf16> to vector<32x384xf32>
    %c0_49 = arith.constant 0 : index
    %c0_50 = arith.constant 0 : index
    %113 = vector.load %arg6[%c0_49, %c0_50] : memref<32x256xbf16, #tpu.memory_space<vmem>>, vector<32x256xbf16>
    %c0_51 = arith.constant 0 : index
    %c0_52 = arith.constant 0 : index
    %114 = vector.load %arg2[%c0_51, %c0_52] : memref<256x384xbf16, #tpu.memory_space<vmem>>, vector<256x384xbf16>
    %cst_53 = arith.constant dense<0.000000e+00> : vector<32x384xf32>
    %115 = tpu.matmul %113, %114, %cst_53 {dimension_numbers = #tpu.dot_dimension_numbers<[1], [0], [0], [1], [0, 0, 1, 1], [], []>} : vector<32x256xbf16>, vector<256x384xbf16>, vector<32x384xf32> -> vector<32x384xf32>
    %116 = vector.extract_strided_slice %112 {offsets = [0, 0], sizes = [32, 128], strides = [1, 1]} : vector<32x384xf32> to vector<32x128xf32>
    %117 = vector.extract_strided_slice %115 {offsets = [0, 0], sizes = [32, 128], strides = [1, 1]} : vector<32x384xf32> to vector<32x128xf32>
    %118 = arith.addf %116, %117 : vector<32x128xf32>
    %119 = arith.negf %118 : vector<32x128xf32>
    %120 = math.exp %119 : vector<32x128xf32>
    %cst_54 = arith.constant 1.000000e+00 : f32
    %121 = vector.broadcast %cst_54 : f32 to vector<32x128xf32>
    %122 = arith.addf %121, %120 : vector<32x128xf32>
    %123 = arith.divf %121, %122 : vector<32x128xf32>
    %124 = vector.extract_strided_slice %112 {offsets = [0, 128], sizes = [32, 128], strides = [1, 1]} : vector<32x384xf32> to vector<32x128xf32>
    %125 = vector.extract_strided_slice %115 {offsets = [0, 128], sizes = [32, 128], strides = [1, 1]} : vector<32x384xf32> to vector<32x128xf32>
    %126 = arith.addf %124, %125 : vector<32x128xf32>
    %127 = arith.negf %126 : vector<32x128xf32>
    %128 = math.exp %127 : vector<32x128xf32>
    %cst_55 = arith.constant 1.000000e+00 : f32
    %129 = vector.broadcast %cst_55 : f32 to vector<32x128xf32>
    %130 = arith.addf %129, %128 : vector<32x128xf32>
    %131 = arith.divf %129, %130 : vector<32x128xf32>
    %132 = vector.extract_strided_slice %112 {offsets = [0, 256], sizes = [32, 128], strides = [1, 1]} : vector<32x384xf32> to vector<32x128xf32>
    %133 = vector.extract_strided_slice %115 {offsets = [0, 256], sizes = [32, 128], strides = [1, 1]} : vector<32x384xf32> to vector<32x128xf32>
    %c0_56 = arith.constant 0 : index
    %c0_57 = arith.constant 0 : index
    %134 = vector.load %arg3[%c0_56, %c0_57] : memref<32x128xf32, #tpu.memory_space<vmem>>, vector<32x128xf32>
    %135 = arith.addf %133, %134 : vector<32x128xf32>
    %136 = arith.mulf %123, %135 : vector<32x128xf32>
    %137 = arith.addf %132, %136 : vector<32x128xf32>
    %138 = math.tanh %137 : vector<32x128xf32>
    %cst_58 = arith.constant 1.000000e+00 : f32
    %139 = vector.broadcast %cst_58 : f32 to vector<32x128xf32>
    %140 = arith.subf %139, %131 : vector<32x128xf32>
    %141 = arith.mulf %140, %138 : vector<32x128xf32>
    %c0_59 = arith.constant 0 : index
    %c0_60 = arith.constant 0 : index
    %142 = vector.load %arg7[%c0_59, %c0_60] : memref<32x128xf32, #tpu.memory_space<vmem>>, vector<32x128xf32>
    %143 = arith.mulf %131, %142 : vector<32x128xf32>
    %144 = arith.addf %141, %143 : vector<32x128xf32>
    %c0_61 = arith.constant 0 : index
    %c0_62 = arith.constant 0 : index
    %145 = vector.load %arg7[%c0_61, %c0_62] : memref<32x128xf32, #tpu.memory_space<vmem>>, vector<32x128xf32>
    tpu.vector_store %arg7[%c0_61, %c0_62], %144 {strides = array<i32>} : memref<32x128xf32, #tpu.memory_space<vmem>>, vector<32x128xf32>,
    %146 = arith.truncf %144 : vector<32x128xf32> to vector<32x128xbf16>
    %147 = vector.extract_strided_slice %146 {offsets = [0, 0], sizes = [16, 128], strides = [1, 1]} : vector<32x128xbf16> to vector<16x128xbf16>
    %c0_63 = arith.constant 0 : index
    %c0_64 = arith.constant 0 : index
    %148 = vector.load %arg6[%c0_63, %c0_64] : memref<32x256xbf16, #tpu.memory_space<vmem>>, vector<16x128xbf16>
    tpu.vector_store %arg6[%c0_63, %c0_64], %147 {strides = array<i32>} : memref<32x256xbf16, #tpu.memory_space<vmem>>, vector<16x128xbf16>,
    %149 = vector.extract_strided_slice %146 {offsets = [16, 0], sizes = [16, 128], strides = [1, 1]} : vector<32x128xbf16> to vector<16x128xbf16>
    %c16_65 = arith.constant 16 : index
    %c128_66 = arith.constant 128 : index
    %150 = vector.load %arg6[%c16_65, %c128_66] : memref<32x256xbf16, #tpu.memory_space<vmem>>, vector<16x128xbf16>
    tpu.vector_store %arg6[%c16_65, %c128_66], %149 {strides = array<i32>} : memref<32x256xbf16, #tpu.memory_space<vmem>>, vector<16x128xbf16>,
    %151 = vector.extract_strided_slice %146 {offsets = [0, 0], sizes = [16, 128], strides = [1, 1]} : vector<32x128xbf16> to vector<16x128xbf16>
    %152 = arith.index_cast %c2_i32 : i32 to index
    %c0_67 = arith.constant 0 : index
    %c0_68 = arith.constant 0 : index
    %153 = vector.load %arg4[%152, %c0_67, %c0_68] : memref<8x16x128xbf16, #tpu.memory_space<vmem>>, vector<1x16x128xbf16>
    %154 = vector.shape_cast %153 : vector<1x16x128xbf16> to vector<16x128xbf16>
    %155 = vector.shape_cast %151 : vector<16x128xbf16> to vector<1x16x128xbf16>
    tpu.vector_store %arg4[%152, %c0_67, %c0_68], %155 {strides = array<i32>} : memref<8x16x128xbf16, #tpu.memory_space<vmem>>, vector<1x16x128xbf16>,
    %156 = vector.extract_strided_slice %146 {offsets = [16, 0], sizes = [16, 128], strides = [1, 1]} : vector<32x128xbf16> to vector<16x128xbf16>
    %c7_i32_69 = arith.constant 7 : i32
    %157 = arith.subi %c7_i32_69, %c2_i32 : i32
    %158 = arith.index_cast %157 : i32 to index
    %c0_70 = arith.constant 0 : index
    %c0_71 = arith.constant 0 : index
    %159 = vector.load %arg5[%158, %c0_70, %c0_71] : memref<8x16x128xbf16, #tpu.memory_space<vmem>>, vector<1x16x128xbf16>
    %160 = vector.shape_cast %159 : vector<1x16x128xbf16> to vector<16x128xbf16>
    %161 = vector.shape_cast %156 : vector<16x128xbf16> to vector<1x16x128xbf16>
    tpu.vector_store %arg5[%158, %c0_70, %c0_71], %161 {strides = array<i32>} : memref<8x16x128xbf16, #tpu.memory_space<vmem>>, vector<1x16x128xbf16>,
    %c3_i32 = arith.constant 3 : i32
    %162 = arith.index_cast %c3_i32 : i32 to index
    %c0_72 = arith.constant 0 : index
    %c0_73 = arith.constant 0 : index
    %163 = vector.load %arg1[%162, %c0_72, %c0_73] : memref<8x32x384xbf16, #tpu.memory_space<vmem>>, vector<1x32x384xbf16>
    %164 = vector.shape_cast %163 : vector<1x32x384xbf16> to vector<32x384xbf16>
    %165 = arith.extf %164 : vector<32x384xbf16> to vector<32x384xf32>
    %c0_74 = arith.constant 0 : index
    %c0_75 = arith.constant 0 : index
    %166 = vector.load %arg6[%c0_74, %c0_75] : memref<32x256xbf16, #tpu.memory_space<vmem>>, vector<32x256xbf16>
    %c0_76 = arith.constant 0 : index
    %c0_77 = arith.constant 0 : index
    %167 = vector.load %arg2[%c0_76, %c0_77] : memref<256x384xbf16, #tpu.memory_space<vmem>>, vector<256x384xbf16>
    %cst_78 = arith.constant dense<0.000000e+00> : vector<32x384xf32>
    %168 = tpu.matmul %166, %167, %cst_78 {dimension_numbers = #tpu.dot_dimension_numbers<[1], [0], [0], [1], [0, 0, 1, 1], [], []>} : vector<32x256xbf16>, vector<256x384xbf16>, vector<32x384xf32> -> vector<32x384xf32>
    %169 = vector.extract_strided_slice %165 {offsets = [0, 0], sizes = [32, 128], strides = [1, 1]} : vector<32x384xf32> to vector<32x128xf32>
    %170 = vector.extract_strided_slice %168 {offsets = [0, 0], sizes = [32, 128], strides = [1, 1]} : vector<32x384xf32> to vector<32x128xf32>
    %171 = arith.addf %169, %170 : vector<32x128xf32>
    %172 = arith.negf %171 : vector<32x128xf32>
    %173 = math.exp %172 : vector<32x128xf32>
    %cst_79 = arith.constant 1.000000e+00 : f32
    %174 = vector.broadcast %cst_79 : f32 to vector<32x128xf32>
    %175 = arith.addf %174, %173 : vector<32x128xf32>
    %176 = arith.divf %174, %175 : vector<32x128xf32>
    %177 = vector.extract_strided_slice %165 {offsets = [0, 128], sizes = [32, 128], strides = [1, 1]} : vector<32x384xf32> to vector<32x128xf32>
    %178 = vector.extract_strided_slice %168 {offsets = [0, 128], sizes = [32, 128], strides = [1, 1]} : vector<32x384xf32> to vector<32x128xf32>
    %179 = arith.addf %177, %178 : vector<32x128xf32>
    %180 = arith.negf %179 : vector<32x128xf32>
    %181 = math.exp %180 : vector<32x128xf32>
    %cst_80 = arith.constant 1.000000e+00 : f32
    %182 = vector.broadcast %cst_80 : f32 to vector<32x128xf32>
    %183 = arith.addf %182, %181 : vector<32x128xf32>
    %184 = arith.divf %182, %183 : vector<32x128xf32>
    %185 = vector.extract_strided_slice %165 {offsets = [0, 256], sizes = [32, 128], strides = [1, 1]} : vector<32x384xf32> to vector<32x128xf32>
    %186 = vector.extract_strided_slice %168 {offsets = [0, 256], sizes = [32, 128], strides = [1, 1]} : vector<32x384xf32> to vector<32x128xf32>
    %c0_81 = arith.constant 0 : index
    %c0_82 = arith.constant 0 : index
    %187 = vector.load %arg3[%c0_81, %c0_82] : memref<32x128xf32, #tpu.memory_space<vmem>>, vector<32x128xf32>
    %188 = arith.addf %186, %187 : vector<32x128xf32>
    %189 = arith.mulf %176, %188 : vector<32x128xf32>
    %190 = arith.addf %185, %189 : vector<32x128xf32>
    %191 = math.tanh %190 : vector<32x128xf32>
    %cst_83 = arith.constant 1.000000e+00 : f32
    %192 = vector.broadcast %cst_83 : f32 to vector<32x128xf32>
    %193 = arith.subf %192, %184 : vector<32x128xf32>
    %194 = arith.mulf %193, %191 : vector<32x128xf32>
    %c0_84 = arith.constant 0 : index
    %c0_85 = arith.constant 0 : index
    %195 = vector.load %arg7[%c0_84, %c0_85] : memref<32x128xf32, #tpu.memory_space<vmem>>, vector<32x128xf32>
    %196 = arith.mulf %184, %195 : vector<32x128xf32>
    %197 = arith.addf %194, %196 : vector<32x128xf32>
    %c0_86 = arith.constant 0 : index
    %c0_87 = arith.constant 0 : index
    %198 = vector.load %arg7[%c0_86, %c0_87] : memref<32x128xf32, #tpu.memory_space<vmem>>, vector<32x128xf32>
    tpu.vector_store %arg7[%c0_86, %c0_87], %197 {strides = array<i32>} : memref<32x128xf32, #tpu.memory_space<vmem>>, vector<32x128xf32>,
    %199 = arith.truncf %197 : vector<32x128xf32> to vector<32x128xbf16>
    %200 = vector.extract_strided_slice %199 {offsets = [0, 0], sizes = [16, 128], strides = [1, 1]} : vector<32x128xbf16> to vector<16x128xbf16>
    %c0_88 = arith.constant 0 : index
    %c0_89 = arith.constant 0 : index
    %201 = vector.load %arg6[%c0_88, %c0_89] : memref<32x256xbf16, #tpu.memory_space<vmem>>, vector<16x128xbf16>
    tpu.vector_store %arg6[%c0_88, %c0_89], %200 {strides = array<i32>} : memref<32x256xbf16, #tpu.memory_space<vmem>>, vector<16x128xbf16>,
    %202 = vector.extract_strided_slice %199 {offsets = [16, 0], sizes = [16, 128], strides = [1, 1]} : vector<32x128xbf16> to vector<16x128xbf16>
    %c16_90 = arith.constant 16 : index
    %c128_91 = arith.constant 128 : index
    %203 = vector.load %arg6[%c16_90, %c128_91] : memref<32x256xbf16, #tpu.memory_space<vmem>>, vector<16x128xbf16>
    tpu.vector_store %arg6[%c16_90, %c128_91], %202 {strides = array<i32>} : memref<32x256xbf16, #tpu.memory_space<vmem>>, vector<16x128xbf16>,
    %204 = vector.extract_strided_slice %199 {offsets = [0, 0], sizes = [16, 128], strides = [1, 1]} : vector<32x128xbf16> to vector<16x128xbf16>
    %205 = arith.index_cast %c3_i32 : i32 to index
    %c0_92 = arith.constant 0 : index
    %c0_93 = arith.constant 0 : index
    %206 = vector.load %arg4[%205, %c0_92, %c0_93] : memref<8x16x128xbf16, #tpu.memory_space<vmem>>, vector<1x16x128xbf16>
    %207 = vector.shape_cast %206 : vector<1x16x128xbf16> to vector<16x128xbf16>
    %208 = vector.shape_cast %204 : vector<16x128xbf16> to vector<1x16x128xbf16>
    tpu.vector_store %arg4[%205, %c0_92, %c0_93], %208 {strides = array<i32>} : memref<8x16x128xbf16, #tpu.memory_space<vmem>>, vector<1x16x128xbf16>,
    %209 = vector.extract_strided_slice %199 {offsets = [16, 0], sizes = [16, 128], strides = [1, 1]} : vector<32x128xbf16> to vector<16x128xbf16>
    %c7_i32_94 = arith.constant 7 : i32
    %210 = arith.subi %c7_i32_94, %c3_i32 : i32
    %211 = arith.index_cast %210 : i32 to index
    %c0_95 = arith.constant 0 : index
    %c0_96 = arith.constant 0 : index
    %212 = vector.load %arg5[%211, %c0_95, %c0_96] : memref<8x16x128xbf16, #tpu.memory_space<vmem>>, vector<1x16x128xbf16>
    %213 = vector.shape_cast %212 : vector<1x16x128xbf16> to vector<16x128xbf16>
    %214 = vector.shape_cast %209 : vector<16x128xbf16> to vector<1x16x128xbf16>
    tpu.vector_store %arg5[%211, %c0_95, %c0_96], %214 {strides = array<i32>} : memref<8x16x128xbf16, #tpu.memory_space<vmem>>, vector<1x16x128xbf16>,
    %c4_i32 = arith.constant 4 : i32
    %215 = arith.index_cast %c4_i32 : i32 to index
    %c0_97 = arith.constant 0 : index
    %c0_98 = arith.constant 0 : index
    %216 = vector.load %arg1[%215, %c0_97, %c0_98] : memref<8x32x384xbf16, #tpu.memory_space<vmem>>, vector<1x32x384xbf16>
    %217 = vector.shape_cast %216 : vector<1x32x384xbf16> to vector<32x384xbf16>
    %218 = arith.extf %217 : vector<32x384xbf16> to vector<32x384xf32>
    %c0_99 = arith.constant 0 : index
    %c0_100 = arith.constant 0 : index
    %219 = vector.load %arg6[%c0_99, %c0_100] : memref<32x256xbf16, #tpu.memory_space<vmem>>, vector<32x256xbf16>
    %c0_101 = arith.constant 0 : index
    %c0_102 = arith.constant 0 : index
    %220 = vector.load %arg2[%c0_101, %c0_102] : memref<256x384xbf16, #tpu.memory_space<vmem>>, vector<256x384xbf16>
    %cst_103 = arith.constant dense<0.000000e+00> : vector<32x384xf32>
    %221 = tpu.matmul %219, %220, %cst_103 {dimension_numbers = #tpu.dot_dimension_numbers<[1], [0], [0], [1], [0, 0, 1, 1], [], []>} : vector<32x256xbf16>, vector<256x384xbf16>, vector<32x384xf32> -> vector<32x384xf32>
    %222 = vector.extract_strided_slice %218 {offsets = [0, 0], sizes = [32, 128], strides = [1, 1]} : vector<32x384xf32> to vector<32x128xf32>
    %223 = vector.extract_strided_slice %221 {offsets = [0, 0], sizes = [32, 128], strides = [1, 1]} : vector<32x384xf32> to vector<32x128xf32>
    %224 = arith.addf %222, %223 : vector<32x128xf32>
    %225 = arith.negf %224 : vector<32x128xf32>
    %226 = math.exp %225 : vector<32x128xf32>
    %cst_104 = arith.constant 1.000000e+00 : f32
    %227 = vector.broadcast %cst_104 : f32 to vector<32x128xf32>
    %228 = arith.addf %227, %226 : vector<32x128xf32>
    %229 = arith.divf %227, %228 : vector<32x128xf32>
    %230 = vector.extract_strided_slice %218 {offsets = [0, 128], sizes = [32, 128], strides = [1, 1]} : vector<32x384xf32> to vector<32x128xf32>
    %231 = vector.extract_strided_slice %221 {offsets = [0, 128], sizes = [32, 128], strides = [1, 1]} : vector<32x384xf32> to vector<32x128xf32>
    %232 = arith.addf %230, %231 : vector<32x128xf32>
    %233 = arith.negf %232 : vector<32x128xf32>
    %234 = math.exp %233 : vector<32x128xf32>
    %cst_105 = arith.constant 1.000000e+00 : f32
    %235 = vector.broadcast %cst_105 : f32 to vector<32x128xf32>
    %236 = arith.addf %235, %234 : vector<32x128xf32>
    %237 = arith.divf %235, %236 : vector<32x128xf32>
    %238 = vector.extract_strided_slice %218 {offsets = [0, 256], sizes = [32, 128], strides = [1, 1]} : vector<32x384xf32> to vector<32x128xf32>
    %239 = vector.extract_strided_slice %221 {offsets = [0, 256], sizes = [32, 128], strides = [1, 1]} : vector<32x384xf32> to vector<32x128xf32>
    %c0_106 = arith.constant 0 : index
    %c0_107 = arith.constant 0 : index
    %240 = vector.load %arg3[%c0_106, %c0_107] : memref<32x128xf32, #tpu.memory_space<vmem>>, vector<32x128xf32>
    %241 = arith.addf %239, %240 : vector<32x128xf32>
    %242 = arith.mulf %229, %241 : vector<32x128xf32>
    %243 = arith.addf %238, %242 : vector<32x128xf32>
    %244 = math.tanh %243 : vector<32x128xf32>
    %cst_108 = arith.constant 1.000000e+00 : f32
    %245 = vector.broadcast %cst_108 : f32 to vector<32x128xf32>
    %246 = arith.subf %245, %237 : vector<32x128xf32>
    %247 = arith.mulf %246, %244 : vector<32x128xf32>
    %c0_109 = arith.constant 0 : index
    %c0_110 = arith.constant 0 : index
    %248 = vector.load %arg7[%c0_109, %c0_110] : memref<32x128xf32, #tpu.memory_space<vmem>>, vector<32x128xf32>
    %249 = arith.mulf %237, %248 : vector<32x128xf32>
    %250 = arith.addf %247, %249 : vector<32x128xf32>
    %c0_111 = arith.constant 0 : index
    %c0_112 = arith.constant 0 : index
    %251 = vector.load %arg7[%c0_111, %c0_112] : memref<32x128xf32, #tpu.memory_space<vmem>>, vector<32x128xf32>
    tpu.vector_store %arg7[%c0_111, %c0_112], %250 {strides = array<i32>} : memref<32x128xf32, #tpu.memory_space<vmem>>, vector<32x128xf32>,
    %252 = arith.truncf %250 : vector<32x128xf32> to vector<32x128xbf16>
    %253 = vector.extract_strided_slice %252 {offsets = [0, 0], sizes = [16, 128], strides = [1, 1]} : vector<32x128xbf16> to vector<16x128xbf16>
    %c0_113 = arith.constant 0 : index
    %c0_114 = arith.constant 0 : index
    %254 = vector.load %arg6[%c0_113, %c0_114] : memref<32x256xbf16, #tpu.memory_space<vmem>>, vector<16x128xbf16>
    tpu.vector_store %arg6[%c0_113, %c0_114], %253 {strides = array<i32>} : memref<32x256xbf16, #tpu.memory_space<vmem>>, vector<16x128xbf16>,
    %255 = vector.extract_strided_slice %252 {offsets = [16, 0], sizes = [16, 128], strides = [1, 1]} : vector<32x128xbf16> to vector<16x128xbf16>
    %c16_115 = arith.constant 16 : index
    %c128_116 = arith.constant 128 : index
    %256 = vector.load %arg6[%c16_115, %c128_116] : memref<32x256xbf16, #tpu.memory_space<vmem>>, vector<16x128xbf16>
    tpu.vector_store %arg6[%c16_115, %c128_116], %255 {strides = array<i32>} : memref<32x256xbf16, #tpu.memory_space<vmem>>, vector<16x128xbf16>,
    %257 = vector.extract_strided_slice %252 {offsets = [0, 0], sizes = [16, 128], strides = [1, 1]} : vector<32x128xbf16> to vector<16x128xbf16>
    %258 = arith.index_cast %c4_i32 : i32 to index
    %c0_117 = arith.constant 0 : index
    %c0_118 = arith.constant 0 : index
    %259 = vector.load %arg4[%258, %c0_117, %c0_118] : memref<8x16x128xbf16, #tpu.memory_space<vmem>>, vector<1x16x128xbf16>
    %260 = vector.shape_cast %259 : vector<1x16x128xbf16> to vector<16x128xbf16>
    %261 = vector.shape_cast %257 : vector<16x128xbf16> to vector<1x16x128xbf16>
    tpu.vector_store %arg4[%258, %c0_117, %c0_118], %261 {strides = array<i32>} : memref<8x16x128xbf16, #tpu.memory_space<vmem>>, vector<1x16x128xbf16>,
    %262 = vector.extract_strided_slice %252 {offsets = [16, 0], sizes = [16, 128], strides = [1, 1]} : vector<32x128xbf16> to vector<16x128xbf16>
    %c7_i32_119 = arith.constant 7 : i32
    %263 = arith.subi %c7_i32_119, %c4_i32 : i32
    %264 = arith.index_cast %263 : i32 to index
    %c0_120 = arith.constant 0 : index
    %c0_121 = arith.constant 0 : index
    %265 = vector.load %arg5[%264, %c0_120, %c0_121] : memref<8x16x128xbf16, #tpu.memory_space<vmem>>, vector<1x16x128xbf16>
    %266 = vector.shape_cast %265 : vector<1x16x128xbf16> to vector<16x128xbf16>
    %267 = vector.shape_cast %262 : vector<16x128xbf16> to vector<1x16x128xbf16>
    tpu.vector_store %arg5[%264, %c0_120, %c0_121], %267 {strides = array<i32>} : memref<8x16x128xbf16, #tpu.memory_space<vmem>>, vector<1x16x128xbf16>,
    %c5_i32 = arith.constant 5 : i32
    %268 = arith.index_cast %c5_i32 : i32 to index
    %c0_122 = arith.constant 0 : index
    %c0_123 = arith.constant 0 : index
    %269 = vector.load %arg1[%268, %c0_122, %c0_123] : memref<8x32x384xbf16, #tpu.memory_space<vmem>>, vector<1x32x384xbf16>
    %270 = vector.shape_cast %269 : vector<1x32x384xbf16> to vector<32x384xbf16>
    %271 = arith.extf %270 : vector<32x384xbf16> to vector<32x384xf32>
    %c0_124 = arith.constant 0 : index
    %c0_125 = arith.constant 0 : index
    %272 = vector.load %arg6[%c0_124, %c0_125] : memref<32x256xbf16, #tpu.memory_space<vmem>>, vector<32x256xbf16>
    %c0_126 = arith.constant 0 : index
    %c0_127 = arith.constant 0 : index
    %273 = vector.load %arg2[%c0_126, %c0_127] : memref<256x384xbf16, #tpu.memory_space<vmem>>, vector<256x384xbf16>
    %cst_128 = arith.constant dense<0.000000e+00> : vector<32x384xf32>
    %274 = tpu.matmul %272, %273, %cst_128 {dimension_numbers = #tpu.dot_dimension_numbers<[1], [0], [0], [1], [0, 0, 1, 1], [], []>} : vector<32x256xbf16>, vector<256x384xbf16>, vector<32x384xf32> -> vector<32x384xf32>
    %275 = vector.extract_strided_slice %271 {offsets = [0, 0], sizes = [32, 128], strides = [1, 1]} : vector<32x384xf32> to vector<32x128xf32>
    %276 = vector.extract_strided_slice %274 {offsets = [0, 0], sizes = [32, 128], strides = [1, 1]} : vector<32x384xf32> to vector<32x128xf32>
    %277 = arith.addf %275, %276 : vector<32x128xf32>
    %278 = arith.negf %277 : vector<32x128xf32>
    %279 = math.exp %278 : vector<32x128xf32>
    %cst_129 = arith.constant 1.000000e+00 : f32
    %280 = vector.broadcast %cst_129 : f32 to vector<32x128xf32>
    %281 = arith.addf %280, %279 : vector<32x128xf32>
    %282 = arith.divf %280, %281 : vector<32x128xf32>
    %283 = vector.extract_strided_slice %271 {offsets = [0, 128], sizes = [32, 128], strides = [1, 1]} : vector<32x384xf32> to vector<32x128xf32>
    %284 = vector.extract_strided_slice %274 {offsets = [0, 128], sizes = [32, 128], strides = [1, 1]} : vector<32x384xf32> to vector<32x128xf32>
    %285 = arith.addf %283, %284 : vector<32x128xf32>
    %286 = arith.negf %285 : vector<32x128xf32>
    %287 = math.exp %286 : vector<32x128xf32>
    %cst_130 = arith.constant 1.000000e+00 : f32
    %288 = vector.broadcast %cst_130 : f32 to vector<32x128xf32>
    %289 = arith.addf %288, %287 : vector<32x128xf32>
    %290 = arith.divf %288, %289 : vector<32x128xf32>
    %291 = vector.extract_strided_slice %271 {offsets = [0, 256], sizes = [32, 128], strides = [1, 1]} : vector<32x384xf32> to vector<32x128xf32>
    %292 = vector.extract_strided_slice %274 {offsets = [0, 256], sizes = [32, 128], strides = [1, 1]} : vector<32x384xf32> to vector<32x128xf32>
    %c0_131 = arith.constant 0 : index
    %c0_132 = arith.constant 0 : index
    %293 = vector.load %arg3[%c0_131, %c0_132] : memref<32x128xf32, #tpu.memory_space<vmem>>, vector<32x128xf32>
    %294 = arith.addf %292, %293 : vector<32x128xf32>
    %295 = arith.mulf %282, %294 : vector<32x128xf32>
    %296 = arith.addf %291, %295 : vector<32x128xf32>
    %297 = math.tanh %296 : vector<32x128xf32>
    %cst_133 = arith.constant 1.000000e+00 : f32
    %298 = vector.broadcast %cst_133 : f32 to vector<32x128xf32>
    %299 = arith.subf %298, %290 : vector<32x128xf32>
    %300 = arith.mulf %299, %297 : vector<32x128xf32>
    %c0_134 = arith.constant 0 : index
    %c0_135 = arith.constant 0 : index
    %301 = vector.load %arg7[%c0_134, %c0_135] : memref<32x128xf32, #tpu.memory_space<vmem>>, vector<32x128xf32>
    %302 = arith.mulf %290, %301 : vector<32x128xf32>
    %303 = arith.addf %300, %302 : vector<32x128xf32>
    %c0_136 = arith.constant 0 : index
    %c0_137 = arith.constant 0 : index
    %304 = vector.load %arg7[%c0_136, %c0_137] : memref<32x128xf32, #tpu.memory_space<vmem>>, vector<32x128xf32>
    tpu.vector_store %arg7[%c0_136, %c0_137], %303 {strides = array<i32>} : memref<32x128xf32, #tpu.memory_space<vmem>>, vector<32x128xf32>,
    %305 = arith.truncf %303 : vector<32x128xf32> to vector<32x128xbf16>
    %306 = vector.extract_strided_slice %305 {offsets = [0, 0], sizes = [16, 128], strides = [1, 1]} : vector<32x128xbf16> to vector<16x128xbf16>
    %c0_138 = arith.constant 0 : index
    %c0_139 = arith.constant 0 : index
    %307 = vector.load %arg6[%c0_138, %c0_139] : memref<32x256xbf16, #tpu.memory_space<vmem>>, vector<16x128xbf16>
    tpu.vector_store %arg6[%c0_138, %c0_139], %306 {strides = array<i32>} : memref<32x256xbf16, #tpu.memory_space<vmem>>, vector<16x128xbf16>,
    %308 = vector.extract_strided_slice %305 {offsets = [16, 0], sizes = [16, 128], strides = [1, 1]} : vector<32x128xbf16> to vector<16x128xbf16>
    %c16_140 = arith.constant 16 : index
    %c128_141 = arith.constant 128 : index
    %309 = vector.load %arg6[%c16_140, %c128_141] : memref<32x256xbf16, #tpu.memory_space<vmem>>, vector<16x128xbf16>
    tpu.vector_store %arg6[%c16_140, %c128_141], %308 {strides = array<i32>} : memref<32x256xbf16, #tpu.memory_space<vmem>>, vector<16x128xbf16>,
    %310 = vector.extract_strided_slice %305 {offsets = [0, 0], sizes = [16, 128], strides = [1, 1]} : vector<32x128xbf16> to vector<16x128xbf16>
    %311 = arith.index_cast %c5_i32 : i32 to index
    %c0_142 = arith.constant 0 : index
    %c0_143 = arith.constant 0 : index
    %312 = vector.load %arg4[%311, %c0_142, %c0_143] : memref<8x16x128xbf16, #tpu.memory_space<vmem>>, vector<1x16x128xbf16>
    %313 = vector.shape_cast %312 : vector<1x16x128xbf16> to vector<16x128xbf16>
    %314 = vector.shape_cast %310 : vector<16x128xbf16> to vector<1x16x128xbf16>
    tpu.vector_store %arg4[%311, %c0_142, %c0_143], %314 {strides = array<i32>} : memref<8x16x128xbf16, #tpu.memory_space<vmem>>, vector<1x16x128xbf16>,
    %315 = vector.extract_strided_slice %305 {offsets = [16, 0], sizes = [16, 128], strides = [1, 1]} : vector<32x128xbf16> to vector<16x128xbf16>
    %c7_i32_144 = arith.constant 7 : i32
    %316 = arith.subi %c7_i32_144, %c5_i32 : i32
    %317 = arith.index_cast %316 : i32 to index
    %c0_145 = arith.constant 0 : index
    %c0_146 = arith.constant 0 : index
    %318 = vector.load %arg5[%317, %c0_145, %c0_146] : memref<8x16x128xbf16, #tpu.memory_space<vmem>>, vector<1x16x128xbf16>
    %319 = vector.shape_cast %318 : vector<1x16x128xbf16> to vector<16x128xbf16>
    %320 = vector.shape_cast %315 : vector<16x128xbf16> to vector<1x16x128xbf16>
    tpu.vector_store %arg5[%317, %c0_145, %c0_146], %320 {strides = array<i32>} : memref<8x16x128xbf16, #tpu.memory_space<vmem>>, vector<1x16x128xbf16>,
    %c6_i32 = arith.constant 6 : i32
    %321 = arith.index_cast %c6_i32 : i32 to index
    %c0_147 = arith.constant 0 : index
    %c0_148 = arith.constant 0 : index
    %322 = vector.load %arg1[%321, %c0_147, %c0_148] : memref<8x32x384xbf16, #tpu.memory_space<vmem>>, vector<1x32x384xbf16>
    %323 = vector.shape_cast %322 : vector<1x32x384xbf16> to vector<32x384xbf16>
    %324 = arith.extf %323 : vector<32x384xbf16> to vector<32x384xf32>
    %c0_149 = arith.constant 0 : index
    %c0_150 = arith.constant 0 : index
    %325 = vector.load %arg6[%c0_149, %c0_150] : memref<32x256xbf16, #tpu.memory_space<vmem>>, vector<32x256xbf16>
    %c0_151 = arith.constant 0 : index
    %c0_152 = arith.constant 0 : index
    %326 = vector.load %arg2[%c0_151, %c0_152] : memref<256x384xbf16, #tpu.memory_space<vmem>>, vector<256x384xbf16>
    %cst_153 = arith.constant dense<0.000000e+00> : vector<32x384xf32>
    %327 = tpu.matmul %325, %326, %cst_153 {dimension_numbers = #tpu.dot_dimension_numbers<[1], [0], [0], [1], [0, 0, 1, 1], [], []>} : vector<32x256xbf16>, vector<256x384xbf16>, vector<32x384xf32> -> vector<32x384xf32>
    %328 = vector.extract_strided_slice %324 {offsets = [0, 0], sizes = [32, 128], strides = [1, 1]} : vector<32x384xf32> to vector<32x128xf32>
    %329 = vector.extract_strided_slice %327 {offsets = [0, 0], sizes = [32, 128], strides = [1, 1]} : vector<32x384xf32> to vector<32x128xf32>
    %330 = arith.addf %328, %329 : vector<32x128xf32>
    %331 = arith.negf %330 : vector<32x128xf32>
    %332 = math.exp %331 : vector<32x128xf32>
    %cst_154 = arith.constant 1.000000e+00 : f32
    %333 = vector.broadcast %cst_154 : f32 to vector<32x128xf32>
    %334 = arith.addf %333, %332 : vector<32x128xf32>
    %335 = arith.divf %333, %334 : vector<32x128xf32>
    %336 = vector.extract_strided_slice %324 {offsets = [0, 128], sizes = [32, 128], strides = [1, 1]} : vector<32x384xf32> to vector<32x128xf32>
    %337 = vector.extract_strided_slice %327 {offsets = [0, 128], sizes = [32, 128], strides = [1, 1]} : vector<32x384xf32> to vector<32x128xf32>
    %338 = arith.addf %336, %337 : vector<32x128xf32>
    %339 = arith.negf %338 : vector<32x128xf32>
    %340 = math.exp %339 : vector<32x128xf32>
    %cst_155 = arith.constant 1.000000e+00 : f32
    %341 = vector.broadcast %cst_155 : f32 to vector<32x128xf32>
    %342 = arith.addf %341, %340 : vector<32x128xf32>
    %343 = arith.divf %341, %342 : vector<32x128xf32>
    %344 = vector.extract_strided_slice %324 {offsets = [0, 256], sizes = [32, 128], strides = [1, 1]} : vector<32x384xf32> to vector<32x128xf32>
    %345 = vector.extract_strided_slice %327 {offsets = [0, 256], sizes = [32, 128], strides = [1, 1]} : vector<32x384xf32> to vector<32x128xf32>
    %c0_156 = arith.constant 0 : index
    %c0_157 = arith.constant 0 : index
    %346 = vector.load %arg3[%c0_156, %c0_157] : memref<32x128xf32, #tpu.memory_space<vmem>>, vector<32x128xf32>
    %347 = arith.addf %345, %346 : vector<32x128xf32>
    %348 = arith.mulf %335, %347 : vector<32x128xf32>
    %349 = arith.addf %344, %348 : vector<32x128xf32>
    %350 = math.tanh %349 : vector<32x128xf32>
    %cst_158 = arith.constant 1.000000e+00 : f32
    %351 = vector.broadcast %cst_158 : f32 to vector<32x128xf32>
    %352 = arith.subf %351, %343 : vector<32x128xf32>
    %353 = arith.mulf %352, %350 : vector<32x128xf32>
    %c0_159 = arith.constant 0 : index
    %c0_160 = arith.constant 0 : index
    %354 = vector.load %arg7[%c0_159, %c0_160] : memref<32x128xf32, #tpu.memory_space<vmem>>, vector<32x128xf32>
    %355 = arith.mulf %343, %354 : vector<32x128xf32>
    %356 = arith.addf %353, %355 : vector<32x128xf32>
    %c0_161 = arith.constant 0 : index
    %c0_162 = arith.constant 0 : index
    %357 = vector.load %arg7[%c0_161, %c0_162] : memref<32x128xf32, #tpu.memory_space<vmem>>, vector<32x128xf32>
    tpu.vector_store %arg7[%c0_161, %c0_162], %356 {strides = array<i32>} : memref<32x128xf32, #tpu.memory_space<vmem>>, vector<32x128xf32>,
    %358 = arith.truncf %356 : vector<32x128xf32> to vector<32x128xbf16>
    %359 = vector.extract_strided_slice %358 {offsets = [0, 0], sizes = [16, 128], strides = [1, 1]} : vector<32x128xbf16> to vector<16x128xbf16>
    %c0_163 = arith.constant 0 : index
    %c0_164 = arith.constant 0 : index
    %360 = vector.load %arg6[%c0_163, %c0_164] : memref<32x256xbf16, #tpu.memory_space<vmem>>, vector<16x128xbf16>
    tpu.vector_store %arg6[%c0_163, %c0_164], %359 {strides = array<i32>} : memref<32x256xbf16, #tpu.memory_space<vmem>>, vector<16x128xbf16>,
    %361 = vector.extract_strided_slice %358 {offsets = [16, 0], sizes = [16, 128], strides = [1, 1]} : vector<32x128xbf16> to vector<16x128xbf16>
    %c16_165 = arith.constant 16 : index
    %c128_166 = arith.constant 128 : index
    %362 = vector.load %arg6[%c16_165, %c128_166] : memref<32x256xbf16, #tpu.memory_space<vmem>>, vector<16x128xbf16>
    tpu.vector_store %arg6[%c16_165, %c128_166], %361 {strides = array<i32>} : memref<32x256xbf16, #tpu.memory_space<vmem>>, vector<16x128xbf16>,
    %363 = vector.extract_strided_slice %358 {offsets = [0, 0], sizes = [16, 128], strides = [1, 1]} : vector<32x128xbf16> to vector<16x128xbf16>
    %364 = arith.index_cast %c6_i32 : i32 to index
    %c0_167 = arith.constant 0 : index
    %c0_168 = arith.constant 0 : index
    %365 = vector.load %arg4[%364, %c0_167, %c0_168] : memref<8x16x128xbf16, #tpu.memory_space<vmem>>, vector<1x16x128xbf16>
    %366 = vector.shape_cast %365 : vector<1x16x128xbf16> to vector<16x128xbf16>
    %367 = vector.shape_cast %363 : vector<16x128xbf16> to vector<1x16x128xbf16>
    tpu.vector_store %arg4[%364, %c0_167, %c0_168], %367 {strides = array<i32>} : memref<8x16x128xbf16, #tpu.memory_space<vmem>>, vector<1x16x128xbf16>,
    %368 = vector.extract_strided_slice %358 {offsets = [16, 0], sizes = [16, 128], strides = [1, 1]} : vector<32x128xbf16> to vector<16x128xbf16>
    %c7_i32_169 = arith.constant 7 : i32
    %369 = arith.subi %c7_i32_169, %c6_i32 : i32
    %370 = arith.index_cast %369 : i32 to index
    %c0_170 = arith.constant 0 : index
    %c0_171 = arith.constant 0 : index
    %371 = vector.load %arg5[%370, %c0_170, %c0_171] : memref<8x16x128xbf16, #tpu.memory_space<vmem>>, vector<1x16x128xbf16>
    %372 = vector.shape_cast %371 : vector<1x16x128xbf16> to vector<16x128xbf16>
    %373 = vector.shape_cast %368 : vector<16x128xbf16> to vector<1x16x128xbf16>
    tpu.vector_store %arg5[%370, %c0_170, %c0_171], %373 {strides = array<i32>} : memref<8x16x128xbf16, #tpu.memory_space<vmem>>, vector<1x16x128xbf16>,
    %c7_i32_172 = arith.constant 7 : i32
    %374 = arith.index_cast %c7_i32_172 : i32 to index
    %c0_173 = arith.constant 0 : index
    %c0_174 = arith.constant 0 : index
    %375 = vector.load %arg1[%374, %c0_173, %c0_174] : memref<8x32x384xbf16, #tpu.memory_space<vmem>>, vector<1x32x384xbf16>
    %376 = vector.shape_cast %375 : vector<1x32x384xbf16> to vector<32x384xbf16>
    %377 = arith.extf %376 : vector<32x384xbf16> to vector<32x384xf32>
    %c0_175 = arith.constant 0 : index
    %c0_176 = arith.constant 0 : index
    %378 = vector.load %arg6[%c0_175, %c0_176] : memref<32x256xbf16, #tpu.memory_space<vmem>>, vector<32x256xbf16>
    %c0_177 = arith.constant 0 : index
    %c0_178 = arith.constant 0 : index
    %379 = vector.load %arg2[%c0_177, %c0_178] : memref<256x384xbf16, #tpu.memory_space<vmem>>, vector<256x384xbf16>
    %cst_179 = arith.constant dense<0.000000e+00> : vector<32x384xf32>
    %380 = tpu.matmul %378, %379, %cst_179 {dimension_numbers = #tpu.dot_dimension_numbers<[1], [0], [0], [1], [0, 0, 1, 1], [], []>} : vector<32x256xbf16>, vector<256x384xbf16>, vector<32x384xf32> -> vector<32x384xf32>
    %381 = vector.extract_strided_slice %377 {offsets = [0, 0], sizes = [32, 128], strides = [1, 1]} : vector<32x384xf32> to vector<32x128xf32>
    %382 = vector.extract_strided_slice %380 {offsets = [0, 0], sizes = [32, 128], strides = [1, 1]} : vector<32x384xf32> to vector<32x128xf32>
    %383 = arith.addf %381, %382 : vector<32x128xf32>
    %384 = arith.negf %383 : vector<32x128xf32>
    %385 = math.exp %384 : vector<32x128xf32>
    %cst_180 = arith.constant 1.000000e+00 : f32
    %386 = vector.broadcast %cst_180 : f32 to vector<32x128xf32>
    %387 = arith.addf %386, %385 : vector<32x128xf32>
    %388 = arith.divf %386, %387 : vector<32x128xf32>
    %389 = vector.extract_strided_slice %377 {offsets = [0, 128], sizes = [32, 128], strides = [1, 1]} : vector<32x384xf32> to vector<32x128xf32>
    %390 = vector.extract_strided_slice %380 {offsets = [0, 128], sizes = [32, 128], strides = [1, 1]} : vector<32x384xf32> to vector<32x128xf32>
    %391 = arith.addf %389, %390 : vector<32x128xf32>
    %392 = arith.negf %391 : vector<32x128xf32>
    %393 = math.exp %392 : vector<32x128xf32>
    %cst_181 = arith.constant 1.000000e+00 : f32
    %394 = vector.broadcast %cst_181 : f32 to vector<32x128xf32>
    %395 = arith.addf %394, %393 : vector<32x128xf32>
    %396 = arith.divf %394, %395 : vector<32x128xf32>
    %397 = vector.extract_strided_slice %377 {offsets = [0, 256], sizes = [32, 128], strides = [1, 1]} : vector<32x384xf32> to vector<32x128xf32>
    %398 = vector.extract_strided_slice %380 {offsets = [0, 256], sizes = [32, 128], strides = [1, 1]} : vector<32x384xf32> to vector<32x128xf32>
    %c0_182 = arith.constant 0 : index
    %c0_183 = arith.constant 0 : index
    %399 = vector.load %arg3[%c0_182, %c0_183] : memref<32x128xf32, #tpu.memory_space<vmem>>, vector<32x128xf32>
    %400 = arith.addf %398, %399 : vector<32x128xf32>
    %401 = arith.mulf %388, %400 : vector<32x128xf32>
    %402 = arith.addf %397, %401 : vector<32x128xf32>
    %403 = math.tanh %402 : vector<32x128xf32>
    %cst_184 = arith.constant 1.000000e+00 : f32
    %404 = vector.broadcast %cst_184 : f32 to vector<32x128xf32>
    %405 = arith.subf %404, %396 : vector<32x128xf32>
    %406 = arith.mulf %405, %403 : vector<32x128xf32>
    %c0_185 = arith.constant 0 : index
    %c0_186 = arith.constant 0 : index
    %407 = vector.load %arg7[%c0_185, %c0_186] : memref<32x128xf32, #tpu.memory_space<vmem>>, vector<32x128xf32>
    %408 = arith.mulf %396, %407 : vector<32x128xf32>
    %409 = arith.addf %406, %408 : vector<32x128xf32>
    %c0_187 = arith.constant 0 : index
    %c0_188 = arith.constant 0 : index
    %410 = vector.load %arg7[%c0_187, %c0_188] : memref<32x128xf32, #tpu.memory_space<vmem>>, vector<32x128xf32>
    tpu.vector_store %arg7[%c0_187, %c0_188], %409 {strides = array<i32>} : memref<32x128xf32, #tpu.memory_space<vmem>>, vector<32x128xf32>,
    %411 = arith.truncf %409 : vector<32x128xf32> to vector<32x128xbf16>
    %412 = vector.extract_strided_slice %411 {offsets = [0, 0], sizes = [16, 128], strides = [1, 1]} : vector<32x128xbf16> to vector<16x128xbf16>
    %c0_189 = arith.constant 0 : index
    %c0_190 = arith.constant 0 : index
    %413 = vector.load %arg6[%c0_189, %c0_190] : memref<32x256xbf16, #tpu.memory_space<vmem>>, vector<16x128xbf16>
    tpu.vector_store %arg6[%c0_189, %c0_190], %412 {strides = array<i32>} : memref<32x256xbf16, #tpu.memory_space<vmem>>, vector<16x128xbf16>,
    %414 = vector.extract_strided_slice %411 {offsets = [16, 0], sizes = [16, 128], strides = [1, 1]} : vector<32x128xbf16> to vector<16x128xbf16>
    %c16_191 = arith.constant 16 : index
    %c128_192 = arith.constant 128 : index
    %415 = vector.load %arg6[%c16_191, %c128_192] : memref<32x256xbf16, #tpu.memory_space<vmem>>, vector<16x128xbf16>
    tpu.vector_store %arg6[%c16_191, %c128_192], %414 {strides = array<i32>} : memref<32x256xbf16, #tpu.memory_space<vmem>>, vector<16x128xbf16>,
    %416 = vector.extract_strided_slice %411 {offsets = [0, 0], sizes = [16, 128], strides = [1, 1]} : vector<32x128xbf16> to vector<16x128xbf16>
    %417 = arith.index_cast %c7_i32_172 : i32 to index
    %c0_193 = arith.constant 0 : index
    %c0_194 = arith.constant 0 : index
    %418 = vector.load %arg4[%417, %c0_193, %c0_194] : memref<8x16x128xbf16, #tpu.memory_space<vmem>>, vector<1x16x128xbf16>
    %419 = vector.shape_cast %418 : vector<1x16x128xbf16> to vector<16x128xbf16>
    %420 = vector.shape_cast %416 : vector<16x128xbf16> to vector<1x16x128xbf16>
    tpu.vector_store %arg4[%417, %c0_193, %c0_194], %420 {strides = array<i32>} : memref<8x16x128xbf16, #tpu.memory_space<vmem>>, vector<1x16x128xbf16>,
    %421 = vector.extract_strided_slice %411 {offsets = [16, 0], sizes = [16, 128], strides = [1, 1]} : vector<32x128xbf16> to vector<16x128xbf16>
    %c7_i32_195 = arith.constant 7 : i32
    %422 = arith.subi %c7_i32_195, %c7_i32_172 : i32
    %423 = arith.index_cast %422 : i32 to index
    %c0_196 = arith.constant 0 : index
    %c0_197 = arith.constant 0 : index
    %424 = vector.load %arg5[%423, %c0_196, %c0_197] : memref<8x16x128xbf16, #tpu.memory_space<vmem>>, vector<1x16x128xbf16>
    %425 = vector.shape_cast %424 : vector<1x16x128xbf16> to vector<16x128xbf16>
    %426 = vector.shape_cast %421 : vector<16x128xbf16> to vector<1x16x128xbf16>
    tpu.vector_store %arg5[%423, %c0_196, %c0_197], %426 {strides = array<i32>} : memref<8x16x128xbf16, #tpu.memory_space<vmem>>, vector<1x16x128xbf16>,
    %c8_i32 = arith.constant 8 : i32
    return
  }
  func.func @transform_0(%arg0: i32) -> (i32, i32, i32) {
    %c0_i32 = arith.constant 0 : i32
    %c0_i32_0 = arith.constant 0 : i32
    %c0_i32_1 = arith.constant 0 : i32
    return %arg0, %c0_i32, %c0_i32_0 : i32, i32, i32
  }
  func.func @transform_1(%arg0: i32) -> (i32, i32) {
    %c0_i32 = arith.constant 0 : i32
    %c0_i32_0 = arith.constant 0 : i32
    %c0_i32_1 = arith.constant 0 : i32
    return %c0_i32, %c0_i32_0 : i32, i32
  }
  func.func @transform_2(%arg0: i32) -> (i32, i32) {
    %c0_i32 = arith.constant 0 : i32
    %c0_i32_0 = arith.constant 0 : i32
    %c0_i32_1 = arith.constant 0 : i32
    return %c0_i32, %c0_i32_0 : i32, i32
  }
  func.func @transform_3(%arg0: i32) -> (i32, i32, i32) {
    %c0_i32 = arith.constant 0 : i32
    %c0_i32_0 = arith.constant 0 : i32
    %c0_i32_1 = arith.constant 0 : i32
    return %arg0, %c0_i32, %c0_i32_0 : i32, i32, i32
  }
  func.func @transform_4(%arg0: i32) -> (i32, i32, i32) {
    %c0_i32 = arith.constant 0 : i32
    %0 = arith.subi %c0_i32, %arg0 : i32
    %c0_i32_0 = arith.constant 0 : i32
    %c0_i32_1 = arith.constant 0 : i32
    %c0_i32_2 = arith.constant 0 : i32
    return %0, %c0_i32_0, %c0_i32_1 : i32, i32, i32
  }
}

module attributes {stable_mosaic.version = 11 : i64} {
  func.func @_bigru_layer_kernel(%arg0: i32, %arg1: memref<8x32x384xbf16, #tpu.memory_space<vmem>>, %arg2: memref<256x384xbf16, #tpu.memory_space<vmem>>, %arg3: memref<32x128xf32, #tpu.memory_space<vmem>>, %arg4: memref<8x16x128xbf16, #tpu.memory_space<vmem>>, %arg5: memref<8x16x128xbf16, #tpu.memory_space<vmem>>, %arg6: memref<32x256xbf16, #tpu.memory_space<vmem>>, %arg7: memref<32x128xf32, #tpu.memory_space<vmem>>) attributes {dimension_semantics = [#tpu.dimension_semantics<arbitrary>], iteration_bounds = array<i64: 1>, scalar_prefetch = 0 : i64, scratch_operands = 2 : i64, tpu.core_type = #tpu.core_type<tc>, window_params = [{transform_indices = @transform_0, window_bounds = array<i64: 8, 32, 384>}, {pipeline_mode = #tpu.pipeline_mode<synchronous>, transform_indices = @transform_1, window_bounds = array<i64: 256, 384>}, {pipeline_mode = #tpu.pipeline_mode<synchronous>, transform_indices = @transform_2, window_bounds = array<i64: 32, 128>}, {transform_indices = @transform_3, window_bounds = array<i64: 8, 16, 128>}, {transform_indices = @transform_4, window_bounds = array<i64: 8, 16, 128>}]} {
    %c0_i32 = arith.constant 0 : i32
    %0 = arith.cmpi eq, %arg0, %c0_i32 : i32
    %1 = arith.extui %0 : i1 to i32
    %c0_i32_0 = arith.constant 0 : i32
    %2 = arith.cmpi ne, %1, %c0_i32_0 : i32
    scf.if %2 {
      %cst_198 = arith.constant 0.000000e+00 : bf16
      %427 = vector.broadcast %cst_198 : bf16 to vector<32x256xbf16>
      %c0_199 = arith.constant 0 : index
      %c0_200 = arith.constant 0 : index
      %428 = vector.load %arg6[%c0_199, %c0_200] : memref<32x256xbf16, #tpu.memory_space<vmem>>, vector<32x256xbf16>
      tpu.vector_store %arg6[%c0_199, %c0_200], %427 {strides = array<i32>} : memref<32x256xbf16, #tpu.memory_space<vmem>>, vector<32x256xbf16>,
      %cst_201 = arith.constant 0.000000e+00 : f32
      %429 = vector.broadcast %cst_201 : f32 to vector<32x128xf32>
      %c0_202 = arith.constant 0 : index
      %c0_203 = arith.constant 0 : index
      %430 = vector.load %arg7[%c0_202, %c0_203] : memref<32x128xf32, #tpu.memory_space<vmem>>, vector<32x128xf32>
      tpu.vector_store %arg7[%c0_202, %c0_203], %429 {strides = array<i32>} : memref<32x128xf32, #tpu.memory_space<vmem>>, vector<32x128xf32>,
    } else {
    }
    %c0_i32_1 = arith.constant 0 : i32
    %3 = arith.index_cast %c0_i32_1 : i32 to index
    %c0 = arith.constant 0 : index
    %c0_2 = arith.constant 0 : index
    %4 = vector.load %arg1[%3, %c0, %c0_2] : memref<8x32x384xbf16, #tpu.memory_space<vmem>>, vector<1x32x384xbf16>
    %5 = vector.shape_cast %4 : vector<1x32x384xbf16> to vector<32x384xbf16>
    %6 = arith.extf %5 : vector<32x384xbf16> to vector<32x384xf32>
    %c0_3 = arith.constant 0 : index
    %c0_4 = arith.constant 0 : index
    %7 = vector.load %arg6[%c0_3, %c0_4] : memref<32x256xbf16, #tpu.memory_space<vmem>>, vector<32x256xbf16>
    %c0_5 = arith.constant 0 : index
    %c0_6 = arith.constant 0 : index
    %8 = vector.load %arg2[%c0_5, %c0_6] : memref<256x384xbf16, #tpu.memory_space<vmem>>, vector<256x384xbf16>
    %cst = arith.constant dense<0.000000e+00> : vector<32x384xf32>
    %9 = tpu.matmul %7, %8, %cst {dimension_numbers = #tpu.dot_dimension_numbers<[1], [0], [0], [1], [0, 0, 1, 1], [], []>} : vector<32x256xbf16>, vector<256x384xbf16>, vector<32x384xf32> -> vector<32x384xf32>
    %10 = vector.extract_strided_slice %6 {offsets = [0, 0], sizes = [32, 128], strides = [1, 1]} : vector<32x384xf32> to vector<32x128xf32>
    %11 = vector.extract_strided_slice %9 {offsets = [0, 0], sizes = [32, 128], strides = [1, 1]} : vector<32x384xf32> to vector<32x128xf32>
    %12 = arith.addf %10, %11 : vector<32x128xf32>
    %13 = arith.negf %12 : vector<32x128xf32>
    %14 = math.exp %13 : vector<32x128xf32>
    %cst_7 = arith.constant 1.000000e+00 : f32
    %15 = vector.broadcast %cst_7 : f32 to vector<32x128xf32>
    %16 = arith.addf %15, %14 : vector<32x128xf32>
    %17 = arith.divf %15, %16 : vector<32x128xf32>
    %18 = vector.extract_strided_slice %6 {offsets = [0, 128], sizes = [32, 128], strides = [1, 1]} : vector<32x384xf32> to vector<32x128xf32>
    %19 = vector.extract_strided_slice %9 {offsets = [0, 128], sizes = [32, 128], strides = [1, 1]} : vector<32x384xf32> to vector<32x128xf32>
    %20 = arith.addf %18, %19 : vector<32x128xf32>
    %21 = arith.negf %20 : vector<32x128xf32>
    %22 = math.exp %21 : vector<32x128xf32>
    %cst_8 = arith.constant 1.000000e+00 : f32
    %23 = vector.broadcast %cst_8 : f32 to vector<32x128xf32>
    %24 = arith.addf %23, %22 : vector<32x128xf32>
    %25 = arith.divf %23, %24 : vector<32x128xf32>
    %26 = vector.extract_strided_slice %6 {offsets = [0, 256], sizes = [32, 128], strides = [1, 1]} : vector<32x384xf32> to vector<32x128xf32>
    %27 = vector.extract_strided_slice %9 {offsets = [0, 256], sizes = [32, 128], strides = [1, 1]} : vector<32x384xf32> to vector<32x128xf32>
    %c0_9 = arith.constant 0 : index
    %c0_10 = arith.constant 0 : index
    %28 = vector.load %arg3[%c0_9, %c0_10] : memref<32x128xf32, #tpu.memory_space<vmem>>, vector<32x128xf32>
    %29 = arith.addf %27, %28 : vector<32x128xf32>
    %30 = arith.mulf %17, %29 : vector<32x128xf32>
    %31 = arith.addf %26, %30 : vector<32x128xf32>
    %32 = math.tanh %31 : vector<32x128xf32>
    %cst_11 = arith.constant 1.000000e+00 : f32
    %33 = vector.broadcast %cst_11 : f32 to vector<32x128xf32>
    %34 = arith.subf %33, %25 : vector<32x128xf32>
    %35 = arith.mulf %34, %32 : vector<32x128xf32>
    %c0_12 = arith.constant 0 : index
    %c0_13 = arith.constant 0 : index
    %36 = vector.load %arg7[%c0_12, %c0_13] : memref<32x128xf32, #tpu.memory_space<vmem>>, vector<32x128xf32>
    %37 = arith.mulf %25, %36 : vector<32x128xf32>
    %38 = arith.addf %35, %37 : vector<32x128xf32>
    %c0_14 = arith.constant 0 : index
    %c0_15 = arith.constant 0 : index
    %39 = vector.load %arg7[%c0_14, %c0_15] : memref<32x128xf32, #tpu.memory_space<vmem>>, vector<32x128xf32>
    tpu.vector_store %arg7[%c0_14, %c0_15], %38 {strides = array<i32>} : memref<32x128xf32, #tpu.memory_space<vmem>>, vector<32x128xf32>,
    %40 = arith.truncf %38 : vector<32x128xf32> to vector<32x128xbf16>
    %41 = vector.extract_strided_slice %40 {offsets = [0, 0], sizes = [16, 128], strides = [1, 1]} : vector<32x128xbf16> to vector<16x128xbf16>
    %c0_16 = arith.constant 0 : index
    %c0_17 = arith.constant 0 : index
    %42 = vector.load %arg6[%c0_16, %c0_17] : memref<32x256xbf16, #tpu.memory_space<vmem>>, vector<16x128xbf16>
    tpu.vector_store %arg6[%c0_16, %c0_17], %41 {strides = array<i32>} : memref<32x256xbf16, #tpu.memory_space<vmem>>, vector<16x128xbf16>,
    %43 = vector.extract_strided_slice %40 {offsets = [16, 0], sizes = [16, 128], strides = [1, 1]} : vector<32x128xbf16> to vector<16x128xbf16>
    %c16 = arith.constant 16 : index
    %c128 = arith.constant 128 : index
    %44 = vector.load %arg6[%c16, %c128] : memref<32x256xbf16, #tpu.memory_space<vmem>>, vector<16x128xbf16>
    tpu.vector_store %arg6[%c16, %c128], %43 {strides = array<i32>} : memref<32x256xbf16, #tpu.memory_space<vmem>>, vector<16x128xbf16>,
    %45 = vector.extract_strided_slice %40 {offsets = [0, 0], sizes = [16, 128], strides = [1, 1]} : vector<32x128xbf16> to vector<16x128xbf16>
    %46 = arith.index_cast %c0_i32_1 : i32 to index
    %c0_18 = arith.constant 0 : index
    %c0_19 = arith.constant 0 : index
    %47 = vector.load %arg4[%46, %c0_18, %c0_19] : memref<8x16x128xbf16, #tpu.memory_space<vmem>>, vector<1x16x128xbf16>
    %48 = vector.shape_cast %47 : vector<1x16x128xbf16> to vector<16x128xbf16>
    %49 = vector.shape_cast %45 : vector<16x128xbf16> to vector<1x16x128xbf16>
    tpu.vector_store %arg4[%46, %c0_18, %c0_19], %49 {strides = array<i32>} : memref<8x16x128xbf16, #tpu.memory_space<vmem>>, vector<1x16x128xbf16>,
    %50 = vector.extract_strided_slice %40 {offsets = [16, 0], sizes = [16, 128], strides = [1, 1]} : vector<32x128xbf16> to vector<16x128xbf16>
    %c7_i32 = arith.constant 7 : i32
    %51 = arith.subi %c7_i32, %c0_i32_1 : i32
    %52 = arith.index_cast %51 : i32 to index
    %c0_20 = arith.constant 0 : index
    %c0_21 = arith.constant 0 : index
    %53 = vector.load %arg5[%52, %c0_20, %c0_21] : memref<8x16x128xbf16, #tpu.memory_space<vmem>>, vector<1x16x128xbf16>
    %54 = vector.shape_cast %53 : vector<1x16x128xbf16> to vector<16x128xbf16>
    %55 = vector.shape_cast %50 : vector<16x128xbf16> to vector<1x16x128xbf16>
    tpu.vector_store %arg5[%52, %c0_20, %c0_21], %55 {strides = array<i32>} : memref<8x16x128xbf16, #tpu.memory_space<vmem>>, vector<1x16x128xbf16>,
    %c1_i32 = arith.constant 1 : i32
    %56 = arith.index_cast %c1_i32 : i32 to index
    %c0_22 = arith.constant 0 : index
    %c0_23 = arith.constant 0 : index
    %57 = vector.load %arg1[%56, %c0_22, %c0_23] : memref<8x32x384xbf16, #tpu.memory_space<vmem>>, vector<1x32x384xbf16>
    %58 = vector.shape_cast %57 : vector<1x32x384xbf16> to vector<32x384xbf16>
    %59 = arith.extf %58 : vector<32x384xbf16> to vector<32x384xf32>
    %c0_24 = arith.constant 0 : index
    %c0_25 = arith.constant 0 : index
    %60 = vector.load %arg6[%c0_24, %c0_25] : memref<32x256xbf16, #tpu.memory_space<vmem>>, vector<32x256xbf16>
    %c0_26 = arith.constant 0 : index
    %c0_27 = arith.constant 0 : index
    %61 = vector.load %arg2[%c0_26, %c0_27] : memref<256x384xbf16, #tpu.memory_space<vmem>>, vector<256x384xbf16>
    %cst_28 = arith.constant dense<0.000000e+00> : vector<32x384xf32>
    %62 = tpu.matmul %60, %61, %cst_28 {dimension_numbers = #tpu.dot_dimension_numbers<[1], [0], [0], [1], [0, 0, 1, 1], [], []>} : vector<32x256xbf16>, vector<256x384xbf16>, vector<32x384xf32> -> vector<32x384xf32>
    %63 = vector.extract_strided_slice %59 {offsets = [0, 0], sizes = [32, 128], strides = [1, 1]} : vector<32x384xf32> to vector<32x128xf32>
    %64 = vector.extract_strided_slice %62 {offsets = [0, 0], sizes = [32, 128], strides = [1, 1]} : vector<32x384xf32> to vector<32x128xf32>
    %65 = arith.addf %63, %64 : vector<32x128xf32>
    %66 = arith.negf %65 : vector<32x128xf32>
    %67 = math.exp %66 : vector<32x128xf32>
    %cst_29 = arith.constant 1.000000e+00 : f32
    %68 = vector.broadcast %cst_29 : f32 to vector<32x128xf32>
    %69 = arith.addf %68, %67 : vector<32x128xf32>
    %70 = arith.divf %68, %69 : vector<32x128xf32>
    %71 = vector.extract_strided_slice %59 {offsets = [0, 128], sizes = [32, 128], strides = [1, 1]} : vector<32x384xf32> to vector<32x128xf32>
    %72 = vector.extract_strided_slice %62 {offsets = [0, 128], sizes = [32, 128], strides = [1, 1]} : vector<32x384xf32> to vector<32x128xf32>
    %73 = arith.addf %71, %72 : vector<32x128xf32>
    %74 = arith.negf %73 : vector<32x128xf32>
    %75 = math.exp %74 : vector<32x128xf32>
    %cst_30 = arith.constant 1.000000e+00 : f32
    %76 = vector.broadcast %cst_30 : f32 to vector<32x128xf32>
    %77 = arith.addf %76, %75 : vector<32x128xf32>
    %78 = arith.divf %76, %77 : vector<32x128xf32>
    %79 = vector.extract_strided_slice %59 {offsets = [0, 256], sizes = [32, 128], strides = [1, 1]} : vector<32x384xf32> to vector<32x128xf32>
    %80 = vector.extract_strided_slice %62 {offsets = [0, 256], sizes = [32, 128], strides = [1, 1]} : vector<32x384xf32> to vector<32x128xf32>
    %c0_31 = arith.constant 0 : index
    %c0_32 = arith.constant 0 : index
    %81 = vector.load %arg3[%c0_31, %c0_32] : memref<32x128xf32, #tpu.memory_space<vmem>>, vector<32x128xf32>
    %82 = arith.addf %80, %81 : vector<32x128xf32>
    %83 = arith.mulf %70, %82 : vector<32x128xf32>
    %84 = arith.addf %79, %83 : vector<32x128xf32>
    %85 = math.tanh %84 : vector<32x128xf32>
    %cst_33 = arith.constant 1.000000e+00 : f32
    %86 = vector.broadcast %cst_33 : f32 to vector<32x128xf32>
    %87 = arith.subf %86, %78 : vector<32x128xf32>
    %88 = arith.mulf %87, %85 : vector<32x128xf32>
    %c0_34 = arith.constant 0 : index
    %c0_35 = arith.constant 0 : index
    %89 = vector.load %arg7[%c0_34, %c0_35] : memref<32x128xf32, #tpu.memory_space<vmem>>, vector<32x128xf32>
    %90 = arith.mulf %78, %89 : vector<32x128xf32>
    %91 = arith.addf %88, %90 : vector<32x128xf32>
    %c0_36 = arith.constant 0 : index
    %c0_37 = arith.constant 0 : index
    %92 = vector.load %arg7[%c0_36, %c0_37] : memref<32x128xf32, #tpu.memory_space<vmem>>, vector<32x128xf32>
    tpu.vector_store %arg7[%c0_36, %c0_37], %91 {strides = array<i32>} : memref<32x128xf32, #tpu.memory_space<vmem>>, vector<32x128xf32>,
    %93 = arith.truncf %91 : vector<32x128xf32> to vector<32x128xbf16>
    %94 = vector.extract_strided_slice %93 {offsets = [0, 0], sizes = [16, 128], strides = [1, 1]} : vector<32x128xbf16> to vector<16x128xbf16>
    %c0_38 = arith.constant 0 : index
    %c0_39 = arith.constant 0 : index
    %95 = vector.load %arg6[%c0_38, %c0_39] : memref<32x256xbf16, #tpu.memory_space<vmem>>, vector<16x128xbf16>
    tpu.vector_store %arg6[%c0_38, %c0_39], %94 {strides = array<i32>} : memref<32x256xbf16, #tpu.memory_space<vmem>>, vector<16x128xbf16>,
    %96 = vector.extract_strided_slice %93 {offsets = [16, 0], sizes = [16, 128], strides = [1, 1]} : vector<32x128xbf16> to vector<16x128xbf16>
    %c16_40 = arith.constant 16 : index
    %c128_41 = arith.constant 128 : index
    %97 = vector.load %arg6[%c16_40, %c128_41] : memref<32x256xbf16, #tpu.memory_space<vmem>>, vector<16x128xbf16>
    tpu.vector_store %arg6[%c16_40, %c128_41], %96 {strides = array<i32>} : memref<32x256xbf16, #tpu.memory_space<vmem>>, vector<16x128xbf16>,
    %98 = vector.extract_strided_slice %93 {offsets = [0, 0], sizes = [16, 128], strides = [1, 1]} : vector<32x128xbf16> to vector<16x128xbf16>
    %99 = arith.index_cast %c1_i32 : i32 to index
    %c0_42 = arith.constant 0 : index
    %c0_43 = arith.constant 0 : index
    %100 = vector.load %arg4[%99, %c0_42, %c0_43] : memref<8x16x128xbf16, #tpu.memory_space<vmem>>, vector<1x16x128xbf16>
    %101 = vector.shape_cast %100 : vector<1x16x128xbf16> to vector<16x128xbf16>
    %102 = vector.shape_cast %98 : vector<16x128xbf16> to vector<1x16x128xbf16>
    tpu.vector_store %arg4[%99, %c0_42, %c0_43], %102 {strides = array<i32>} : memref<8x16x128xbf16, #tpu.memory_space<vmem>>, vector<1x16x128xbf16>,
    %103 = vector.extract_strided_slice %93 {offsets = [16, 0], sizes = [16, 128], strides = [1, 1]} : vector<32x128xbf16> to vector<16x128xbf16>
    %c7_i32_44 = arith.constant 7 : i32
    %104 = arith.subi %c7_i32_44, %c1_i32 : i32
    %105 = arith.index_cast %104 : i32 to index
    %c0_45 = arith.constant 0 : index
    %c0_46 = arith.constant 0 : index
    %106 = vector.load %arg5[%105, %c0_45, %c0_46] : memref<8x16x128xbf16, #tpu.memory_space<vmem>>, vector<1x16x128xbf16>
    %107 = vector.shape_cast %106 : vector<1x16x128xbf16> to vector<16x128xbf16>
    %108 = vector.shape_cast %103 : vector<16x128xbf16> to vector<1x16x128xbf16>
    tpu.vector_store %arg5[%105, %c0_45, %c0_46], %108 {strides = array<i32>} : memref<8x16x128xbf16, #tpu.memory_space<vmem>>, vector<1x16x128xbf16>,
    %c2_i32 = arith.constant 2 : i32
    %109 = arith.index_cast %c2_i32 : i32 to index
    %c0_47 = arith.constant 0 : index
    %c0_48 = arith.constant 0 : index
    %110 = vector.load %arg1[%109, %c0_47, %c0_48] : memref<8x32x384xbf16, #tpu.memory_space<vmem>>, vector<1x32x384xbf16>
    %111 = vector.shape_cast %110 : vector<1x32x384xbf16> to vector<32x384xbf16>
    %112 = arith.extf %111 : vector<32x384xbf16> to vector<32x384xf32>
    %c0_49 = arith.constant 0 : index
    %c0_50 = arith.constant 0 : index
    %113 = vector.load %arg6[%c0_49, %c0_50] : memref<32x256xbf16, #tpu.memory_space<vmem>>, vector<32x256xbf16>
    %c0_51 = arith.constant 0 : index
    %c0_52 = arith.constant 0 : index
    %114 = vector.load %arg2[%c0_51, %c0_52] : memref<256x384xbf16, #tpu.memory_space<vmem>>, vector<256x384xbf16>
    %cst_53 = arith.constant dense<0.000000e+00> : vector<32x384xf32>
    %115 = tpu.matmul %113, %114, %cst_53 {dimension_numbers = #tpu.dot_dimension_numbers<[1], [0], [0], [1], [0, 0, 1, 1], [], []>} : vector<32x256xbf16>, vector<256x384xbf16>, vector<32x384xf32> -> vector<32x384xf32>
    %116 = vector.extract_strided_slice %112 {offsets = [0, 0], sizes = [32, 128], strides = [1, 1]} : vector<32x384xf32> to vector<32x128xf32>
    %117 = vector.extract_strided_slice %115 {offsets = [0, 0], sizes = [32, 128], strides = [1, 1]} : vector<32x384xf32> to vector<32x128xf32>
    %118 = arith.addf %116, %117 : vector<32x128xf32>
    %119 = arith.negf %118 : vector<32x128xf32>
    %120 = math.exp %119 : vector<32x128xf32>
    %cst_54 = arith.constant 1.000000e+00 : f32
    %121 = vector.broadcast %cst_54 : f32 to vector<32x128xf32>
    %122 = arith.addf %121, %120 : vector<32x128xf32>
    %123 = arith.divf %121, %122 : vector<32x128xf32>
    %124 = vector.extract_strided_slice %112 {offsets = [0, 128], sizes = [32, 128], strides = [1, 1]} : vector<32x384xf32> to vector<32x128xf32>
    %125 = vector.extract_strided_slice %115 {offsets = [0, 128], sizes = [32, 128], strides = [1, 1]} : vector<32x384xf32> to vector<32x128xf32>
    %126 = arith.addf %124, %125 : vector<32x128xf32>
    %127 = arith.negf %126 : vector<32x128xf32>
    %128 = math.exp %127 : vector<32x128xf32>
    %cst_55 = arith.constant 1.000000e+00 : f32
    %129 = vector.broadcast %cst_55 : f32 to vector<32x128xf32>
    %130 = arith.addf %129, %128 : vector<32x128xf32>
    %131 = arith.divf %129, %130 : vector<32x128xf32>
    %132 = vector.extract_strided_slice %112 {offsets = [0, 256], sizes = [32, 128], strides = [1, 1]} : vector<32x384xf32> to vector<32x128xf32>
    %133 = vector.extract_strided_slice %115 {offsets = [0, 256], sizes = [32, 128], strides = [1, 1]} : vector<32x384xf32> to vector<32x128xf32>
    %c0_56 = arith.constant 0 : index
    %c0_57 = arith.constant 0 : index
    %134 = vector.load %arg3[%c0_56, %c0_57] : memref<32x128xf32, #tpu.memory_space<vmem>>, vector<32x128xf32>
    %135 = arith.addf %133, %134 : vector<32x128xf32>
    %136 = arith.mulf %123, %135 : vector<32x128xf32>
    %137 = arith.addf %132, %136 : vector<32x128xf32>
    %138 = math.tanh %137 : vector<32x128xf32>
    %cst_58 = arith.constant 1.000000e+00 : f32
    %139 = vector.broadcast %cst_58 : f32 to vector<32x128xf32>
    %140 = arith.subf %139, %131 : vector<32x128xf32>
    %141 = arith.mulf %140, %138 : vector<32x128xf32>
    %c0_59 = arith.constant 0 : index
    %c0_60 = arith.constant 0 : index
    %142 = vector.load %arg7[%c0_59, %c0_60] : memref<32x128xf32, #tpu.memory_space<vmem>>, vector<32x128xf32>
    %143 = arith.mulf %131, %142 : vector<32x128xf32>
    %144 = arith.addf %141, %143 : vector<32x128xf32>
    %c0_61 = arith.constant 0 : index
    %c0_62 = arith.constant 0 : index
    %145 = vector.load %arg7[%c0_61, %c0_62] : memref<32x128xf32, #tpu.memory_space<vmem>>, vector<32x128xf32>
    tpu.vector_store %arg7[%c0_61, %c0_62], %144 {strides = array<i32>} : memref<32x128xf32, #tpu.memory_space<vmem>>, vector<32x128xf32>,
    %146 = arith.truncf %144 : vector<32x128xf32> to vector<32x128xbf16>
    %147 = vector.extract_strided_slice %146 {offsets = [0, 0], sizes = [16, 128], strides = [1, 1]} : vector<32x128xbf16> to vector<16x128xbf16>
    %c0_63 = arith.constant 0 : index
    %c0_64 = arith.constant 0 : index
    %148 = vector.load %arg6[%c0_63, %c0_64] : memref<32x256xbf16, #tpu.memory_space<vmem>>, vector<16x128xbf16>
    tpu.vector_store %arg6[%c0_63, %c0_64], %147 {strides = array<i32>} : memref<32x256xbf16, #tpu.memory_space<vmem>>, vector<16x128xbf16>,
    %149 = vector.extract_strided_slice %146 {offsets = [16, 0], sizes = [16, 128], strides = [1, 1]} : vector<32x128xbf16> to vector<16x128xbf16>
    %c16_65 = arith.constant 16 : index
    %c128_66 = arith.constant 128 : index
    %150 = vector.load %arg6[%c16_65, %c128_66] : memref<32x256xbf16, #tpu.memory_space<vmem>>, vector<16x128xbf16>
    tpu.vector_store %arg6[%c16_65, %c128_66], %149 {strides = array<i32>} : memref<32x256xbf16, #tpu.memory_space<vmem>>, vector<16x128xbf16>,
    %151 = vector.extract_strided_slice %146 {offsets = [0, 0], sizes = [16, 128], strides = [1, 1]} : vector<32x128xbf16> to vector<16x128xbf16>
    %152 = arith.index_cast %c2_i32 : i32 to index
    %c0_67 = arith.constant 0 : index
    %c0_68 = arith.constant 0 : index
    %153 = vector.load %arg4[%152, %c0_67, %c0_68] : memref<8x16x128xbf16, #tpu.memory_space<vmem>>, vector<1x16x128xbf16>
    %154 = vector.shape_cast %153 : vector<1x16x128xbf16> to vector<16x128xbf16>
    %155 = vector.shape_cast %151 : vector<16x128xbf16> to vector<1x16x128xbf16>
    tpu.vector_store %arg4[%152, %c0_67, %c0_68], %155 {strides = array<i32>} : memref<8x16x128xbf16, #tpu.memory_space<vmem>>, vector<1x16x128xbf16>,
    %156 = vector.extract_strided_slice %146 {offsets = [16, 0], sizes = [16, 128], strides = [1, 1]} : vector<32x128xbf16> to vector<16x128xbf16>
    %c7_i32_69 = arith.constant 7 : i32
    %157 = arith.subi %c7_i32_69, %c2_i32 : i32
    %158 = arith.index_cast %157 : i32 to index
    %c0_70 = arith.constant 0 : index
    %c0_71 = arith.constant 0 : index
    %159 = vector.load %arg5[%158, %c0_70, %c0_71] : memref<8x16x128xbf16, #tpu.memory_space<vmem>>, vector<1x16x128xbf16>
    %160 = vector.shape_cast %159 : vector<1x16x128xbf16> to vector<16x128xbf16>
    %161 = vector.shape_cast %156 : vector<16x128xbf16> to vector<1x16x128xbf16>
    tpu.vector_store %arg5[%158, %c0_70, %c0_71], %161 {strides = array<i32>} : memref<8x16x128xbf16, #tpu.memory_space<vmem>>, vector<1x16x128xbf16>,
    %c3_i32 = arith.constant 3 : i32
    %162 = arith.index_cast %c3_i32 : i32 to index
    %c0_72 = arith.constant 0 : index
    %c0_73 = arith.constant 0 : index
    %163 = vector.load %arg1[%162, %c0_72, %c0_73] : memref<8x32x384xbf16, #tpu.memory_space<vmem>>, vector<1x32x384xbf16>
    %164 = vector.shape_cast %163 : vector<1x32x384xbf16> to vector<32x384xbf16>
    %165 = arith.extf %164 : vector<32x384xbf16> to vector<32x384xf32>
    %c0_74 = arith.constant 0 : index
    %c0_75 = arith.constant 0 : index
    %166 = vector.load %arg6[%c0_74, %c0_75] : memref<32x256xbf16, #tpu.memory_space<vmem>>, vector<32x256xbf16>
    %c0_76 = arith.constant 0 : index
    %c0_77 = arith.constant 0 : index
    %167 = vector.load %arg2[%c0_76, %c0_77] : memref<256x384xbf16, #tpu.memory_space<vmem>>, vector<256x384xbf16>
    %cst_78 = arith.constant dense<0.000000e+00> : vector<32x384xf32>
    %168 = tpu.matmul %166, %167, %cst_78 {dimension_numbers = #tpu.dot_dimension_numbers<[1], [0], [0], [1], [0, 0, 1, 1], [], []>} : vector<32x256xbf16>, vector<256x384xbf16>, vector<32x384xf32> -> vector<32x384xf32>
    %169 = vector.extract_strided_slice %165 {offsets = [0, 0], sizes = [32, 128], strides = [1, 1]} : vector<32x384xf32> to vector<32x128xf32>
    %170 = vector.extract_strided_slice %168 {offsets = [0, 0], sizes = [32, 128], strides = [1, 1]} : vector<32x384xf32> to vector<32x128xf32>
    %171 = arith.addf %169, %170 : vector<32x128xf32>
    %172 = arith.negf %171 : vector<32x128xf32>
    %173 = math.exp %172 : vector<32x128xf32>
    %cst_79 = arith.constant 1.000000e+00 : f32
    %174 = vector.broadcast %cst_79 : f32 to vector<32x128xf32>
    %175 = arith.addf %174, %173 : vector<32x128xf32>
    %176 = arith.divf %174, %175 : vector<32x128xf32>
    %177 = vector.extract_strided_slice %165 {offsets = [0, 128], sizes = [32, 128], strides = [1, 1]} : vector<32x384xf32> to vector<32x128xf32>
    %178 = vector.extract_strided_slice %168 {offsets = [0, 128], sizes = [32, 128], strides = [1, 1]} : vector<32x384xf32> to vector<32x128xf32>
    %179 = arith.addf %177, %178 : vector<32x128xf32>
    %180 = arith.negf %179 : vector<32x128xf32>
    %181 = math.exp %180 : vector<32x128xf32>
    %cst_80 = arith.constant 1.000000e+00 : f32
    %182 = vector.broadcast %cst_80 : f32 to vector<32x128xf32>
    %183 = arith.addf %182, %181 : vector<32x128xf32>
    %184 = arith.divf %182, %183 : vector<32x128xf32>
    %185 = vector.extract_strided_slice %165 {offsets = [0, 256], sizes = [32, 128], strides = [1, 1]} : vector<32x384xf32> to vector<32x128xf32>
    %186 = vector.extract_strided_slice %168 {offsets = [0, 256], sizes = [32, 128], strides = [1, 1]} : vector<32x384xf32> to vector<32x128xf32>
    %c0_81 = arith.constant 0 : index
    %c0_82 = arith.constant 0 : index
    %187 = vector.load %arg3[%c0_81, %c0_82] : memref<32x128xf32, #tpu.memory_space<vmem>>, vector<32x128xf32>
    %188 = arith.addf %186, %187 : vector<32x128xf32>
    %189 = arith.mulf %176, %188 : vector<32x128xf32>
    %190 = arith.addf %185, %189 : vector<32x128xf32>
    %191 = math.tanh %190 : vector<32x128xf32>
    %cst_83 = arith.constant 1.000000e+00 : f32
    %192 = vector.broadcast %cst_83 : f32 to vector<32x128xf32>
    %193 = arith.subf %192, %184 : vector<32x128xf32>
    %194 = arith.mulf %193, %191 : vector<32x128xf32>
    %c0_84 = arith.constant 0 : index
    %c0_85 = arith.constant 0 : index
    %195 = vector.load %arg7[%c0_84, %c0_85] : memref<32x128xf32, #tpu.memory_space<vmem>>, vector<32x128xf32>
    %196 = arith.mulf %184, %195 : vector<32x128xf32>
    %197 = arith.addf %194, %196 : vector<32x128xf32>
    %c0_86 = arith.constant 0 : index
    %c0_87 = arith.constant 0 : index
    %198 = vector.load %arg7[%c0_86, %c0_87] : memref<32x128xf32, #tpu.memory_space<vmem>>, vector<32x128xf32>
    tpu.vector_store %arg7[%c0_86, %c0_87], %197 {strides = array<i32>} : memref<32x128xf32, #tpu.memory_space<vmem>>, vector<32x128xf32>,
    %199 = arith.truncf %197 : vector<32x128xf32> to vector<32x128xbf16>
    %200 = vector.extract_strided_slice %199 {offsets = [0, 0], sizes = [16, 128], strides = [1, 1]} : vector<32x128xbf16> to vector<16x128xbf16>
    %c0_88 = arith.constant 0 : index
    %c0_89 = arith.constant 0 : index
    %201 = vector.load %arg6[%c0_88, %c0_89] : memref<32x256xbf16, #tpu.memory_space<vmem>>, vector<16x128xbf16>
    tpu.vector_store %arg6[%c0_88, %c0_89], %200 {strides = array<i32>} : memref<32x256xbf16, #tpu.memory_space<vmem>>, vector<16x128xbf16>,
    %202 = vector.extract_strided_slice %199 {offsets = [16, 0], sizes = [16, 128], strides = [1, 1]} : vector<32x128xbf16> to vector<16x128xbf16>
    %c16_90 = arith.constant 16 : index
    %c128_91 = arith.constant 128 : index
    %203 = vector.load %arg6[%c16_90, %c128_91] : memref<32x256xbf16, #tpu.memory_space<vmem>>, vector<16x128xbf16>
    tpu.vector_store %arg6[%c16_90, %c128_91], %202 {strides = array<i32>} : memref<32x256xbf16, #tpu.memory_space<vmem>>, vector<16x128xbf16>,
    %204 = vector.extract_strided_slice %199 {offsets = [0, 0], sizes = [16, 128], strides = [1, 1]} : vector<32x128xbf16> to vector<16x128xbf16>
    %205 = arith.index_cast %c3_i32 : i32 to index
    %c0_92 = arith.constant 0 : index
    %c0_93 = arith.constant 0 : index
    %206 = vector.load %arg4[%205, %c0_92, %c0_93] : memref<8x16x128xbf16, #tpu.memory_space<vmem>>, vector<1x16x128xbf16>
    %207 = vector.shape_cast %206 : vector<1x16x128xbf16> to vector<16x128xbf16>
    %208 = vector.shape_cast %204 : vector<16x128xbf16> to vector<1x16x128xbf16>
    tpu.vector_store %arg4[%205, %c0_92, %c0_93], %208 {strides = array<i32>} : memref<8x16x128xbf16, #tpu.memory_space<vmem>>, vector<1x16x128xbf16>,
    %209 = vector.extract_strided_slice %199 {offsets = [16, 0], sizes = [16, 128], strides = [1, 1]} : vector<32x128xbf16> to vector<16x128xbf16>
    %c7_i32_94 = arith.constant 7 : i32
    %210 = arith.subi %c7_i32_94, %c3_i32 : i32
    %211 = arith.index_cast %210 : i32 to index
    %c0_95 = arith.constant 0 : index
    %c0_96 = arith.constant 0 : index
    %212 = vector.load %arg5[%211, %c0_95, %c0_96] : memref<8x16x128xbf16, #tpu.memory_space<vmem>>, vector<1x16x128xbf16>
    %213 = vector.shape_cast %212 : vector<1x16x128xbf16> to vector<16x128xbf16>
    %214 = vector.shape_cast %209 : vector<16x128xbf16> to vector<1x16x128xbf16>
    tpu.vector_store %arg5[%211, %c0_95, %c0_96], %214 {strides = array<i32>} : memref<8x16x128xbf16, #tpu.memory_space<vmem>>, vector<1x16x128xbf16>,
    %c4_i32 = arith.constant 4 : i32
    %215 = arith.index_cast %c4_i32 : i32 to index
    %c0_97 = arith.constant 0 : index
    %c0_98 = arith.constant 0 : index
    %216 = vector.load %arg1[%215, %c0_97, %c0_98] : memref<8x32x384xbf16, #tpu.memory_space<vmem>>, vector<1x32x384xbf16>
    %217 = vector.shape_cast %216 : vector<1x32x384xbf16> to vector<32x384xbf16>
    %218 = arith.extf %217 : vector<32x384xbf16> to vector<32x384xf32>
    %c0_99 = arith.constant 0 : index
    %c0_100 = arith.constant 0 : index
    %219 = vector.load %arg6[%c0_99, %c0_100] : memref<32x256xbf16, #tpu.memory_space<vmem>>, vector<32x256xbf16>
    %c0_101 = arith.constant 0 : index
    %c0_102 = arith.constant 0 : index
    %220 = vector.load %arg2[%c0_101, %c0_102] : memref<256x384xbf16, #tpu.memory_space<vmem>>, vector<256x384xbf16>
    %cst_103 = arith.constant dense<0.000000e+00> : vector<32x384xf32>
    %221 = tpu.matmul %219, %220, %cst_103 {dimension_numbers = #tpu.dot_dimension_numbers<[1], [0], [0], [1], [0, 0, 1, 1], [], []>} : vector<32x256xbf16>, vector<256x384xbf16>, vector<32x384xf32> -> vector<32x384xf32>
    %222 = vector.extract_strided_slice %218 {offsets = [0, 0], sizes = [32, 128], strides = [1, 1]} : vector<32x384xf32> to vector<32x128xf32>
    %223 = vector.extract_strided_slice %221 {offsets = [0, 0], sizes = [32, 128], strides = [1, 1]} : vector<32x384xf32> to vector<32x128xf32>
    %224 = arith.addf %222, %223 : vector<32x128xf32>
    %225 = arith.negf %224 : vector<32x128xf32>
    %226 = math.exp %225 : vector<32x128xf32>
    %cst_104 = arith.constant 1.000000e+00 : f32
    %227 = vector.broadcast %cst_104 : f32 to vector<32x128xf32>
    %228 = arith.addf %227, %226 : vector<32x128xf32>
    %229 = arith.divf %227, %228 : vector<32x128xf32>
    %230 = vector.extract_strided_slice %218 {offsets = [0, 128], sizes = [32, 128], strides = [1, 1]} : vector<32x384xf32> to vector<32x128xf32>
    %231 = vector.extract_strided_slice %221 {offsets = [0, 128], sizes = [32, 128], strides = [1, 1]} : vector<32x384xf32> to vector<32x128xf32>
    %232 = arith.addf %230, %231 : vector<32x128xf32>
    %233 = arith.negf %232 : vector<32x128xf32>
    %234 = math.exp %233 : vector<32x128xf32>
    %cst_105 = arith.constant 1.000000e+00 : f32
    %235 = vector.broadcast %cst_105 : f32 to vector<32x128xf32>
    %236 = arith.addf %235, %234 : vector<32x128xf32>
    %237 = arith.divf %235, %236 : vector<32x128xf32>
    %238 = vector.extract_strided_slice %218 {offsets = [0, 256], sizes = [32, 128], strides = [1, 1]} : vector<32x384xf32> to vector<32x128xf32>
    %239 = vector.extract_strided_slice %221 {offsets = [0, 256], sizes = [32, 128], strides = [1, 1]} : vector<32x384xf32> to vector<32x128xf32>
    %c0_106 = arith.constant 0 : index
    %c0_107 = arith.constant 0 : index
    %240 = vector.load %arg3[%c0_106, %c0_107] : memref<32x128xf32, #tpu.memory_space<vmem>>, vector<32x128xf32>
    %241 = arith.addf %239, %240 : vector<32x128xf32>
    %242 = arith.mulf %229, %241 : vector<32x128xf32>
    %243 = arith.addf %238, %242 : vector<32x128xf32>
    %244 = math.tanh %243 : vector<32x128xf32>
    %cst_108 = arith.constant 1.000000e+00 : f32
    %245 = vector.broadcast %cst_108 : f32 to vector<32x128xf32>
    %246 = arith.subf %245, %237 : vector<32x128xf32>
    %247 = arith.mulf %246, %244 : vector<32x128xf32>
    %c0_109 = arith.constant 0 : index
    %c0_110 = arith.constant 0 : index
    %248 = vector.load %arg7[%c0_109, %c0_110] : memref<32x128xf32, #tpu.memory_space<vmem>>, vector<32x128xf32>
    %249 = arith.mulf %237, %248 : vector<32x128xf32>
    %250 = arith.addf %247, %249 : vector<32x128xf32>
    %c0_111 = arith.constant 0 : index
    %c0_112 = arith.constant 0 : index
    %251 = vector.load %arg7[%c0_111, %c0_112] : memref<32x128xf32, #tpu.memory_space<vmem>>, vector<32x128xf32>
    tpu.vector_store %arg7[%c0_111, %c0_112], %250 {strides = array<i32>} : memref<32x128xf32, #tpu.memory_space<vmem>>, vector<32x128xf32>,
    %252 = arith.truncf %250 : vector<32x128xf32> to vector<32x128xbf16>
    %253 = vector.extract_strided_slice %252 {offsets = [0, 0], sizes = [16, 128], strides = [1, 1]} : vector<32x128xbf16> to vector<16x128xbf16>
    %c0_113 = arith.constant 0 : index
    %c0_114 = arith.constant 0 : index
    %254 = vector.load %arg6[%c0_113, %c0_114] : memref<32x256xbf16, #tpu.memory_space<vmem>>, vector<16x128xbf16>
    tpu.vector_store %arg6[%c0_113, %c0_114], %253 {strides = array<i32>} : memref<32x256xbf16, #tpu.memory_space<vmem>>, vector<16x128xbf16>,
    %255 = vector.extract_strided_slice %252 {offsets = [16, 0], sizes = [16, 128], strides = [1, 1]} : vector<32x128xbf16> to vector<16x128xbf16>
    %c16_115 = arith.constant 16 : index
    %c128_116 = arith.constant 128 : index
    %256 = vector.load %arg6[%c16_115, %c128_116] : memref<32x256xbf16, #tpu.memory_space<vmem>>, vector<16x128xbf16>
    tpu.vector_store %arg6[%c16_115, %c128_116], %255 {strides = array<i32>} : memref<32x256xbf16, #tpu.memory_space<vmem>>, vector<16x128xbf16>,
    %257 = vector.extract_strided_slice %252 {offsets = [0, 0], sizes = [16, 128], strides = [1, 1]} : vector<32x128xbf16> to vector<16x128xbf16>
    %258 = arith.index_cast %c4_i32 : i32 to index
    %c0_117 = arith.constant 0 : index
    %c0_118 = arith.constant 0 : index
    %259 = vector.load %arg4[%258, %c0_117, %c0_118] : memref<8x16x128xbf16, #tpu.memory_space<vmem>>, vector<1x16x128xbf16>
    %260 = vector.shape_cast %259 : vector<1x16x128xbf16> to vector<16x128xbf16>
    %261 = vector.shape_cast %257 : vector<16x128xbf16> to vector<1x16x128xbf16>
    tpu.vector_store %arg4[%258, %c0_117, %c0_118], %261 {strides = array<i32>} : memref<8x16x128xbf16, #tpu.memory_space<vmem>>, vector<1x16x128xbf16>,
    %262 = vector.extract_strided_slice %252 {offsets = [16, 0], sizes = [16, 128], strides = [1, 1]} : vector<32x128xbf16> to vector<16x128xbf16>
    %c7_i32_119 = arith.constant 7 : i32
    %263 = arith.subi %c7_i32_119, %c4_i32 : i32
    %264 = arith.index_cast %263 : i32 to index
    %c0_120 = arith.constant 0 : index
    %c0_121 = arith.constant 0 : index
    %265 = vector.load %arg5[%264, %c0_120, %c0_121] : memref<8x16x128xbf16, #tpu.memory_space<vmem>>, vector<1x16x128xbf16>
    %266 = vector.shape_cast %265 : vector<1x16x128xbf16> to vector<16x128xbf16>
    %267 = vector.shape_cast %262 : vector<16x128xbf16> to vector<1x16x128xbf16>
    tpu.vector_store %arg5[%264, %c0_120, %c0_121], %267 {strides = array<i32>} : memref<8x16x128xbf16, #tpu.memory_space<vmem>>, vector<1x16x128xbf16>,
    %c5_i32 = arith.constant 5 : i32
    %268 = arith.index_cast %c5_i32 : i32 to index
    %c0_122 = arith.constant 0 : index
    %c0_123 = arith.constant 0 : index
    %269 = vector.load %arg1[%268, %c0_122, %c0_123] : memref<8x32x384xbf16, #tpu.memory_space<vmem>>, vector<1x32x384xbf16>
    %270 = vector.shape_cast %269 : vector<1x32x384xbf16> to vector<32x384xbf16>
    %271 = arith.extf %270 : vector<32x384xbf16> to vector<32x384xf32>
    %c0_124 = arith.constant 0 : index
    %c0_125 = arith.constant 0 : index
    %272 = vector.load %arg6[%c0_124, %c0_125] : memref<32x256xbf16, #tpu.memory_space<vmem>>, vector<32x256xbf16>
    %c0_126 = arith.constant 0 : index
    %c0_127 = arith.constant 0 : index
    %273 = vector.load %arg2[%c0_126, %c0_127] : memref<256x384xbf16, #tpu.memory_space<vmem>>, vector<256x384xbf16>
    %cst_128 = arith.constant dense<0.000000e+00> : vector<32x384xf32>
    %274 = tpu.matmul %272, %273, %cst_128 {dimension_numbers = #tpu.dot_dimension_numbers<[1], [0], [0], [1], [0, 0, 1, 1], [], []>} : vector<32x256xbf16>, vector<256x384xbf16>, vector<32x384xf32> -> vector<32x384xf32>
    %275 = vector.extract_strided_slice %271 {offsets = [0, 0], sizes = [32, 128], strides = [1, 1]} : vector<32x384xf32> to vector<32x128xf32>
    %276 = vector.extract_strided_slice %274 {offsets = [0, 0], sizes = [32, 128], strides = [1, 1]} : vector<32x384xf32> to vector<32x128xf32>
    %277 = arith.addf %275, %276 : vector<32x128xf32>
    %278 = arith.negf %277 : vector<32x128xf32>
    %279 = math.exp %278 : vector<32x128xf32>
    %cst_129 = arith.constant 1.000000e+00 : f32
    %280 = vector.broadcast %cst_129 : f32 to vector<32x128xf32>
    %281 = arith.addf %280, %279 : vector<32x128xf32>
    %282 = arith.divf %280, %281 : vector<32x128xf32>
    %283 = vector.extract_strided_slice %271 {offsets = [0, 128], sizes = [32, 128], strides = [1, 1]} : vector<32x384xf32> to vector<32x128xf32>
    %284 = vector.extract_strided_slice %274 {offsets = [0, 128], sizes = [32, 128], strides = [1, 1]} : vector<32x384xf32> to vector<32x128xf32>
    %285 = arith.addf %283, %284 : vector<32x128xf32>
    %286 = arith.negf %285 : vector<32x128xf32>
    %287 = math.exp %286 : vector<32x128xf32>
    %cst_130 = arith.constant 1.000000e+00 : f32
    %288 = vector.broadcast %cst_130 : f32 to vector<32x128xf32>
    %289 = arith.addf %288, %287 : vector<32x128xf32>
    %290 = arith.divf %288, %289 : vector<32x128xf32>
    %291 = vector.extract_strided_slice %271 {offsets = [0, 256], sizes = [32, 128], strides = [1, 1]} : vector<32x384xf32> to vector<32x128xf32>
    %292 = vector.extract_strided_slice %274 {offsets = [0, 256], sizes = [32, 128], strides = [1, 1]} : vector<32x384xf32> to vector<32x128xf32>
    %c0_131 = arith.constant 0 : index
    %c0_132 = arith.constant 0 : index
    %293 = vector.load %arg3[%c0_131, %c0_132] : memref<32x128xf32, #tpu.memory_space<vmem>>, vector<32x128xf32>
    %294 = arith.addf %292, %293 : vector<32x128xf32>
    %295 = arith.mulf %282, %294 : vector<32x128xf32>
    %296 = arith.addf %291, %295 : vector<32x128xf32>
    %297 = math.tanh %296 : vector<32x128xf32>
    %cst_133 = arith.constant 1.000000e+00 : f32
    %298 = vector.broadcast %cst_133 : f32 to vector<32x128xf32>
    %299 = arith.subf %298, %290 : vector<32x128xf32>
    %300 = arith.mulf %299, %297 : vector<32x128xf32>
    %c0_134 = arith.constant 0 : index
    %c0_135 = arith.constant 0 : index
    %301 = vector.load %arg7[%c0_134, %c0_135] : memref<32x128xf32, #tpu.memory_space<vmem>>, vector<32x128xf32>
    %302 = arith.mulf %290, %301 : vector<32x128xf32>
    %303 = arith.addf %300, %302 : vector<32x128xf32>
    %c0_136 = arith.constant 0 : index
    %c0_137 = arith.constant 0 : index
    %304 = vector.load %arg7[%c0_136, %c0_137] : memref<32x128xf32, #tpu.memory_space<vmem>>, vector<32x128xf32>
    tpu.vector_store %arg7[%c0_136, %c0_137], %303 {strides = array<i32>} : memref<32x128xf32, #tpu.memory_space<vmem>>, vector<32x128xf32>,
    %305 = arith.truncf %303 : vector<32x128xf32> to vector<32x128xbf16>
    %306 = vector.extract_strided_slice %305 {offsets = [0, 0], sizes = [16, 128], strides = [1, 1]} : vector<32x128xbf16> to vector<16x128xbf16>
    %c0_138 = arith.constant 0 : index
    %c0_139 = arith.constant 0 : index
    %307 = vector.load %arg6[%c0_138, %c0_139] : memref<32x256xbf16, #tpu.memory_space<vmem>>, vector<16x128xbf16>
    tpu.vector_store %arg6[%c0_138, %c0_139], %306 {strides = array<i32>} : memref<32x256xbf16, #tpu.memory_space<vmem>>, vector<16x128xbf16>,
    %308 = vector.extract_strided_slice %305 {offsets = [16, 0], sizes = [16, 128], strides = [1, 1]} : vector<32x128xbf16> to vector<16x128xbf16>
    %c16_140 = arith.constant 16 : index
    %c128_141 = arith.constant 128 : index
    %309 = vector.load %arg6[%c16_140, %c128_141] : memref<32x256xbf16, #tpu.memory_space<vmem>>, vector<16x128xbf16>
    tpu.vector_store %arg6[%c16_140, %c128_141], %308 {strides = array<i32>} : memref<32x256xbf16, #tpu.memory_space<vmem>>, vector<16x128xbf16>,
    %310 = vector.extract_strided_slice %305 {offsets = [0, 0], sizes = [16, 128], strides = [1, 1]} : vector<32x128xbf16> to vector<16x128xbf16>
    %311 = arith.index_cast %c5_i32 : i32 to index
    %c0_142 = arith.constant 0 : index
    %c0_143 = arith.constant 0 : index
    %312 = vector.load %arg4[%311, %c0_142, %c0_143] : memref<8x16x128xbf16, #tpu.memory_space<vmem>>, vector<1x16x128xbf16>
    %313 = vector.shape_cast %312 : vector<1x16x128xbf16> to vector<16x128xbf16>
    %314 = vector.shape_cast %310 : vector<16x128xbf16> to vector<1x16x128xbf16>
    tpu.vector_store %arg4[%311, %c0_142, %c0_143], %314 {strides = array<i32>} : memref<8x16x128xbf16, #tpu.memory_space<vmem>>, vector<1x16x128xbf16>,
    %315 = vector.extract_strided_slice %305 {offsets = [16, 0], sizes = [16, 128], strides = [1, 1]} : vector<32x128xbf16> to vector<16x128xbf16>
    %c7_i32_144 = arith.constant 7 : i32
    %316 = arith.subi %c7_i32_144, %c5_i32 : i32
    %317 = arith.index_cast %316 : i32 to index
    %c0_145 = arith.constant 0 : index
    %c0_146 = arith.constant 0 : index
    %318 = vector.load %arg5[%317, %c0_145, %c0_146] : memref<8x16x128xbf16, #tpu.memory_space<vmem>>, vector<1x16x128xbf16>
    %319 = vector.shape_cast %318 : vector<1x16x128xbf16> to vector<16x128xbf16>
    %320 = vector.shape_cast %315 : vector<16x128xbf16> to vector<1x16x128xbf16>
    tpu.vector_store %arg5[%317, %c0_145, %c0_146], %320 {strides = array<i32>} : memref<8x16x128xbf16, #tpu.memory_space<vmem>>, vector<1x16x128xbf16>,
    %c6_i32 = arith.constant 6 : i32
    %321 = arith.index_cast %c6_i32 : i32 to index
    %c0_147 = arith.constant 0 : index
    %c0_148 = arith.constant 0 : index
    %322 = vector.load %arg1[%321, %c0_147, %c0_148] : memref<8x32x384xbf16, #tpu.memory_space<vmem>>, vector<1x32x384xbf16>
    %323 = vector.shape_cast %322 : vector<1x32x384xbf16> to vector<32x384xbf16>
    %324 = arith.extf %323 : vector<32x384xbf16> to vector<32x384xf32>
    %c0_149 = arith.constant 0 : index
    %c0_150 = arith.constant 0 : index
    %325 = vector.load %arg6[%c0_149, %c0_150] : memref<32x256xbf16, #tpu.memory_space<vmem>>, vector<32x256xbf16>
    %c0_151 = arith.constant 0 : index
    %c0_152 = arith.constant 0 : index
    %326 = vector.load %arg2[%c0_151, %c0_152] : memref<256x384xbf16, #tpu.memory_space<vmem>>, vector<256x384xbf16>
    %cst_153 = arith.constant dense<0.000000e+00> : vector<32x384xf32>
    %327 = tpu.matmul %325, %326, %cst_153 {dimension_numbers = #tpu.dot_dimension_numbers<[1], [0], [0], [1], [0, 0, 1, 1], [], []>} : vector<32x256xbf16>, vector<256x384xbf16>, vector<32x384xf32> -> vector<32x384xf32>
    %328 = vector.extract_strided_slice %324 {offsets = [0, 0], sizes = [32, 128], strides = [1, 1]} : vector<32x384xf32> to vector<32x128xf32>
    %329 = vector.extract_strided_slice %327 {offsets = [0, 0], sizes = [32, 128], strides = [1, 1]} : vector<32x384xf32> to vector<32x128xf32>
    %330 = arith.addf %328, %329 : vector<32x128xf32>
    %331 = arith.negf %330 : vector<32x128xf32>
    %332 = math.exp %331 : vector<32x128xf32>
    %cst_154 = arith.constant 1.000000e+00 : f32
    %333 = vector.broadcast %cst_154 : f32 to vector<32x128xf32>
    %334 = arith.addf %333, %332 : vector<32x128xf32>
    %335 = arith.divf %333, %334 : vector<32x128xf32>
    %336 = vector.extract_strided_slice %324 {offsets = [0, 128], sizes = [32, 128], strides = [1, 1]} : vector<32x384xf32> to vector<32x128xf32>
    %337 = vector.extract_strided_slice %327 {offsets = [0, 128], sizes = [32, 128], strides = [1, 1]} : vector<32x384xf32> to vector<32x128xf32>
    %338 = arith.addf %336, %337 : vector<32x128xf32>
    %339 = arith.negf %338 : vector<32x128xf32>
    %340 = math.exp %339 : vector<32x128xf32>
    %cst_155 = arith.constant 1.000000e+00 : f32
    %341 = vector.broadcast %cst_155 : f32 to vector<32x128xf32>
    %342 = arith.addf %341, %340 : vector<32x128xf32>
    %343 = arith.divf %341, %342 : vector<32x128xf32>
    %344 = vector.extract_strided_slice %324 {offsets = [0, 256], sizes = [32, 128], strides = [1, 1]} : vector<32x384xf32> to vector<32x128xf32>
    %345 = vector.extract_strided_slice %327 {offsets = [0, 256], sizes = [32, 128], strides = [1, 1]} : vector<32x384xf32> to vector<32x128xf32>
    %c0_156 = arith.constant 0 : index
    %c0_157 = arith.constant 0 : index
    %346 = vector.load %arg3[%c0_156, %c0_157] : memref<32x128xf32, #tpu.memory_space<vmem>>, vector<32x128xf32>
    %347 = arith.addf %345, %346 : vector<32x128xf32>
    %348 = arith.mulf %335, %347 : vector<32x128xf32>
    %349 = arith.addf %344, %348 : vector<32x128xf32>
    %350 = math.tanh %349 : vector<32x128xf32>
    %cst_158 = arith.constant 1.000000e+00 : f32
    %351 = vector.broadcast %cst_158 : f32 to vector<32x128xf32>
    %352 = arith.subf %351, %343 : vector<32x128xf32>
    %353 = arith.mulf %352, %350 : vector<32x128xf32>
    %c0_159 = arith.constant 0 : index
    %c0_160 = arith.constant 0 : index
    %354 = vector.load %arg7[%c0_159, %c0_160] : memref<32x128xf32, #tpu.memory_space<vmem>>, vector<32x128xf32>
    %355 = arith.mulf %343, %354 : vector<32x128xf32>
    %356 = arith.addf %353, %355 : vector<32x128xf32>
    %c0_161 = arith.constant 0 : index
    %c0_162 = arith.constant 0 : index
    %357 = vector.load %arg7[%c0_161, %c0_162] : memref<32x128xf32, #tpu.memory_space<vmem>>, vector<32x128xf32>
    tpu.vector_store %arg7[%c0_161, %c0_162], %356 {strides = array<i32>} : memref<32x128xf32, #tpu.memory_space<vmem>>, vector<32x128xf32>,
    %358 = arith.truncf %356 : vector<32x128xf32> to vector<32x128xbf16>
    %359 = vector.extract_strided_slice %358 {offsets = [0, 0], sizes = [16, 128], strides = [1, 1]} : vector<32x128xbf16> to vector<16x128xbf16>
    %c0_163 = arith.constant 0 : index
    %c0_164 = arith.constant 0 : index
    %360 = vector.load %arg6[%c0_163, %c0_164] : memref<32x256xbf16, #tpu.memory_space<vmem>>, vector<16x128xbf16>
    tpu.vector_store %arg6[%c0_163, %c0_164], %359 {strides = array<i32>} : memref<32x256xbf16, #tpu.memory_space<vmem>>, vector<16x128xbf16>,
    %361 = vector.extract_strided_slice %358 {offsets = [16, 0], sizes = [16, 128], strides = [1, 1]} : vector<32x128xbf16> to vector<16x128xbf16>
    %c16_165 = arith.constant 16 : index
    %c128_166 = arith.constant 128 : index
    %362 = vector.load %arg6[%c16_165, %c128_166] : memref<32x256xbf16, #tpu.memory_space<vmem>>, vector<16x128xbf16>
    tpu.vector_store %arg6[%c16_165, %c128_166], %361 {strides = array<i32>} : memref<32x256xbf16, #tpu.memory_space<vmem>>, vector<16x128xbf16>,
    %363 = vector.extract_strided_slice %358 {offsets = [0, 0], sizes = [16, 128], strides = [1, 1]} : vector<32x128xbf16> to vector<16x128xbf16>
    %364 = arith.index_cast %c6_i32 : i32 to index
    %c0_167 = arith.constant 0 : index
    %c0_168 = arith.constant 0 : index
    %365 = vector.load %arg4[%364, %c0_167, %c0_168] : memref<8x16x128xbf16, #tpu.memory_space<vmem>>, vector<1x16x128xbf16>
    %366 = vector.shape_cast %365 : vector<1x16x128xbf16> to vector<16x128xbf16>
    %367 = vector.shape_cast %363 : vector<16x128xbf16> to vector<1x16x128xbf16>
    tpu.vector_store %arg4[%364, %c0_167, %c0_168], %367 {strides = array<i32>} : memref<8x16x128xbf16, #tpu.memory_space<vmem>>, vector<1x16x128xbf16>,
    %368 = vector.extract_strided_slice %358 {offsets = [16, 0], sizes = [16, 128], strides = [1, 1]} : vector<32x128xbf16> to vector<16x128xbf16>
    %c7_i32_169 = arith.constant 7 : i32
    %369 = arith.subi %c7_i32_169, %c6_i32 : i32
    %370 = arith.index_cast %369 : i32 to index
    %c0_170 = arith.constant 0 : index
    %c0_171 = arith.constant 0 : index
    %371 = vector.load %arg5[%370, %c0_170, %c0_171] : memref<8x16x128xbf16, #tpu.memory_space<vmem>>, vector<1x16x128xbf16>
    %372 = vector.shape_cast %371 : vector<1x16x128xbf16> to vector<16x128xbf16>
    %373 = vector.shape_cast %368 : vector<16x128xbf16> to vector<1x16x128xbf16>
    tpu.vector_store %arg5[%370, %c0_170, %c0_171], %373 {strides = array<i32>} : memref<8x16x128xbf16, #tpu.memory_space<vmem>>, vector<1x16x128xbf16>,
    %c7_i32_172 = arith.constant 7 : i32
    %374 = arith.index_cast %c7_i32_172 : i32 to index
    %c0_173 = arith.constant 0 : index
    %c0_174 = arith.constant 0 : index
    %375 = vector.load %arg1[%374, %c0_173, %c0_174] : memref<8x32x384xbf16, #tpu.memory_space<vmem>>, vector<1x32x384xbf16>
    %376 = vector.shape_cast %375 : vector<1x32x384xbf16> to vector<32x384xbf16>
    %377 = arith.extf %376 : vector<32x384xbf16> to vector<32x384xf32>
    %c0_175 = arith.constant 0 : index
    %c0_176 = arith.constant 0 : index
    %378 = vector.load %arg6[%c0_175, %c0_176] : memref<32x256xbf16, #tpu.memory_space<vmem>>, vector<32x256xbf16>
    %c0_177 = arith.constant 0 : index
    %c0_178 = arith.constant 0 : index
    %379 = vector.load %arg2[%c0_177, %c0_178] : memref<256x384xbf16, #tpu.memory_space<vmem>>, vector<256x384xbf16>
    %cst_179 = arith.constant dense<0.000000e+00> : vector<32x384xf32>
    %380 = tpu.matmul %378, %379, %cst_179 {dimension_numbers = #tpu.dot_dimension_numbers<[1], [0], [0], [1], [0, 0, 1, 1], [], []>} : vector<32x256xbf16>, vector<256x384xbf16>, vector<32x384xf32> -> vector<32x384xf32>
    %381 = vector.extract_strided_slice %377 {offsets = [0, 0], sizes = [32, 128], strides = [1, 1]} : vector<32x384xf32> to vector<32x128xf32>
    %382 = vector.extract_strided_slice %380 {offsets = [0, 0], sizes = [32, 128], strides = [1, 1]} : vector<32x384xf32> to vector<32x128xf32>
    %383 = arith.addf %381, %382 : vector<32x128xf32>
    %384 = arith.negf %383 : vector<32x128xf32>
    %385 = math.exp %384 : vector<32x128xf32>
    %cst_180 = arith.constant 1.000000e+00 : f32
    %386 = vector.broadcast %cst_180 : f32 to vector<32x128xf32>
    %387 = arith.addf %386, %385 : vector<32x128xf32>
    %388 = arith.divf %386, %387 : vector<32x128xf32>
    %389 = vector.extract_strided_slice %377 {offsets = [0, 128], sizes = [32, 128], strides = [1, 1]} : vector<32x384xf32> to vector<32x128xf32>
    %390 = vector.extract_strided_slice %380 {offsets = [0, 128], sizes = [32, 128], strides = [1, 1]} : vector<32x384xf32> to vector<32x128xf32>
    %391 = arith.addf %389, %390 : vector<32x128xf32>
    %392 = arith.negf %391 : vector<32x128xf32>
    %393 = math.exp %392 : vector<32x128xf32>
    %cst_181 = arith.constant 1.000000e+00 : f32
    %394 = vector.broadcast %cst_181 : f32 to vector<32x128xf32>
    %395 = arith.addf %394, %393 : vector<32x128xf32>
    %396 = arith.divf %394, %395 : vector<32x128xf32>
    %397 = vector.extract_strided_slice %377 {offsets = [0, 256], sizes = [32, 128], strides = [1, 1]} : vector<32x384xf32> to vector<32x128xf32>
    %398 = vector.extract_strided_slice %380 {offsets = [0, 256], sizes = [32, 128], strides = [1, 1]} : vector<32x384xf32> to vector<32x128xf32>
    %c0_182 = arith.constant 0 : index
    %c0_183 = arith.constant 0 : index
    %399 = vector.load %arg3[%c0_182, %c0_183] : memref<32x128xf32, #tpu.memory_space<vmem>>, vector<32x128xf32>
    %400 = arith.addf %398, %399 : vector<32x128xf32>
    %401 = arith.mulf %388, %400 : vector<32x128xf32>
    %402 = arith.addf %397, %401 : vector<32x128xf32>
    %403 = math.tanh %402 : vector<32x128xf32>
    %cst_184 = arith.constant 1.000000e+00 : f32
    %404 = vector.broadcast %cst_184 : f32 to vector<32x128xf32>
    %405 = arith.subf %404, %396 : vector<32x128xf32>
    %406 = arith.mulf %405, %403 : vector<32x128xf32>
    %c0_185 = arith.constant 0 : index
    %c0_186 = arith.constant 0 : index
    %407 = vector.load %arg7[%c0_185, %c0_186] : memref<32x128xf32, #tpu.memory_space<vmem>>, vector<32x128xf32>
    %408 = arith.mulf %396, %407 : vector<32x128xf32>
    %409 = arith.addf %406, %408 : vector<32x128xf32>
    %c0_187 = arith.constant 0 : index
    %c0_188 = arith.constant 0 : index
    %410 = vector.load %arg7[%c0_187, %c0_188] : memref<32x128xf32, #tpu.memory_space<vmem>>, vector<32x128xf32>
    tpu.vector_store %arg7[%c0_187, %c0_188], %409 {strides = array<i32>} : memref<32x128xf32, #tpu.memory_space<vmem>>, vector<32x128xf32>,
    %411 = arith.truncf %409 : vector<32x128xf32> to vector<32x128xbf16>
    %412 = vector.extract_strided_slice %411 {offsets = [0, 0], sizes = [16, 128], strides = [1, 1]} : vector<32x128xbf16> to vector<16x128xbf16>
    %c0_189 = arith.constant 0 : index
    %c0_190 = arith.constant 0 : index
    %413 = vector.load %arg6[%c0_189, %c0_190] : memref<32x256xbf16, #tpu.memory_space<vmem>>, vector<16x128xbf16>
    tpu.vector_store %arg6[%c0_189, %c0_190], %412 {strides = array<i32>} : memref<32x256xbf16, #tpu.memory_space<vmem>>, vector<16x128xbf16>,
    %414 = vector.extract_strided_slice %411 {offsets = [16, 0], sizes = [16, 128], strides = [1, 1]} : vector<32x128xbf16> to vector<16x128xbf16>
    %c16_191 = arith.constant 16 : index
    %c128_192 = arith.constant 128 : index
    %415 = vector.load %arg6[%c16_191, %c128_192] : memref<32x256xbf16, #tpu.memory_space<vmem>>, vector<16x128xbf16>
    tpu.vector_store %arg6[%c16_191, %c128_192], %414 {strides = array<i32>} : memref<32x256xbf16, #tpu.memory_space<vmem>>, vector<16x128xbf16>,
    %416 = vector.extract_strided_slice %411 {offsets = [0, 0], sizes = [16, 128], strides = [1, 1]} : vector<32x128xbf16> to vector<16x128xbf16>
    %417 = arith.index_cast %c7_i32_172 : i32 to index
    %c0_193 = arith.constant 0 : index
    %c0_194 = arith.constant 0 : index
    %418 = vector.load %arg4[%417, %c0_193, %c0_194] : memref<8x16x128xbf16, #tpu.memory_space<vmem>>, vector<1x16x128xbf16>
    %419 = vector.shape_cast %418 : vector<1x16x128xbf16> to vector<16x128xbf16>
    %420 = vector.shape_cast %416 : vector<16x128xbf16> to vector<1x16x128xbf16>
    tpu.vector_store %arg4[%417, %c0_193, %c0_194], %420 {strides = array<i32>} : memref<8x16x128xbf16, #tpu.memory_space<vmem>>, vector<1x16x128xbf16>,
    %421 = vector.extract_strided_slice %411 {offsets = [16, 0], sizes = [16, 128], strides = [1, 1]} : vector<32x128xbf16> to vector<16x128xbf16>
    %c7_i32_195 = arith.constant 7 : i32
    %422 = arith.subi %c7_i32_195, %c7_i32_172 : i32
    %423 = arith.index_cast %422 : i32 to index
    %c0_196 = arith.constant 0 : index
    %c0_197 = arith.constant 0 : index
    %424 = vector.load %arg5[%423, %c0_196, %c0_197] : memref<8x16x128xbf16, #tpu.memory_space<vmem>>, vector<1x16x128xbf16>
    %425 = vector.shape_cast %424 : vector<1x16x128xbf16> to vector<16x128xbf16>
    %426 = vector.shape_cast %421 : vector<16x128xbf16> to vector<1x16x128xbf16>
    tpu.vector_store %arg5[%423, %c0_196, %c0_197], %426 {strides = array<i32>} : memref<8x16x128xbf16, #tpu.memory_space<vmem>>, vector<1x16x128xbf16>,
    %c8_i32 = arith.constant 8 : i32
    return
  }
  func.func @transform_0(%arg0: i32) -> (i32, i32, i32) {
    %c0_i32 = arith.constant 0 : i32
    %c0_i32_0 = arith.constant 0 : i32
    %c0_i32_1 = arith.constant 0 : i32
    return %arg0, %c0_i32, %c0_i32_0 : i32, i32, i32
  }
  func.func @transform_1(%arg0: i32) -> (i32, i32) {
    %c0_i32 = arith.constant 0 : i32
    %c0_i32_0 = arith.constant 0 : i32
    %c0_i32_1 = arith.constant 0 : i32
    return %c0_i32, %c0_i32_0 : i32, i32
  }
  func.func @transform_2(%arg0: i32) -> (i32, i32) {
    %c0_i32 = arith.constant 0 : i32
    %c0_i32_0 = arith.constant 0 : i32
    %c0_i32_1 = arith.constant 0 : i32
    return %c0_i32, %c0_i32_0 : i32, i32
  }
  func.func @transform_3(%arg0: i32) -> (i32, i32, i32) {
    %c0_i32 = arith.constant 0 : i32
    %c0_i32_0 = arith.constant 0 : i32
    %c0_i32_1 = arith.constant 0 : i32
    return %arg0, %c0_i32, %c0_i32_0 : i32, i32, i32
  }
  func.func @transform_4(%arg0: i32) -> (i32, i32, i32) {
    %c0_i32 = arith.constant 0 : i32
    %0 = arith.subi %c0_i32, %arg0 : i32
    %c0_i32_0 = arith.constant 0 : i32
    %c0_i32_1 = arith.constant 0 : i32
    %c0_i32_2 = arith.constant 0 : i32
    return %0, %c0_i32_0, %c0_i32_1 : i32, i32, i32
  }
}

</mosaic_0001>

<bundles_post_ra>
// kernel: bigru_forward.2
= control target key start
LH: loop header
LB: loop body
LE: loop exit
PB: predicated region body
PF: predicated region fallthrough
CT: control target
= control target key end

     0   :  { %v5901_v1 = vmov 0   ;;  %s7620_s1 = inlined_call_operand.vmem [shape: bf16[256,384], index: 1, kind: input, shape index: {}]   ;;  %s7621_s0 = inlined_call_operand.vmem [shape: bf16[8,32,384], index: 0, kind: input, shape index: {}]   ;;  %s7622_s2 = inlined_call_operand.vmem [shape: f32[32,128], index: 2, kind: input, shape index: {}]   ;;  %s7623_s3 = inlined_call_operand.vmem [shape: bf16[8,16,128], index: 3, kind: output, shape index: {0}]   ;;  %s7624_s4 = inlined_call_operand.vmem [shape: bf16[8,16,128], index: 4, kind: output, shape index: {1}]  }
   0x1   :  { %v5930_v0 = vld [vmem:[%s7620_s1 + $0x4] ss:$12 sps:$4 sm:$0xff]   ;;  %419 = vmatprep.mubr.bf16.mxu0 %v5901_v1  ;;  %472 = vmatprep.mubr.bf16.mxu1 %v5901_v1  ;;  %v5937_v2 = vld [vmem:[%s7620_s1] ss:$12 sps:$4 sm:$0xff]   ;;  %v5943_v3 = vld [vmem:[%s7620_s1 + $0x1c] ss:$12 sps:$4 sm:$0xff]  }
   0x2   :  { %387 = vmatprep.subr.bf16.mxu0 %v5930_v0  ;;  %v5949_v4 = vld [vmem:[%s7620_s1 + $0x18] ss:$12 sps:$4 sm:$0xff]   ;;  %v5955_v5 = vld [vmem:[%s7620_s1 + $0x34] ss:$12 sps:$4 sm:$0xff]   ;;  %v5961_v6 = vld [vmem:[%s7620_s1 + $0x30] ss:$12 sps:$4 sm:$0xff]  }
   0x3   :  { %388 = vmatpush1.bf16.msra.mxu0 %v5937_v2  ;;  %v5967_v7 = vld [vmem:[%s7620_s1 + $0x4c] ss:$12 sps:$4 sm:$0xff]   ;;  %v5973_v8 = vld [vmem:[%s7620_s1 + $0x48] ss:$12 sps:$4 sm:$0xff]   ;;  %v5979_v9 = vld [vmem:[%s7620_s1 + $0x64] ss:$12 sps:$4 sm:$0xff]  }
   0x4   :  { %389 = vmatprep.subr.bf16.mxu0 %v5943_v3  ;;  %v5985_v10 = vld [vmem:[%s7620_s1 + $0x60] ss:$12 sps:$4 sm:$0xff]   ;;  %v5991_v11 = vld [vmem:[%s7620_s1 + $0x7c] ss:$12 sps:$4 sm:$0xff]   ;;  %v5996_v12 = vld [vmem:[%s7620_s1 + $0x78] ss:$12 sps:$4 sm:$0xff]  }
   0x5   :  { %v6002_v13 = vld [vmem:[%s7620_s1 + $0x94] ss:$12 sps:$4 sm:$0xff]   ;;  %v6014_v16 = vld [vmem:[%s7620_s1 + $0x90] ss:$12 sps:$4 sm:$0xff]   ;;  %v6027_v19 = vld [vmem:[%s7620_s1 + $0xac] ss:$12 sps:$4 sm:$0xff]  }
   0x6   :  { %v5294_v14 = vld [vmem:[%s7620_s1 + $0xc8] ss:$12 sps:$4 sm:$0xff]   ;;  %v5299_v17 = vld [vmem:[%s7620_s1 + $0xe0] ss:$12 sps:$4 sm:$0xff]   ;;  %v5304_v21 = vld [vmem:[%s7620_s1 + $0xf8] ss:$12 sps:$4 sm:$0xff]  }
   0x7   :  { %390 = vmatpush1.bf16.msra.mxu0 %v5949_v4  ;;  %v5296_v15 = vld [vmem:[%s7620_s1 + $0x8] ss:$12 sps:$4 sm:$0xff]   ;;  %5028 = vmatprep.subr.bf16.mxu1 %v5294_v14  ;;  %v5301_v18 = vld [vmem:[%s7620_s1 + $0x20] ss:$12 sps:$4 sm:$0xff]   ;;  %v6040_v22 = vld [vmem:[%s7620_s1 + $0xc4] ss:$12 sps:$4 sm:$0xff]  }
   0x8   :  { %391 = vmatprep.subr.bf16.mxu0 %v5955_v5  ;;  %5029 = vmatpush3.bf16.msra.mxu1 %v5296_v15  ;;  %v6032_v20 = vld [vmem:[%s7620_s1 + $0xa8] ss:$12 sps:$4 sm:$0xff]   ;;  %v5306_v23 = vld [vmem:[%s7620_s1 + $0x38] ss:$12 sps:$4 sm:$0xff]   ;;  %v5307_v24 = vld [vmem:[%s7620_s1 + $0x110] ss:$12 sps:$4 sm:$0xff]  }
   0x9   :  { %5030 = vmatprep.subr.bf16.mxu1 %v5299_v17  ;;  %v6053_v25 = vld [vmem:[%s7620_s1 + $0xc0] ss:$12 sps:$4 sm:$0xff]   ;;  %v5308_v26 = vld [vmem:[%s7620_s1 + $0x50] ss:$12 sps:$4 sm:$0xff]   ;;  %v5309_v27 = vld [vmem:[%s7620_s1 + $0x128] ss:$12 sps:$4 sm:$0xff]  }
   0xa   :  { %v6066_v28 = vld [vmem:[%s7620_s1 + $0xdc] ss:$12 sps:$4 sm:$0xff]   ;;  %v6071_v29 = vld [vmem:[%s7620_s1 + $0xd8] ss:$12 sps:$4 sm:$0xff]   ;;  %v5311_v31 = vld [vmem:[%s7620_s1 + $0x140] ss:$12 sps:$4 sm:$0xff]  }
   0xb   :  { %392 = vmatpush1.bf16.msra.mxu0 %v5961_v6  ;;  %v5310_v30 = vld [vmem:[%s7620_s1 + $0x68] ss:$12 sps:$4 sm:$0xff]   ;;  %v6089_v33 = vld [vmem:[%s7620_s1 + $0xf0] ss:$12 sps:$4 sm:$0xff]   ;;  %v5312_v34 = vld [vmem:[%s7620_s1 + $0x80] ss:$12 sps:$4 sm:$0xff]  }
   0xc   :  { %393 = vmatprep.subr.bf16.mxu0 %v5967_v7  ;;  %5031 = vmatpush3.bf16.msra.mxu1 %v5301_v18  ;;  %v6084_v32 = vld [vmem:[%s7620_s1 + $0xf4] ss:$12 sps:$4 sm:$0xff]   ;;  %v5313_v35 = vld [vmem:[%s7620_s1 + $0x158] ss:$12 sps:$4 sm:$0xff]   ;;  %v5315_v39 = vld [vmem:[%s7620_s1 + $0x170] ss:$12 sps:$4 sm:$0xff]  }
   0xd   :  { %5032 = vmatprep.subr.bf16.mxu1 %v5304_v21  ;;  %v5286_v36 = vld [vmem:[%s7620_s1 + $0x10c] ss:$12 sps:$4 sm:$0xff]   ;;  %v5288_v38 = vld [vmem:[%s7620_s1 + $0x108] ss:$12 sps:$4 sm:$0xff]   ;;  %v5289_v40 = vld [vmem:[%s7620_s1 + $0x124] ss:$12 sps:$4 sm:$0xff]  }
   0xe   :  { %v5314_v37 = vld [vmem:[%s7620_s1 + $0x98] ss:$12 sps:$4 sm:$0xff]   ;;  %v5316_v41 = vld [vmem:[%s7620_s1 + $0xb0] ss:$12 sps:$4 sm:$0xff]   ;;  %v5291_v42 = vld [vmem:[%s7620_s1 + $0x120] ss:$12 sps:$4 sm:$0xff]  }
   0xf   :  { %394 = vmatpush1.bf16.msra.mxu0 %v5973_v8  ;;  %v5292_v43 = vld [vmem:[%s7620_s1 + $0x13c] ss:$12 sps:$4 sm:$0xff]   ;;  %v5295_v44 = vld [vmem:[%s7620_s1 + $0x138] ss:$12 sps:$4 sm:$0xff]   ;;  %v5297_v45 = vld [vmem:[%s7620_s1 + $0x154] ss:$12 sps:$4 sm:$0xff]  }
  0x10   :  { %395 = vmatprep.subr.bf16.mxu0 %v5979_v9  ;;  %5033 = vmatpush3.bf16.msra.mxu1 %v5306_v23  ;;  %v5300_v46 = vld [vmem:[%s7620_s1 + $0x150] ss:$12 sps:$4 sm:$0xff]   ;;  %v5302_v47 = vld [vmem:[%s7620_s1 + $0x16c] ss:$12 sps:$4 sm:$0xff]   ;;  %v5305_v48 = vld [vmem:[%s7620_s1 + $0x168] ss:$12 sps:$4 sm:$0xff]  }
  0x11   :  { %5034 = vmatprep.subr.bf16.mxu1 %v5307_v24  ;;  %v5317_v49 = vld [vmem:[%s7620_s1 + $0xc8] ss:$12 sps:$4 sm:$0xff]   ;;  %v5319_v51 = vld [vmem:[%s7620_s1 + $0xe0] ss:$12 sps:$4 sm:$0xff]   ;;  %v5321_v53 = vld [vmem:[%s7620_s1 + $0xf8] ss:$12 sps:$4 sm:$0xff]  }
  0x12   :  { %v5318_v50 = vld [vmem:[%s7620_s1 + $0x8] ss:$12 sps:$4 sm:$0xff]   ;;  %v5320_v52 = vld [vmem:[%s7620_s1 + $0x20] ss:$12 sps:$4 sm:$0xff]   ;;  %v5322_v54 = vld [vmem:[%s7620_s1 + $0x38] ss:$12 sps:$4 sm:$0xff]  }
  0x13   :  { %396 = vmatpush1.bf16.msra.mxu0 %v5985_v10  ;;  %v5323_v55 = vld [vmem:[%s7620_s1 + $0x110] ss:$12 sps:$4 sm:$0xff]   ;;  %v5325_v57 = vld [vmem:[%s7620_s1 + $0x128] ss:$12 sps:$4 sm:$0xff]   ;;  %v5327_v59 = vld [vmem:[%s7620_s1 + $0x140] ss:$12 sps:$4 sm:$0xff]  }
  0x14   :  { %397 = vmatprep.subr.bf16.mxu0 %v5991_v11  ;;  %5035 = vmatpush3.bf16.msra.mxu1 %v5308_v26  ;;  %v5324_v56 = vld [vmem:[%s7620_s1 + $0x50] ss:$12 sps:$4 sm:$0xff]   ;;  %v5326_v58 = vld [vmem:[%s7620_s1 + $0x68] ss:$12 sps:$4 sm:$0xff]   ;;  %v5328_v60 = vld [vmem:[%s7620_s1 + $0x80] ss:$12 sps:$4 sm:$0xff]  }
  0x15   :  { %5036 = vmatprep.subr.bf16.mxu1 %v5309_v27  ;;  %v5329_v61 = vld [vmem:[%s7620_s1 + $0x158] ss:$12 sps:$4 sm:$0xff]   ;;  %v5331_v63 = vld [vmem:[%s7620_s1 + $0x170] ss:$12 sps:$4 sm:$0xff]  }
  0x16   :  { %v5330_v62 = vld [vmem:[%s7620_s1 + $0x98] ss:$12 sps:$4 sm:$0xff]  }
  0x17   :  { %398 = vmatpush1.bf16.msra.mxu0 %v5996_v12 }
  0x18   :  { %399 = vmatprep.subr.bf16.mxu0 %v6002_v13  ;;  %5037 = vmatpush3.bf16.msra.mxu1 %v5310_v30  ;;  %v49_v30 = vld [vmem:[%s7621_s0 + $0x24] sm:$0xff] }
  0x19   :  { %5038 = vmatprep.subr.bf16.mxu1 %v5311_v31 }
  0x1b   :  { %400 = vmatpush1.bf16.msra.mxu0 %v6014_v16 }
  0x1c   :  { %401 = vmatprep.subr.bf16.mxu0 %v6027_v19  ;;  %5039 = vmatpush3.bf16.msra.mxu1 %v5312_v34 }
  0x1d   :  { %5040 = vmatprep.subr.bf16.mxu1 %v5313_v35  ;;  %v60_v35 = vunpack.c.l.bf16 %v49_v30 }
  0x1f   :  { %402 = vmatpush1.bf16.msra.mxu0 %v6032_v20 }
  0x20   :  { %403 = vmatprep.subr.bf16.mxu0 %v6040_v22  ;;  %5041 = vmatpush3.bf16.msra.mxu1 %v5314_v37 }
  0x21   :  { %5042 = vmatprep.subr.bf16.mxu1 %v5315_v39 }
  0x23   :  { %404 = vmatpush1.bf16.msra.mxu0 %v6053_v25 }
  0x24   :  { %405 = vmatprep.subr.bf16.mxu0 %v6066_v28  ;;  %5043 = vmatpush3.bf16.msra.mxu1 %v5316_v41 }
  0x25   :  { %941 = vmatprep.subr.bf16.mxu1 %v5930_v0  ;;  %v5332_v0 = vld [vmem:[%s7620_s1 + $0xb0] ss:$12 sps:$4 sm:$0xff]  }
  0x27   :  { %406 = vmatpush1.bf16.msra.mxu0 %v6071_v29  ;;  %473 = vmatmul.mubr.bf16.vlgmr.msra.gmra.mrb[0].mxu1 %v5901_v1 }
  0x28   :  { %407 = vmatprep.subr.bf16.mxu0 %v6084_v32  ;;  %480 = vmatprep.mubr.bf16.mxu1 %v5901_v1 }
  0x29   :  { %942 = vmatpush1.bf16.msra.mxu1 %v5937_v2  ;;  %v5893_v2 = vld [vmem:[%s7620_s1 + $0x4] ss:$12 sps:$4 sm:$0xff]  }
  0x2a   :  { %943 = vmatprep.subr.bf16.mxu1 %v5943_v3 }
  0x2b   :  { %408 = vmatpush1.bf16.msra.mxu0 %v6089_v33 }
  0x2c   :  { %409 = vmatprep.subr.bf16.mxu0 %v5286_v36 }
  0x2d   :  { %944 = vmatpush1.bf16.msra.mxu1 %v5949_v4 }
  0x2e   :  { %945 = vmatprep.subr.bf16.mxu1 %v5955_v5 }
  0x2f   :  { %410 = vmatpush1.bf16.msra.mxu0 %v5288_v38  ;;  %481 = vmatmul.mubr.bf16.gmra.mrb[4].mxu1 %v5901_v1 }
  0x30   :  { %411 = vmatprep.subr.bf16.mxu0 %v5289_v40  ;;  %973 = vmatprep.mubr.bf16.mxu1 %v5901_v1 }
  0x31   :  { %946 = vmatpush1.bf16.msra.mxu1 %v5961_v6 }
  0x32   :  { %947 = vmatprep.subr.bf16.mxu1 %v5967_v7 }
  0x33   :  { %412 = vmatpush1.bf16.msra.mxu0 %v5291_v42 }
  0x34   :  { %413 = vmatprep.subr.bf16.mxu0 %v5292_v43 }
  0x35   :  { %948 = vmatpush1.bf16.msra.mxu1 %v5973_v8 }
  0x36   :  { %949 = vmatprep.subr.bf16.mxu1 %v5979_v9  ;;  %v43_v9 = vld [vmem:[%s7621_s0] sm:$0xff] }
  0x37   :  { %414 = vmatpush1.bf16.msra.mxu0 %v5295_v44 }
  0x38   :  { %415 = vmatprep.subr.bf16.mxu0 %v5297_v45 }
  0x39   :  { %950 = vmatpush1.bf16.msra.mxu1 %v5985_v10 }
  0x3a   :  { %951 = vmatprep.subr.bf16.mxu1 %v5991_v11  ;;  %v45_v11 = vld [vmem:[%s7621_s0 + $0xc] sm:$0xff] }
  0x3b   :  { %416 = vmatpush1.bf16.msra.mxu0 %v5300_v46  ;;  %v54_v17 = vunpack.c.l.bf16 %v45_v11  ;;  %v55_v24 = vunpack.c.h.bf16 %v45_v11 }
  0x3c   :  { %417 = vmatprep.subr.bf16.mxu0 %v5302_v47 }
  0x3d   :  { %952 = vmatpush1.bf16.msra.mxu1 %v5996_v12 }
  0x3e   :  { %953 = vmatprep.subr.bf16.mxu1 %v6002_v13  ;;  %v51_v13 = vunpack.c.l.bf16 %v43_v9 }
  0x3f   :  { %418 = vmatpush1.bf16.msra.mxu0 %v5305_v48 }
  0x40   :  { %5056 = vmatprep.subr.bf16.mxu0 %v5317_v49 }
  0x41   :  { %954 = vmatpush1.bf16.msra.mxu1 %v6014_v16 }
  0x42   :  { %420 = vmatmul.mubr.bf16.vlgmr.msra.gmra.mrb[0].mxu0 %v5901_v1  ;;  %955 = vmatprep.subr.bf16.mxu1 %v6027_v19 }
  0x43   :  { %429 = vmatprep.mubr.bf16.mxu0 %v5901_v1  ;;  %5057 = vmatpush3.bf16.msra.mxu0 %v5318_v50 }
  0x44   :  { %5058 = vmatprep.subr.bf16.mxu0 %v5319_v51 }
  0x45   :  { %956 = vmatpush1.bf16.msra.mxu1 %v6032_v20  ;;  %v52_v20 = vunpack.c.h.bf16 %v43_v9 }
  0x46   :  { %957 = vmatprep.subr.bf16.mxu1 %v6040_v22 }
  0x47   :  { %5059 = vmatpush3.bf16.msra.mxu0 %v5320_v52 }
  0x48   :  { %5060 = vmatprep.subr.bf16.mxu0 %v5321_v53 }
  0x49   :  { %958 = vmatpush1.bf16.msra.mxu1 %v6053_v25  ;;  %v47_v25 = vld [vmem:[%s7621_s0 + $0x18] sm:$0xff] }
  0x4a   :  { %430 = vmatmul.mubr.bf16.gmra.mrb[4].mxu0 %v5901_v1  ;;  %959 = vmatprep.subr.bf16.mxu1 %v6066_v28  ;;  %v58_v34 = vunpack.c.h.bf16 %v47_v25 }
  0x4b   :  { %1026 = vmatprep.mubr.bf16.mxu0 %v5901_v1  ;;  %5061 = vmatpush3.bf16.msra.mxu0 %v5322_v54 }
  0x4c   :  { %5062 = vmatprep.subr.bf16.mxu0 %v5323_v55 }
  0x4d   :  { %960 = vmatpush1.bf16.msra.mxu1 %v6071_v29 }
  0x4e   :  { %961 = vmatprep.subr.bf16.mxu1 %v6084_v32  ;;  %v57_v32 = vunpack.c.l.bf16 %v47_v25 }
  0x4f   :  { %5063 = vmatpush3.bf16.msra.mxu0 %v5324_v56  ;;  %v6243_v56 = vld [vmem:[%s7622_s2] sm:$0xff] }
  0x50   :  { %5064 = vmatprep.subr.bf16.mxu0 %v5325_v57 }
  0x51   :  { %962 = vmatpush1.bf16.msra.mxu1 %v6089_v33 }
  0x52   :  { %963 = vmatprep.subr.bf16.mxu1 %v5286_v36 }
  0x53   :  { %5065 = vmatpush3.bf16.msra.mxu0 %v5326_v58 }
  0x54   :  { %5066 = vmatprep.subr.bf16.mxu0 %v5327_v59 }
  0x55   :  { %964 = vmatpush1.bf16.msra.mxu1 %v5288_v38 }
  0x56   :  { %965 = vmatprep.subr.bf16.mxu1 %v5289_v40 }
  0x57   :  { %5067 = vmatpush3.bf16.msra.mxu0 %v5328_v60  ;;  %v44_v60 = vld [vmem:[%s7621_s0 + $0x8] ss:$12 sps:$4 sm:$0xff]  }
  0x58   :  { %5068 = vmatprep.subr.bf16.mxu0 %v5329_v61 }
  0x59   :  { %966 = vmatpush1.bf16.msra.mxu1 %v5291_v42  ;;  %v61_v42 = vunpack.c.h.bf16 %v49_v30 }
  0x5a   :  { %967 = vmatprep.subr.bf16.mxu1 %v5292_v43 }
  0x5b   :  { %5069 = vmatpush3.bf16.msra.mxu0 %v5330_v62 }
  0x5c   :  { %5070 = vmatprep.subr.bf16.mxu0 %v5331_v63 }
  0x5d   :  { %968 = vmatpush1.bf16.msra.mxu1 %v5295_v44 }
  0x5e   :  { %969 = vmatprep.subr.bf16.mxu1 %v5297_v45 }
  0x5f   :  { %5071 = vmatpush3.bf16.msra.mxu0 %v5332_v0 }
  0x60   :  { %1496 = vmatprep.subr.bf16.mxu0 %v5893_v2  ;;  %v6253_v2 = vld [vmem:[%s7622_s2 + $0x8] sm:$0xff] }
  0x61   :  { %970 = vmatpush1.bf16.msra.mxu1 %v5300_v46 }
  0x62   :  { %971 = vmatprep.subr.bf16.mxu1 %v5302_v47 }
  0x65   :  { %972 = vmatpush1.bf16.msra.mxu1 %v5305_v48 }
  0xfa   :  { %v5044_v3 = vpop.f32.mrb[0].mxu1 }
  0xfb   :  { %v5045_v4 = vpop.f32.mrb[1].mxu1 }
  0xfc   :  { %v6220_v5 = vadd.f32 %v5045_v4, %v5044_v3  ;;  %v5047_v6 = vpop.f32.mrb[2].mxu1  ;;  %v53_v4 = vunpack.c.l.bf16 %v44_v60 }
  0xfd   :  { %v5048_v7 = vpop.f32.mrb[3].mxu1 }
  0xfe   :  { %v6222_v8 = vadd.f32 %v5048_v7, %v5047_v6  ;;  %v549_v63 = vadd.f32 %v6220_v5, %v6243_v56  ;;  %v6260_v5 = vld [vmem:[%s7622_s2 + $0x10] sm:$0xff] }
 0x100   :  { %v550_v11 = vadd.f32 %v6222_v8, %v6253_v2 }
 0x102   :  { %v5050_v10 = vpop.f32.mrb[4].mxu1 }
 0x103   :  { %v5051_v12 = vpop.f32.mrb[5].mxu1 }
 0x104   :  { %v6230_v14 = vadd.f32 %v5051_v12, %v5050_v10  ;;  %v5053_v15 = vpop.f32.mrb[6].mxu1  ;;  %v56_v10 = vunpack.c.h.bf16 %v44_v60  ;;  %v5897_v60 = vld [vmem:[%s7620_s1 + $0x34] ss:$12 sps:$4 sm:$0xff]  }
 0x105   :  { %v5054_v16 = vpop.f32.mrb[7].mxu1 }
 0x106   :  { %v6232_v18 = vadd.f32 %v5054_v16, %v5053_v15  ;;  %v551_v8 = vadd.f32 %v6230_v14, %v6260_v5 }
 0x115   :  { %v421_v19 = vpop.f32.mrb[0].mxu0 }
 0x116   :  { %v489_v21 = vadd.f32 %v421_v19, %v51_v13  ;;  %v423_v22 = vpop.f32.mrb[1].mxu0 }
 0x117   :  { %v425_v23 = vpop.f32.mrb[2].mxu0  ;;  %v517_v29 = vadd.f32 %v423_v22, %v52_v20 }
 0x118   :  { %v4558_v26 = vmul.f32 -1.442695, %v489_v21  ;;  %v490_v27 = vadd.f32 %v425_v23, %v54_v17  ;;  %v427_v28 = vpop.f32.mrb[3].mxu0  ;;  %v48_v17 = vld [vmem:[%s7621_s0 + $0x20] ss:$12 sps:$4 sm:$0xff]   ;;  %v6270_v21 = vld [vmem:[%s7622_s2 + $0x18] sm:$0xff] }
 0x119   :  { %v518_v33 = vadd.f32 %v427_v28, %v55_v24  ;;  %v4562_v36 = vmul.f32 -1.442695, %v517_v29  ;;  %v59_v23 = vunpack.c.l.bf16 %v48_v17 }
 0x11a   :  { %5573 = vpow2.f32 %v4558_v26  ;;  %v4559_v31 = vmul.f32 -1.442695, %v490_v27  ;;  %v62_v26 = vunpack.c.h.bf16 %v48_v17  ;;  %v552_v27 = vadd.f32 %v6232_v18, %v6270_v21  ;;  %v6386_v17 = vld [vmem:[%s7620_s1 + $0xdc] ss:$12 sps:$4 sm:$0xff]  }
 0x11b   :  { %v4563_v40 = vmul.f32 -1.442695, %v518_v33 }
 0x11c   :  { %5575 = vpow2.f32 %v4559_v31 }
 0x11d   :  { %v431_v37 = vpop.f32.mrb[4].mxu0  ;;  %5577 = vpow2.f32 %v4562_v36 }
 0x11e   :  { %v491_v38 = vadd.f32 %v431_v37, %v57_v32  ;;  %v433_v39 = vpop.f32.mrb[5].mxu0 }
 0x11f   :  { %v435_v41 = vpop.f32.mrb[6].mxu0  ;;  %v519_v44 = vadd.f32 %v433_v39, %v58_v34 }
 0x120   :  { %v4560_v43 = vmul.f32 -1.442695, %v491_v38  ;;  %v492_v45 = vadd.f32 %v435_v41, %v60_v35  ;;  %v437_v46 = vpop.f32.mrb[7].mxu0 }
 0x121   :  { %v520_v48 = vadd.f32 %v437_v46, %v61_v42  ;;  %v4564_v50 = vmul.f32 -1.442695, %v519_v44 }
 0x122   :  { %5579 = vpow2.f32 %v4560_v43  ;;  %v4561_v47 = vmul.f32 -1.442695, %v492_v45 }
 0x123   :  { %5581 = vpow2.f32 %v4563_v40  ;;  %v4565_v54 = vmul.f32 -1.442695, %v520_v48 }
 0x124   :  { %v5574_v49 = vpop.eup %5573  ;;  %5583 = vpow2.f32 %v4561_v47 }
 0x125   :  { %v505_v51 = vadd.f32 1.0, %v5574_v49 }
 0x126   :  { %v5576_v52 = vpop.eup %5575 }
 0x127   :  { %5585 = vrcp.f32 %v505_v51  ;;  %v506_v53 = vadd.f32 1.0, %v5576_v52  ;;  %v5578_v55 = vpop.eup %5577  ;;  %v5894_v51 = vld [vmem:[%s7620_s1] ss:$12 sps:$4 sm:$0xff]  }
 0x128   :  { %5587 = vpow2.f32 %v4564_v50  ;;  %v533_v62 = vadd.f32 1.0, %v5578_v55  ;;  %v5895_v55 = vld [vmem:[%s7620_s1 + $0x1c] ss:$12 sps:$4 sm:$0xff]  }
 0x129   :  { %5589 = vrcp.f32 %v506_v53 }
 0x12a   :  { %5591 = vpow2.f32 %v4565_v54 }
 0x12c   :  { %v5580_v57 = vpop.eup %5579 }
 0x12d   :  { %v5582_v58 = vpop.eup %5581  ;;  %v507_v59 = vadd.f32 1.0, %v5580_v57 }
 0x12e   :  { %v5584_v61 = vpop.eup %5583  ;;  %v534_v3 = vadd.f32 1.0, %v5582_v58  ;;  %v5896_v58 = vld [vmem:[%s7620_s1 + $0x18] ss:$12 sps:$4 sm:$0xff]  }
 0x12f   :  { %5593 = vrcp.f32 %v507_v59  ;;  %v508_v0 = vadd.f32 1.0, %v5584_v61  ;;  %v5898_v61 = vld [vmem:[%s7620_s1 + $0x30] ss:$12 sps:$4 sm:$0xff]  }
 0x131   :  { %v5586_v6 = vpop.eup %5585  ;;  %5595 = vrcp.f32 %v508_v0  ;;  %v6320_v0 = vld [vmem:[%s7620_s1 + $0x64] ss:$12 sps:$4 sm:$0xff]  }
 0x132   :  { %v5588_v7 = vpop.eup %5587  ;;  %5597 = vrcp.f32 %v533_v62  ;;  %v553_v9 = vmul.f32 %v5586_v6, %v549_v63  ;;  %v5899_v62 = vld [vmem:[%s7620_s1 + $0x4c] ss:$12 sps:$4 sm:$0xff]   ;;  %v5900_v63 = vld [vmem:[%s7620_s1 + $0x48] ss:$12 sps:$4 sm:$0xff]  }
 0x133   :  { %v5590_v12 = vpop.eup %5589  ;;  %5599 = vrcp.f32 %v534_v3  ;;  %v535_v19 = vadd.f32 1.0, %v5588_v7  ;;  %v6325_v3 = vld [vmem:[%s7620_s1 + $0x60] ss:$12 sps:$4 sm:$0xff]   ;;  %v6337_v6 = vld [vmem:[%s7620_s1 + $0x78] ss:$12 sps:$4 sm:$0xff]  }
 0x134   :  { %v557_v13 = vadd.f32 %v553_v9, %v53_v4  ;;  %v554_v15 = vmul.f32 %v5590_v12, %v550_v11  ;;  %v5592_v16 = vpop.eup %5591  ;;  %v6332_v4 = vld [vmem:[%s7620_s1 + $0x7c] ss:$12 sps:$4 sm:$0xff]   ;;  %v6344_v7 = vld [vmem:[%s7620_s1 + $0x94] ss:$12 sps:$4 sm:$0xff]   ;;  %v6368_v12 = vld [vmem:[%s7620_s1 + $0xc4] ss:$12 sps:$4 sm:$0xff]  }
 0x135   :  { %v536_v22 = vadd.f32 1.0, %v5592_v16  ;;  %v6349_v9 = vld [vmem:[%s7620_s1 + $0x90] ss:$12 sps:$4 sm:$0xff]   ;;  %v6361_v11 = vld [vmem:[%s7620_s1 + $0xa8] ss:$12 sps:$4 sm:$0xff]  }
 0x136   :  { %5601 = vtanh.f32 %v557_v13  ;;  %v558_v20 = vadd.f32 %v554_v15, %v56_v10  ;;  %v6356_v10 = vld [vmem:[%s7620_s1 + $0xac] ss:$12 sps:$4 sm:$0xff]   ;;  %v5348_v13 = vld [vmem:[%s7620_s1 + $0xc8] ss:$12 sps:$4 sm:$0xff]  }
 0x137   :  { %v6376_v15 = vld [vmem:[%s7620_s1 + $0xc0] ss:$12 sps:$4 sm:$0xff]   ;;  %v5349_v16 = vld [vmem:[%s7620_s1 + $0x8] ss:$12 sps:$4 sm:$0xff]   ;;  %5084 = vmatprep.subr.bf16.mxu1 %v5348_v13 }
 0x138   :  { %5603 = vtanh.f32 %v558_v20  ;;  %v6394_v20 = vld [vmem:[%s7620_s1 + $0xd8] ss:$12 sps:$4 sm:$0xff]  }
 0x139   :  { %v5594_v24 = vpop.eup %5593  ;;  %5605 = vrcp.f32 %v535_v19  ;;  %v5353_v19 = vld [vmem:[%s7620_s1 + $0xe0] ss:$12 sps:$4 sm:$0xff]  }
 0x13a   :  { %v555_v25 = vmul.f32 %v5594_v24, %v551_v8  ;;  %5607 = vrcp.f32 %v536_v22  ;;  %v5354_v8 = vld [vmem:[%s7620_s1 + $0x20] ss:$12 sps:$4 sm:$0xff]   ;;  %v6412_v24 = vld [vmem:[%s7620_s1 + $0xf0] ss:$12 sps:$4 sm:$0xff]  }
 0x13b   :  { %v5596_v28 = vpop.eup %5595  ;;  %v6404_v22 = vld [vmem:[%s7620_s1 + $0xf4] ss:$12 sps:$4 sm:$0xff]  }
 0x13c   :  { %v5598_v29 = vpop.eup %5597  ;;  %v559_v30 = vadd.f32 %v555_v25, %v59_v23  ;;  %v556_v14 = vmul.f32 %v5596_v28, %v552_v27  ;;  %v5358_v23 = vld [vmem:[%s7620_s1 + $0xf8] ss:$12 sps:$4 sm:$0xff]   ;;  %v5363_v27 = vld [vmem:[%s7620_s1 + $0x110] ss:$12 sps:$4 sm:$0xff]   ;;  %v6430_v28 = vld [vmem:[%s7620_s1 + $0x108] ss:$12 sps:$4 sm:$0xff]  }
 0x13d   :  { %v5600_v31 = vpop.eup %5599  ;;  %v565_v33 = vsub.f32 1.0, %v5598_v29  ;;  %v577_v35 = vmul.f32 0.0, %v5598_v29  ;;  %v5359_v25 = vld [vmem:[%s7620_s1 + $0x38] ss:$12 sps:$4 sm:$0xff]   ;;  %v5364_v29 = vld [vmem:[%s7620_s1 + $0x50] ss:$12 sps:$4 sm:$0xff]  }
 0x13e   :  { %5609 = vtanh.f32 %v559_v30  ;;  %v560_v32 = vadd.f32 %v556_v14, %v62_v26  ;;  %v566_v36 = vsub.f32 1.0, %v5600_v31  ;;  %v578_v39 = vmul.f32 0.0, %v5600_v31  ;;  %v6422_v26 = vld [vmem:[%s7620_s1 + $0x10c] ss:$12 sps:$4 sm:$0xff]   ;;  %v6440_v30 = vld [vmem:[%s7620_s1 + $0x124] ss:$12 sps:$4 sm:$0xff]  }
 0x13f   :  { %v5368_v14 = vld [vmem:[%s7620_s1 + $0x128] ss:$12 sps:$4 sm:$0xff]   ;;  %v6448_v31 = vld [vmem:[%s7620_s1 + $0x120] ss:$12 sps:$4 sm:$0xff]  }
 0x140   :  { %v5602_v34 = vpop.eup %5601  ;;  %5611 = vtanh.f32 %v560_v32  ;;  %v5369_v32 = vld [vmem:[%s7620_s1 + $0x68] ss:$12 sps:$4 sm:$0xff]  }
 0x141   :  { %v569_v37 = vmul.f32 %v5602_v34, %v565_v33  ;;  %v6458_v33 = vld [vmem:[%s7620_s1 + $0x13c] ss:$12 sps:$4 sm:$0xff]   ;;  %v5373_v34 = vld [vmem:[%s7620_s1 + $0x140] ss:$12 sps:$4 sm:$0xff]  }
 0x142   :  { %v5604_v38 = vpop.eup %5603 }
 0x143   :  { %v570_v40 = vmul.f32 %v5604_v38, %v566_v36  ;;  %v6274_v41 = vadd.f32 %v577_v35, %v569_v37  ;;  %v5606_v18 = vpop.eup %5605  ;;  %v6466_v35 = vld [vmem:[%s7620_s1 + $0x138] ss:$12 sps:$4 sm:$0xff]   ;;  %v5374_v36 = vld [vmem:[%s7620_s1 + $0x80] ss:$12 sps:$4 sm:$0xff]  }
 0x144   :  { %v5608_v43 = vpop.eup %5607  ;;  %v567_v45 = vsub.f32 1.0, %v5606_v18  ;;  %v579_v49 = vmul.f32 0.0, %v5606_v18  ;;  %v6476_v37 = vld [vmem:[%s7620_s1 + $0x154] ss:$12 sps:$4 sm:$0xff]   ;;  %v5378_v38 = vld [vmem:[%s7620_s1 + $0x158] ss:$12 sps:$4 sm:$0xff]  }
 0x145   :  { %v6276_v42 = vadd.f32 %v578_v39, %v570_v40  ;;  %v568_v47 = vsub.f32 1.0, %v5608_v43  ;;  %v580_v53 = vmul.f32 0.0, %v5608_v43  ;;  %v6484_v39 = vld [vmem:[%s7620_s1 + $0x150] ss:$12 sps:$4 sm:$0xff]   ;;  %v5379_v40 = vld [vmem:[%s7620_s1 + $0x98] ss:$12 sps:$4 sm:$0xff]  }
 0x146   :  { %v6493_v18 = vld [vmem:[%s7620_s1 + $0x16c] ss:$12 sps:$4 sm:$0xff]   ;;  %v5383_v43 = vld [vmem:[%s7620_s1 + $0x170] ss:$12 sps:$4 sm:$0xff]  }
 0x147   :  { %v589_v44 = vpack.c.bf16 %v6276_v42, %v6274_v41 }
 0x148   :  { %v5610_v46 = vpop.eup %5609 }
 0x149   :  { %593 = vst [vmem:[%s7623_s3] sm:$0xff] %v589_v44  ;;  %974 = vmatmul.mubr.bf16.vlgmr.msra.gmra.mrb[8].mxu1 %v589_v44  ;;  %1027 = vmatmul.mubr.bf16.vlgmr.msra.gmra.mrb[8].mxu0 %v589_v44  ;;  %v571_v48 = vmul.f32 %v5610_v46, %v567_v45  ;;  %v6502_v44 = vld [vmem:[%s7620_s1 + $0x168] ss:$12 sps:$4 sm:$0xff]   ;;  %v5384_v45 = vld [vmem:[%s7620_s1 + $0xb0] ss:$12 sps:$4 sm:$0xff]  }
 0x14a   :  { %v5612_v50 = vpop.eup %5611  ;;  %1497 = vmatpush1.bf16.msra.mxu0 %v5894_v51  ;;  %5085 = vmatpush3.bf16.msra.mxu1 %v5349_v16  ;;  %v6512_v46 = vld [vmem:[%s7620_s1 + $0x4] ss:$12 sps:$4 sm:$0xff]  }
 0x14b   :  { %v572_v52 = vmul.f32 %v5612_v50, %v568_v47  ;;  %v6286_v54 = vadd.f32 %v579_v49, %v571_v48  ;;  %1498 = vmatprep.subr.bf16.mxu0 %v5895_v55  ;;  %5086 = vmatprep.subr.bf16.mxu1 %v5353_v19  ;;  %v4567_v47 = vld [vmem:[%s7621_s0 + $0x30] sm:$0xff]  ;;  %v4569_v48 = vld [vmem:[%s7621_s0 + $0x3c] sm:$0xff] }
 0x14c   :  { %v605_v49 = vunpack.c.l.bf16 %v4567_v47  ;;  %v606_v50 = vunpack.c.h.bf16 %v4567_v47  ;;  %v608_v51 = vunpack.c.l.bf16 %v4569_v48 }
 0x14d   :  { %v6291_v57 = vadd.f32 %v580_v53, %v572_v52 }
 0x14e   :  { %1499 = vmatpush1.bf16.msra.mxu0 %v5896_v58  ;;  %5087 = vmatpush3.bf16.msra.mxu1 %v5354_v8 }
 0x14f   :  { %v590_v59 = vpack.c.bf16 %v6291_v57, %v6286_v54  ;;  %1500 = vmatprep.subr.bf16.mxu0 %v5897_v60  ;;  %5088 = vmatprep.subr.bf16.mxu1 %v5358_v23  ;;  %v609_v60 = vunpack.c.h.bf16 %v4569_v48 }
 0x151   :  { %4566 = vst [vmem:[%s7624_s4 + $0x38] sm:$0xff] %v590_v59  ;;  %983 = vmatprep.mubr.bf16.mxu1 %v590_v59  ;;  %1034 = vmatprep.mubr.bf16.mxu0 %v590_v59 }
 0x152   :  { %984 = vmatmul.mubr.bf16.gmra.mrb[12].mxu1 %v5901_v1  ;;  %1035 = vmatmul.mubr.bf16.gmra.mrb[12].mxu0 %v5901_v1 }
 0x153   :  { %1501 = vmatpush1.bf16.msra.mxu0 %v5898_v61  ;;  %1528 = vmatprep.mubr.bf16.mxu0 %v5901_v1 }
 0x154   :  { %1502 = vmatprep.subr.bf16.mxu0 %v5899_v62  ;;  %1581 = vmatprep.mubr.bf16.mxu1 %v5901_v1 }
 0x155   :  { %5089 = vmatpush3.bf16.msra.mxu1 %v5359_v25  ;;  %v4571_v25 = vld [vmem:[%s7621_s0 + $0x48] sm:$0xff] }
 0x156   :  { %5090 = vmatprep.subr.bf16.mxu1 %v5363_v27 }
 0x157   :  { %1503 = vmatpush1.bf16.msra.mxu0 %v5900_v63 }
 0x158   :  { %1504 = vmatprep.subr.bf16.mxu0 %v6320_v0 }
 0x159   :  { %5091 = vmatpush3.bf16.msra.mxu1 %v5364_v29 }
 0x15a   :  { %5092 = vmatprep.subr.bf16.mxu1 %v5368_v14 }
 0x15b   :  { %1505 = vmatpush1.bf16.msra.mxu0 %v6325_v3 }
 0x15c   :  { %1506 = vmatprep.subr.bf16.mxu0 %v6332_v4 }
 0x15d   :  { %5093 = vmatpush3.bf16.msra.mxu1 %v5369_v32  ;;  %v4573_v32 = vld [vmem:[%s7621_s0 + $0x54] sm:$0xff] }
 0x15e   :  { %5094 = vmatprep.subr.bf16.mxu1 %v5373_v34  ;;  %v611_v34 = vunpack.c.l.bf16 %v4571_v25 }
 0x15f   :  { %1507 = vmatpush1.bf16.msra.mxu0 %v6337_v6 }
 0x160   :  { %1508 = vmatprep.subr.bf16.mxu0 %v6344_v7 }
 0x161   :  { %5095 = vmatpush3.bf16.msra.mxu1 %v5374_v36 }
 0x162   :  { %5096 = vmatprep.subr.bf16.mxu1 %v5378_v38  ;;  %v614_v38 = vunpack.c.l.bf16 %v4573_v32 }
 0x163   :  { %1509 = vmatpush1.bf16.msra.mxu0 %v6349_v9 }
 0x164   :  { %1510 = vmatprep.subr.bf16.mxu0 %v6356_v10 }
 0x165   :  { %5097 = vmatpush3.bf16.msra.mxu1 %v5379_v40 }
 0x166   :  { %5098 = vmatprep.subr.bf16.mxu1 %v5383_v43 }
 0x167   :  { %1511 = vmatpush1.bf16.msra.mxu0 %v6361_v11 }
 0x168   :  { %1512 = vmatprep.subr.bf16.mxu0 %v6368_v12 }
 0x169   :  { %5099 = vmatpush3.bf16.msra.mxu1 %v5384_v45  ;;  %v612_v45 = vunpack.c.h.bf16 %v4571_v25 }
 0x16a   :  { %2051 = vmatprep.subr.bf16.mxu1 %v6512_v46 }
 0x16b   :  { %1513 = vmatpush1.bf16.msra.mxu0 %v6376_v15 }
 0x16c   :  { %1514 = vmatprep.subr.bf16.mxu0 %v6386_v17 }
 0x16f   :  { %1515 = vmatpush1.bf16.msra.mxu0 %v6394_v20 }
 0x170   :  { %1516 = vmatprep.subr.bf16.mxu0 %v6404_v22 }
 0x173   :  { %1517 = vmatpush1.bf16.msra.mxu0 %v6412_v24 }
 0x174   :  { %1518 = vmatprep.subr.bf16.mxu0 %v6422_v26 }
 0x177   :  { %1519 = vmatpush1.bf16.msra.mxu0 %v6430_v28 }
 0x178   :  { %1520 = vmatprep.subr.bf16.mxu0 %v6440_v30 }
 0x17b   :  { %1521 = vmatpush1.bf16.msra.mxu0 %v6448_v31 }
 0x17c   :  { %1522 = vmatprep.subr.bf16.mxu0 %v6458_v33 }
 0x17f   :  { %1523 = vmatpush1.bf16.msra.mxu0 %v6466_v35 }
 0x180   :  { %1524 = vmatprep.subr.bf16.mxu0 %v6476_v37 }
 0x183   :  { %1525 = vmatpush1.bf16.msra.mxu0 %v6484_v39 }
 0x184   :  { %1526 = vmatprep.subr.bf16.mxu0 %v6493_v18 }
 0x187   :  { %1527 = vmatpush1.bf16.msra.mxu0 %v6502_v44 }
 0x21c   :  { %v975_v52 = vpop.f32.mrb[8].mxu1  ;;  %v5072_v53 = vpop.f32.mrb[8].mxu0 }
 0x21d   :  { %v1043_v55 = vadd.f32 %v975_v52, %v605_v49  ;;  %v977_v58 = vpop.f32.mrb[9].mxu1  ;;  %v5073_v59 = vpop.f32.mrb[9].mxu0  ;;  %v615_v52 = vunpack.c.h.bf16 %v4573_v32 }
 0x21e   :  { %v5074_v61 = vadd.f32 %v5073_v59, %v5072_v53  ;;  %v979_v62 = vpop.f32.mrb[10].mxu1  ;;  %v5075_v63 = vpop.f32.mrb[10].mxu0  ;;  %v1071_v16 = vadd.f32 %v977_v58, %v606_v50 }
 0x21f   :  { %v4623_v13 = vmul.f32 -1.442695, %v1043_v55  ;;  %v1044_v19 = vadd.f32 %v979_v62, %v608_v51  ;;  %v981_v8 = vpop.f32.mrb[11].mxu1  ;;  %v5076_v23 = vpop.f32.mrb[11].mxu0 }
 0x220   :  { %v5077_v27 = vadd.f32 %v5076_v23, %v5075_v63  ;;  %v1072_v14 = vadd.f32 %v981_v8, %v609_v60  ;;  %v4627_v36 = vmul.f32 -1.442695, %v1071_v16 }
 0x221   :  { %5613 = vpow2.f32 %v4623_v13  ;;  %v4624_v29 = vmul.f32 -1.442695, %v1044_v19 }
 0x222   :  { %v4628_v40 = vmul.f32 -1.442695, %v1072_v14 }
 0x223   :  { %5615 = vpow2.f32 %v4624_v29 }
 0x224   :  { %5617 = vpow2.f32 %v4627_v36 }
 0x225   :  { %v985_v43 = vpop.f32.mrb[12].mxu1  ;;  %v5078_v47 = vpop.f32.mrb[12].mxu0  ;;  %5619 = vpow2.f32 %v4628_v40 }
 0x226   :  { %v1045_v48 = vadd.f32 %v985_v43, %v611_v34  ;;  %v987_v49 = vpop.f32.mrb[13].mxu1  ;;  %v5079_v50 = vpop.f32.mrb[13].mxu0 }
 0x227   :  { %v989_v51 = vpop.f32.mrb[14].mxu1  ;;  %v5080_v53 = vadd.f32 %v5079_v50, %v5078_v47  ;;  %v5081_v55 = vpop.f32.mrb[14].mxu0  ;;  %v1073_v63 = vadd.f32 %v987_v49, %v612_v45  ;;  %v1103_v49 = vadd.f32 %v5074_v61, %v6243_v56  ;;  %v4572_v61 = vld [vmem:[%s7621_s0 + $0x50] ss:$12 sps:$4 sm:$0xff]  }
 0x228   :  { %v4625_v58 = vmul.f32 -1.442695, %v1045_v48  ;;  %v1046_v59 = vadd.f32 %v989_v51, %v614_v38  ;;  %v991_v60 = vpop.f32.mrb[15].mxu1  ;;  %v5082_v62 = vpop.f32.mrb[15].mxu0  ;;  %v4568_v38 = vld [vmem:[%s7621_s0 + $0x38] ss:$12 sps:$4 sm:$0xff]  }
 0x229   :  { %v5083_v13 = vadd.f32 %v5082_v62, %v5081_v55  ;;  %v1074_v8 = vadd.f32 %v991_v60, %v615_v52  ;;  %v4629_v29 = vmul.f32 -1.442695, %v1073_v63  ;;  %v607_v48 = vunpack.c.l.bf16 %v4568_v38 }
 0x22a   :  { %5621 = vpow2.f32 %v4625_v58  ;;  %v4626_v16 = vmul.f32 -1.442695, %v1046_v59  ;;  %v610_v58 = vunpack.c.h.bf16 %v4568_v38  ;;  %v1104_v59 = vadd.f32 %v5077_v27, %v6253_v2 }
 0x22b   :  { %v5614_v19 = vpop.eup %5613  ;;  %v4630_v32 = vmul.f32 -1.442695, %v1074_v8  ;;  %v1106_v38 = vadd.f32 %v5083_v13, %v6270_v21 }
 0x22c   :  { %v1059_v23 = vadd.f32 1.0, %v5614_v19  ;;  %5623 = vpow2.f32 %v4626_v16 }
 0x22d   :  { %v5616_v25 = vpop.eup %5615 }
 0x22e   :  { %5625 = vrcp.f32 %v1059_v23  ;;  %v1060_v14 = vadd.f32 1.0, %v5616_v25  ;;  %v5618_v34 = vpop.eup %5617  ;;  %v1105_v25 = vadd.f32 %v5080_v53, %v6260_v5 }
 0x22f   :  { %v5620_v36 = vpop.eup %5619  ;;  %v1087_v43 = vadd.f32 1.0, %v5618_v34 }
 0x230   :  { %5627 = vrcp.f32 %v1060_v14  ;;  %v1088_v50 = vadd.f32 1.0, %v5620_v36  ;;  %v613_v14 = vunpack.c.l.bf16 %v4572_v61  ;;  %v616_v36 = vunpack.c.h.bf16 %v4572_v61 }
 0x231   :  { %5629 = vpow2.f32 %v4629_v29 }
 0x232   :  { %5631 = vpow2.f32 %v4630_v32 }
 0x234   :  { %v5622_v40 = vpop.eup %5621 }
 0x235   :  { %v1061_v45 = vadd.f32 1.0, %v5622_v40 }
 0x236   :  { %v5624_v47 = vpop.eup %5623 }
 0x237   :  { %5633 = vrcp.f32 %v1061_v45  ;;  %v1062_v51 = vadd.f32 1.0, %v5624_v47 }
 0x238   :  { %v5626_v52 = vpop.eup %5625  ;;  %5635 = vrcp.f32 %v1087_v43 }
 0x239   :  { %v1107_v55 = vmul.f32 %v5626_v52, %v1103_v49  ;;  %5637 = vrcp.f32 %v1062_v51 }
 0x23a   :  { %v5628_v60 = vpop.eup %5627  ;;  %5639 = vrcp.f32 %v1088_v50 }
 0x23b   :  { %v5630_v62 = vpop.eup %5629  ;;  %v1111_v63 = vadd.f32 %v1107_v55, %v607_v48  ;;  %v1108_v16 = vmul.f32 %v5628_v60, %v1104_v59  ;;  %v6546_v60 = vld [vmem:[%s7620_s1] ss:$12 sps:$4 sm:$0xff]  }
 0x23c   :  { %v5632_v19 = vpop.eup %5631  ;;  %v1089_v23 = vadd.f32 1.0, %v5630_v62 }
 0x23d   :  { %5641 = vtanh.f32 %v1111_v63  ;;  %v1112_v8 = vadd.f32 %v1108_v16, %v610_v58  ;;  %v1090_v29 = vadd.f32 1.0, %v5632_v19  ;;  %v6553_v63 = vld [vmem:[%s7620_s1 + $0x1c] ss:$12 sps:$4 sm:$0xff]  }
 0x23f   :  { %5643 = vtanh.f32 %v1112_v8 }
 0x240   :  { %5645 = vrcp.f32 %v1089_v23  ;;  %v6563_v23 = vld [vmem:[%s7620_s1 + $0x18] ss:$12 sps:$4 sm:$0xff]  }
 0x241   :  { %v5634_v27 = vpop.eup %5633  ;;  %5647 = vrcp.f32 %v1090_v29  ;;  %v6569_v29 = vld [vmem:[%s7620_s1 + $0x34] ss:$12 sps:$4 sm:$0xff]  }
 0x242   :  { %v5636_v32 = vpop.eup %5635  ;;  %v1109_v34 = vmul.f32 %v5634_v27, %v1105_v25 }
 0x243   :  { %v5638_v40 = vpop.eup %5637  ;;  %v1119_v48 = vsub.f32 1.0, %v5636_v32  ;;  %v1131_v5 = vmul.f32 %v5636_v32, %v6274_v41 }
 0x244   :  { %v1113_v43 = vadd.f32 %v1109_v34, %v613_v14  ;;  %v1110_v45 = vmul.f32 %v5638_v40, %v1106_v38  ;;  %v5640_v47 = vpop.eup %5639  ;;  %v6601_v38 = vld [vmem:[%s7620_s1 + $0x48] ss:$12 sps:$4 sm:$0xff]  }
 0x245   :  { %v1120_v53 = vsub.f32 1.0, %v5640_v47  ;;  %v1132_v55 = vmul.f32 %v5640_v47, %v6276_v42 }
 0x246   :  { %5649 = vtanh.f32 %v1113_v43  ;;  %v1114_v49 = vadd.f32 %v1110_v45, %v616_v36  ;;  %v6583_v36 = vld [vmem:[%s7620_s1 + $0x30] ss:$12 sps:$4 sm:$0xff]  }
 0x247   :  { %v5642_v50 = vpop.eup %5641 }
 0x248   :  { %5651 = vtanh.f32 %v1114_v49  ;;  %v1123_v51 = vmul.f32 %v5642_v50, %v1119_v48 }
 0x249   :  { %v5644_v52 = vpop.eup %5643 }
 0x24a   :  { %v1124_v58 = vmul.f32 %v5644_v52, %v1120_v53  ;;  %v6539_v59 = vadd.f32 %v1131_v5, %v1123_v51  ;;  %v5646_v21 = vpop.eup %5645 }
 0x24b   :  { %v5648_v62 = vpop.eup %5647  ;;  %v1121_v42 = vsub.f32 1.0, %v5646_v21  ;;  %v1133_v61 = vmul.f32 %v5646_v21, %v6286_v54 }
 0x24c   :  { %v6541_v13 = vadd.f32 %v1132_v55, %v1124_v58  ;;  %v1122_v19 = vsub.f32 1.0, %v5648_v62  ;;  %v1134_v27 = vmul.f32 %v5648_v62, %v6291_v57  ;;  %v6596_v57 = vld [vmem:[%s7620_s1 + $0x4c] ss:$12 sps:$4 sm:$0xff]   ;;  %v4639_v62 = vld [vmem:[%s7621_s0 + $0x84] sm:$0xff] }
 0x24d   :  { %v4637_v55 = vld [vmem:[%s7621_s0 + $0x78] sm:$0xff] }
 0x24e   :  { %v1143_v41 = vpack.c.bf16 %v6541_v13, %v6539_v59 }
 0x250   :  { %v5650_v16 = vpop.eup %5649  ;;  %4631 = vst [vmem:[%s7623_s3 + $0x8] sm:$0xff] %v1143_v41  ;;  %1529 = vmatmul.mubr.bf16.vlgmr.msra.gmra.mrb[16].mxu0 %v1143_v41  ;;  %1582 = vmatmul.mubr.bf16.vlgmr.msra.gmra.mrb[16].mxu1 %v1143_v41  ;;  %v1166_v41 = vunpack.c.l.bf16 %v4637_v55 }
 0x251   :  { %v1125_v8 = vmul.f32 %v5650_v16, %v1121_v42  ;;  %2052 = vmatpush1.bf16.msra.mxu1 %v6546_v60  ;;  %v1169_v16 = vunpack.c.l.bf16 %v4639_v62 }
 0x252   :  { %v5652_v25 = vpop.eup %5651  ;;  %2053 = vmatprep.subr.bf16.mxu1 %v6553_v63 }
 0x253   :  { %v1126_v14 = vmul.f32 %v5652_v25, %v1122_v19  ;;  %v6572_v32 = vadd.f32 %v1133_v61, %v1125_v8  ;;  %v1167_v61 = vunpack.c.h.bf16 %v4637_v55 }
 0x255   :  { %v6574_v54 = vadd.f32 %v1134_v27, %v1126_v14  ;;  %2054 = vmatpush1.bf16.msra.mxu1 %v6563_v23 }
 0x256   :  { %2055 = vmatprep.subr.bf16.mxu1 %v6569_v29 }
 0x257   :  { %v1144_v34 = vpack.c.bf16 %v6574_v54, %v6572_v32 }
 0x259   :  { %4632 = vst [vmem:[%s7624_s4 + $0x30] sm:$0xff] %v1144_v34  ;;  %1538 = vmatprep.mubr.bf16.mxu0 %v1144_v34  ;;  %1589 = vmatprep.mubr.bf16.mxu1 %v1144_v34 }
 0x25a   :  { %1539 = vmatmul.mubr.bf16.gmra.mrb[20].mxu0 %v5901_v1  ;;  %1590 = vmatmul.mubr.bf16.gmra.mrb[20].mxu1 %v5901_v1 }
 0x25b   :  { %2056 = vmatpush1.bf16.msra.mxu1 %v6583_v36  ;;  %2083 = vmatprep.mubr.bf16.mxu1 %v5901_v1 }
 0x25c   :  { %2136 = vmatprep.mubr.bf16.mxu0 %v5901_v1  ;;  %2057 = vmatprep.subr.bf16.mxu1 %v6596_v57 }
 0x25f   :  { %2058 = vmatpush1.bf16.msra.mxu1 %v6601_v38 }
 0x260   :  { %2059 = vmatprep.subr.bf16.mxu1 %v6320_v0  ;;  %v5397_v0 = vld [vmem:[%s7620_s1 + $0xc8] ss:$12 sps:$4 sm:$0xff]  }
 0x261   :  { %5112 = vmatprep.subr.bf16.mxu0 %v5397_v0 }
 0x263   :  { %2060 = vmatpush1.bf16.msra.mxu1 %v6325_v3  ;;  %v5398_v3 = vld [vmem:[%s7620_s1 + $0x8] ss:$12 sps:$4 sm:$0xff]  }
 0x264   :  { %2061 = vmatprep.subr.bf16.mxu1 %v6332_v4  ;;  %5113 = vmatpush3.bf16.msra.mxu0 %v5398_v3  ;;  %v5399_v4 = vld [vmem:[%s7620_s1 + $0xe0] ss:$12 sps:$4 sm:$0xff]   ;;  %v1170_v3 = vunpack.c.h.bf16 %v4639_v62  ;;  %v6698_v62 = vld [vmem:[%s7622_s2 + $0x10] sm:$0xff] }
 0x265   :  { %5114 = vmatprep.subr.bf16.mxu0 %v5399_v4 }
 0x267   :  { %2062 = vmatpush1.bf16.msra.mxu1 %v6337_v6  ;;  %v5400_v6 = vld [vmem:[%s7620_s1 + $0x20] ss:$12 sps:$4 sm:$0xff]  }
 0x268   :  { %2063 = vmatprep.subr.bf16.mxu1 %v6344_v7  ;;  %5115 = vmatpush3.bf16.msra.mxu0 %v5400_v6  ;;  %v5401_v7 = vld [vmem:[%s7620_s1 + $0xf8] ss:$12 sps:$4 sm:$0xff]  }
 0x269   :  { %5116 = vmatprep.subr.bf16.mxu0 %v5401_v7 }
 0x26b   :  { %2064 = vmatpush1.bf16.msra.mxu1 %v6349_v9  ;;  %v5402_v9 = vld [vmem:[%s7620_s1 + $0x38] ss:$12 sps:$4 sm:$0xff]  }
 0x26c   :  { %2065 = vmatprep.subr.bf16.mxu1 %v6356_v10  ;;  %5117 = vmatpush3.bf16.msra.mxu0 %v5402_v9  ;;  %v5403_v10 = vld [vmem:[%s7620_s1 + $0x110] ss:$12 sps:$4 sm:$0xff]  }
 0x26d   :  { %5118 = vmatprep.subr.bf16.mxu0 %v5403_v10 }
 0x26f   :  { %2066 = vmatpush1.bf16.msra.mxu1 %v6361_v11  ;;  %v5404_v11 = vld [vmem:[%s7620_s1 + $0x50] ss:$12 sps:$4 sm:$0xff]  }
 0x270   :  { %2067 = vmatprep.subr.bf16.mxu1 %v6368_v12  ;;  %5119 = vmatpush3.bf16.msra.mxu0 %v5404_v11  ;;  %v5405_v12 = vld [vmem:[%s7620_s1 + $0x128] ss:$12 sps:$4 sm:$0xff]  }
 0x271   :  { %5120 = vmatprep.subr.bf16.mxu0 %v5405_v12 }
 0x273   :  { %2068 = vmatpush1.bf16.msra.mxu1 %v6376_v15  ;;  %v5406_v15 = vld [vmem:[%s7620_s1 + $0x68] ss:$12 sps:$4 sm:$0xff]  }
 0x274   :  { %2069 = vmatprep.subr.bf16.mxu1 %v6386_v17  ;;  %5121 = vmatpush3.bf16.msra.mxu0 %v5406_v15  ;;  %v5407_v17 = vld [vmem:[%s7620_s1 + $0x140] ss:$12 sps:$4 sm:$0xff]  }
 0x275   :  { %5122 = vmatprep.subr.bf16.mxu0 %v5407_v17 }
 0x277   :  { %2070 = vmatpush1.bf16.msra.mxu1 %v6394_v20  ;;  %v5408_v20 = vld [vmem:[%s7620_s1 + $0x80] ss:$12 sps:$4 sm:$0xff]  }
 0x278   :  { %2071 = vmatprep.subr.bf16.mxu1 %v6404_v22  ;;  %v5409_v22 = vld [vmem:[%s7620_s1 + $0x158] ss:$12 sps:$4 sm:$0xff]   ;;  %5123 = vmatpush3.bf16.msra.mxu0 %v5408_v20 }
 0x279   :  { %5124 = vmatprep.subr.bf16.mxu0 %v5409_v22 }
 0x27b   :  { %2072 = vmatpush1.bf16.msra.mxu1 %v6412_v24  ;;  %v5410_v24 = vld [vmem:[%s7620_s1 + $0x98] ss:$12 sps:$4 sm:$0xff]  }
 0x27c   :  { %2073 = vmatprep.subr.bf16.mxu1 %v6422_v26  ;;  %v5411_v26 = vld [vmem:[%s7620_s1 + $0x170] ss:$12 sps:$4 sm:$0xff]   ;;  %5125 = vmatpush3.bf16.msra.mxu0 %v5410_v24 }
 0x27d   :  { %5126 = vmatprep.subr.bf16.mxu0 %v5411_v26 }
 0x27f   :  { %2074 = vmatpush1.bf16.msra.mxu1 %v6430_v28  ;;  %v5412_v28 = vld [vmem:[%s7620_s1 + $0xb0] ss:$12 sps:$4 sm:$0xff]  }
 0x280   :  { %2075 = vmatprep.subr.bf16.mxu1 %v6440_v30  ;;  %5127 = vmatpush3.bf16.msra.mxu0 %v5412_v28  ;;  %v4633_v30 = vld [vmem:[%s7621_s0 + $0x60] sm:$0xff] }
 0x281   :  { %2606 = vmatprep.subr.bf16.mxu0 %v6512_v46 }
 0x283   :  { %2076 = vmatpush1.bf16.msra.mxu1 %v6448_v31  ;;  %v4635_v31 = vld [vmem:[%s7621_s0 + $0x6c] sm:$0xff] }
 0x284   :  { %2077 = vmatprep.subr.bf16.mxu1 %v6458_v33  ;;  %v1160_v33 = vunpack.c.l.bf16 %v4633_v30  ;;  %v1164_v46 = vunpack.c.h.bf16 %v4635_v31 }
 0x287   :  { %2078 = vmatpush1.bf16.msra.mxu1 %v6466_v35  ;;  %v1163_v35 = vunpack.c.l.bf16 %v4635_v31 }
 0x288   :  { %2079 = vmatprep.subr.bf16.mxu1 %v6476_v37 }
 0x28b   :  { %2080 = vmatpush1.bf16.msra.mxu1 %v6484_v39 }
 0x28c   :  { %2081 = vmatprep.subr.bf16.mxu1 %v6493_v18  ;;  %v1161_v18 = vunpack.c.h.bf16 %v4633_v30 }
 0x28f   :  { %2082 = vmatpush1.bf16.msra.mxu1 %v6502_v44 }
 0x323   :  { %v1530_v37 = vpop.f32.mrb[16].mxu0  ;;  %v5100_v39 = vpop.f32.mrb[16].mxu1 }
 0x324   :  { %v1598_v44 = vadd.f32 %v1530_v37, %v1160_v33  ;;  %v1532_v40 = vpop.f32.mrb[17].mxu0  ;;  %v5101_v43 = vpop.f32.mrb[17].mxu1  ;;  %v4634_v37 = vld [vmem:[%s7621_s0 + $0x68] ss:$12 sps:$4 sm:$0xff]  }
 0x325   :  { %v5102_v45 = vadd.f32 %v5101_v43, %v5100_v39  ;;  %v1534_v47 = vpop.f32.mrb[18].mxu0  ;;  %v5103_v48 = vpop.f32.mrb[18].mxu1  ;;  %v1626_v51 = vadd.f32 %v1532_v40, %v1161_v18  ;;  %v1162_v43 = vunpack.c.l.bf16 %v4634_v37 }
 0x326   :  { %v4689_v49 = vmul.f32 -1.442695, %v1598_v44  ;;  %v1599_v50 = vadd.f32 %v1534_v47, %v1163_v35  ;;  %v1536_v5 = vpop.f32.mrb[19].mxu0  ;;  %v5104_v53 = vpop.f32.mrb[19].mxu1 }
 0x327   :  { %v5105_v52 = vadd.f32 %v5104_v53, %v5103_v48  ;;  %v1627_v21 = vadd.f32 %v1536_v5, %v1164_v46  ;;  %v4693_v42 = vmul.f32 -1.442695, %v1626_v51  ;;  %v1658_v47 = vadd.f32 %v5102_v45, %v6243_v56 }
 0x328   :  { %5653 = vpow2.f32 %v4689_v49  ;;  %v4690_v58 = vmul.f32 -1.442695, %v1599_v50  ;;  %v1165_v5 = vunpack.c.h.bf16 %v4634_v37 }
 0x329   :  { %v4694_v19 = vmul.f32 -1.442695, %v1627_v21  ;;  %v1659_v53 = vadd.f32 %v5105_v52, %v6253_v2 }
 0x32a   :  { %5655 = vpow2.f32 %v4690_v58 }
 0x32b   :  { %5657 = vpow2.f32 %v4693_v42  ;;  %v6707_v42 = vld [vmem:[%s7622_s2 + $0x18] sm:$0xff] }
 0x32c   :  { %5659 = vpow2.f32 %v4694_v19 }
 0x32d   :  { %v1540_v8 = vpop.f32.mrb[20].mxu0  ;;  %v5106_v25 = vpop.f32.mrb[20].mxu1 }
 0x32e   :  { %v1600_v14 = vadd.f32 %v1540_v8, %v1166_v41  ;;  %v1542_v27 = vpop.f32.mrb[21].mxu0  ;;  %v5107_v34 = vpop.f32.mrb[21].mxu1  ;;  %v4638_v41 = vld [vmem:[%s7621_s0 + $0x80] ss:$12 sps:$4 sm:$0xff]  }
 0x32f   :  { %v1544_v0 = vpop.f32.mrb[22].mxu0  ;;  %v5108_v4 = vadd.f32 %v5107_v34, %v5106_v25  ;;  %v5109_v6 = vpop.f32.mrb[22].mxu1  ;;  %v1628_v12 = vadd.f32 %v1542_v27, %v1167_v61  ;;  %v1168_v19 = vunpack.c.l.bf16 %v4638_v41 }
 0x330   :  { %v4691_v7 = vmul.f32 -1.442695, %v1600_v14  ;;  %v1601_v9 = vadd.f32 %v1544_v0, %v1169_v16  ;;  %v1546_v10 = vpop.f32.mrb[23].mxu0  ;;  %v5110_v11 = vpop.f32.mrb[23].mxu1  ;;  %v1171_v14 = vunpack.c.h.bf16 %v4638_v41  ;;  %v6856_v41 = vld [vmem:[%s7620_s1 + $0x108] ss:$12 sps:$4 sm:$0xff]  }
 0x331   :  { %v5111_v15 = vadd.f32 %v5110_v11, %v5109_v6  ;;  %v1629_v24 = vadd.f32 %v1546_v10, %v1170_v3  ;;  %v4695_v30 = vmul.f32 -1.442695, %v1628_v12  ;;  %v1660_v52 = vadd.f32 %v5108_v4, %v6698_v62 }
 0x332   :  { %v5654_v17 = vpop.eup %5653  ;;  %5661 = vpow2.f32 %v4691_v7  ;;  %v4692_v20 = vmul.f32 -1.442695, %v1601_v9 }
 0x333   :  { %v1614_v22 = vadd.f32 1.0, %v5654_v17  ;;  %v4696_v31 = vmul.f32 -1.442695, %v1629_v24  ;;  %v1661_v27 = vadd.f32 %v5111_v15, %v6707_v42 }
 0x334   :  { %v5656_v26 = vpop.eup %5655  ;;  %5663 = vpow2.f32 %v4692_v20 }
 0x335   :  { %5665 = vrcp.f32 %v1614_v22  ;;  %v1615_v28 = vadd.f32 1.0, %v5656_v26  ;;  %v5658_v33 = vpop.eup %5657 }
 0x336   :  { %v5660_v35 = vpop.eup %5659  ;;  %v1642_v18 = vadd.f32 1.0, %v5658_v33 }
 0x337   :  { %5667 = vrcp.f32 %v1615_v28  ;;  %v1643_v48 = vadd.f32 1.0, %v5660_v35 }
 0x338   :  { %5669 = vpow2.f32 %v4695_v30 }
 0x339   :  { %5671 = vpow2.f32 %v4696_v31 }
 0x33c   :  { %v5662_v39 = vpop.eup %5661 }
 0x33d   :  { %v1616_v44 = vadd.f32 1.0, %v5662_v39 }
 0x33e   :  { %v5664_v40 = vpop.eup %5663 }
 0x33f   :  { %v5666_v46 = vpop.eup %5665  ;;  %5673 = vrcp.f32 %v1616_v44  ;;  %v1617_v49 = vadd.f32 1.0, %v5664_v40 }
 0x340   :  { %5675 = vrcp.f32 %v1642_v18  ;;  %v1662_v50 = vmul.f32 %v5666_v46, %v1658_v47  ;;  %v5428_v47 = vld [vmem:[%s7620_s1 + $0xc8] ss:$12 sps:$4 sm:$0xff]  }
 0x341   :  { %v5668_v51 = vpop.eup %5667  ;;  %5677 = vrcp.f32 %v1617_v49  ;;  %v5429_v46 = vld [vmem:[%s7620_s1 + $0x8] ss:$12 sps:$4 sm:$0xff]   ;;  %5140 = vmatprep.subr.bf16.mxu1 %v5428_v47 }
 0x342   :  { %v1666_v55 = vadd.f32 %v1662_v50, %v1162_v43  ;;  %5679 = vrcp.f32 %v1643_v48  ;;  %v1663_v58 = vmul.f32 %v5668_v51, %v1659_v53  ;;  %v5670_v21 = vpop.eup %5669  ;;  %v6794_v43 = vld [vmem:[%s7620_s1 + $0xc4] ss:$12 sps:$4 sm:$0xff]   ;;  %v6802_v48 = vld [vmem:[%s7620_s1 + $0xc0] ss:$12 sps:$4 sm:$0xff]   ;;  %v6812_v49 = vld [vmem:[%s7620_s1 + $0xdc] ss:$12 sps:$4 sm:$0xff]  }
 0x343   :  { %v5672_v45 = vpop.eup %5671  ;;  %v1644_v2 = vadd.f32 1.0, %v5670_v21  ;;  %v5433_v50 = vld [vmem:[%s7620_s1 + $0xe0] ss:$12 sps:$4 sm:$0xff]   ;;  %v5439_v21 = vld [vmem:[%s7620_s1 + $0x38] ss:$12 sps:$4 sm:$0xff]  }
 0x344   :  { %5681 = vtanh.f32 %v1666_v55  ;;  %v1667_v56 = vadd.f32 %v1663_v58, %v1165_v5  ;;  %v1645_v16 = vadd.f32 1.0, %v5672_v45  ;;  %v6820_v5 = vld [vmem:[%s7620_s1 + $0xd8] ss:$12 sps:$4 sm:$0xff]   ;;  %v5434_v53 = vld [vmem:[%s7620_s1 + $0x20] ss:$12 sps:$4 sm:$0xff]  }
 0x345   :  { %v6830_v51 = vld [vmem:[%s7620_s1 + $0xf4] ss:$12 sps:$4 sm:$0xff]   ;;  %v5438_v55 = vld [vmem:[%s7620_s1 + $0xf8] ss:$12 sps:$4 sm:$0xff]   ;;  %v6838_v58 = vld [vmem:[%s7620_s1 + $0xf0] ss:$12 sps:$4 sm:$0xff]  }
 0x346   :  { %5683 = vtanh.f32 %v1667_v56  ;;  %v6848_v56 = vld [vmem:[%s7620_s1 + $0x10c] ss:$12 sps:$4 sm:$0xff]   ;;  %v5443_v45 = vld [vmem:[%s7620_s1 + $0x110] ss:$12 sps:$4 sm:$0xff]  }
 0x347   :  { %5685 = vrcp.f32 %v1644_v2  ;;  %v5444_v2 = vld [vmem:[%s7620_s1 + $0x50] ss:$12 sps:$4 sm:$0xff]  }
 0x348   :  { %5687 = vrcp.f32 %v1645_v16  ;;  %v5448_v16 = vld [vmem:[%s7620_s1 + $0x128] ss:$12 sps:$4 sm:$0xff]  }
 0x349   :  { %v5674_v8 = vpop.eup %5673 }
 0x34a   :  { %v5676_v61 = vpop.eup %5675  ;;  %v1664_v25 = vmul.f32 %v5674_v8, %v1660_v52  ;;  %v6866_v52 = vld [vmem:[%s7620_s1 + $0x124] ss:$12 sps:$4 sm:$0xff]   ;;  %v5449_v8 = vld [vmem:[%s7620_s1 + $0x68] ss:$12 sps:$4 sm:$0xff]  }
 0x34b   :  { %v5678_v34 = vpop.eup %5677  ;;  %v1674_v4 = vsub.f32 1.0, %v5676_v61  ;;  %v1686_v10 = vmul.f32 %v5676_v61, %v6539_v59  ;;  %v6884_v61 = vld [vmem:[%s7620_s1 + $0x13c] ss:$12 sps:$4 sm:$0xff]  }
 0x34c   :  { %v5680_v0 = vpop.eup %5679  ;;  %v1668_v3 = vadd.f32 %v1664_v25, %v1168_v19  ;;  %v1665_v6 = vmul.f32 %v5678_v34, %v1661_v27  ;;  %v6874_v19 = vld [vmem:[%s7620_s1 + $0x120] ss:$12 sps:$4 sm:$0xff]  }
 0x34d   :  { %v1675_v11 = vsub.f32 1.0, %v5680_v0  ;;  %v1687_v20 = vmul.f32 %v5680_v0, %v6541_v13  ;;  %v5453_v25 = vld [vmem:[%s7620_s1 + $0x140] ss:$12 sps:$4 sm:$0xff]   ;;  %v5458_v0 = vld [vmem:[%s7620_s1 + $0x158] ss:$12 sps:$4 sm:$0xff]  }
 0x34e   :  { %v5682_v7 = vpop.eup %5681  ;;  %5689 = vtanh.f32 %v1668_v3  ;;  %v1669_v9 = vadd.f32 %v1665_v6, %v1171_v14  ;;  %v6892_v14 = vld [vmem:[%s7620_s1 + $0x138] ss:$12 sps:$4 sm:$0xff]   ;;  %v5454_v27 = vld [vmem:[%s7620_s1 + $0x80] ss:$12 sps:$4 sm:$0xff]   ;;  %v6910_v3 = vld [vmem:[%s7620_s1 + $0x150] ss:$12 sps:$4 sm:$0xff]  }
 0x34f   :  { %v1678_v12 = vmul.f32 %v5682_v7, %v1674_v4  ;;  %v6902_v34 = vld [vmem:[%s7620_s1 + $0x154] ss:$12 sps:$4 sm:$0xff]   ;;  %v5459_v6 = vld [vmem:[%s7620_s1 + $0x98] ss:$12 sps:$4 sm:$0xff]  }
 0x350   :  { %v5684_v17 = vpop.eup %5683  ;;  %5691 = vtanh.f32 %v1669_v9  ;;  %v6920_v4 = vld [vmem:[%s7620_s1 + $0x168] ss:$12 sps:$4 sm:$0xff]   ;;  %v6925_v7 = vld [vmem:[%s7620_s1 + $0x16c] ss:$12 sps:$4 sm:$0xff]   ;;  %v5463_v9 = vld [vmem:[%s7620_s1 + $0x170] ss:$12 sps:$4 sm:$0xff]  }
 0x351   :  { %v1679_v22 = vmul.f32 %v5684_v17, %v1675_v11  ;;  %v6712_v24 = vadd.f32 %v1686_v10, %v1678_v12  ;;  %v5686_v26 = vpop.eup %5685  ;;  %v5464_v10 = vld [vmem:[%s7620_s1 + $0xb0] ss:$12 sps:$4 sm:$0xff]  }
 0x352   :  { %v5688_v30 = vpop.eup %5687  ;;  %v1676_v59 = vsub.f32 1.0, %v5686_v26  ;;  %v1688_v35 = vmul.f32 %v5686_v26, %v6572_v32  ;;  %v6763_v32 = vld [vmem:[%s7620_s1 + $0x78] ss:$12 sps:$4 sm:$0xff]   ;;  %v4699_v12 = vld [vmem:[%s7621_s0 + $0x90] sm:$0xff]  ;;  %v4701_v17 = vld [vmem:[%s7621_s0 + $0x9c] sm:$0xff] }
 0x353   :  { %v6714_v15 = vadd.f32 %v1687_v20, %v1679_v22  ;;  %v1677_v13 = vsub.f32 1.0, %v5688_v30  ;;  %v1689_v18 = vmul.f32 %v5688_v30, %v6574_v54  ;;  %v6770_v54 = vld [vmem:[%s7620_s1 + $0x94] ss:$12 sps:$4 sm:$0xff]   ;;  %v6938_v11 = vld [vmem:[%s7620_s1 + $0x4] ss:$12 sps:$4 sm:$0xff]   ;;  %v1715_v20 = vunpack.c.l.bf16 %v4699_v12 }
 0x354   :  { %v1716_v22 = vunpack.c.h.bf16 %v4699_v12  ;;  %v1718_v26 = vunpack.c.l.bf16 %v4701_v17 }
 0x355   :  { %v1698_v28 = vpack.c.bf16 %v6714_v15, %v6712_v24 }
 0x357   :  { %4697 = vst [vmem:[%s7623_s3 + $0x10] sm:$0xff] %v1698_v28  ;;  %2084 = vmatmul.mubr.bf16.vlgmr.msra.gmra.mrb[24].mxu1 %v1698_v28  ;;  %2137 = vmatmul.mubr.bf16.vlgmr.msra.gmra.mrb[24].mxu0 %v1698_v28 }
 0x358   :  { %v5690_v31 = vpop.eup %5689  ;;  %2607 = vmatpush1.bf16.msra.mxu0 %v6546_v60  ;;  %5141 = vmatpush3.bf16.msra.mxu1 %v5429_v46 }
 0x359   :  { %v1680_v33 = vmul.f32 %v5690_v31, %v1676_v59  ;;  %2608 = vmatprep.subr.bf16.mxu0 %v6553_v63  ;;  %v6746_v63 = vld [vmem:[%s7620_s1 + $0x64] ss:$12 sps:$4 sm:$0xff]   ;;  %5142 = vmatprep.subr.bf16.mxu1 %v5433_v50 }
 0x35a   :  { %v5692_v37 = vpop.eup %5691 }
 0x35b   :  { %v1681_v39 = vmul.f32 %v5692_v37, %v1677_v13  ;;  %v6725_v44 = vadd.f32 %v1688_v35, %v1680_v33 }
 0x35c   :  { %2609 = vmatpush1.bf16.msra.mxu0 %v6563_v23  ;;  %v6751_v23 = vld [vmem:[%s7620_s1 + $0x60] ss:$12 sps:$4 sm:$0xff]   ;;  %5143 = vmatpush3.bf16.msra.mxu1 %v5434_v53 }
 0x35d   :  { %v6728_v40 = vadd.f32 %v1689_v18, %v1681_v39  ;;  %2610 = vmatprep.subr.bf16.mxu0 %v6569_v29  ;;  %v6758_v29 = vld [vmem:[%s7620_s1 + $0x7c] ss:$12 sps:$4 sm:$0xff]   ;;  %5144 = vmatprep.subr.bf16.mxu1 %v5438_v55  ;;  %v1719_v39 = vunpack.c.h.bf16 %v4701_v17 }
 0x35f   :  { %v1699_v60 = vpack.c.bf16 %v6728_v40, %v6725_v44 }
 0x360   :  { %2611 = vmatpush1.bf16.msra.mxu0 %v6583_v36  ;;  %v6775_v36 = vld [vmem:[%s7620_s1 + $0x90] ss:$12 sps:$4 sm:$0xff]   ;;  %5145 = vmatpush3.bf16.msra.mxu1 %v5439_v21  ;;  %v4703_v21 = vld [vmem:[%s7621_s0 + $0xa8] sm:$0xff] }
 0x361   :  { %4698 = vst [vmem:[%s7624_s4 + $0x28] sm:$0xff] %v1699_v60  ;;  %2093 = vmatprep.mubr.bf16.mxu1 %v1699_v60  ;;  %2144 = vmatprep.mubr.bf16.mxu0 %v1699_v60 }
 0x362   :  { %2094 = vmatmul.mubr.bf16.gmra.mrb[28].mxu1 %v5901_v1  ;;  %2145 = vmatmul.mubr.bf16.gmra.mrb[28].mxu0 %v5901_v1 }
 0x363   :  { %2612 = vmatprep.subr.bf16.mxu0 %v6596_v57  ;;  %2638 = vmatprep.mubr.bf16.mxu0 %v5901_v1  ;;  %v6782_v57 = vld [vmem:[%s7620_s1 + $0xac] ss:$12 sps:$4 sm:$0xff]  }
 0x364   :  { %2613 = vmatpush1.bf16.msra.mxu0 %v6601_v38  ;;  %2691 = vmatprep.mubr.bf16.mxu1 %v5901_v1  ;;  %v6787_v38 = vld [vmem:[%s7620_s1 + $0xa8] ss:$12 sps:$4 sm:$0xff]  }
 0x365   :  { %2614 = vmatprep.subr.bf16.mxu0 %v6746_v63  ;;  %5146 = vmatprep.subr.bf16.mxu1 %v5443_v45 }
 0x366   :  { %5147 = vmatpush3.bf16.msra.mxu1 %v5444_v2 }
 0x367   :  { %5148 = vmatprep.subr.bf16.mxu1 %v5448_v16  ;;  %v4705_v16 = vld [vmem:[%s7621_s0 + $0xb4] sm:$0xff] }
 0x368   :  { %2615 = vmatpush1.bf16.msra.mxu0 %v6751_v23 }
 0x369   :  { %2616 = vmatprep.subr.bf16.mxu0 %v6758_v29 }
 0x36a   :  { %5149 = vmatpush3.bf16.msra.mxu1 %v5449_v8  ;;  %v1721_v8 = vunpack.c.l.bf16 %v4703_v21 }
 0x36b   :  { %5150 = vmatprep.subr.bf16.mxu1 %v5453_v25 }
 0x36c   :  { %2617 = vmatpush1.bf16.msra.mxu0 %v6763_v32 }
 0x36d   :  { %2618 = vmatprep.subr.bf16.mxu0 %v6770_v54 }
 0x36e   :  { %5151 = vmatpush3.bf16.msra.mxu1 %v5454_v27  ;;  %v1724_v27 = vunpack.c.l.bf16 %v4705_v16 }
 0x36f   :  { %5152 = vmatprep.subr.bf16.mxu1 %v5458_v0 }
 0x370   :  { %2619 = vmatpush1.bf16.msra.mxu0 %v6775_v36 }
 0x371   :  { %2620 = vmatprep.subr.bf16.mxu0 %v6782_v57 }
 0x372   :  { %5153 = vmatpush3.bf16.msra.mxu1 %v5459_v6  ;;  %v1722_v6 = vunpack.c.h.bf16 %v4703_v21 }
 0x373   :  { %5154 = vmatprep.subr.bf16.mxu1 %v5463_v9 }
 0x374   :  { %2621 = vmatpush1.bf16.msra.mxu0 %v6787_v38 }
 0x375   :  { %2622 = vmatprep.subr.bf16.mxu0 %v6794_v43 }
 0x376   :  { %5155 = vmatpush3.bf16.msra.mxu1 %v5464_v10 }
 0x377   :  { %3161 = vmatprep.subr.bf16.mxu1 %v6938_v11 }
 0x378   :  { %2623 = vmatpush1.bf16.msra.mxu0 %v6802_v48 }
 0x379   :  { %2624 = vmatprep.subr.bf16.mxu0 %v6812_v49 }
 0x37c   :  { %2625 = vmatpush1.bf16.msra.mxu0 %v6820_v5 }
 0x37d   :  { %2626 = vmatprep.subr.bf16.mxu0 %v6830_v51 }
 0x380   :  { %2627 = vmatpush1.bf16.msra.mxu0 %v6838_v58 }
 0x381   :  { %2628 = vmatprep.subr.bf16.mxu0 %v6848_v56 }
 0x384   :  { %2629 = vmatpush1.bf16.msra.mxu0 %v6856_v41 }
 0x385   :  { %2630 = vmatprep.subr.bf16.mxu0 %v6866_v52 }
 0x388   :  { %2631 = vmatpush1.bf16.msra.mxu0 %v6874_v19 }
 0x389   :  { %2632 = vmatprep.subr.bf16.mxu0 %v6884_v61 }
 0x38c   :  { %2633 = vmatpush1.bf16.msra.mxu0 %v6892_v14 }
 0x38d   :  { %2634 = vmatprep.subr.bf16.mxu0 %v6902_v34 }
 0x390   :  { %2635 = vmatpush1.bf16.msra.mxu0 %v6910_v3 }
 0x391   :  { %2636 = vmatprep.subr.bf16.mxu0 %v6925_v7 }
 0x394   :  { %2637 = vmatpush1.bf16.msra.mxu0 %v6920_v4 }
 0x42a   :  { %v2085_v28 = vpop.f32.mrb[24].mxu1  ;;  %v5128_v30 = vpop.f32.mrb[24].mxu0 }
 0x42b   :  { %v2153_v59 = vadd.f32 %v2085_v28, %v1715_v20  ;;  %v2087_v31 = vpop.f32.mrb[25].mxu1  ;;  %v5129_v13 = vpop.f32.mrb[25].mxu0 }
 0x42c   :  { %v5130_v33 = vadd.f32 %v5129_v13, %v5128_v30  ;;  %v2089_v35 = vpop.f32.mrb[26].mxu1  ;;  %v5131_v37 = vpop.f32.mrb[26].mxu0  ;;  %v2181_v60 = vadd.f32 %v2087_v31, %v1716_v22 }
 0x42d   :  { %v4755_v18 = vmul.f32 -1.442695, %v2153_v59  ;;  %v2154_v47 = vadd.f32 %v2089_v35, %v1718_v26  ;;  %v2091_v46 = vpop.f32.mrb[27].mxu1  ;;  %v5132_v50 = vpop.f32.mrb[27].mxu0 }
 0x42e   :  { %v5133_v53 = vadd.f32 %v5132_v50, %v5131_v37  ;;  %v2182_v45 = vadd.f32 %v2091_v46, %v1719_v39  ;;  %v4759_v2 = vmul.f32 -1.442695, %v2181_v60  ;;  %v1725_v46 = vunpack.c.h.bf16 %v4705_v16  ;;  %v6966_v16 = vld [vmem:[%s7622_s2 + $0x8] sm:$0xff] }
 0x42f   :  { %5693 = vpow2.f32 %v4755_v18  ;;  %v4756_v55 = vmul.f32 -1.442695, %v2154_v47 }
 0x430   :  { %v4760_v25 = vmul.f32 -1.442695, %v2182_v45 }
 0x431   :  { %5695 = vpow2.f32 %v4756_v55 }
 0x432   :  { %5697 = vpow2.f32 %v4759_v2 }
 0x433   :  { %5699 = vpow2.f32 %v4760_v25  ;;  %v6961_v25 = vld [vmem:[%s7622_s2] sm:$0xff] }
 0x435   :  { %v2095_v0 = vpop.f32.mrb[28].mxu1  ;;  %v5134_v9 = vpop.f32.mrb[28].mxu0 }
 0x436   :  { %v2155_v10 = vadd.f32 %v2095_v0, %v1721_v8  ;;  %v2097_v12 = vpop.f32.mrb[29].mxu1  ;;  %v5135_v17 = vpop.f32.mrb[29].mxu0  ;;  %v4700_v8 = vld [vmem:[%s7621_s0 + $0x98] ss:$12 sps:$4 sm:$0xff]  }
 0x437   :  { %v2099_v20 = vpop.f32.mrb[30].mxu1  ;;  %v5136_v22 = vadd.f32 %v5135_v17, %v5134_v9  ;;  %v5137_v26 = vpop.f32.mrb[30].mxu0  ;;  %v2183_v35 = vadd.f32 %v2097_v12, %v1722_v6  ;;  %v1717_v6 = vunpack.c.l.bf16 %v4700_v8  ;;  %v2213_v9 = vadd.f32 %v5130_v33, %v6961_v25  ;;  %v4704_v33 = vld [vmem:[%s7621_s0 + $0xb0] ss:$12 sps:$4 sm:$0xff]  }
 0x438   :  { %v4757_v28 = vmul.f32 -1.442695, %v2155_v10  ;;  %v2156_v30 = vadd.f32 %v2099_v20, %v1724_v27  ;;  %v2101_v59 = vpop.f32.mrb[31].mxu1  ;;  %v5138_v31 = vpop.f32.mrb[31].mxu0 }
 0x439   :  { %v5694_v13 = vpop.eup %5693  ;;  %v6953_v37 = vadd.f32 %v5138_v31, %v5137_v26  ;;  %v4761_v50 = vmul.f32 -1.442695, %v2183_v35  ;;  %v2184_v21 = vadd.f32 %v2101_v59, %v1725_v46  ;;  %v1720_v26 = vunpack.c.h.bf16 %v4700_v8 }
 0x43a   :  { %v2169_v39 = vadd.f32 1.0, %v5694_v13  ;;  %5701 = vpow2.f32 %v4757_v28  ;;  %v4758_v47 = vmul.f32 -1.442695, %v2156_v30  ;;  %v2214_v28 = vadd.f32 %v5133_v53, %v6966_v16 }
 0x43b   :  { %v5696_v18 = vpop.eup %5695  ;;  %v4762_v0 = vmul.f32 -1.442695, %v2184_v21  ;;  %v2215_v53 = vadd.f32 %v5136_v22, %v6698_v62  ;;  %v1723_v46 = vunpack.c.l.bf16 %v4704_v33  ;;  %v2216_v62 = vadd.f32 %v6953_v37, %v6707_v42 }
 0x43c   :  { %5703 = vrcp.f32 %v2169_v39  ;;  %v2170_v60 = vadd.f32 1.0, %v5696_v18  ;;  %v5698_v55 = vpop.eup %5697 }
 0x43d   :  { %v5700_v45 = vpop.eup %5699  ;;  %v2197_v2 = vadd.f32 1.0, %v5698_v55 }
 0x43e   :  { %5705 = vrcp.f32 %v2170_v60  ;;  %v2198_v10 = vadd.f32 1.0, %v5700_v45 }
 0x43f   :  { %5707 = vpow2.f32 %v4758_v47 }
 0x440   :  { %5709 = vpow2.f32 %v4761_v50 }
 0x441   :  { %5711 = vrcp.f32 %v2197_v2 }
 0x444   :  { %v5702_v27 = vpop.eup %5701 }
 0x445   :  { %v2171_v12 = vadd.f32 1.0, %v5702_v27 }
 0x446   :  { %v5704_v17 = vpop.eup %5703 }
 0x447   :  { %v2217_v20 = vmul.f32 %v5704_v17, %v2213_v9  ;;  %5713 = vrcp.f32 %v2171_v12  ;;  %v1726_v17 = vunpack.c.h.bf16 %v4704_v33 }
 0x448   :  { %v5706_v30 = vpop.eup %5705  ;;  %5715 = vpow2.f32 %v4762_v0 }
 0x449   :  { %v2221_v59 = vadd.f32 %v2217_v20, %v1717_v6  ;;  %5717 = vrcp.f32 %v2198_v10  ;;  %v2218_v31 = vmul.f32 %v5706_v30, %v2214_v28  ;;  %v5708_v13 = vpop.eup %5707 }
 0x44a   :  { %v5710_v35 = vpop.eup %5709  ;;  %v2172_v18 = vadd.f32 1.0, %v5708_v13 }
 0x44b   :  { %5719 = vtanh.f32 %v2221_v59  ;;  %v2222_v39 = vadd.f32 %v2218_v31, %v1720_v26  ;;  %v2199_v60 = vadd.f32 1.0, %v5710_v35  ;;  %v5712_v47 = vpop.eup %5711  ;;  %v7001_v35 = vld [vmem:[%s7620_s1 + $0x18] ss:$12 sps:$4 sm:$0xff]  }
 0x44c   :  { %v2229_v2 = vsub.f32 1.0, %v5712_v47  ;;  %v2241_v6 = vmul.f32 %v5712_v47, %v6712_v24  ;;  %v6985_v24 = vld [vmem:[%s7620_s1] ss:$12 sps:$4 sm:$0xff]  }
 0x44d   :  { %5721 = vtanh.f32 %v2222_v39 }
 0x44e   :  { %5723 = vrcp.f32 %v2172_v18  ;;  %v7007_v18 = vld [vmem:[%s7620_s1 + $0x34] ss:$12 sps:$4 sm:$0xff]  }
 0x44f   :  { %5725 = vrcp.f32 %v2199_v60 }
 0x451   :  { %v5714_v50 = vpop.eup %5713 }
 0x452   :  { %v5716_v55 = vpop.eup %5715  ;;  %v2219_v21 = vmul.f32 %v5714_v50, %v2215_v53 }
 0x453   :  { %v5718_v45 = vpop.eup %5717  ;;  %v2200_v0 = vadd.f32 1.0, %v5716_v55 }
 0x454   :  { %v2223_v8 = vadd.f32 %v2219_v21, %v1723_v46  ;;  %v2230_v9 = vsub.f32 1.0, %v5718_v45  ;;  %v2242_v20 = vmul.f32 %v5718_v45, %v6714_v15  ;;  %v6992_v15 = vld [vmem:[%s7620_s1 + $0x1c] ss:$12 sps:$4 sm:$0xff]  }
 0x455   :  { %v5720_v27 = vpop.eup %5719  ;;  %v7016_v46 = vld [vmem:[%s7620_s1 + $0x30] ss:$12 sps:$4 sm:$0xff]  }
 0x456   :  { %5727 = vtanh.f32 %v2223_v8  ;;  %v2233_v10 = vmul.f32 %v5720_v27, %v2229_v2  ;;  %v7040_v8 = vld [vmem:[%s7620_s1 + $0x48] ss:$12 sps:$4 sm:$0xff]  }
 0x457   :  { %v5722_v12 = vpop.eup %5721  ;;  %5729 = vrcp.f32 %v2200_v0 }
 0x458   :  { %v5724_v22 = vpop.eup %5723  ;;  %v2234_v26 = vmul.f32 %v5722_v12, %v2230_v9  ;;  %v6978_v28 = vadd.f32 %v2241_v6, %v2233_v10 }
 0x459   :  { %v2220_v30 = vmul.f32 %v5724_v22, %v2216_v62  ;;  %v5726_v13 = vpop.eup %5725 }
 0x45a   :  { %v6980_v59 = vadd.f32 %v2242_v20, %v2234_v26  ;;  %v2231_v37 = vsub.f32 1.0, %v5726_v13  ;;  %v2243_v60 = vmul.f32 %v5726_v13, %v6725_v44 }
 0x45b   :  { %v2224_v31 = vadd.f32 %v2220_v30, %v1726_v17 }
 0x45c   :  { %v2253_v42 = vpack.c.bf16 %v6980_v59, %v6978_v28 }
 0x45d   :  { %5731 = vtanh.f32 %v2224_v31 }
 0x45e   :  { %4763 = vst [vmem:[%s7623_s3 + $0x18] sm:$0xff] %v2253_v42  ;;  %2639 = vmatmul.mubr.bf16.vlgmr.msra.gmra.mrb[32].mxu0 %v2253_v42  ;;  %2692 = vmatmul.mubr.bf16.vlgmr.msra.gmra.mrb[32].mxu1 %v2253_v42 }
 0x45f   :  { %3162 = vmatpush1.bf16.msra.mxu1 %v6985_v24 }
 0x460   :  { %v5728_v39 = vpop.eup %5727  ;;  %3163 = vmatprep.subr.bf16.mxu1 %v6992_v15 }
 0x461   :  { %v2235_v33 = vmul.f32 %v5728_v39, %v2231_v37  ;;  %v5730_v53 = vpop.eup %5729  ;;  %v4769_v37 = vld [vmem:[%s7621_s0 + $0xd8] sm:$0xff]  ;;  %v4771_v39 = vld [vmem:[%s7621_s0 + $0xe4] sm:$0xff] }
 0x462   :  { %v2232_v50 = vsub.f32 1.0, %v5730_v53  ;;  %v2244_v45 = vmul.f32 %v5730_v53, %v6728_v40  ;;  %v7035_v40 = vld [vmem:[%s7620_s1 + $0x4c] ss:$12 sps:$4 sm:$0xff]  }
 0x463   :  { %v7010_v47 = vadd.f32 %v2243_v60, %v2235_v33  ;;  %3164 = vmatpush1.bf16.msra.mxu1 %v7001_v35  ;;  %v2276_v33 = vunpack.c.l.bf16 %v4769_v37 }
 0x464   :  { %3165 = vmatprep.subr.bf16.mxu1 %v7007_v18 }
 0x467   :  { %v5732_v55 = vpop.eup %5731  ;;  %3166 = vmatpush1.bf16.msra.mxu1 %v7016_v46 }
 0x468   :  { %v2236_v21 = vmul.f32 %v5732_v55, %v2232_v50  ;;  %3167 = vmatprep.subr.bf16.mxu1 %v7035_v40  ;;  %v2279_v50 = vunpack.c.l.bf16 %v4771_v39 }
 0x46a   :  { %v7021_v44 = vadd.f32 %v2244_v45, %v2236_v21 }
 0x46b   :  { %3168 = vmatpush1.bf16.msra.mxu1 %v7040_v8 }
 0x46c   :  { %v2254_v2 = vpack.c.bf16 %v7021_v44, %v7010_v47  ;;  %3169 = vmatprep.subr.bf16.mxu1 %v6746_v63  ;;  %v5477_v63 = vld [vmem:[%s7620_s1 + $0xc8] ss:$12 sps:$4 sm:$0xff]  }
 0x46d   :  { %5168 = vmatprep.subr.bf16.mxu0 %v5477_v63 }
 0x46e   :  { %4764 = vst [vmem:[%s7624_s4 + $0x20] sm:$0xff] %v2254_v2  ;;  %2648 = vmatprep.mubr.bf16.mxu0 %v2254_v2  ;;  %2699 = vmatprep.mubr.bf16.mxu1 %v2254_v2 }
 0x46f   :  { %2649 = vmatmul.mubr.bf16.gmra.mrb[36].mxu0 %v5901_v1  ;;  %2700 = vmatmul.mubr.bf16.gmra.mrb[36].mxu1 %v5901_v1 }
 0x470   :  { %3193 = vmatprep.mubr.bf16.mxu1 %v5901_v1  ;;  %3246 = vmatprep.mubr.bf16.mxu0 %v5901_v1 }
 0x471   :  { %3170 = vmatpush1.bf16.msra.mxu1 %v6751_v23  ;;  %v5478_v23 = vld [vmem:[%s7620_s1 + $0x8] ss:$12 sps:$4 sm:$0xff]  }
 0x472   :  { %3171 = vmatprep.subr.bf16.mxu1 %v6758_v29  ;;  %5169 = vmatpush3.bf16.msra.mxu0 %v5478_v23  ;;  %v5479_v29 = vld [vmem:[%s7620_s1 + $0xe0] ss:$12 sps:$4 sm:$0xff]   ;;  %v2277_v23 = vunpack.c.h.bf16 %v4769_v37 }
 0x473   :  { %5170 = vmatprep.subr.bf16.mxu0 %v5479_v29 }
 0x475   :  { %3172 = vmatpush1.bf16.msra.mxu1 %v6763_v32  ;;  %v5480_v32 = vld [vmem:[%s7620_s1 + $0x20] ss:$12 sps:$4 sm:$0xff]  }
 0x476   :  { %3173 = vmatprep.subr.bf16.mxu1 %v6770_v54  ;;  %5171 = vmatpush3.bf16.msra.mxu0 %v5480_v32  ;;  %v5481_v54 = vld [vmem:[%s7620_s1 + $0xf8] ss:$12 sps:$4 sm:$0xff]  }
 0x477   :  { %5172 = vmatprep.subr.bf16.mxu0 %v5481_v54 }
 0x479   :  { %3174 = vmatpush1.bf16.msra.mxu1 %v6775_v36  ;;  %v5482_v36 = vld [vmem:[%s7620_s1 + $0x38] ss:$12 sps:$4 sm:$0xff]  }
 0x47a   :  { %3175 = vmatprep.subr.bf16.mxu1 %v6782_v57  ;;  %5173 = vmatpush3.bf16.msra.mxu0 %v5482_v36  ;;  %v5483_v57 = vld [vmem:[%s7620_s1 + $0x110] ss:$12 sps:$4 sm:$0xff]  }
 0x47b   :  { %5174 = vmatprep.subr.bf16.mxu0 %v5483_v57 }
 0x47d   :  { %3176 = vmatpush1.bf16.msra.mxu1 %v6787_v38  ;;  %v5484_v38 = vld [vmem:[%s7620_s1 + $0x50] ss:$12 sps:$4 sm:$0xff]  }
 0x47e   :  { %3177 = vmatprep.subr.bf16.mxu1 %v6794_v43  ;;  %5175 = vmatpush3.bf16.msra.mxu0 %v5484_v38  ;;  %v5485_v43 = vld [vmem:[%s7620_s1 + $0x128] ss:$12 sps:$4 sm:$0xff]  }
 0x47f   :  { %5176 = vmatprep.subr.bf16.mxu0 %v5485_v43 }
 0x481   :  { %3178 = vmatpush1.bf16.msra.mxu1 %v6802_v48  ;;  %v5486_v48 = vld [vmem:[%s7620_s1 + $0x68] ss:$12 sps:$4 sm:$0xff]  }
 0x482   :  { %3179 = vmatprep.subr.bf16.mxu1 %v6812_v49  ;;  %5177 = vmatpush3.bf16.msra.mxu0 %v5486_v48  ;;  %v5487_v49 = vld [vmem:[%s7620_s1 + $0x140] ss:$12 sps:$4 sm:$0xff]   ;;  %v2280_v48 = vunpack.c.h.bf16 %v4771_v39 }
 0x483   :  { %5178 = vmatprep.subr.bf16.mxu0 %v5487_v49  ;;  %v4770_v39 = vld [vmem:[%s7621_s0 + $0xe0] ss:$12 sps:$4 sm:$0xff]  }
 0x485   :  { %3180 = vmatpush1.bf16.msra.mxu1 %v6820_v5  ;;  %v5488_v5 = vld [vmem:[%s7620_s1 + $0x80] ss:$12 sps:$4 sm:$0xff]  }
 0x486   :  { %3181 = vmatprep.subr.bf16.mxu1 %v6830_v51  ;;  %5179 = vmatpush3.bf16.msra.mxu0 %v5488_v5  ;;  %v5489_v51 = vld [vmem:[%s7620_s1 + $0x158] ss:$12 sps:$4 sm:$0xff]  }
 0x487   :  { %5180 = vmatprep.subr.bf16.mxu0 %v5489_v51 }
 0x489   :  { %3182 = vmatpush1.bf16.msra.mxu1 %v6838_v58  ;;  %v5490_v58 = vld [vmem:[%s7620_s1 + $0x98] ss:$12 sps:$4 sm:$0xff]  }
 0x48a   :  { %3183 = vmatprep.subr.bf16.mxu1 %v6848_v56  ;;  %5181 = vmatpush3.bf16.msra.mxu0 %v5490_v58  ;;  %v5491_v56 = vld [vmem:[%s7620_s1 + $0x170] ss:$12 sps:$4 sm:$0xff]  }
 0x48b   :  { %5182 = vmatprep.subr.bf16.mxu0 %v5491_v56 }
 0x48d   :  { %3184 = vmatpush1.bf16.msra.mxu1 %v6856_v41  ;;  %v5492_v41 = vld [vmem:[%s7620_s1 + $0xb0] ss:$12 sps:$4 sm:$0xff]  }
 0x48e   :  { %3185 = vmatprep.subr.bf16.mxu1 %v6866_v52  ;;  %5183 = vmatpush3.bf16.msra.mxu0 %v5492_v41  ;;  %v4765_v52 = vld [vmem:[%s7621_s0 + $0xc0] sm:$0xff] }
 0x48f   :  { %3716 = vmatprep.subr.bf16.mxu0 %v6938_v11 }
 0x491   :  { %3186 = vmatpush1.bf16.msra.mxu1 %v6874_v19  ;;  %v4767_v19 = vld [vmem:[%s7621_s0 + $0xcc] sm:$0xff] }
 0x492   :  { %3187 = vmatprep.subr.bf16.mxu1 %v6884_v61  ;;  %v2270_v61 = vunpack.c.l.bf16 %v4765_v52  ;;  %v2274_v11 = vunpack.c.h.bf16 %v4767_v19 }
 0x495   :  { %3188 = vmatpush1.bf16.msra.mxu1 %v6892_v14  ;;  %v2273_v14 = vunpack.c.l.bf16 %v4767_v19  ;;  %v4766_v19 = vld [vmem:[%s7621_s0 + $0xc8] ss:$12 sps:$4 sm:$0xff]  }
 0x496   :  { %3189 = vmatprep.subr.bf16.mxu1 %v6902_v34 }
 0x499   :  { %3190 = vmatpush1.bf16.msra.mxu1 %v6910_v3 }
 0x49a   :  { %3191 = vmatprep.subr.bf16.mxu1 %v6925_v7  ;;  %v2271_v7 = vunpack.c.h.bf16 %v4765_v52 }
 0x49d   :  { %3192 = vmatpush1.bf16.msra.mxu1 %v6920_v4 }
 0x531   :  { %v2640_v34 = vpop.f32.mrb[32].mxu0  ;;  %v5156_v3 = vpop.f32.mrb[32].mxu1 }
 0x532   :  { %v2708_v27 = vadd.f32 %v2640_v34, %v2270_v61  ;;  %v2642_v0 = vpop.f32.mrb[33].mxu0  ;;  %v5157_v6 = vpop.f32.mrb[33].mxu1 }
 0x533   :  { %v5158_v4 = vadd.f32 %v5157_v6, %v5156_v3  ;;  %v2644_v9 = vpop.f32.mrb[34].mxu0  ;;  %v5159_v10 = vpop.f32.mrb[34].mxu1  ;;  %v2736_v20 = vadd.f32 %v2642_v0, %v2271_v7  ;;  %v2272_v3 = vunpack.c.l.bf16 %v4766_v19 }
 0x534   :  { %v4821_v12 = vmul.f32 -1.442695, %v2708_v27  ;;  %v2709_v17 = vadd.f32 %v2644_v9, %v2273_v14  ;;  %v2646_v62 = vpop.f32.mrb[35].mxu0  ;;  %v5160_v22 = vpop.f32.mrb[35].mxu1 }
 0x535   :  { %v5161_v26 = vadd.f32 %v5160_v22, %v5159_v10  ;;  %v2737_v31 = vadd.f32 %v2646_v62, %v2274_v11  ;;  %v4825_v13 = vmul.f32 -1.442695, %v2736_v20  ;;  %v2768_v7 = vadd.f32 %v5158_v4, %v6961_v25 }
 0x536   :  { %5733 = vpow2.f32 %v4821_v12  ;;  %v4822_v30 = vmul.f32 -1.442695, %v2709_v17  ;;  %v2275_v10 = vunpack.c.h.bf16 %v4766_v19 }
 0x537   :  { %v4826_v42 = vmul.f32 -1.442695, %v2737_v31  ;;  %v2769_v11 = vadd.f32 %v5161_v26, %v6966_v16  ;;  %v7137_v16 = vld [vmem:[%s7622_s2 + $0x10] sm:$0xff] }
 0x538   :  { %5735 = vpow2.f32 %v4822_v30 }
 0x539   :  { %5737 = vpow2.f32 %v4825_v13 }
 0x53a   :  { %5739 = vpow2.f32 %v4826_v42 }
 0x540   :  { %v5734_v60 = vpop.eup %5733 }
 0x541   :  { %v2724_v53 = vadd.f32 1.0, %v5734_v60 }
 0x542   :  { %v5736_v55 = vpop.eup %5735  ;;  %v2650_v21 = vpop.f32.mrb[36].mxu0 }
 0x543   :  { %v5162_v45 = vpop.f32.mrb[36].mxu1  ;;  %5741 = vrcp.f32 %v2724_v53  ;;  %v2725_v2 = vadd.f32 1.0, %v5736_v55  ;;  %v2710_v63 = vadd.f32 %v2650_v21, %v2276_v33  ;;  %v2652_v29 = vpop.f32.mrb[37].mxu0  ;;  %v7147_v21 = vld [vmem:[%s7622_s2 + $0x18] sm:$0xff] }
 0x544   :  { %v5163_v32 = vpop.f32.mrb[37].mxu1  ;;  %v2654_v54 = vpop.f32.mrb[38].mxu0  ;;  %v2738_v58 = vadd.f32 %v2652_v29, %v2277_v23  ;;  %v2278_v23 = vunpack.c.l.bf16 %v4770_v39 }
 0x545   :  { %v5164_v36 = vadd.f32 %v5163_v32, %v5162_v45  ;;  %v5165_v57 = vpop.f32.mrb[38].mxu1  ;;  %5743 = vrcp.f32 %v2725_v2  ;;  %v4823_v38 = vmul.f32 -1.442695, %v2710_v63  ;;  %v2711_v43 = vadd.f32 %v2654_v54, %v2279_v50  ;;  %v2656_v49 = vpop.f32.mrb[39].mxu0 }
 0x546   :  { %v5166_v5 = vpop.f32.mrb[39].mxu1  ;;  %v5738_v51 = vpop.eup %5737  ;;  %v2739_v61 = vadd.f32 %v2656_v49, %v2280_v48  ;;  %v4827_v34 = vmul.f32 -1.442695, %v2738_v58 }
 0x547   :  { %5745 = vpow2.f32 %v4823_v38  ;;  %v4824_v56 = vmul.f32 -1.442695, %v2711_v43  ;;  %v5167_v41 = vadd.f32 %v5166_v5, %v5165_v57  ;;  %v5740_v52 = vpop.eup %5739  ;;  %v2752_v14 = vadd.f32 1.0, %v5738_v51 }
 0x548   :  { %v2753_v27 = vadd.f32 1.0, %v5740_v52  ;;  %v4828_v6 = vmul.f32 -1.442695, %v2739_v61  ;;  %v2770_v53 = vadd.f32 %v5164_v36, %v7137_v16  ;;  %v2281_v38 = vunpack.c.h.bf16 %v4770_v39  ;;  %v5528_v39 = vld [vmem:[%s7620_s1 + $0x128] ss:$12 sps:$4 sm:$0xff]  }
 0x549   :  { %5747 = vpow2.f32 %v4824_v56 }
 0x54a   :  { %5749 = vrcp.f32 %v2752_v14 }
 0x54b   :  { %5751 = vpow2.f32 %v4827_v34 }
 0x54c   :  { %5753 = vrcp.f32 %v2753_v27  ;;  %v7221_v27 = vld [vmem:[%s7620_s1 + $0xac] ss:$12 sps:$4 sm:$0xff]  }
 0x54d   :  { %v5742_v0 = vpop.eup %5741  ;;  %5755 = vpow2.f32 %v4828_v6  ;;  %v7233_v6 = vld [vmem:[%s7620_s1 + $0xc4] ss:$12 sps:$4 sm:$0xff]  }
 0x54e   :  { %v2772_v9 = vmul.f32 %v5742_v0, %v2768_v7  ;;  %v7214_v7 = vld [vmem:[%s7620_s1 + $0x90] ss:$12 sps:$4 sm:$0xff]   ;;  %v7226_v0 = vld [vmem:[%s7620_s1 + $0xa8] ss:$12 sps:$4 sm:$0xff]  }
 0x54f   :  { %v5744_v12 = vpop.eup %5743 }
 0x550   :  { %v2776_v17 = vadd.f32 %v2772_v9, %v2272_v3  ;;  %v2773_v62 = vmul.f32 %v5744_v12, %v2769_v11  ;;  %v5508_v9 = vld [vmem:[%s7620_s1 + $0xc8] ss:$12 sps:$4 sm:$0xff]  }
 0x551   :  { %v5746_v22 = vpop.eup %5745  ;;  %v5509_v11 = vld [vmem:[%s7620_s1 + $0x8] ss:$12 sps:$4 sm:$0xff]   ;;  %5196 = vmatprep.subr.bf16.mxu1 %v5508_v9 }
 0x552   :  { %5757 = vtanh.f32 %v2776_v17  ;;  %v2777_v20 = vadd.f32 %v2773_v62, %v2275_v10  ;;  %v2726_v30 = vadd.f32 1.0, %v5746_v22  ;;  %v7241_v10 = vld [vmem:[%s7620_s1 + $0xc0] ss:$12 sps:$4 sm:$0xff]   ;;  %v7251_v12 = vld [vmem:[%s7620_s1 + $0xdc] ss:$12 sps:$4 sm:$0xff]  }
 0x553   :  { %v5748_v31 = vpop.eup %5747  ;;  %v5513_v17 = vld [vmem:[%s7620_s1 + $0xe0] ss:$12 sps:$4 sm:$0xff]   ;;  %v7259_v62 = vld [vmem:[%s7620_s1 + $0xd8] ss:$12 sps:$4 sm:$0xff]  }
 0x554   :  { %5759 = vtanh.f32 %v2777_v20  ;;  %v2727_v25 = vadd.f32 1.0, %v5748_v31  ;;  %v5750_v4 = vpop.eup %5749  ;;  %v5514_v22 = vld [vmem:[%s7620_s1 + $0x20] ss:$12 sps:$4 sm:$0xff]   ;;  %v7277_v31 = vld [vmem:[%s7620_s1 + $0xf0] ss:$12 sps:$4 sm:$0xff]  }
 0x555   :  { %5761 = vrcp.f32 %v2726_v30  ;;  %v5752_v13 = vpop.eup %5751  ;;  %v2784_v37 = vsub.f32 1.0, %v5750_v4  ;;  %v2796_v50 = vmul.f32 %v5750_v4, %v6978_v28  ;;  %v2771_v28 = vadd.f32 %v5167_v41, %v7147_v21  ;;  %v7269_v20 = vld [vmem:[%s7620_s1 + $0xf4] ss:$12 sps:$4 sm:$0xff]   ;;  %v5518_v30 = vld [vmem:[%s7620_s1 + $0xf8] ss:$12 sps:$4 sm:$0xff]  }
 0x556   :  { %5763 = vrcp.f32 %v2727_v25  ;;  %v5754_v26 = vpop.eup %5753  ;;  %v2754_v60 = vadd.f32 1.0, %v5752_v13  ;;  %v5519_v25 = vld [vmem:[%s7620_s1 + $0x38] ss:$12 sps:$4 sm:$0xff]   ;;  %v5523_v13 = vld [vmem:[%s7620_s1 + $0x110] ss:$12 sps:$4 sm:$0xff]  }
 0x557   :  { %v5756_v42 = vpop.eup %5755  ;;  %v2785_v55 = vsub.f32 1.0, %v5754_v26  ;;  %v2797_v32 = vmul.f32 %v5754_v26, %v6980_v59  ;;  %v7287_v4 = vld [vmem:[%s7620_s1 + $0x10c] ss:$12 sps:$4 sm:$0xff]   ;;  %v7295_v26 = vld [vmem:[%s7620_s1 + $0x108] ss:$12 sps:$4 sm:$0xff]  }
 0x558   :  { %v2755_v63 = vadd.f32 1.0, %v5756_v42  ;;  %5765 = vrcp.f32 %v2754_v60  ;;  %v5524_v42 = vld [vmem:[%s7620_s1 + $0x50] ss:$12 sps:$4 sm:$0xff]   ;;  %v5529_v60 = vld [vmem:[%s7620_s1 + $0x68] ss:$12 sps:$4 sm:$0xff]  }
 0x55a   :  { %5767 = vrcp.f32 %v2755_v63  ;;  %v5538_v63 = vld [vmem:[%s7620_s1 + $0x158] ss:$12 sps:$4 sm:$0xff]  }
 0x55c   :  { %v5758_v33 = vpop.eup %5757 }
 0x55d   :  { %v2788_v45 = vmul.f32 %v5758_v33, %v2784_v37  ;;  %v7305_v37 = vld [vmem:[%s7620_s1 + $0x124] ss:$12 sps:$4 sm:$0xff]   ;;  %v7313_v33 = vld [vmem:[%s7620_s1 + $0x120] ss:$12 sps:$4 sm:$0xff]  }
 0x55e   :  { %v5760_v2 = vpop.eup %5759 }
 0x55f   :  { %v5762_v29 = vpop.eup %5761  ;;  %v2789_v54 = vmul.f32 %v5760_v2, %v2785_v55  ;;  %v7150_v57 = vadd.f32 %v2796_v50, %v2788_v45  ;;  %v5533_v50 = vld [vmem:[%s7620_s1 + $0x140] ss:$12 sps:$4 sm:$0xff]   ;;  %v7331_v55 = vld [vmem:[%s7620_s1 + $0x138] ss:$12 sps:$4 sm:$0xff]  }
 0x560   :  { %v2774_v36 = vmul.f32 %v5762_v29, %v2770_v53  ;;  %v5764_v43 = vpop.eup %5763  ;;  %v7323_v53 = vld [vmem:[%s7620_s1 + $0x13c] ss:$12 sps:$4 sm:$0xff]   ;;  %v5534_v45 = vld [vmem:[%s7620_s1 + $0x80] ss:$12 sps:$4 sm:$0xff]   ;;  %v5539_v29 = vld [vmem:[%s7620_s1 + $0x98] ss:$12 sps:$4 sm:$0xff]  }
 0x561   :  { %v7153_v48 = vadd.f32 %v2797_v32, %v2789_v54  ;;  %v2775_v5 = vmul.f32 %v5764_v43, %v2771_v28  ;;  %v7341_v2 = vld [vmem:[%s7620_s1 + $0x154] ss:$12 sps:$4 sm:$0xff]   ;;  %v7359_v32 = vld [vmem:[%s7620_s1 + $0x16c] ss:$12 sps:$4 sm:$0xff]   ;;  %v5543_v54 = vld [vmem:[%s7620_s1 + $0x170] ss:$12 sps:$4 sm:$0xff]  }
 0x562   :  { %v2778_v49 = vadd.f32 %v2774_v36, %v2278_v23  ;;  %v5766_v59 = vpop.eup %5765  ;;  %v7349_v23 = vld [vmem:[%s7620_s1 + $0x150] ss:$12 sps:$4 sm:$0xff]   ;;  %v7367_v36 = vld [vmem:[%s7620_s1 + $0x168] ss:$12 sps:$4 sm:$0xff]  }
 0x563   :  { %v2808_v51 = vpack.c.bf16 %v7153_v48, %v7150_v57  ;;  %v2779_v58 = vadd.f32 %v2775_v5, %v2281_v38  ;;  %v2786_v41 = vsub.f32 1.0, %v5766_v59  ;;  %v2798_v14 = vmul.f32 %v5766_v59, %v7010_v47  ;;  %v7185_v47 = vld [vmem:[%s7620_s1 + $0x64] ss:$12 sps:$4 sm:$0xff]  }
 0x564   :  { %5769 = vtanh.f32 %v2778_v49  ;;  %v5768_v56 = vpop.eup %5767  ;;  %v5544_v38 = vld [vmem:[%s7620_s1 + $0xb0] ss:$12 sps:$4 sm:$0xff]  }
 0x565   :  { %4829 = vst [vmem:[%s7623_s3 + $0x20] sm:$0xff] %v2808_v51  ;;  %3194 = vmatmul.mubr.bf16.vlgmr.msra.gmra.mrb[40].mxu1 %v2808_v51  ;;  %3247 = vmatmul.mubr.bf16.vlgmr.msra.gmra.mrb[40].mxu0 %v2808_v51  ;;  %5771 = vtanh.f32 %v2779_v58  ;;  %v2787_v19 = vsub.f32 1.0, %v5768_v56  ;;  %v5547_v28 = vld [vmem:[%s7620_s1 + $0x4] ss:$12 sps:$4 sm:$0xff]   ;;  %v4833_v49 = vld [vmem:[%s7621_s0 + $0xfc] sm:$0xff] }
 0x566   :  { %3717 = vmatpush1.bf16.msra.mxu0 %v6985_v24  ;;  %5197 = vmatpush3.bf16.msra.mxu1 %v5509_v11  ;;  %v4831_v43 = vld [vmem:[%s7621_s0 + $0xf0] sm:$0xff]  ;;  %v2828_v51 = vunpack.c.l.bf16 %v4833_v49 }
 0x567   :  { %3718 = vmatprep.subr.bf16.mxu0 %v6992_v15  ;;  %v2799_v15 = vmul.f32 %v5768_v56, %v7021_v44  ;;  %v7197_v44 = vld [vmem:[%s7620_s1 + $0x7c] ss:$12 sps:$4 sm:$0xff]   ;;  %5198 = vmatprep.subr.bf16.mxu1 %v5513_v17  ;;  %v2825_v5 = vunpack.c.l.bf16 %v4831_v43  ;;  %v2826_v56 = vunpack.c.h.bf16 %v4831_v43 }
 0x56a   :  { %3719 = vmatpush1.bf16.msra.mxu0 %v7001_v35  ;;  %5199 = vmatpush3.bf16.msra.mxu1 %v5514_v22 }
 0x56b   :  { %3720 = vmatprep.subr.bf16.mxu0 %v7007_v18  ;;  %5200 = vmatprep.subr.bf16.mxu1 %v5518_v30 }
 0x56e   :  { %v5770_v52 = vpop.eup %5769  ;;  %3721 = vmatpush1.bf16.msra.mxu0 %v7016_v46  ;;  %v7190_v46 = vld [vmem:[%s7620_s1 + $0x60] ss:$12 sps:$4 sm:$0xff]   ;;  %5201 = vmatpush3.bf16.msra.mxu1 %v5519_v25 }
 0x56f   :  { %v2790_v61 = vmul.f32 %v5770_v52, %v2786_v41  ;;  %3722 = vmatprep.subr.bf16.mxu0 %v7035_v40  ;;  %v5772_v34 = vpop.eup %5771  ;;  %v7202_v40 = vld [vmem:[%s7620_s1 + $0x78] ss:$12 sps:$4 sm:$0xff]   ;;  %5202 = vmatprep.subr.bf16.mxu1 %v5523_v13 }
 0x570   :  { %v2791_v24 = vmul.f32 %v5772_v34, %v2787_v19 }
 0x571   :  { %v7168_v3 = vadd.f32 %v2798_v14, %v2790_v61  ;;  %v2829_v61 = vunpack.c.h.bf16 %v4833_v49 }
 0x572   :  { %3723 = vmatpush1.bf16.msra.mxu0 %v7040_v8  ;;  %v7171_v35 = vadd.f32 %v2799_v15, %v2791_v24  ;;  %v7209_v8 = vld [vmem:[%s7620_s1 + $0x94] ss:$12 sps:$4 sm:$0xff]   ;;  %5203 = vmatpush3.bf16.msra.mxu1 %v5524_v42 }
 0x573   :  { %3724 = vmatprep.subr.bf16.mxu0 %v7185_v47  ;;  %5204 = vmatprep.subr.bf16.mxu1 %v5528_v39  ;;  %v4835_v39 = vld [vmem:[%s7621_s0 + $0x108] sm:$0xff] }
 0x574   :  { %v2809_v18 = vpack.c.bf16 %v7171_v35, %v7168_v3  ;;  %v2832_v43 = vunpack.c.h.bf16 %v4835_v39 }
 0x576   :  { %4830 = vst [vmem:[%s7624_s4 + $0x18] sm:$0xff] %v2809_v18  ;;  %3203 = vmatprep.mubr.bf16.mxu1 %v2809_v18  ;;  %3254 = vmatprep.mubr.bf16.mxu0 %v2809_v18 }
 0x577   :  { %3204 = vmatmul.mubr.bf16.gmra.mrb[44].mxu1 %v5901_v1  ;;  %3255 = vmatmul.mubr.bf16.gmra.mrb[44].mxu0 %v5901_v1 }
 0x578   :  { %3748 = vmatprep.mubr.bf16.mxu0 %v5901_v1  ;;  %3801 = vmatprep.mubr.bf16.mxu1 %v5901_v1 }
 0x579   :  { %3725 = vmatpush1.bf16.msra.mxu0 %v7190_v46  ;;  %5205 = vmatpush3.bf16.msra.mxu1 %v5529_v60 }
 0x57a   :  { %3726 = vmatprep.subr.bf16.mxu0 %v7197_v44  ;;  %5206 = vmatprep.subr.bf16.mxu1 %v5533_v50  ;;  %v4837_v50 = vld [vmem:[%s7621_s0 + $0x114] sm:$0xff] }
 0x57d   :  { %3727 = vmatpush1.bf16.msra.mxu0 %v7202_v40  ;;  %5207 = vmatpush3.bf16.msra.mxu1 %v5534_v45 }
 0x57e   :  { %3728 = vmatprep.subr.bf16.mxu0 %v7209_v8  ;;  %5208 = vmatprep.subr.bf16.mxu1 %v5538_v63  ;;  %v2831_v63 = vunpack.c.l.bf16 %v4835_v39 }
 0x581   :  { %3729 = vmatpush1.bf16.msra.mxu0 %v7214_v7  ;;  %5209 = vmatpush3.bf16.msra.mxu1 %v5539_v29 }
 0x582   :  { %3730 = vmatprep.subr.bf16.mxu0 %v7221_v27  ;;  %5210 = vmatprep.subr.bf16.mxu1 %v5543_v54 }
 0x585   :  { %3731 = vmatpush1.bf16.msra.mxu0 %v7226_v0  ;;  %5211 = vmatpush3.bf16.msra.mxu1 %v5544_v38  ;;  %v2834_v38 = vunpack.c.l.bf16 %v4837_v50 }
 0x586   :  { %3732 = vmatprep.subr.bf16.mxu0 %v7233_v6  ;;  %4271 = vmatprep.subr.bf16.mxu1 %v5547_v28 }
 0x589   :  { %3733 = vmatpush1.bf16.msra.mxu0 %v7241_v10 }
 0x58a   :  { %3734 = vmatprep.subr.bf16.mxu0 %v7251_v12 }
 0x58d   :  { %3735 = vmatpush1.bf16.msra.mxu0 %v7259_v62 }
 0x58e   :  { %3736 = vmatprep.subr.bf16.mxu0 %v7269_v20 }
 0x591   :  { %3737 = vmatpush1.bf16.msra.mxu0 %v7277_v31 }
 0x592   :  { %3738 = vmatprep.subr.bf16.mxu0 %v7287_v4 }
 0x595   :  { %3739 = vmatpush1.bf16.msra.mxu0 %v7295_v26 }
 0x596   :  { %3740 = vmatprep.subr.bf16.mxu0 %v7305_v37 }
 0x599   :  { %3741 = vmatpush1.bf16.msra.mxu0 %v7313_v33 }
 0x59a   :  { %3742 = vmatprep.subr.bf16.mxu0 %v7323_v53 }
 0x59d   :  { %3743 = vmatpush1.bf16.msra.mxu0 %v7331_v55 }
 0x59e   :  { %3744 = vmatprep.subr.bf16.mxu0 %v7341_v2 }
 0x5a1   :  { %3745 = vmatpush1.bf16.msra.mxu0 %v7349_v23 }
 0x5a2   :  { %3746 = vmatprep.subr.bf16.mxu0 %v7359_v32 }
 0x5a5   :  { %3747 = vmatpush1.bf16.msra.mxu0 %v7367_v36 }
 0x638   :  { %v3195_v58 = vpop.f32.mrb[40].mxu1  ;;  %v5184_v59 = vpop.f32.mrb[40].mxu0 }
 0x639   :  { %v3263_v41 = vadd.f32 %v3195_v58, %v2825_v5  ;;  %v3197_v52 = vpop.f32.mrb[41].mxu1  ;;  %v5185_v19 = vpop.f32.mrb[41].mxu0  ;;  %v2835_v58 = vunpack.c.h.bf16 %v4837_v50 }
 0x63a   :  { %v5186_v14 = vadd.f32 %v5185_v19, %v5184_v59  ;;  %v3199_v34 = vpop.f32.mrb[42].mxu1  ;;  %v5187_v24 = vpop.f32.mrb[42].mxu0  ;;  %v3291_v17 = vadd.f32 %v3197_v52, %v2826_v56 }
 0x63b   :  { %v4887_v15 = vmul.f32 -1.442695, %v3263_v41  ;;  %v3264_v18 = vadd.f32 %v3199_v34, %v2828_v51  ;;  %v3201_v9 = vpop.f32.mrb[43].mxu1  ;;  %v5188_v11 = vpop.f32.mrb[43].mxu0 }
 0x63c   :  { %v5189_v22 = vadd.f32 %v5188_v11, %v5187_v24  ;;  %v3292_v25 = vadd.f32 %v3201_v9, %v2829_v61  ;;  %v4891_v13 = vmul.f32 -1.442695, %v3291_v17  ;;  %v4832_v17 = vld [vmem:[%s7621_s0 + $0xf8] ss:$12 sps:$4 sm:$0xff]  }
 0x63d   :  { %5773 = vpow2.f32 %v4887_v15  ;;  %v4888_v30 = vmul.f32 -1.442695, %v3264_v18  ;;  %v2827_v50 = vunpack.c.l.bf16 %v4832_v17 }
 0x63e   :  { %v4892_v42 = vmul.f32 -1.442695, %v3292_v25 }
 0x63f   :  { %5775 = vpow2.f32 %v4888_v30  ;;  %v7395_v30 = vld [vmem:[%s7622_s2] sm:$0xff] }
 0x640   :  { %5777 = vpow2.f32 %v4891_v13 }
 0x641   :  { %5779 = vpow2.f32 %v4892_v42 }
 0x647   :  { %v5774_v60 = vpop.eup %5773 }
 0x648   :  { %v3279_v45 = vadd.f32 1.0, %v5774_v60  ;;  %v7400_v60 = vld [vmem:[%s7622_s2 + $0x8] sm:$0xff] }
 0x649   :  { %v5776_v29 = vpop.eup %5775 }
 0x64a   :  { %5781 = vrcp.f32 %v3279_v45  ;;  %v3280_v54 = vadd.f32 1.0, %v5776_v29  ;;  %v3205_v28 = vpop.f32.mrb[44].mxu1  ;;  %v5190_v49 = vpop.f32.mrb[44].mxu0  ;;  %v3323_v45 = vadd.f32 %v5186_v14, %v7395_v30 }
 0x64b   :  { %v3265_v5 = vadd.f32 %v3205_v28, %v2831_v63  ;;  %v3207_v51 = vpop.f32.mrb[45].mxu1  ;;  %v5191_v59 = vpop.f32.mrb[45].mxu0  ;;  %v2830_v28 = vunpack.c.h.bf16 %v4832_v17 }
 0x64c   :  { %5783 = vrcp.f32 %v3280_v54  ;;  %v3209_v56 = vpop.f32.mrb[46].mxu1  ;;  %v5192_v41 = vadd.f32 %v5191_v59, %v5190_v49  ;;  %v5193_v52 = vpop.f32.mrb[46].mxu0  ;;  %v3293_v9 = vadd.f32 %v3207_v51, %v2832_v43  ;;  %v3324_v43 = vadd.f32 %v5189_v22, %v7400_v60 }
 0x64d   :  { %v5778_v19 = vpop.eup %5777  ;;  %v4889_v61 = vmul.f32 -1.442695, %v3265_v5  ;;  %v3266_v34 = vadd.f32 %v3209_v56, %v2834_v38  ;;  %v3211_v24 = vpop.f32.mrb[47].mxu1 }
 0x64e   :  { %v5194_v15 = vpop.f32.mrb[47].mxu0  ;;  %v5780_v18 = vpop.eup %5779  ;;  %v3294_v13 = vadd.f32 %v3211_v24, %v2835_v58  ;;  %v3307_v42 = vadd.f32 1.0, %v5778_v19  ;;  %v4893_v63 = vmul.f32 -1.442695, %v3293_v9  ;;  %v3325_v9 = vadd.f32 %v5192_v41, %v7137_v16  ;;  %v5545_v41 = vld [vmem:[%s7620_s1] ss:$12 sps:$4 sm:$0xff]  }
 0x64f   :  { %v5195_v11 = vadd.f32 %v5194_v15, %v5193_v52  ;;  %5785 = vpow2.f32 %v4889_v61  ;;  %v4890_v25 = vmul.f32 -1.442695, %v3266_v34  ;;  %v3308_v39 = vadd.f32 1.0, %v5780_v18  ;;  %v4836_v15 = vld [vmem:[%s7621_s0 + $0x110] ss:$12 sps:$4 sm:$0xff]  }
 0x650   :  { %v4894_v54 = vmul.f32 -1.442695, %v3294_v13 }
 0x651   :  { %5787 = vpow2.f32 %v4890_v25 }
 0x652   :  { %5789 = vrcp.f32 %v3307_v42 }
 0x653   :  { %5791 = vrcp.f32 %v3308_v39 }
 0x654   :  { %v5782_v29 = vpop.eup %5781  ;;  %5793 = vpow2.f32 %v4893_v63 }
 0x655   :  { %v3327_v38 = vmul.f32 %v5782_v29, %v3323_v45  ;;  %5795 = vpow2.f32 %v4894_v54 }
 0x656   :  { %v5784_v49 = vpop.eup %5783 }
 0x657   :  { %v3331_v5 = vadd.f32 %v3327_v38, %v2827_v50  ;;  %v3328_v51 = vmul.f32 %v5784_v49, %v3324_v43  ;;  %v2833_v50 = vunpack.c.l.bf16 %v4836_v15  ;;  %v3326_v49 = vadd.f32 %v5195_v11, %v7147_v21  ;;  %v5548_v21 = vld [vmem:[%s7620_s1 + $0x18] ss:$12 sps:$4 sm:$0xff]   ;;  %v5553_v11 = vld [vmem:[%s7620_s1 + $0x34] ss:$12 sps:$4 sm:$0xff]  }
 0x659   :  { %5797 = vtanh.f32 %v3331_v5  ;;  %v3332_v58 = vadd.f32 %v3328_v51, %v2830_v28  ;;  %v5786_v59 = vpop.eup %5785  ;;  %v2836_v28 = vunpack.c.h.bf16 %v4836_v15 }
 0x65a   :  { %v3281_v56 = vadd.f32 1.0, %v5786_v59 }
 0x65b   :  { %5799 = vtanh.f32 %v3332_v58  ;;  %v5788_v14 = vpop.eup %5787  ;;  %v5550_v58 = vld [vmem:[%s7620_s1 + $0x1c] ss:$12 sps:$4 sm:$0xff]  }
 0x65c   :  { %5801 = vrcp.f32 %v3281_v56  ;;  %v3282_v52 = vadd.f32 1.0, %v5788_v14  ;;  %v5790_v19 = vpop.eup %5789  ;;  %v5551_v56 = vld [vmem:[%s7620_s1 + $0x30] ss:$12 sps:$4 sm:$0xff]  }
 0x65d   :  { %v5792_v61 = vpop.eup %5791  ;;  %v3339_v22 = vsub.f32 1.0, %v5790_v19  ;;  %v3351_v17 = vmul.f32 %v5790_v19, %v7150_v57 }
 0x65e   :  { %5803 = vrcp.f32 %v3282_v52  ;;  %v5794_v34 = vpop.eup %5793  ;;  %v3340_v25 = vsub.f32 1.0, %v5792_v61  ;;  %v3352_v45 = vmul.f32 %v5792_v61, %v7153_v48 }
 0x65f   :  { %v5796_v24 = vpop.eup %5795  ;;  %v3309_v13 = vadd.f32 1.0, %v5794_v34 }
 0x660   :  { %v3310_v63 = vadd.f32 1.0, %v5796_v24 }
 0x661   :  { %5805 = vrcp.f32 %v3309_v13 }
 0x662   :  { %5807 = vrcp.f32 %v3310_v63 }
 0x663   :  { %v5798_v18 = vpop.eup %5797 }
 0x664   :  { %v3343_v42 = vmul.f32 %v5798_v18, %v3339_v22 }
 0x665   :  { %v5800_v39 = vpop.eup %5799 }
 0x666   :  { %v3344_v29 = vmul.f32 %v5800_v39, %v3340_v25  ;;  %v7410_v54 = vadd.f32 %v3351_v17, %v3343_v42  ;;  %v5802_v38 = vpop.eup %5801 }
 0x667   :  { %v3329_v43 = vmul.f32 %v5802_v38, %v3325_v9 }
 0x668   :  { %v7413_v16 = vadd.f32 %v3352_v45, %v3344_v29  ;;  %v5804_v57 = vpop.eup %5803 }
 0x669   :  { %v3333_v5 = vadd.f32 %v3329_v43, %v2833_v50  ;;  %v3330_v48 = vmul.f32 %v5804_v57, %v3326_v49 }
 0x66a   :  { %v3363_v51 = vpack.c.bf16 %v7413_v16, %v7410_v54 }
 0x66b   :  { %5809 = vtanh.f32 %v3333_v5  ;;  %v3334_v59 = vadd.f32 %v3330_v48, %v2836_v28  ;;  %v5806_v14 = vpop.eup %5805 }
 0x66c   :  { %4895 = vst [vmem:[%s7623_s3 + $0x28] sm:$0xff] %v3363_v51  ;;  %3749 = vmatmul.mubr.bf16.vlgmr.msra.gmra.mrb[48].mxu0 %v3363_v51  ;;  %3802 = vmatmul.mubr.bf16.vlgmr.msra.gmra.mrb[48].mxu1 %v3363_v51  ;;  %v5808_v52 = vpop.eup %5807  ;;  %v3341_v19 = vsub.f32 1.0, %v5806_v14  ;;  %v3353_v22 = vmul.f32 %v5806_v14, %v7168_v3  ;;  %v5556_v3 = vld [vmem:[%s7620_s1 + $0x4c] ss:$12 sps:$4 sm:$0xff]  }
 0x66d   :  { %4272 = vmatpush1.bf16.msra.mxu1 %v5545_v41  ;;  %5811 = vtanh.f32 %v3334_v59  ;;  %v3342_v34 = vsub.f32 1.0, %v5808_v52  ;;  %v3354_v9 = vmul.f32 %v5808_v52, %v7171_v35  ;;  %v5554_v35 = vld [vmem:[%s7620_s1 + $0x48] ss:$12 sps:$4 sm:$0xff]   ;;  %v4901_v59 = vld [vmem:[%s7621_s0 + $0x138] sm:$0xff] }
 0x66e   :  { %4273 = vmatprep.subr.bf16.mxu1 %v5550_v58  ;;  %v3386_v52 = vunpack.c.l.bf16 %v4901_v59 }
 0x671   :  { %4274 = vmatpush1.bf16.msra.mxu1 %v5548_v21 }
 0x672   :  { %4275 = vmatprep.subr.bf16.mxu1 %v5553_v11 }
 0x675   :  { %4276 = vmatpush1.bf16.msra.mxu1 %v5551_v56  ;;  %v5810_v61 = vpop.eup %5809  ;;  %v4903_v56 = vld [vmem:[%s7621_s0 + $0x144] sm:$0xff] }
 0x676   :  { %v3345_v24 = vmul.f32 %v5810_v61, %v3341_v19  ;;  %4277 = vmatprep.subr.bf16.mxu1 %v5556_v3  ;;  %v3389_v61 = vunpack.c.l.bf16 %v4903_v56 }
 0x677   :  { %v5812_v15 = vpop.eup %5811 }
 0x678   :  { %v3346_v18 = vmul.f32 %v5812_v15, %v3342_v34  ;;  %v7437_v17 = vadd.f32 %v3353_v22, %v3345_v24  ;;  %v3387_v24 = vunpack.c.h.bf16 %v4901_v59 }
 0x679   :  { %4278 = vmatpush1.bf16.msra.mxu1 %v5554_v35  ;;  %v3390_v35 = vunpack.c.h.bf16 %v4903_v56  ;;  %v7559_v56 = vld [vmem:[%s7622_s2 + $0x18] sm:$0xff] }
 0x67a   :  { %v7439_v25 = vadd.f32 %v3354_v9, %v3346_v18  ;;  %4279 = vmatprep.subr.bf16.mxu1 %v7185_v47  ;;  %v5557_v47 = vld [vmem:[%s7620_s1 + $0xc8] ss:$12 sps:$4 sm:$0xff]  }
 0x67b   :  { %5224 = vmatprep.subr.bf16.mxu0 %v5557_v47 }
 0x67c   :  { %v3364_v13 = vpack.c.bf16 %v7439_v25, %v7437_v17 }
 0x67d   :  { %4280 = vmatpush1.bf16.msra.mxu1 %v7190_v46  ;;  %v5558_v46 = vld [vmem:[%s7620_s1 + $0x8] ss:$12 sps:$4 sm:$0xff]  }
 0x67e   :  { %4896 = vst [vmem:[%s7624_s4 + $0x10] sm:$0xff] %v3364_v13  ;;  %3758 = vmatprep.mubr.bf16.mxu0 %v3364_v13  ;;  %3809 = vmatprep.mubr.bf16.mxu1 %v3364_v13 }
 0x67f   :  { %3759 = vmatmul.mubr.bf16.gmra.mrb[52].mxu0 %v5901_v1  ;;  %3810 = vmatmul.mubr.bf16.gmra.mrb[52].mxu1 %v5901_v1 }
 0x680   :  { %4303 = vmatprep.mubr.bf16.mxu1 %v5901_v1  ;;  %4356 = vmatprep.mubr.bf16.mxu0 %v5901_v1 }
 0x681   :  { %4281 = vmatprep.subr.bf16.mxu1 %v7197_v44  ;;  %5225 = vmatpush3.bf16.msra.mxu0 %v5558_v46  ;;  %v5559_v44 = vld [vmem:[%s7620_s1 + $0xe0] ss:$12 sps:$4 sm:$0xff]  }
 0x682   :  { %4282 = vmatpush1.bf16.msra.mxu1 %v7202_v40  ;;  %v5560_v40 = vld [vmem:[%s7620_s1 + $0x20] ss:$12 sps:$4 sm:$0xff]   ;;  %5226 = vmatprep.subr.bf16.mxu0 %v5559_v44 }
 0x683   :  { %4283 = vmatprep.subr.bf16.mxu1 %v7209_v8  ;;  %v5561_v8 = vld [vmem:[%s7620_s1 + $0xf8] ss:$12 sps:$4 sm:$0xff]  }
 0x685   :  { %5227 = vmatpush3.bf16.msra.mxu0 %v5560_v40 }
 0x686   :  { %4284 = vmatpush1.bf16.msra.mxu1 %v7214_v7  ;;  %v5562_v7 = vld [vmem:[%s7620_s1 + $0x38] ss:$12 sps:$4 sm:$0xff]   ;;  %5228 = vmatprep.subr.bf16.mxu0 %v5561_v8 }
 0x687   :  { %4285 = vmatprep.subr.bf16.mxu1 %v7221_v27  ;;  %v5563_v27 = vld [vmem:[%s7620_s1 + $0x110] ss:$12 sps:$4 sm:$0xff]  }
 0x689   :  { %5229 = vmatpush3.bf16.msra.mxu0 %v5562_v7 }
 0x68a   :  { %4286 = vmatpush1.bf16.msra.mxu1 %v7226_v0  ;;  %v5564_v0 = vld [vmem:[%s7620_s1 + $0x50] ss:$12 sps:$4 sm:$0xff]   ;;  %5230 = vmatprep.subr.bf16.mxu0 %v5563_v27 }
 0x68b   :  { %4287 = vmatprep.subr.bf16.mxu1 %v7233_v6  ;;  %v5565_v6 = vld [vmem:[%s7620_s1 + $0x128] ss:$12 sps:$4 sm:$0xff]  }
 0x68d   :  { %5231 = vmatpush3.bf16.msra.mxu0 %v5564_v0  ;;  %v4898_v0 = vld [vmem:[%s7621_s0 + $0x128] ss:$12 sps:$4 sm:$0xff]  }
 0x68e   :  { %4288 = vmatpush1.bf16.msra.mxu1 %v7241_v10  ;;  %v5566_v10 = vld [vmem:[%s7620_s1 + $0x68] ss:$12 sps:$4 sm:$0xff]   ;;  %5232 = vmatprep.subr.bf16.mxu0 %v5565_v6 }
 0x68f   :  { %4289 = vmatprep.subr.bf16.mxu1 %v7251_v12  ;;  %v5567_v12 = vld [vmem:[%s7620_s1 + $0x140] ss:$12 sps:$4 sm:$0xff]  }
 0x691   :  { %5233 = vmatpush3.bf16.msra.mxu0 %v5566_v10 }
 0x692   :  { %4290 = vmatpush1.bf16.msra.mxu1 %v7259_v62  ;;  %v5568_v62 = vld [vmem:[%s7620_s1 + $0x80] ss:$12 sps:$4 sm:$0xff]   ;;  %5234 = vmatprep.subr.bf16.mxu0 %v5567_v12 }
 0x693   :  { %4291 = vmatprep.subr.bf16.mxu1 %v7269_v20  ;;  %v5569_v20 = vld [vmem:[%s7620_s1 + $0x158] ss:$12 sps:$4 sm:$0xff]  }
 0x695   :  { %5235 = vmatpush3.bf16.msra.mxu0 %v5568_v62 }
 0x696   :  { %4292 = vmatpush1.bf16.msra.mxu1 %v7277_v31  ;;  %v5570_v31 = vld [vmem:[%s7620_s1 + $0x98] ss:$12 sps:$4 sm:$0xff]   ;;  %5236 = vmatprep.subr.bf16.mxu0 %v5569_v20 }
 0x697   :  { %4293 = vmatprep.subr.bf16.mxu1 %v7287_v4  ;;  %v5571_v4 = vld [vmem:[%s7620_s1 + $0x170] ss:$12 sps:$4 sm:$0xff]  }
 0x699   :  { %5237 = vmatpush3.bf16.msra.mxu0 %v5570_v31  ;;  %v3382_v31 = vunpack.c.l.bf16 %v4898_v0 }
 0x69a   :  { %4294 = vmatpush1.bf16.msra.mxu1 %v7295_v26  ;;  %v5572_v26 = vld [vmem:[%s7620_s1 + $0xb0] ss:$12 sps:$4 sm:$0xff]   ;;  %5238 = vmatprep.subr.bf16.mxu0 %v5571_v4 }
 0x69b   :  { %4295 = vmatprep.subr.bf16.mxu1 %v7305_v37  ;;  %v4897_v37 = vld [vmem:[%s7621_s0 + $0x120] sm:$0xff] }
 0x69d   :  { %5239 = vmatpush3.bf16.msra.mxu0 %v5572_v26 }
 0x69e   :  { %4296 = vmatpush1.bf16.msra.mxu1 %v7313_v33  ;;  %v4899_v33 = vld [vmem:[%s7621_s0 + $0x12c] sm:$0xff] }
 0x69f   :  { %4297 = vmatprep.subr.bf16.mxu1 %v7323_v53  ;;  %v3380_v53 = vunpack.c.l.bf16 %v4897_v37  ;;  %v3384_v29 = vunpack.c.h.bf16 %v4899_v33 }
 0x6a2   :  { %4298 = vmatpush1.bf16.msra.mxu1 %v7331_v55  ;;  %v3383_v55 = vunpack.c.l.bf16 %v4899_v33 }
 0x6a3   :  { %4299 = vmatprep.subr.bf16.mxu1 %v7341_v2 }
 0x6a6   :  { %4300 = vmatpush1.bf16.msra.mxu1 %v7349_v23 }
 0x6a7   :  { %4301 = vmatprep.subr.bf16.mxu1 %v7359_v32  ;;  %v3381_v32 = vunpack.c.h.bf16 %v4897_v37 }
 0x6aa   :  { %4302 = vmatpush1.bf16.msra.mxu1 %v7367_v36 }
 0x73f   :  { %v3750_v2 = vpop.f32.mrb[48].mxu0  ;;  %v5212_v23 = vpop.f32.mrb[48].mxu1 }
 0x740   :  { %v3818_v42 = vadd.f32 %v3750_v2, %v3380_v53  ;;  %v3752_v39 = vpop.f32.mrb[49].mxu0  ;;  %v5213_v50 = vpop.f32.mrb[49].mxu1 }
 0x741   :  { %v5214_v45 = vadd.f32 %v5213_v50, %v5212_v23  ;;  %v3754_v63 = vpop.f32.mrb[50].mxu0  ;;  %v5215_v36 = vpop.f32.mrb[50].mxu1  ;;  %v3846_v57 = vadd.f32 %v3752_v39, %v3381_v32 }
 0x742   :  { %v4953_v38 = vmul.f32 -1.442695, %v3818_v42  ;;  %v3819_v28 = vadd.f32 %v3754_v63, %v3383_v55  ;;  %v3756_v43 = vpop.f32.mrb[51].mxu0  ;;  %v5216_v49 = vpop.f32.mrb[51].mxu1  ;;  %v3385_v55 = vunpack.c.h.bf16 %v4898_v0 }
 0x743   :  { %v5217_v41 = vadd.f32 %v5216_v49, %v5215_v36  ;;  %v3847_v48 = vadd.f32 %v3756_v43, %v3384_v29  ;;  %v4957_v51 = vmul.f32 -1.442695, %v3846_v57  ;;  %v3878_v4 = vadd.f32 %v5214_v45, %v7395_v30  ;;  %v7548_v43 = vld [vmem:[%s7622_s2 + $0x10] sm:$0xff] }
 0x744   :  { %5813 = vpow2.f32 %v4953_v38  ;;  %v4954_v5 = vmul.f32 -1.442695, %v3819_v28 }
 0x745   :  { %v4958_v58 = vmul.f32 -1.442695, %v3847_v48  ;;  %v3879_v2 = vadd.f32 %v5217_v41, %v7400_v60  ;;  %v4902_v48 = vld [vmem:[%s7621_s0 + $0x140] ss:$12 sps:$4 sm:$0xff]  }
 0x746   :  { %5815 = vpow2.f32 %v4954_v5 }
 0x747   :  { %5817 = vpow2.f32 %v4957_v51 }
 0x748   :  { %5819 = vpow2.f32 %v4958_v58 }
 0x74e   :  { %v5814_v21 = vpop.eup %5813 }
 0x74f   :  { %v3834_v11 = vadd.f32 1.0, %v5814_v21 }
 0x750   :  { %v5816_v14 = vpop.eup %5815 }
 0x751   :  { %5821 = vrcp.f32 %v3834_v11  ;;  %v3835_v19 = vadd.f32 1.0, %v5816_v14  ;;  %v5818_v13 = vpop.eup %5817 }
 0x752   :  { %v3760_v34 = vpop.f32.mrb[52].mxu0  ;;  %v5218_v22 = vpop.f32.mrb[52].mxu1  ;;  %v3862_v12 = vadd.f32 1.0, %v5818_v13 }
 0x753   :  { %5823 = vrcp.f32 %v3835_v19  ;;  %v3820_v15 = vadd.f32 %v3760_v34, %v3386_v52  ;;  %v3762_v18 = vpop.f32.mrb[53].mxu0  ;;  %v5219_v9 = vpop.f32.mrb[53].mxu1  ;;  %v3388_v19 = vunpack.c.l.bf16 %v4902_v48 }
 0x754   :  { %v3764_v3 = vpop.f32.mrb[54].mxu0  ;;  %v5220_v47 = vadd.f32 %v5219_v9, %v5218_v22  ;;  %v5221_v46 = vpop.f32.mrb[54].mxu1  ;;  %v3848_v6 = vadd.f32 %v3762_v18, %v3387_v24  ;;  %v3391_v22 = vunpack.c.h.bf16 %v4902_v48 }
 0x755   :  { %v4955_v44 = vmul.f32 -1.442695, %v3820_v15  ;;  %v3821_v40 = vadd.f32 %v3764_v3, %v3389_v61  ;;  %v3766_v8 = vpop.f32.mrb[55].mxu0  ;;  %v5222_v7 = vpop.f32.mrb[55].mxu1 }
 0x756   :  { %v5820_v27 = vpop.eup %5819  ;;  %v5223_v10 = vadd.f32 %v5222_v7, %v5221_v46  ;;  %v3849_v20 = vadd.f32 %v3766_v8, %v3390_v35  ;;  %v4959_v33 = vmul.f32 -1.442695, %v3848_v6  ;;  %v3880_v21 = vadd.f32 %v5220_v47, %v7548_v43 }
 0x757   :  { %5825 = vpow2.f32 %v4955_v44  ;;  %v4956_v62 = vmul.f32 -1.442695, %v3821_v40  ;;  %v3863_v26 = vadd.f32 1.0, %v5820_v27 }
 0x758   :  { %v4960_v32 = vmul.f32 -1.442695, %v3849_v20  ;;  %v3881_v15 = vadd.f32 %v5223_v10, %v7559_v56 }
 0x759   :  { %5827 = vpow2.f32 %v4956_v62 }
 0x75a   :  { %5829 = vrcp.f32 %v3862_v12 }
 0x75b   :  { %v5822_v37 = vpop.eup %5821  ;;  %5831 = vrcp.f32 %v3863_v26 }
 0x75c   :  { %v3882_v53 = vmul.f32 %v5822_v37, %v3878_v4  ;;  %5833 = vpow2.f32 %v4959_v33 }
 0x75d   :  { %v5824_v23 = vpop.eup %5823 }
 0x75e   :  { %v3886_v42 = vadd.f32 %v3882_v53, %v3382_v31  ;;  %v3883_v39 = vmul.f32 %v5824_v23, %v3879_v2 }
 0x760   :  { %5835 = vtanh.f32 %v3886_v42  ;;  %v3887_v50 = vadd.f32 %v3883_v39, %v3385_v55 }
 0x761   :  { %5837 = vpow2.f32 %v4960_v32  ;;  %v5826_v63 = vpop.eup %5825 }
 0x762   :  { %5839 = vtanh.f32 %v3887_v50  ;;  %v3836_v30 = vadd.f32 1.0, %v5826_v63 }
 0x763   :  { %v5828_v45 = vpop.eup %5827 }
 0x764   :  { %5841 = vrcp.f32 %v3836_v30  ;;  %v3837_v36 = vadd.f32 1.0, %v5828_v45  ;;  %v5830_v29 = vpop.eup %5829 }
 0x765   :  { %v5832_v38 = vpop.eup %5831  ;;  %v3894_v60 = vsub.f32 1.0, %v5830_v29  ;;  %v3906_v41 = vmul.f32 %v5830_v29, %v7410_v54 }
 0x766   :  { %5843 = vrcp.f32 %v3837_v36  ;;  %v5834_v28 = vpop.eup %5833  ;;  %v3895_v5 = vsub.f32 1.0, %v5832_v38  ;;  %v3907_v11 = vmul.f32 %v5832_v38, %v7413_v16 }
 0x767   :  { %v3864_v59 = vadd.f32 1.0, %v5834_v28 }
 0x769   :  { %5845 = vrcp.f32 %v3864_v59 }
 0x76a   :  { %v5836_v49 = vpop.eup %5835 }
 0x76b   :  { %v5838_v57 = vpop.eup %5837  ;;  %v3898_v51 = vmul.f32 %v5836_v49, %v3894_v60  ;;  %v4967_v49 = vld [vmem:[%s7621_s0 + $0x168] sm:$0xff] }
 0x76c   :  { %v5840_v58 = vpop.eup %5839  ;;  %v3865_v54 = vadd.f32 1.0, %v5838_v57 }
 0x76d   :  { %v3899_v14 = vmul.f32 %v5840_v58, %v3895_v5  ;;  %v7561_v52 = vadd.f32 %v3906_v41, %v3898_v51  ;;  %v4969_v5 = vld [vmem:[%s7621_s0 + $0x174] sm:$0xff]  ;;  %v3941_v51 = vunpack.c.l.bf16 %v4967_v49  ;;  %v3942_v58 = vunpack.c.h.bf16 %v4967_v49  ;;  %v4968_v49 = vld [vmem:[%s7621_s0 + $0x170] ss:$12 sps:$4 sm:$0xff]  }
 0x76e   :  { %v5842_v61 = vpop.eup %5841  ;;  %5847 = vrcp.f32 %v3865_v54  ;;  %v3944_v59 = vunpack.c.l.bf16 %v4969_v5 }
 0x76f   :  { %v7563_v34 = vadd.f32 %v3907_v11, %v3899_v14  ;;  %v3884_v24 = vmul.f32 %v5842_v61, %v3880_v21  ;;  %v3945_v61 = vunpack.c.h.bf16 %v4969_v5 }
 0x770   :  { %v5844_v18 = vpop.eup %5843 }
 0x771   :  { %v3918_v16 = vpack.c.bf16 %v7563_v34, %v7561_v52  ;;  %v3888_v9 = vadd.f32 %v3884_v24, %v3388_v19  ;;  %v3885_v13 = vmul.f32 %v5844_v18, %v3881_v15 }
 0x773   :  { %4961 = vst [vmem:[%s7623_s3 + $0x30] sm:$0xff] %v3918_v16  ;;  %4304 = vmatmul.mubr.bf16.vlgmr.msra.gmra.mrb[56].mxu1 %v3918_v16  ;;  %4357 = vmatmul.mubr.bf16.vlgmr.msra.gmra.mrb[56].mxu0 %v3918_v16  ;;  %5849 = vtanh.f32 %v3888_v9  ;;  %v3889_v3 = vadd.f32 %v3885_v13, %v3391_v22  ;;  %v5846_v35 = vpop.eup %5845  ;;  %v4429_v22 = vld [vmem:[%s7622_s2] sm:$0xff] }
 0x774   :  { %v3896_v46 = vsub.f32 1.0, %v5846_v35  ;;  %v3908_v7 = vmul.f32 %v5846_v35, %v7437_v17  ;;  %v4963_v17 = vld [vmem:[%s7621_s0 + $0x150] sm:$0xff]  ;;  %v4964_v13 = vld [vmem:[%s7621_s0 + $0x158] ss:$12 sps:$4 sm:$0xff]  }
 0x775   :  { %5851 = vtanh.f32 %v3889_v3  ;;  %v3935_v20 = vunpack.c.l.bf16 %v4963_v17  ;;  %v3936_v37 = vunpack.c.h.bf16 %v4963_v17 }
 0x778   :  { %v5848_v47 = vpop.eup %5847 }
 0x779   :  { %v3897_v40 = vsub.f32 1.0, %v5848_v47  ;;  %v3909_v6 = vmul.f32 %v5848_v47, %v7439_v25  ;;  %v4965_v25 = vld [vmem:[%s7621_s0 + $0x15c] sm:$0xff] }
 0x77a   :  { %v3938_v31 = vunpack.c.l.bf16 %v4965_v25 }
 0x77d   :  { %v5850_v44 = vpop.eup %5849 }
 0x77e   :  { %v3900_v8 = vmul.f32 %v5850_v44, %v3896_v46 }
 0x77f   :  { %v5852_v27 = vpop.eup %5851 }
 0x780   :  { %v3901_v0 = vmul.f32 %v5852_v27, %v3897_v40  ;;  %v7573_v10 = vadd.f32 %v3908_v7, %v3900_v8  ;;  %v4430_v7 = vld [vmem:[%s7622_s2 + $0x8] sm:$0xff] }
 0x782   :  { %v7575_v12 = vadd.f32 %v3909_v6, %v3901_v0  ;;  %v3937_v6 = vunpack.c.l.bf16 %v4964_v13 }
 0x784   :  { %v3919_v62 = vpack.c.bf16 %v7575_v12, %v7573_v10 }
 0x786   :  { %4962 = vst [vmem:[%s7624_s4 + $0x8] sm:$0xff] %v3919_v62  ;;  %4313 = vmatprep.mubr.bf16.mxu1 %v3919_v62  ;;  %4364 = vmatprep.mubr.bf16.mxu0 %v3919_v62 }
 0x787   :  { %4314 = vmatmul.mubr.bf16.gmra.mrb[60].mxu1 %v5901_v1  ;;  %4365 = vmatmul.mubr.bf16.gmra.mrb[60].mxu0 %v5901_v1  ;;  %v3939_v1 = vunpack.c.h.bf16 %v4965_v25 }
 0x846   :  { %v4305_v4 = vpop.f32.mrb[56].mxu1  ;;  %v5240_v26 = vpop.f32.mrb[56].mxu0 }
 0x847   :  { %v4373_v33 = vadd.f32 %v4305_v4, %v3935_v20  ;;  %v4307_v53 = vpop.f32.mrb[57].mxu1  ;;  %v5241_v55 = vpop.f32.mrb[57].mxu0  ;;  %v3940_v4 = vunpack.c.h.bf16 %v4964_v13 }
 0x848   :  { %v5242_v2 = vadd.f32 %v5241_v55, %v5240_v26  ;;  %v4309_v23 = vpop.f32.mrb[58].mxu1  ;;  %v5243_v32 = vpop.f32.mrb[58].mxu0  ;;  %v4401_v30 = vadd.f32 %v4307_v53, %v3936_v37 }
 0x849   :  { %v5019_v42 = vmul.f32 -1.442695, %v4373_v33  ;;  %v4374_v39 = vadd.f32 %v4309_v23, %v3938_v31  ;;  %v4311_v50 = vpop.f32.mrb[59].mxu1  ;;  %v5244_v63 = vpop.f32.mrb[59].mxu0 }
 0x84a   :  { %v5245_v45 = vadd.f32 %v5244_v63, %v5243_v32  ;;  %v4402_v29 = vadd.f32 %v4311_v50, %v3939_v1  ;;  %v5023_v38 = vmul.f32 -1.442695, %v4401_v30  ;;  %v4433_v62 = vadd.f32 %v5242_v2, %v4429_v22 }
 0x84b   :  { %5853 = vpow2.f32 %v5019_v42  ;;  %v5020_v36 = vmul.f32 -1.442695, %v4374_v39 }
 0x84c   :  { %v5024_v28 = vmul.f32 -1.442695, %v4402_v29  ;;  %v4434_v26 = vadd.f32 %v5245_v45, %v4430_v7 }
 0x84d   :  { %5855 = vpow2.f32 %v5020_v36 }
 0x84e   :  { %5857 = vpow2.f32 %v5023_v38 }
 0x84f   :  { %5859 = vpow2.f32 %v5024_v28 }
 0x855   :  { %v5854_v60 = vpop.eup %5853 }
 0x856   :  { %v4389_v57 = vadd.f32 1.0, %v5854_v60 }
 0x857   :  { %v5856_v41 = vpop.eup %5855 }
 0x858   :  { %5861 = vrcp.f32 %v4389_v57  ;;  %v4390_v48 = vadd.f32 1.0, %v5856_v41  ;;  %v5858_v14 = vpop.eup %5857 }
 0x859   :  { %v5860_v9 = vpop.eup %5859  ;;  %v4417_v40 = vadd.f32 1.0, %v5858_v14  ;;  %v3946_v14 = vunpack.c.h.bf16 %v4968_v49 }
 0x85a   :  { %5863 = vrcp.f32 %v4390_v48  ;;  %v4315_v21 = vpop.f32.mrb[60].mxu1  ;;  %v5246_v11 = vpop.f32.mrb[60].mxu0  ;;  %v4418_v17 = vadd.f32 1.0, %v5860_v9 }
 0x85b   :  { %v4375_v54 = vadd.f32 %v4315_v21, %v3941_v51  ;;  %v4317_v19 = vpop.f32.mrb[61].mxu1  ;;  %v5247_v24 = vpop.f32.mrb[61].mxu0  ;;  %v3943_v21 = vunpack.c.l.bf16 %v4968_v49 }
 0x85c   :  { %v4319_v15 = vpop.f32.mrb[62].mxu1  ;;  %v5248_v18 = vadd.f32 %v5247_v24, %v5246_v11  ;;  %v5249_v16 = vpop.f32.mrb[62].mxu0  ;;  %v4403_v35 = vadd.f32 %v4317_v19, %v3942_v58 }
 0x85d   :  { %v5021_v3 = vmul.f32 -1.442695, %v4375_v54  ;;  %v4376_v47 = vadd.f32 %v4319_v15, %v3944_v59  ;;  %v4321_v46 = vpop.f32.mrb[63].mxu1  ;;  %v5250_v44 = vpop.f32.mrb[63].mxu0 }
 0x85e   :  { %v5251_v8 = vadd.f32 %v5250_v44, %v5249_v16  ;;  %v4404_v0 = vadd.f32 %v4321_v46, %v3945_v61  ;;  %v5025_v20 = vmul.f32 -1.442695, %v4403_v35  ;;  %v4435_v57 = vadd.f32 %v5248_v18, %v7548_v43 }
 0x85f   :  { %5865 = vpow2.f32 %v5021_v3  ;;  %v5022_v27 = vmul.f32 -1.442695, %v4376_v47 }
 0x860   :  { %v5026_v33 = vmul.f32 -1.442695, %v4404_v0  ;;  %v4436_v19 = vadd.f32 %v5251_v8, %v7559_v56 }
 0x861   :  { %5867 = vpow2.f32 %v5022_v27 }
 0x862   :  { %v5862_v25 = vpop.eup %5861  ;;  %5869 = vrcp.f32 %v4417_v40 }
 0x863   :  { %v4437_v31 = vmul.f32 %v5862_v25, %v4433_v62  ;;  %5871 = vrcp.f32 %v4418_v17 }
 0x864   :  { %v5864_v37 = vpop.eup %5863  ;;  %5873 = vpow2.f32 %v5025_v20 }
 0x865   :  { %v4441_v53 = vadd.f32 %v4437_v31, %v3937_v6  ;;  %v4438_v55 = vmul.f32 %v5864_v37, %v4434_v26 }
 0x867   :  { %5875 = vtanh.f32 %v4441_v53  ;;  %v4442_v23 = vadd.f32 %v4438_v55, %v3940_v4 }
 0x868   :  { %5877 = vpow2.f32 %v5026_v33 }
 0x869   :  { %5879 = vtanh.f32 %v4442_v23  ;;  %v5866_v32 = vpop.eup %5865 }
 0x86a   :  { %v4391_v2 = vadd.f32 1.0, %v5866_v32 }
 0x86b   :  { %v5868_v1 = vpop.eup %5867 }
 0x86c   :  { %v5870_v42 = vpop.eup %5869  ;;  %5881 = vrcp.f32 %v4391_v2  ;;  %v4392_v39 = vadd.f32 1.0, %v5868_v1 }
 0x86d   :  { %v5872_v50 = vpop.eup %5871  ;;  %v4449_v30 = vsub.f32 1.0, %v5870_v42  ;;  %v4461_v29 = vmul.f32 %v5870_v42, %v7561_v52 }
 0x86e   :  { %5883 = vrcp.f32 %v4392_v39  ;;  %v5874_v63 = vpop.eup %5873  ;;  %v4450_v28 = vsub.f32 1.0, %v5872_v50  ;;  %v4462_v5 = vmul.f32 %v5872_v50, %v7563_v34 }
 0x86f   :  { %v4419_v51 = vadd.f32 1.0, %v5874_v63 }
 0x871   :  { %v5876_v45 = vpop.eup %5875  ;;  %5885 = vrcp.f32 %v4419_v51 }
 0x872   :  { %v5878_v36 = vpop.eup %5877  ;;  %v4453_v38 = vmul.f32 %v5876_v45, %v4449_v30 }
 0x873   :  { %v5880_v60 = vpop.eup %5879  ;;  %v4420_v59 = vadd.f32 1.0, %v5878_v36 }
 0x874   :  { %v4465_v41 = vadd.f32 %v4461_v29, %v4453_v38  ;;  %v4454_v48 = vmul.f32 %v5880_v60, %v4450_v28 }
 0x875   :  { %5887 = vrcp.f32 %v4420_v59 }
 0x876   :  { %v4466_v58 = vadd.f32 %v4462_v5, %v4454_v48  ;;  %v5882_v11 = vpop.eup %5881 }
 0x877   :  { %v4439_v54 = vmul.f32 %v5882_v11, %v4435_v57 }
 0x878   :  { %v4473_v52 = vpack.c.bf16 %v4466_v58, %v4465_v41  ;;  %v5884_v61 = vpop.eup %5883 }
 0x879   :  { %v4443_v43 = vadd.f32 %v4439_v54, %v3943_v21  ;;  %v4440_v34 = vmul.f32 %v5884_v61, %v4436_v19 }
 0x87a   :  { %5027 = vst [vmem:[%s7623_s3 + $0x38] sm:$0xff] %v4473_v52 }
 0x87b   :  { %5889 = vtanh.f32 %v4443_v43  ;;  %v4444_v24 = vadd.f32 %v4440_v34, %v3946_v14  ;;  %v5886_v22 = vpop.eup %5885 }
 0x87c   :  { %v4451_v18 = vsub.f32 1.0, %v5886_v22  ;;  %v4463_v9 = vmul.f32 %v5886_v22, %v7573_v10 }
 0x87d   :  { %5891 = vtanh.f32 %v4444_v24 }
 0x87f   :  { %v5888_v15 = vpop.eup %5887 }
 0x880   :  { %v4452_v13 = vsub.f32 1.0, %v5888_v15  ;;  %v4464_v35 = vmul.f32 %v5888_v15, %v7575_v12 }
 0x885   :  { %v5890_v16 = vpop.eup %5889 }
 0x886   :  { %v4455_v3 = vmul.f32 %v5890_v16, %v4451_v18 }
 0x887   :  { %v5892_v56 = vpop.eup %5891 }
 0x888   :  { %v4467_v47 = vadd.f32 %v4463_v9, %v4455_v3  ;;  %v4456_v46 = vmul.f32 %v5892_v56, %v4452_v13 }
 0x88a   :  { %v4468_v44 = vadd.f32 %v4464_v35, %v4456_v46 }
 0x88c   :  { %v4474_v40 = vpack.c.bf16 %v4468_v44, %v4467_v47 }
 0x88e   :  { %4479 = vst [vmem:[%s7624_s4] sm:$0xff] %v4474_v40 }

// kernel: bigru_forward.3
= control target key start
LH: loop header
LB: loop body
LE: loop exit
PB: predicated region body
PF: predicated region fallthrough
CT: control target
= control target key end

     0   :  { %v6205_v1 = vmov 0   ;;  %s7924_s1 = inlined_call_operand.vmem [shape: bf16[256,384], index: 1, kind: input, shape index: {}]   ;;  %s7925_s0 = inlined_call_operand.vmem [shape: bf16[8,32,384], index: 0, kind: input, shape index: {}]   ;;  %s7926_s2 = inlined_call_operand.vmem [shape: f32[32,128], index: 2, kind: input, shape index: {}]   ;;  %s7927_s3 = inlined_call_operand.vmem [shape: bf16[8,16,128], index: 3, kind: output, shape index: {0}]   ;;  %s7928_s4 = inlined_call_operand.vmem [shape: bf16[8,16,128], index: 4, kind: output, shape index: {1}]  }
   0x1   :  { %v6234_v0 = vld [vmem:[%s7924_s1 + $0x4] ss:$12 sps:$4 sm:$0xff]   ;;  %421 = vmatprep.mubr.bf16.mxu0 %v6205_v1  ;;  %474 = vmatprep.mubr.bf16.mxu1 %v6205_v1  ;;  %v6241_v2 = vld [vmem:[%s7924_s1] ss:$12 sps:$4 sm:$0xff]   ;;  %v6247_v3 = vld [vmem:[%s7924_s1 + $0x1c] ss:$12 sps:$4 sm:$0xff]  }
   0x2   :  { %389 = vmatprep.subr.bf16.mxu0 %v6234_v0  ;;  %v6253_v4 = vld [vmem:[%s7924_s1 + $0x18] ss:$12 sps:$4 sm:$0xff]   ;;  %v6259_v5 = vld [vmem:[%s7924_s1 + $0x34] ss:$12 sps:$4 sm:$0xff]   ;;  %v6265_v6 = vld [vmem:[%s7924_s1 + $0x30] ss:$12 sps:$4 sm:$0xff]  }
   0x3   :  { %390 = vmatpush1.bf16.msra.mxu0 %v6241_v2  ;;  %v6271_v7 = vld [vmem:[%s7924_s1 + $0x4c] ss:$12 sps:$4 sm:$0xff]   ;;  %v6277_v8 = vld [vmem:[%s7924_s1 + $0x48] ss:$12 sps:$4 sm:$0xff]   ;;  %v6283_v9 = vld [vmem:[%s7924_s1 + $0x64] ss:$12 sps:$4 sm:$0xff]  }
   0x4   :  { %391 = vmatprep.subr.bf16.mxu0 %v6247_v3  ;;  %v6289_v10 = vld [vmem:[%s7924_s1 + $0x60] ss:$12 sps:$4 sm:$0xff]   ;;  %v6295_v11 = vld [vmem:[%s7924_s1 + $0x7c] ss:$12 sps:$4 sm:$0xff]   ;;  %v6300_v12 = vld [vmem:[%s7924_s1 + $0x78] ss:$12 sps:$4 sm:$0xff]  }
   0x5   :  { %v6306_v13 = vld [vmem:[%s7924_s1 + $0x94] ss:$12 sps:$4 sm:$0xff]   ;;  %v6318_v16 = vld [vmem:[%s7924_s1 + $0x90] ss:$12 sps:$4 sm:$0xff]   ;;  %v6331_v19 = vld [vmem:[%s7924_s1 + $0xac] ss:$12 sps:$4 sm:$0xff]  }
   0x6   :  { %v5598_v14 = vld [vmem:[%s7924_s1 + $0xc8] ss:$12 sps:$4 sm:$0xff]   ;;  %v5603_v17 = vld [vmem:[%s7924_s1 + $0xe0] ss:$12 sps:$4 sm:$0xff]   ;;  %v5608_v21 = vld [vmem:[%s7924_s1 + $0xf8] ss:$12 sps:$4 sm:$0xff]  }
   0x7   :  { %392 = vmatpush1.bf16.msra.mxu0 %v6253_v4  ;;  %v5600_v15 = vld [vmem:[%s7924_s1 + $0x8] ss:$12 sps:$4 sm:$0xff]   ;;  %5332 = vmatprep.subr.bf16.mxu1 %v5598_v14  ;;  %v5605_v18 = vld [vmem:[%s7924_s1 + $0x20] ss:$12 sps:$4 sm:$0xff]   ;;  %v6344_v22 = vld [vmem:[%s7924_s1 + $0xc4] ss:$12 sps:$4 sm:$0xff]  }
   0x8   :  { %393 = vmatprep.subr.bf16.mxu0 %v6259_v5  ;;  %5333 = vmatpush3.bf16.msra.mxu1 %v5600_v15  ;;  %v6336_v20 = vld [vmem:[%s7924_s1 + $0xa8] ss:$12 sps:$4 sm:$0xff]   ;;  %v5610_v23 = vld [vmem:[%s7924_s1 + $0x38] ss:$12 sps:$4 sm:$0xff]   ;;  %v5611_v24 = vld [vmem:[%s7924_s1 + $0x110] ss:$12 sps:$4 sm:$0xff]  }
   0x9   :  { %5334 = vmatprep.subr.bf16.mxu1 %v5603_v17  ;;  %v6357_v25 = vld [vmem:[%s7924_s1 + $0xc0] ss:$12 sps:$4 sm:$0xff]   ;;  %v5612_v26 = vld [vmem:[%s7924_s1 + $0x50] ss:$12 sps:$4 sm:$0xff]   ;;  %v5613_v27 = vld [vmem:[%s7924_s1 + $0x128] ss:$12 sps:$4 sm:$0xff]  }
   0xa   :  { %v6370_v28 = vld [vmem:[%s7924_s1 + $0xdc] ss:$12 sps:$4 sm:$0xff]   ;;  %v6375_v29 = vld [vmem:[%s7924_s1 + $0xd8] ss:$12 sps:$4 sm:$0xff]   ;;  %v5615_v31 = vld [vmem:[%s7924_s1 + $0x140] ss:$12 sps:$4 sm:$0xff]  }
   0xb   :  { %394 = vmatpush1.bf16.msra.mxu0 %v6265_v6  ;;  %v5614_v30 = vld [vmem:[%s7924_s1 + $0x68] ss:$12 sps:$4 sm:$0xff]   ;;  %v6393_v33 = vld [vmem:[%s7924_s1 + $0xf0] ss:$12 sps:$4 sm:$0xff]   ;;  %v5616_v34 = vld [vmem:[%s7924_s1 + $0x80] ss:$12 sps:$4 sm:$0xff]  }
   0xc   :  { %395 = vmatprep.subr.bf16.mxu0 %v6271_v7  ;;  %5335 = vmatpush3.bf16.msra.mxu1 %v5605_v18  ;;  %v6388_v32 = vld [vmem:[%s7924_s1 + $0xf4] ss:$12 sps:$4 sm:$0xff]   ;;  %v5617_v35 = vld [vmem:[%s7924_s1 + $0x158] ss:$12 sps:$4 sm:$0xff]   ;;  %v5619_v39 = vld [vmem:[%s7924_s1 + $0x170] ss:$12 sps:$4 sm:$0xff]  }
   0xd   :  { %5336 = vmatprep.subr.bf16.mxu1 %v5608_v21  ;;  %v5590_v36 = vld [vmem:[%s7924_s1 + $0x10c] ss:$12 sps:$4 sm:$0xff]   ;;  %v5592_v38 = vld [vmem:[%s7924_s1 + $0x108] ss:$12 sps:$4 sm:$0xff]   ;;  %v5593_v40 = vld [vmem:[%s7924_s1 + $0x124] ss:$12 sps:$4 sm:$0xff]  }
   0xe   :  { %v5618_v37 = vld [vmem:[%s7924_s1 + $0x98] ss:$12 sps:$4 sm:$0xff]   ;;  %v5620_v41 = vld [vmem:[%s7924_s1 + $0xb0] ss:$12 sps:$4 sm:$0xff]   ;;  %v5595_v42 = vld [vmem:[%s7924_s1 + $0x120] ss:$12 sps:$4 sm:$0xff]  }
   0xf   :  { %396 = vmatpush1.bf16.msra.mxu0 %v6277_v8  ;;  %v5596_v43 = vld [vmem:[%s7924_s1 + $0x13c] ss:$12 sps:$4 sm:$0xff]   ;;  %v5599_v44 = vld [vmem:[%s7924_s1 + $0x138] ss:$12 sps:$4 sm:$0xff]   ;;  %v5601_v45 = vld [vmem:[%s7924_s1 + $0x154] ss:$12 sps:$4 sm:$0xff]  }
  0x10   :  { %397 = vmatprep.subr.bf16.mxu0 %v6283_v9  ;;  %5337 = vmatpush3.bf16.msra.mxu1 %v5610_v23  ;;  %v5604_v46 = vld [vmem:[%s7924_s1 + $0x150] ss:$12 sps:$4 sm:$0xff]   ;;  %v5606_v47 = vld [vmem:[%s7924_s1 + $0x16c] ss:$12 sps:$4 sm:$0xff]   ;;  %v5609_v48 = vld [vmem:[%s7924_s1 + $0x168] ss:$12 sps:$4 sm:$0xff]  }
  0x11   :  { %5338 = vmatprep.subr.bf16.mxu1 %v5611_v24  ;;  %v5621_v49 = vld [vmem:[%s7924_s1 + $0xc8] ss:$12 sps:$4 sm:$0xff]   ;;  %v5623_v51 = vld [vmem:[%s7924_s1 + $0xe0] ss:$12 sps:$4 sm:$0xff]   ;;  %v5625_v53 = vld [vmem:[%s7924_s1 + $0xf8] ss:$12 sps:$4 sm:$0xff]  }
  0x12   :  { %v5622_v50 = vld [vmem:[%s7924_s1 + $0x8] ss:$12 sps:$4 sm:$0xff]   ;;  %v5624_v52 = vld [vmem:[%s7924_s1 + $0x20] ss:$12 sps:$4 sm:$0xff]   ;;  %v5626_v54 = vld [vmem:[%s7924_s1 + $0x38] ss:$12 sps:$4 sm:$0xff]  }
  0x13   :  { %398 = vmatpush1.bf16.msra.mxu0 %v6289_v10  ;;  %v5627_v55 = vld [vmem:[%s7924_s1 + $0x110] ss:$12 sps:$4 sm:$0xff]   ;;  %v5629_v57 = vld [vmem:[%s7924_s1 + $0x128] ss:$12 sps:$4 sm:$0xff]   ;;  %v5631_v59 = vld [vmem:[%s7924_s1 + $0x140] ss:$12 sps:$4 sm:$0xff]  }
  0x14   :  { %399 = vmatprep.subr.bf16.mxu0 %v6295_v11  ;;  %5339 = vmatpush3.bf16.msra.mxu1 %v5612_v26  ;;  %v5628_v56 = vld [vmem:[%s7924_s1 + $0x50] ss:$12 sps:$4 sm:$0xff]   ;;  %v5630_v58 = vld [vmem:[%s7924_s1 + $0x68] ss:$12 sps:$4 sm:$0xff]   ;;  %v5632_v60 = vld [vmem:[%s7924_s1 + $0x80] ss:$12 sps:$4 sm:$0xff]  }
  0x15   :  { %5340 = vmatprep.subr.bf16.mxu1 %v5613_v27  ;;  %v5633_v61 = vld [vmem:[%s7924_s1 + $0x158] ss:$12 sps:$4 sm:$0xff]   ;;  %v5635_v63 = vld [vmem:[%s7924_s1 + $0x170] ss:$12 sps:$4 sm:$0xff]  }
  0x16   :  { %v5634_v62 = vld [vmem:[%s7924_s1 + $0x98] ss:$12 sps:$4 sm:$0xff]  }
  0x17   :  { %400 = vmatpush1.bf16.msra.mxu0 %v6300_v12 }
  0x18   :  { %401 = vmatprep.subr.bf16.mxu0 %v6306_v13  ;;  %5341 = vmatpush3.bf16.msra.mxu1 %v5614_v30  ;;  %v51_v30 = vld [vmem:[%s7925_s0 + $0x24] sm:$0xff] }
  0x19   :  { %5342 = vmatprep.subr.bf16.mxu1 %v5615_v31 }
  0x1b   :  { %402 = vmatpush1.bf16.msra.mxu0 %v6318_v16 }
  0x1c   :  { %403 = vmatprep.subr.bf16.mxu0 %v6331_v19  ;;  %5343 = vmatpush3.bf16.msra.mxu1 %v5616_v34 }
  0x1d   :  { %5344 = vmatprep.subr.bf16.mxu1 %v5617_v35  ;;  %v62_v35 = vunpack.c.l.bf16 %v51_v30 }
  0x1f   :  { %404 = vmatpush1.bf16.msra.mxu0 %v6336_v20 }
  0x20   :  { %405 = vmatprep.subr.bf16.mxu0 %v6344_v22  ;;  %5345 = vmatpush3.bf16.msra.mxu1 %v5618_v37 }
  0x21   :  { %5346 = vmatprep.subr.bf16.mxu1 %v5619_v39 }
  0x23   :  { %406 = vmatpush1.bf16.msra.mxu0 %v6357_v25 }
  0x24   :  { %407 = vmatprep.subr.bf16.mxu0 %v6370_v28  ;;  %5347 = vmatpush3.bf16.msra.mxu1 %v5620_v41 }
  0x25   :  { %959 = vmatprep.subr.bf16.mxu1 %v6234_v0  ;;  %v5636_v0 = vld [vmem:[%s7924_s1 + $0xb0] ss:$12 sps:$4 sm:$0xff]  }
  0x27   :  { %408 = vmatpush1.bf16.msra.mxu0 %v6375_v29  ;;  %475 = vmatmul.mubr.bf16.vlgmr.msra.gmra.mrb[0].mxu1 %v6205_v1 }
  0x28   :  { %409 = vmatprep.subr.bf16.mxu0 %v6388_v32  ;;  %482 = vmatprep.mubr.bf16.mxu1 %v6205_v1 }
  0x29   :  { %960 = vmatpush1.bf16.msra.mxu1 %v6241_v2  ;;  %v6197_v2 = vld [vmem:[%s7924_s1 + $0x4] ss:$12 sps:$4 sm:$0xff]  }
  0x2a   :  { %961 = vmatprep.subr.bf16.mxu1 %v6247_v3 }
  0x2b   :  { %410 = vmatpush1.bf16.msra.mxu0 %v6393_v33 }
  0x2c   :  { %411 = vmatprep.subr.bf16.mxu0 %v5590_v36 }
  0x2d   :  { %962 = vmatpush1.bf16.msra.mxu1 %v6253_v4 }
  0x2e   :  { %963 = vmatprep.subr.bf16.mxu1 %v6259_v5 }
  0x2f   :  { %412 = vmatpush1.bf16.msra.mxu0 %v5592_v38  ;;  %483 = vmatmul.mubr.bf16.gmra.mrb[4].mxu1 %v6205_v1 }
  0x30   :  { %413 = vmatprep.subr.bf16.mxu0 %v5593_v40  ;;  %991 = vmatprep.mubr.bf16.mxu1 %v6205_v1 }
  0x31   :  { %964 = vmatpush1.bf16.msra.mxu1 %v6265_v6 }
  0x32   :  { %965 = vmatprep.subr.bf16.mxu1 %v6271_v7 }
  0x33   :  { %414 = vmatpush1.bf16.msra.mxu0 %v5595_v42 }
  0x34   :  { %415 = vmatprep.subr.bf16.mxu0 %v5596_v43 }
  0x35   :  { %966 = vmatpush1.bf16.msra.mxu1 %v6277_v8 }
  0x36   :  { %967 = vmatprep.subr.bf16.mxu1 %v6283_v9  ;;  %v45_v9 = vld [vmem:[%s7925_s0] sm:$0xff] }
  0x37   :  { %416 = vmatpush1.bf16.msra.mxu0 %v5599_v44 }
  0x38   :  { %417 = vmatprep.subr.bf16.mxu0 %v5601_v45 }
  0x39   :  { %968 = vmatpush1.bf16.msra.mxu1 %v6289_v10 }
  0x3a   :  { %969 = vmatprep.subr.bf16.mxu1 %v6295_v11  ;;  %v47_v11 = vld [vmem:[%s7925_s0 + $0xc] sm:$0xff] }
  0x3b   :  { %418 = vmatpush1.bf16.msra.mxu0 %v5604_v46  ;;  %v56_v17 = vunpack.c.l.bf16 %v47_v11  ;;  %v57_v24 = vunpack.c.h.bf16 %v47_v11 }
  0x3c   :  { %419 = vmatprep.subr.bf16.mxu0 %v5606_v47 }
  0x3d   :  { %970 = vmatpush1.bf16.msra.mxu1 %v6300_v12 }
  0x3e   :  { %971 = vmatprep.subr.bf16.mxu1 %v6306_v13  ;;  %v53_v13 = vunpack.c.l.bf16 %v45_v9 }
  0x3f   :  { %420 = vmatpush1.bf16.msra.mxu0 %v5609_v48 }
  0x40   :  { %5360 = vmatprep.subr.bf16.mxu0 %v5621_v49 }
  0x41   :  { %972 = vmatpush1.bf16.msra.mxu1 %v6318_v16 }
  0x42   :  { %422 = vmatmul.mubr.bf16.vlgmr.msra.gmra.mrb[0].mxu0 %v6205_v1  ;;  %973 = vmatprep.subr.bf16.mxu1 %v6331_v19 }
  0x43   :  { %431 = vmatprep.mubr.bf16.mxu0 %v6205_v1  ;;  %5361 = vmatpush3.bf16.msra.mxu0 %v5622_v50 }
  0x44   :  { %5362 = vmatprep.subr.bf16.mxu0 %v5623_v51 }
  0x45   :  { %974 = vmatpush1.bf16.msra.mxu1 %v6336_v20  ;;  %v54_v20 = vunpack.c.h.bf16 %v45_v9 }
  0x46   :  { %975 = vmatprep.subr.bf16.mxu1 %v6344_v22 }
  0x47   :  { %5363 = vmatpush3.bf16.msra.mxu0 %v5624_v52 }
  0x48   :  { %5364 = vmatprep.subr.bf16.mxu0 %v5625_v53 }
  0x49   :  { %976 = vmatpush1.bf16.msra.mxu1 %v6357_v25  ;;  %v49_v25 = vld [vmem:[%s7925_s0 + $0x18] sm:$0xff] }
  0x4a   :  { %432 = vmatmul.mubr.bf16.gmra.mrb[4].mxu0 %v6205_v1  ;;  %977 = vmatprep.subr.bf16.mxu1 %v6370_v28  ;;  %v60_v34 = vunpack.c.h.bf16 %v49_v25 }
  0x4b   :  { %1044 = vmatprep.mubr.bf16.mxu0 %v6205_v1  ;;  %5365 = vmatpush3.bf16.msra.mxu0 %v5626_v54 }
  0x4c   :  { %5366 = vmatprep.subr.bf16.mxu0 %v5627_v55 }
  0x4d   :  { %978 = vmatpush1.bf16.msra.mxu1 %v6375_v29 }
  0x4e   :  { %979 = vmatprep.subr.bf16.mxu1 %v6388_v32  ;;  %v59_v32 = vunpack.c.l.bf16 %v49_v25 }
  0x4f   :  { %5367 = vmatpush3.bf16.msra.mxu0 %v5628_v56  ;;  %v6547_v56 = vld [vmem:[%s7926_s2] sm:$0xff] }
  0x50   :  { %5368 = vmatprep.subr.bf16.mxu0 %v5629_v57 }
  0x51   :  { %980 = vmatpush1.bf16.msra.mxu1 %v6393_v33 }
  0x52   :  { %981 = vmatprep.subr.bf16.mxu1 %v5590_v36 }
  0x53   :  { %5369 = vmatpush3.bf16.msra.mxu0 %v5630_v58 }
  0x54   :  { %5370 = vmatprep.subr.bf16.mxu0 %v5631_v59 }
  0x55   :  { %982 = vmatpush1.bf16.msra.mxu1 %v5592_v38 }
  0x56   :  { %983 = vmatprep.subr.bf16.mxu1 %v5593_v40 }
  0x57   :  { %5371 = vmatpush3.bf16.msra.mxu0 %v5632_v60  ;;  %v46_v60 = vld [vmem:[%s7925_s0 + $0x8] ss:$12 sps:$4 sm:$0xff]  }
  0x58   :  { %5372 = vmatprep.subr.bf16.mxu0 %v5633_v61 }
  0x59   :  { %984 = vmatpush1.bf16.msra.mxu1 %v5595_v42  ;;  %v63_v42 = vunpack.c.h.bf16 %v51_v30 }
  0x5a   :  { %985 = vmatprep.subr.bf16.mxu1 %v5596_v43 }
  0x5b   :  { %5373 = vmatpush3.bf16.msra.mxu0 %v5634_v62 }
  0x5c   :  { %5374 = vmatprep.subr.bf16.mxu0 %v5635_v63 }
  0x5d   :  { %986 = vmatpush1.bf16.msra.mxu1 %v5599_v44 }
  0x5e   :  { %987 = vmatprep.subr.bf16.mxu1 %v5601_v45 }
  0x5f   :  { %5375 = vmatpush3.bf16.msra.mxu0 %v5636_v0 }
  0x60   :  { %1530 = vmatprep.subr.bf16.mxu0 %v6197_v2  ;;  %v6557_v2 = vld [vmem:[%s7926_s2 + $0x8] sm:$0xff] }
  0x61   :  { %988 = vmatpush1.bf16.msra.mxu1 %v5604_v46 }
  0x62   :  { %989 = vmatprep.subr.bf16.mxu1 %v5606_v47 }
  0x65   :  { %990 = vmatpush1.bf16.msra.mxu1 %v5609_v48 }
  0xfa   :  { %v5348_v3 = vpop.f32.mrb[0].mxu1 }
  0xfb   :  { %v5349_v4 = vpop.f32.mrb[1].mxu1 }
  0xfc   :  { %v6524_v5 = vadd.f32 %v5349_v4, %v5348_v3  ;;  %v5351_v6 = vpop.f32.mrb[2].mxu1  ;;  %v55_v4 = vunpack.c.l.bf16 %v46_v60 }
  0xfd   :  { %v5352_v7 = vpop.f32.mrb[3].mxu1 }
  0xfe   :  { %v6526_v8 = vadd.f32 %v5352_v7, %v5351_v6  ;;  %v551_v63 = vadd.f32 %v6524_v5, %v6547_v56  ;;  %v6564_v5 = vld [vmem:[%s7926_s2 + $0x10] sm:$0xff] }
 0x100   :  { %v552_v11 = vadd.f32 %v6526_v8, %v6557_v2 }
 0x102   :  { %v5354_v10 = vpop.f32.mrb[4].mxu1 }
 0x103   :  { %v5355_v12 = vpop.f32.mrb[5].mxu1 }
 0x104   :  { %v6534_v14 = vadd.f32 %v5355_v12, %v5354_v10  ;;  %v5357_v15 = vpop.f32.mrb[6].mxu1  ;;  %v58_v10 = vunpack.c.h.bf16 %v46_v60  ;;  %v6201_v60 = vld [vmem:[%s7924_s1 + $0x34] ss:$12 sps:$4 sm:$0xff]  }
 0x105   :  { %v5358_v16 = vpop.f32.mrb[7].mxu1 }
 0x106   :  { %v6536_v18 = vadd.f32 %v5358_v16, %v5357_v15  ;;  %v553_v8 = vadd.f32 %v6534_v14, %v6564_v5 }
 0x115   :  { %v423_v19 = vpop.f32.mrb[0].mxu0 }
 0x116   :  { %v491_v21 = vadd.f32 %v423_v19, %v53_v13  ;;  %v425_v22 = vpop.f32.mrb[1].mxu0 }
 0x117   :  { %v427_v23 = vpop.f32.mrb[2].mxu0  ;;  %v519_v29 = vadd.f32 %v425_v22, %v54_v20 }
 0x118   :  { %v4690_v26 = vmul.f32 -1.442695, %v491_v21  ;;  %v492_v27 = vadd.f32 %v427_v23, %v56_v17  ;;  %v429_v28 = vpop.f32.mrb[3].mxu0  ;;  %v50_v17 = vld [vmem:[%s7925_s0 + $0x20] ss:$12 sps:$4 sm:$0xff]   ;;  %v6574_v21 = vld [vmem:[%s7926_s2 + $0x18] sm:$0xff] }
 0x119   :  { %v520_v33 = vadd.f32 %v429_v28, %v57_v24  ;;  %v4694_v36 = vmul.f32 -1.442695, %v519_v29  ;;  %v61_v23 = vunpack.c.l.bf16 %v50_v17 }
 0x11a   :  { %5877 = vpow2.f32 %v4690_v26  ;;  %v4691_v31 = vmul.f32 -1.442695, %v492_v27  ;;  %v64_v26 = vunpack.c.h.bf16 %v50_v17  ;;  %v554_v27 = vadd.f32 %v6536_v18, %v6574_v21  ;;  %v6690_v17 = vld [vmem:[%s7924_s1 + $0xdc] ss:$12 sps:$4 sm:$0xff]  }
 0x11b   :  { %v4695_v40 = vmul.f32 -1.442695, %v520_v33 }
 0x11c   :  { %5879 = vpow2.f32 %v4691_v31 }
 0x11d   :  { %v433_v37 = vpop.f32.mrb[4].mxu0  ;;  %5881 = vpow2.f32 %v4694_v36 }
 0x11e   :  { %v493_v38 = vadd.f32 %v433_v37, %v59_v32  ;;  %v435_v39 = vpop.f32.mrb[5].mxu0 }
 0x11f   :  { %v437_v41 = vpop.f32.mrb[6].mxu0  ;;  %v521_v44 = vadd.f32 %v435_v39, %v60_v34 }
 0x120   :  { %v4692_v43 = vmul.f32 -1.442695, %v493_v38  ;;  %v494_v45 = vadd.f32 %v437_v41, %v62_v35  ;;  %v439_v46 = vpop.f32.mrb[7].mxu0 }
 0x121   :  { %v522_v48 = vadd.f32 %v439_v46, %v63_v42  ;;  %v4696_v50 = vmul.f32 -1.442695, %v521_v44 }
 0x122   :  { %5883 = vpow2.f32 %v4692_v43  ;;  %v4693_v47 = vmul.f32 -1.442695, %v494_v45 }
 0x123   :  { %5885 = vpow2.f32 %v4695_v40  ;;  %v4697_v54 = vmul.f32 -1.442695, %v522_v48 }
 0x124   :  { %v5878_v49 = vpop.eup %5877  ;;  %5887 = vpow2.f32 %v4693_v47 }
 0x125   :  { %v507_v51 = vadd.f32 1.0, %v5878_v49 }
 0x126   :  { %v5880_v52 = vpop.eup %5879 }
 0x127   :  { %5889 = vrcp.f32 %v507_v51  ;;  %v508_v53 = vadd.f32 1.0, %v5880_v52  ;;  %v5882_v55 = vpop.eup %5881  ;;  %v6198_v51 = vld [vmem:[%s7924_s1] ss:$12 sps:$4 sm:$0xff]  }
 0x128   :  { %5891 = vpow2.f32 %v4696_v50  ;;  %v535_v62 = vadd.f32 1.0, %v5882_v55  ;;  %v6199_v55 = vld [vmem:[%s7924_s1 + $0x1c] ss:$12 sps:$4 sm:$0xff]  }
 0x129   :  { %5893 = vrcp.f32 %v508_v53 }
 0x12a   :  { %5895 = vpow2.f32 %v4697_v54 }
 0x12c   :  { %v5884_v57 = vpop.eup %5883 }
 0x12d   :  { %v5886_v58 = vpop.eup %5885  ;;  %v509_v59 = vadd.f32 1.0, %v5884_v57 }
 0x12e   :  { %v5888_v61 = vpop.eup %5887  ;;  %v536_v3 = vadd.f32 1.0, %v5886_v58  ;;  %v6200_v58 = vld [vmem:[%s7924_s1 + $0x18] ss:$12 sps:$4 sm:$0xff]  }
 0x12f   :  { %5897 = vrcp.f32 %v509_v59  ;;  %v510_v0 = vadd.f32 1.0, %v5888_v61  ;;  %v6202_v61 = vld [vmem:[%s7924_s1 + $0x30] ss:$12 sps:$4 sm:$0xff]  }
 0x131   :  { %v5890_v6 = vpop.eup %5889  ;;  %5899 = vrcp.f32 %v510_v0  ;;  %v6624_v0 = vld [vmem:[%s7924_s1 + $0x64] ss:$12 sps:$4 sm:$0xff]  }
 0x132   :  { %v5892_v7 = vpop.eup %5891  ;;  %5901 = vrcp.f32 %v535_v62  ;;  %v555_v9 = vmul.f32 %v5890_v6, %v551_v63  ;;  %v6203_v62 = vld [vmem:[%s7924_s1 + $0x4c] ss:$12 sps:$4 sm:$0xff]   ;;  %v6204_v63 = vld [vmem:[%s7924_s1 + $0x48] ss:$12 sps:$4 sm:$0xff]  }
 0x133   :  { %v5894_v12 = vpop.eup %5893  ;;  %5903 = vrcp.f32 %v536_v3  ;;  %v537_v19 = vadd.f32 1.0, %v5892_v7  ;;  %v6629_v3 = vld [vmem:[%s7924_s1 + $0x60] ss:$12 sps:$4 sm:$0xff]   ;;  %v6641_v6 = vld [vmem:[%s7924_s1 + $0x78] ss:$12 sps:$4 sm:$0xff]  }
 0x134   :  { %v559_v13 = vadd.f32 %v555_v9, %v55_v4  ;;  %v556_v15 = vmul.f32 %v5894_v12, %v552_v11  ;;  %v5896_v16 = vpop.eup %5895  ;;  %v6636_v4 = vld [vmem:[%s7924_s1 + $0x7c] ss:$12 sps:$4 sm:$0xff]   ;;  %v6648_v7 = vld [vmem:[%s7924_s1 + $0x94] ss:$12 sps:$4 sm:$0xff]   ;;  %v6672_v12 = vld [vmem:[%s7924_s1 + $0xc4] ss:$12 sps:$4 sm:$0xff]  }
 0x135   :  { %v538_v22 = vadd.f32 1.0, %v5896_v16  ;;  %v6653_v9 = vld [vmem:[%s7924_s1 + $0x90] ss:$12 sps:$4 sm:$0xff]   ;;  %v6665_v11 = vld [vmem:[%s7924_s1 + $0xa8] ss:$12 sps:$4 sm:$0xff]  }
 0x136   :  { %5905 = vtanh.f32 %v559_v13  ;;  %v560_v20 = vadd.f32 %v556_v15, %v58_v10  ;;  %v6660_v10 = vld [vmem:[%s7924_s1 + $0xac] ss:$12 sps:$4 sm:$0xff]   ;;  %v5652_v13 = vld [vmem:[%s7924_s1 + $0xc8] ss:$12 sps:$4 sm:$0xff]  }
 0x137   :  { %v6680_v15 = vld [vmem:[%s7924_s1 + $0xc0] ss:$12 sps:$4 sm:$0xff]   ;;  %v5653_v16 = vld [vmem:[%s7924_s1 + $0x8] ss:$12 sps:$4 sm:$0xff]   ;;  %5388 = vmatprep.subr.bf16.mxu1 %v5652_v13 }
 0x138   :  { %5907 = vtanh.f32 %v560_v20  ;;  %v6698_v20 = vld [vmem:[%s7924_s1 + $0xd8] ss:$12 sps:$4 sm:$0xff]  }
 0x139   :  { %v5898_v24 = vpop.eup %5897  ;;  %5909 = vrcp.f32 %v537_v19  ;;  %v5657_v19 = vld [vmem:[%s7924_s1 + $0xe0] ss:$12 sps:$4 sm:$0xff]  }
 0x13a   :  { %v557_v25 = vmul.f32 %v5898_v24, %v553_v8  ;;  %5911 = vrcp.f32 %v538_v22  ;;  %v5658_v8 = vld [vmem:[%s7924_s1 + $0x20] ss:$12 sps:$4 sm:$0xff]   ;;  %v6716_v24 = vld [vmem:[%s7924_s1 + $0xf0] ss:$12 sps:$4 sm:$0xff]  }
 0x13b   :  { %v5900_v28 = vpop.eup %5899  ;;  %v6708_v22 = vld [vmem:[%s7924_s1 + $0xf4] ss:$12 sps:$4 sm:$0xff]  }
 0x13c   :  { %v5902_v29 = vpop.eup %5901  ;;  %v561_v30 = vadd.f32 %v557_v25, %v61_v23  ;;  %v558_v14 = vmul.f32 %v5900_v28, %v554_v27  ;;  %v5662_v23 = vld [vmem:[%s7924_s1 + $0xf8] ss:$12 sps:$4 sm:$0xff]   ;;  %v5667_v27 = vld [vmem:[%s7924_s1 + $0x110] ss:$12 sps:$4 sm:$0xff]   ;;  %v6734_v28 = vld [vmem:[%s7924_s1 + $0x108] ss:$12 sps:$4 sm:$0xff]  }
 0x13d   :  { %v5904_v31 = vpop.eup %5903  ;;  %v567_v33 = vsub.f32 1.0, %v5902_v29  ;;  %v579_v35 = vmul.f32 0.0, %v5902_v29  ;;  %v5663_v25 = vld [vmem:[%s7924_s1 + $0x38] ss:$12 sps:$4 sm:$0xff]   ;;  %v5668_v29 = vld [vmem:[%s7924_s1 + $0x50] ss:$12 sps:$4 sm:$0xff]  }
 0x13e   :  { %5913 = vtanh.f32 %v561_v30  ;;  %v562_v32 = vadd.f32 %v558_v14, %v64_v26  ;;  %v568_v36 = vsub.f32 1.0, %v5904_v31  ;;  %v580_v39 = vmul.f32 0.0, %v5904_v31  ;;  %v6726_v26 = vld [vmem:[%s7924_s1 + $0x10c] ss:$12 sps:$4 sm:$0xff]   ;;  %v6744_v30 = vld [vmem:[%s7924_s1 + $0x124] ss:$12 sps:$4 sm:$0xff]  }
 0x13f   :  { %v5672_v14 = vld [vmem:[%s7924_s1 + $0x128] ss:$12 sps:$4 sm:$0xff]   ;;  %v6752_v31 = vld [vmem:[%s7924_s1 + $0x120] ss:$12 sps:$4 sm:$0xff]  }
 0x140   :  { %v5906_v34 = vpop.eup %5905  ;;  %5915 = vtanh.f32 %v562_v32  ;;  %v5673_v32 = vld [vmem:[%s7924_s1 + $0x68] ss:$12 sps:$4 sm:$0xff]  }
 0x141   :  { %v571_v37 = vmul.f32 %v5906_v34, %v567_v33  ;;  %v6762_v33 = vld [vmem:[%s7924_s1 + $0x13c] ss:$12 sps:$4 sm:$0xff]   ;;  %v5677_v34 = vld [vmem:[%s7924_s1 + $0x140] ss:$12 sps:$4 sm:$0xff]  }
 0x142   :  { %v5908_v38 = vpop.eup %5907 }
 0x143   :  { %v572_v40 = vmul.f32 %v5908_v38, %v568_v36  ;;  %v6578_v41 = vadd.f32 %v579_v35, %v571_v37  ;;  %v5910_v18 = vpop.eup %5909  ;;  %v6770_v35 = vld [vmem:[%s7924_s1 + $0x138] ss:$12 sps:$4 sm:$0xff]   ;;  %v5678_v36 = vld [vmem:[%s7924_s1 + $0x80] ss:$12 sps:$4 sm:$0xff]  }
 0x144   :  { %v5912_v43 = vpop.eup %5911  ;;  %v569_v45 = vsub.f32 1.0, %v5910_v18  ;;  %v581_v49 = vmul.f32 0.0, %v5910_v18  ;;  %v6780_v37 = vld [vmem:[%s7924_s1 + $0x154] ss:$12 sps:$4 sm:$0xff]   ;;  %v5682_v38 = vld [vmem:[%s7924_s1 + $0x158] ss:$12 sps:$4 sm:$0xff]  }
 0x145   :  { %v6580_v42 = vadd.f32 %v580_v39, %v572_v40  ;;  %v570_v47 = vsub.f32 1.0, %v5912_v43  ;;  %v582_v53 = vmul.f32 0.0, %v5912_v43  ;;  %v6788_v39 = vld [vmem:[%s7924_s1 + $0x150] ss:$12 sps:$4 sm:$0xff]   ;;  %v5683_v40 = vld [vmem:[%s7924_s1 + $0x98] ss:$12 sps:$4 sm:$0xff]  }
 0x146   :  { %v6797_v18 = vld [vmem:[%s7924_s1 + $0x16c] ss:$12 sps:$4 sm:$0xff]   ;;  %v5687_v43 = vld [vmem:[%s7924_s1 + $0x170] ss:$12 sps:$4 sm:$0xff]  }
 0x147   :  { %v591_v44 = vpack.c.bf16 %v6580_v42, %v6578_v41 }
 0x148   :  { %v5914_v46 = vpop.eup %5913 }
 0x149   :  { %5242 = vst [vmem:[%s7927_s3] sm:$0xff] %v591_v44   ;;  %992 = vmatmul.mubr.bf16.vlgmr.msra.gmra.mrb[8].mxu1 %v591_v44  ;;  %1045 = vmatmul.mubr.bf16.vlgmr.msra.gmra.mrb[8].mxu0 %v591_v44  ;;  %v573_v48 = vmul.f32 %v5914_v46, %v569_v45  ;;  %v6806_v44 = vld [vmem:[%s7924_s1 + $0x168] ss:$12 sps:$4 sm:$0xff]   ;;  %v5688_v45 = vld [vmem:[%s7924_s1 + $0xb0] ss:$12 sps:$4 sm:$0xff]  }
 0x14a   :  { %v5916_v50 = vpop.eup %5915  ;;  %1531 = vmatpush1.bf16.msra.mxu0 %v6198_v51  ;;  %5389 = vmatpush3.bf16.msra.mxu1 %v5653_v16  ;;  %v6816_v46 = vld [vmem:[%s7924_s1 + $0x4] ss:$12 sps:$4 sm:$0xff]  }
 0x14b   :  { %v574_v52 = vmul.f32 %v5916_v50, %v570_v47  ;;  %v6590_v54 = vadd.f32 %v581_v49, %v573_v48  ;;  %1532 = vmatprep.subr.bf16.mxu0 %v6199_v55  ;;  %5390 = vmatprep.subr.bf16.mxu1 %v5657_v19  ;;  %v4704_v47 = vld [vmem:[%s7925_s0 + $0x30] sm:$0xff]  ;;  %v4706_v48 = vld [vmem:[%s7925_s0 + $0x3c] sm:$0xff] }
 0x14c   :  { %v623_v49 = vunpack.c.l.bf16 %v4704_v47  ;;  %v624_v50 = vunpack.c.h.bf16 %v4704_v47  ;;  %v626_v51 = vunpack.c.l.bf16 %v4706_v48 }
 0x14d   :  { %v6595_v57 = vadd.f32 %v582_v53, %v574_v52 }
 0x14e   :  { %1533 = vmatpush1.bf16.msra.mxu0 %v6200_v58  ;;  %5391 = vmatpush3.bf16.msra.mxu1 %v5658_v8 }
 0x14f   :  { %v592_v59 = vpack.c.bf16 %v6595_v57, %v6590_v54  ;;  %1534 = vmatprep.subr.bf16.mxu0 %v6201_v60  ;;  %5392 = vmatprep.subr.bf16.mxu1 %v5662_v23  ;;  %v627_v60 = vunpack.c.h.bf16 %v4706_v48 }
 0x151   :  { %5318 = vst [vmem:[%s7928_s4 + $0x38] sm:$0xff] %v592_v59   ;;  %1001 = vmatprep.mubr.bf16.mxu1 %v592_v59  ;;  %1052 = vmatprep.mubr.bf16.mxu0 %v592_v59 }
 0x152   :  { %1002 = vmatmul.mubr.bf16.gmra.mrb[12].mxu1 %v6205_v1  ;;  %1053 = vmatmul.mubr.bf16.gmra.mrb[12].mxu0 %v6205_v1 }
 0x153   :  { %1535 = vmatpush1.bf16.msra.mxu0 %v6202_v61  ;;  %1562 = vmatprep.mubr.bf16.mxu0 %v6205_v1 }
 0x154   :  { %1536 = vmatprep.subr.bf16.mxu0 %v6203_v62  ;;  %1615 = vmatprep.mubr.bf16.mxu1 %v6205_v1 }
 0x155   :  { %5393 = vmatpush3.bf16.msra.mxu1 %v5663_v25  ;;  %v4708_v25 = vld [vmem:[%s7925_s0 + $0x48] sm:$0xff] }
 0x156   :  { %5394 = vmatprep.subr.bf16.mxu1 %v5667_v27 }
 0x157   :  { %1537 = vmatpush1.bf16.msra.mxu0 %v6204_v63 }
 0x158   :  { %1538 = vmatprep.subr.bf16.mxu0 %v6624_v0 }
 0x159   :  { %5395 = vmatpush3.bf16.msra.mxu1 %v5668_v29 }
 0x15a   :  { %5396 = vmatprep.subr.bf16.mxu1 %v5672_v14 }
 0x15b   :  { %1539 = vmatpush1.bf16.msra.mxu0 %v6629_v3 }
 0x15c   :  { %1540 = vmatprep.subr.bf16.mxu0 %v6636_v4 }
 0x15d   :  { %5397 = vmatpush3.bf16.msra.mxu1 %v5673_v32  ;;  %v4710_v32 = vld [vmem:[%s7925_s0 + $0x54] sm:$0xff] }
 0x15e   :  { %5398 = vmatprep.subr.bf16.mxu1 %v5677_v34  ;;  %v629_v34 = vunpack.c.l.bf16 %v4708_v25 }
 0x15f   :  { %1541 = vmatpush1.bf16.msra.mxu0 %v6641_v6 }
 0x160   :  { %1542 = vmatprep.subr.bf16.mxu0 %v6648_v7 }
 0x161   :  { %5399 = vmatpush3.bf16.msra.mxu1 %v5678_v36 }
 0x162   :  { %5400 = vmatprep.subr.bf16.mxu1 %v5682_v38  ;;  %v632_v38 = vunpack.c.l.bf16 %v4710_v32 }
 0x163   :  { %1543 = vmatpush1.bf16.msra.mxu0 %v6653_v9 }
 0x164   :  { %1544 = vmatprep.subr.bf16.mxu0 %v6660_v10 }
 0x165   :  { %5401 = vmatpush3.bf16.msra.mxu1 %v5683_v40 }
 0x166   :  { %5402 = vmatprep.subr.bf16.mxu1 %v5687_v43 }
 0x167   :  { %1545 = vmatpush1.bf16.msra.mxu0 %v6665_v11 }
 0x168   :  { %1546 = vmatprep.subr.bf16.mxu0 %v6672_v12 }
 0x169   :  { %5403 = vmatpush3.bf16.msra.mxu1 %v5688_v45  ;;  %v630_v45 = vunpack.c.h.bf16 %v4708_v25 }
 0x16a   :  { %2101 = vmatprep.subr.bf16.mxu1 %v6816_v46 }
 0x16b   :  { %1547 = vmatpush1.bf16.msra.mxu0 %v6680_v15 }
 0x16c   :  { %1548 = vmatprep.subr.bf16.mxu0 %v6690_v17 }
 0x16f   :  { %1549 = vmatpush1.bf16.msra.mxu0 %v6698_v20 }
 0x170   :  { %1550 = vmatprep.subr.bf16.mxu0 %v6708_v22 }
 0x173   :  { %1551 = vmatpush1.bf16.msra.mxu0 %v6716_v24 }
 0x174   :  { %1552 = vmatprep.subr.bf16.mxu0 %v6726_v26 }
 0x177   :  { %1553 = vmatpush1.bf16.msra.mxu0 %v6734_v28 }
 0x178   :  { %1554 = vmatprep.subr.bf16.mxu0 %v6744_v30 }
 0x17b   :  { %1555 = vmatpush1.bf16.msra.mxu0 %v6752_v31 }
 0x17c   :  { %1556 = vmatprep.subr.bf16.mxu0 %v6762_v33 }
 0x17f   :  { %1557 = vmatpush1.bf16.msra.mxu0 %v6770_v35 }
 0x180   :  { %1558 = vmatprep.subr.bf16.mxu0 %v6780_v37 }
 0x183   :  { %1559 = vmatpush1.bf16.msra.mxu0 %v6788_v39 }
 0x184   :  { %1560 = vmatprep.subr.bf16.mxu0 %v6797_v18 }
 0x187   :  { %1561 = vmatpush1.bf16.msra.mxu0 %v6806_v44 }
 0x21c   :  { %v993_v52 = vpop.f32.mrb[8].mxu1  ;;  %v5376_v53 = vpop.f32.mrb[8].mxu0 }
 0x21d   :  { %v1061_v55 = vadd.f32 %v993_v52, %v623_v49  ;;  %v995_v58 = vpop.f32.mrb[9].mxu1  ;;  %v5377_v59 = vpop.f32.mrb[9].mxu0  ;;  %v633_v52 = vunpack.c.h.bf16 %v4710_v32 }
 0x21e   :  { %v5378_v61 = vadd.f32 %v5377_v59, %v5376_v53  ;;  %v997_v62 = vpop.f32.mrb[10].mxu1  ;;  %v5379_v63 = vpop.f32.mrb[10].mxu0  ;;  %v1089_v16 = vadd.f32 %v995_v58, %v624_v50 }
 0x21f   :  { %v4760_v13 = vmul.f32 -1.442695, %v1061_v55  ;;  %v1062_v19 = vadd.f32 %v997_v62, %v626_v51  ;;  %v999_v8 = vpop.f32.mrb[11].mxu1  ;;  %v5380_v23 = vpop.f32.mrb[11].mxu0 }
 0x220   :  { %v5381_v27 = vadd.f32 %v5380_v23, %v5379_v63  ;;  %v1090_v14 = vadd.f32 %v999_v8, %v627_v60  ;;  %v4764_v36 = vmul.f32 -1.442695, %v1089_v16 }
 0x221   :  { %5917 = vpow2.f32 %v4760_v13  ;;  %v4761_v29 = vmul.f32 -1.442695, %v1062_v19 }
 0x222   :  { %v4765_v40 = vmul.f32 -1.442695, %v1090_v14 }
 0x223   :  { %5919 = vpow2.f32 %v4761_v29 }
 0x224   :  { %5921 = vpow2.f32 %v4764_v36 }
 0x225   :  { %v1003_v43 = vpop.f32.mrb[12].mxu1  ;;  %v5382_v47 = vpop.f32.mrb[12].mxu0  ;;  %5923 = vpow2.f32 %v4765_v40 }
 0x226   :  { %v1063_v48 = vadd.f32 %v1003_v43, %v629_v34  ;;  %v1005_v49 = vpop.f32.mrb[13].mxu1  ;;  %v5383_v50 = vpop.f32.mrb[13].mxu0 }
 0x227   :  { %v1007_v51 = vpop.f32.mrb[14].mxu1  ;;  %v5384_v53 = vadd.f32 %v5383_v50, %v5382_v47  ;;  %v5385_v55 = vpop.f32.mrb[14].mxu0  ;;  %v1091_v63 = vadd.f32 %v1005_v49, %v630_v45  ;;  %v1121_v49 = vadd.f32 %v5378_v61, %v6547_v56  ;;  %v4709_v61 = vld [vmem:[%s7925_s0 + $0x50] ss:$12 sps:$4 sm:$0xff]  }
 0x228   :  { %v4762_v58 = vmul.f32 -1.442695, %v1063_v48  ;;  %v1064_v59 = vadd.f32 %v1007_v51, %v632_v38  ;;  %v1009_v60 = vpop.f32.mrb[15].mxu1  ;;  %v5386_v62 = vpop.f32.mrb[15].mxu0  ;;  %v4705_v38 = vld [vmem:[%s7925_s0 + $0x38] ss:$12 sps:$4 sm:$0xff]  }
 0x229   :  { %v5387_v13 = vadd.f32 %v5386_v62, %v5385_v55  ;;  %v1092_v8 = vadd.f32 %v1009_v60, %v633_v52  ;;  %v4766_v29 = vmul.f32 -1.442695, %v1091_v63  ;;  %v625_v48 = vunpack.c.l.bf16 %v4705_v38 }
 0x22a   :  { %5925 = vpow2.f32 %v4762_v58  ;;  %v4763_v16 = vmul.f32 -1.442695, %v1064_v59  ;;  %v628_v58 = vunpack.c.h.bf16 %v4705_v38  ;;  %v1122_v59 = vadd.f32 %v5381_v27, %v6557_v2 }
 0x22b   :  { %v5918_v19 = vpop.eup %5917  ;;  %v4767_v32 = vmul.f32 -1.442695, %v1092_v8  ;;  %v1124_v38 = vadd.f32 %v5387_v13, %v6574_v21 }
 0x22c   :  { %v1077_v23 = vadd.f32 1.0, %v5918_v19  ;;  %5927 = vpow2.f32 %v4763_v16 }
 0x22d   :  { %v5920_v25 = vpop.eup %5919 }
 0x22e   :  { %5929 = vrcp.f32 %v1077_v23  ;;  %v1078_v14 = vadd.f32 1.0, %v5920_v25  ;;  %v5922_v34 = vpop.eup %5921  ;;  %v1123_v25 = vadd.f32 %v5384_v53, %v6564_v5 }
 0x22f   :  { %v5924_v36 = vpop.eup %5923  ;;  %v1105_v43 = vadd.f32 1.0, %v5922_v34 }
 0x230   :  { %5931 = vrcp.f32 %v1078_v14  ;;  %v1106_v50 = vadd.f32 1.0, %v5924_v36  ;;  %v631_v14 = vunpack.c.l.bf16 %v4709_v61  ;;  %v634_v36 = vunpack.c.h.bf16 %v4709_v61 }
 0x231   :  { %5933 = vpow2.f32 %v4766_v29 }
 0x232   :  { %5935 = vpow2.f32 %v4767_v32 }
 0x234   :  { %v5926_v40 = vpop.eup %5925 }
 0x235   :  { %v1079_v45 = vadd.f32 1.0, %v5926_v40 }
 0x236   :  { %v5928_v47 = vpop.eup %5927 }
 0x237   :  { %5937 = vrcp.f32 %v1079_v45  ;;  %v1080_v51 = vadd.f32 1.0, %v5928_v47 }
 0x238   :  { %v5930_v52 = vpop.eup %5929  ;;  %5939 = vrcp.f32 %v1105_v43 }
 0x239   :  { %v1125_v55 = vmul.f32 %v5930_v52, %v1121_v49  ;;  %5941 = vrcp.f32 %v1080_v51 }
 0x23a   :  { %v5932_v60 = vpop.eup %5931  ;;  %5943 = vrcp.f32 %v1106_v50 }
 0x23b   :  { %v5934_v62 = vpop.eup %5933  ;;  %v1129_v63 = vadd.f32 %v1125_v55, %v625_v48  ;;  %v1126_v16 = vmul.f32 %v5932_v60, %v1122_v59  ;;  %v6850_v60 = vld [vmem:[%s7924_s1] ss:$12 sps:$4 sm:$0xff]  }
 0x23c   :  { %v5936_v19 = vpop.eup %5935  ;;  %v1107_v23 = vadd.f32 1.0, %v5934_v62 }
 0x23d   :  { %5945 = vtanh.f32 %v1129_v63  ;;  %v1130_v8 = vadd.f32 %v1126_v16, %v628_v58  ;;  %v1108_v29 = vadd.f32 1.0, %v5936_v19  ;;  %v6857_v63 = vld [vmem:[%s7924_s1 + $0x1c] ss:$12 sps:$4 sm:$0xff]  }
 0x23f   :  { %5947 = vtanh.f32 %v1130_v8 }
 0x240   :  { %5949 = vrcp.f32 %v1107_v23  ;;  %v6867_v23 = vld [vmem:[%s7924_s1 + $0x18] ss:$12 sps:$4 sm:$0xff]  }
 0x241   :  { %v5938_v27 = vpop.eup %5937  ;;  %5951 = vrcp.f32 %v1108_v29  ;;  %v6873_v29 = vld [vmem:[%s7924_s1 + $0x34] ss:$12 sps:$4 sm:$0xff]  }
 0x242   :  { %v5940_v32 = vpop.eup %5939  ;;  %v1127_v34 = vmul.f32 %v5938_v27, %v1123_v25 }
 0x243   :  { %v5942_v40 = vpop.eup %5941  ;;  %v1137_v48 = vsub.f32 1.0, %v5940_v32  ;;  %v1149_v5 = vmul.f32 %v5940_v32, %v6578_v41 }
 0x244   :  { %v1131_v43 = vadd.f32 %v1127_v34, %v631_v14  ;;  %v1128_v45 = vmul.f32 %v5942_v40, %v1124_v38  ;;  %v5944_v47 = vpop.eup %5943  ;;  %v6905_v38 = vld [vmem:[%s7924_s1 + $0x48] ss:$12 sps:$4 sm:$0xff]  }
 0x245   :  { %v1138_v53 = vsub.f32 1.0, %v5944_v47  ;;  %v1150_v55 = vmul.f32 %v5944_v47, %v6580_v42 }
 0x246   :  { %5953 = vtanh.f32 %v1131_v43  ;;  %v1132_v49 = vadd.f32 %v1128_v45, %v634_v36  ;;  %v6887_v36 = vld [vmem:[%s7924_s1 + $0x30] ss:$12 sps:$4 sm:$0xff]  }
 0x247   :  { %v5946_v50 = vpop.eup %5945 }
 0x248   :  { %5955 = vtanh.f32 %v1132_v49  ;;  %v1141_v51 = vmul.f32 %v5946_v50, %v1137_v48 }
 0x249   :  { %v5948_v52 = vpop.eup %5947 }
 0x24a   :  { %v1142_v58 = vmul.f32 %v5948_v52, %v1138_v53  ;;  %v6843_v59 = vadd.f32 %v1149_v5, %v1141_v51  ;;  %v5950_v21 = vpop.eup %5949 }
 0x24b   :  { %v5952_v62 = vpop.eup %5951  ;;  %v1139_v42 = vsub.f32 1.0, %v5950_v21  ;;  %v1151_v61 = vmul.f32 %v5950_v21, %v6590_v54 }
 0x24c   :  { %v6845_v13 = vadd.f32 %v1150_v55, %v1142_v58  ;;  %v1140_v19 = vsub.f32 1.0, %v5952_v62  ;;  %v1152_v27 = vmul.f32 %v5952_v62, %v6595_v57  ;;  %v6900_v57 = vld [vmem:[%s7924_s1 + $0x4c] ss:$12 sps:$4 sm:$0xff]   ;;  %v4782_v62 = vld [vmem:[%s7925_s0 + $0x84] sm:$0xff] }
 0x24d   :  { %v4780_v55 = vld [vmem:[%s7925_s0 + $0x78] sm:$0xff] }
 0x24e   :  { %v1161_v41 = vpack.c.bf16 %v6845_v13, %v6843_v59 }
 0x250   :  { %v5954_v16 = vpop.eup %5953  ;;  %5319 = vst [vmem:[%s7927_s3 + $0x8] sm:$0xff] %v1161_v41   ;;  %1563 = vmatmul.mubr.bf16.vlgmr.msra.gmra.mrb[16].mxu0 %v1161_v41  ;;  %1616 = vmatmul.mubr.bf16.vlgmr.msra.gmra.mrb[16].mxu1 %v1161_v41  ;;  %v1200_v41 = vunpack.c.l.bf16 %v4780_v55 }
 0x251   :  { %v1143_v8 = vmul.f32 %v5954_v16, %v1139_v42  ;;  %2102 = vmatpush1.bf16.msra.mxu1 %v6850_v60  ;;  %v1203_v16 = vunpack.c.l.bf16 %v4782_v62 }
 0x252   :  { %v5956_v25 = vpop.eup %5955  ;;  %2103 = vmatprep.subr.bf16.mxu1 %v6857_v63 }
 0x253   :  { %v1144_v14 = vmul.f32 %v5956_v25, %v1140_v19  ;;  %v6876_v32 = vadd.f32 %v1151_v61, %v1143_v8  ;;  %v1201_v61 = vunpack.c.h.bf16 %v4780_v55 }
 0x255   :  { %v6878_v54 = vadd.f32 %v1152_v27, %v1144_v14  ;;  %2104 = vmatpush1.bf16.msra.mxu1 %v6867_v23 }
 0x256   :  { %2105 = vmatprep.subr.bf16.mxu1 %v6873_v29 }
 0x257   :  { %v1162_v34 = vpack.c.bf16 %v6878_v54, %v6876_v32 }
 0x259   :  { %5320 = vst [vmem:[%s7928_s4 + $0x30] sm:$0xff] %v1162_v34   ;;  %1572 = vmatprep.mubr.bf16.mxu0 %v1162_v34  ;;  %1623 = vmatprep.mubr.bf16.mxu1 %v1162_v34 }
 0x25a   :  { %1573 = vmatmul.mubr.bf16.gmra.mrb[20].mxu0 %v6205_v1  ;;  %1624 = vmatmul.mubr.bf16.gmra.mrb[20].mxu1 %v6205_v1 }
 0x25b   :  { %2106 = vmatpush1.bf16.msra.mxu1 %v6887_v36  ;;  %2133 = vmatprep.mubr.bf16.mxu1 %v6205_v1 }
 0x25c   :  { %2186 = vmatprep.mubr.bf16.mxu0 %v6205_v1  ;;  %2107 = vmatprep.subr.bf16.mxu1 %v6900_v57 }
 0x25f   :  { %2108 = vmatpush1.bf16.msra.mxu1 %v6905_v38 }
 0x260   :  { %2109 = vmatprep.subr.bf16.mxu1 %v6624_v0  ;;  %v5701_v0 = vld [vmem:[%s7924_s1 + $0xc8] ss:$12 sps:$4 sm:$0xff]  }
 0x261   :  { %5416 = vmatprep.subr.bf16.mxu0 %v5701_v0 }
 0x263   :  { %2110 = vmatpush1.bf16.msra.mxu1 %v6629_v3  ;;  %v5702_v3 = vld [vmem:[%s7924_s1 + $0x8] ss:$12 sps:$4 sm:$0xff]  }
 0x264   :  { %2111 = vmatprep.subr.bf16.mxu1 %v6636_v4  ;;  %5417 = vmatpush3.bf16.msra.mxu0 %v5702_v3  ;;  %v5703_v4 = vld [vmem:[%s7924_s1 + $0xe0] ss:$12 sps:$4 sm:$0xff]   ;;  %v1204_v3 = vunpack.c.h.bf16 %v4782_v62  ;;  %v7002_v62 = vld [vmem:[%s7926_s2 + $0x10] sm:$0xff] }
 0x265   :  { %5418 = vmatprep.subr.bf16.mxu0 %v5703_v4 }
 0x267   :  { %2112 = vmatpush1.bf16.msra.mxu1 %v6641_v6  ;;  %v5704_v6 = vld [vmem:[%s7924_s1 + $0x20] ss:$12 sps:$4 sm:$0xff]  }
 0x268   :  { %2113 = vmatprep.subr.bf16.mxu1 %v6648_v7  ;;  %5419 = vmatpush3.bf16.msra.mxu0 %v5704_v6  ;;  %v5705_v7 = vld [vmem:[%s7924_s1 + $0xf8] ss:$12 sps:$4 sm:$0xff]  }
 0x269   :  { %5420 = vmatprep.subr.bf16.mxu0 %v5705_v7 }
 0x26b   :  { %2114 = vmatpush1.bf16.msra.mxu1 %v6653_v9  ;;  %v5706_v9 = vld [vmem:[%s7924_s1 + $0x38] ss:$12 sps:$4 sm:$0xff]  }
 0x26c   :  { %2115 = vmatprep.subr.bf16.mxu1 %v6660_v10  ;;  %5421 = vmatpush3.bf16.msra.mxu0 %v5706_v9  ;;  %v5707_v10 = vld [vmem:[%s7924_s1 + $0x110] ss:$12 sps:$4 sm:$0xff]  }
 0x26d   :  { %5422 = vmatprep.subr.bf16.mxu0 %v5707_v10 }
 0x26f   :  { %2116 = vmatpush1.bf16.msra.mxu1 %v6665_v11  ;;  %v5708_v11 = vld [vmem:[%s7924_s1 + $0x50] ss:$12 sps:$4 sm:$0xff]  }
 0x270   :  { %2117 = vmatprep.subr.bf16.mxu1 %v6672_v12  ;;  %5423 = vmatpush3.bf16.msra.mxu0 %v5708_v11  ;;  %v5709_v12 = vld [vmem:[%s7924_s1 + $0x128] ss:$12 sps:$4 sm:$0xff]  }
 0x271   :  { %5424 = vmatprep.subr.bf16.mxu0 %v5709_v12 }
 0x273   :  { %2118 = vmatpush1.bf16.msra.mxu1 %v6680_v15  ;;  %v5710_v15 = vld [vmem:[%s7924_s1 + $0x68] ss:$12 sps:$4 sm:$0xff]  }
 0x274   :  { %2119 = vmatprep.subr.bf16.mxu1 %v6690_v17  ;;  %5425 = vmatpush3.bf16.msra.mxu0 %v5710_v15  ;;  %v5711_v17 = vld [vmem:[%s7924_s1 + $0x140] ss:$12 sps:$4 sm:$0xff]  }
 0x275   :  { %5426 = vmatprep.subr.bf16.mxu0 %v5711_v17 }
 0x277   :  { %2120 = vmatpush1.bf16.msra.mxu1 %v6698_v20  ;;  %v5712_v20 = vld [vmem:[%s7924_s1 + $0x80] ss:$12 sps:$4 sm:$0xff]  }
 0x278   :  { %2121 = vmatprep.subr.bf16.mxu1 %v6708_v22  ;;  %v5713_v22 = vld [vmem:[%s7924_s1 + $0x158] ss:$12 sps:$4 sm:$0xff]   ;;  %5427 = vmatpush3.bf16.msra.mxu0 %v5712_v20 }
 0x279   :  { %5428 = vmatprep.subr.bf16.mxu0 %v5713_v22 }
 0x27b   :  { %2122 = vmatpush1.bf16.msra.mxu1 %v6716_v24  ;;  %v5714_v24 = vld [vmem:[%s7924_s1 + $0x98] ss:$12 sps:$4 sm:$0xff]  }
 0x27c   :  { %2123 = vmatprep.subr.bf16.mxu1 %v6726_v26  ;;  %v5715_v26 = vld [vmem:[%s7924_s1 + $0x170] ss:$12 sps:$4 sm:$0xff]   ;;  %5429 = vmatpush3.bf16.msra.mxu0 %v5714_v24 }
 0x27d   :  { %5430 = vmatprep.subr.bf16.mxu0 %v5715_v26 }
 0x27f   :  { %2124 = vmatpush1.bf16.msra.mxu1 %v6734_v28  ;;  %v5716_v28 = vld [vmem:[%s7924_s1 + $0xb0] ss:$12 sps:$4 sm:$0xff]  }
 0x280   :  { %2125 = vmatprep.subr.bf16.mxu1 %v6744_v30  ;;  %5431 = vmatpush3.bf16.msra.mxu0 %v5716_v28  ;;  %v4776_v30 = vld [vmem:[%s7925_s0 + $0x60] sm:$0xff] }
 0x281   :  { %2672 = vmatprep.subr.bf16.mxu0 %v6816_v46 }
 0x283   :  { %2126 = vmatpush1.bf16.msra.mxu1 %v6752_v31  ;;  %v4778_v31 = vld [vmem:[%s7925_s0 + $0x6c] sm:$0xff] }
 0x284   :  { %2127 = vmatprep.subr.bf16.mxu1 %v6762_v33  ;;  %v1194_v33 = vunpack.c.l.bf16 %v4776_v30  ;;  %v1198_v46 = vunpack.c.h.bf16 %v4778_v31 }
 0x287   :  { %2128 = vmatpush1.bf16.msra.mxu1 %v6770_v35  ;;  %v1197_v35 = vunpack.c.l.bf16 %v4778_v31 }
 0x288   :  { %2129 = vmatprep.subr.bf16.mxu1 %v6780_v37 }
 0x28b   :  { %2130 = vmatpush1.bf16.msra.mxu1 %v6788_v39 }
 0x28c   :  { %2131 = vmatprep.subr.bf16.mxu1 %v6797_v18  ;;  %v1195_v18 = vunpack.c.h.bf16 %v4776_v30 }
 0x28f   :  { %2132 = vmatpush1.bf16.msra.mxu1 %v6806_v44 }
 0x323   :  { %v1564_v37 = vpop.f32.mrb[16].mxu0  ;;  %v5404_v39 = vpop.f32.mrb[16].mxu1 }
 0x324   :  { %v1632_v44 = vadd.f32 %v1564_v37, %v1194_v33  ;;  %v1566_v40 = vpop.f32.mrb[17].mxu0  ;;  %v5405_v43 = vpop.f32.mrb[17].mxu1  ;;  %v4777_v37 = vld [vmem:[%s7925_s0 + $0x68] ss:$12 sps:$4 sm:$0xff]  }
 0x325   :  { %v5406_v45 = vadd.f32 %v5405_v43, %v5404_v39  ;;  %v1568_v47 = vpop.f32.mrb[18].mxu0  ;;  %v5407_v48 = vpop.f32.mrb[18].mxu1  ;;  %v1660_v51 = vadd.f32 %v1566_v40, %v1195_v18  ;;  %v1196_v43 = vunpack.c.l.bf16 %v4777_v37 }
 0x326   :  { %v4832_v49 = vmul.f32 -1.442695, %v1632_v44  ;;  %v1633_v50 = vadd.f32 %v1568_v47, %v1197_v35  ;;  %v1570_v5 = vpop.f32.mrb[19].mxu0  ;;  %v5408_v53 = vpop.f32.mrb[19].mxu1 }
 0x327   :  { %v5409_v52 = vadd.f32 %v5408_v53, %v5407_v48  ;;  %v1661_v21 = vadd.f32 %v1570_v5, %v1198_v46  ;;  %v4836_v42 = vmul.f32 -1.442695, %v1660_v51  ;;  %v1692_v47 = vadd.f32 %v5406_v45, %v6547_v56 }
 0x328   :  { %5957 = vpow2.f32 %v4832_v49  ;;  %v4833_v58 = vmul.f32 -1.442695, %v1633_v50  ;;  %v1199_v5 = vunpack.c.h.bf16 %v4777_v37 }
 0x329   :  { %v4837_v19 = vmul.f32 -1.442695, %v1661_v21  ;;  %v1693_v53 = vadd.f32 %v5409_v52, %v6557_v2 }
 0x32a   :  { %5959 = vpow2.f32 %v4833_v58 }
 0x32b   :  { %5961 = vpow2.f32 %v4836_v42  ;;  %v7011_v42 = vld [vmem:[%s7926_s2 + $0x18] sm:$0xff] }
 0x32c   :  { %5963 = vpow2.f32 %v4837_v19 }
 0x32d   :  { %v1574_v8 = vpop.f32.mrb[20].mxu0  ;;  %v5410_v25 = vpop.f32.mrb[20].mxu1 }
 0x32e   :  { %v1634_v14 = vadd.f32 %v1574_v8, %v1200_v41  ;;  %v1576_v27 = vpop.f32.mrb[21].mxu0  ;;  %v5411_v34 = vpop.f32.mrb[21].mxu1  ;;  %v4781_v41 = vld [vmem:[%s7925_s0 + $0x80] ss:$12 sps:$4 sm:$0xff]  }
 0x32f   :  { %v1578_v0 = vpop.f32.mrb[22].mxu0  ;;  %v5412_v4 = vadd.f32 %v5411_v34, %v5410_v25  ;;  %v5413_v6 = vpop.f32.mrb[22].mxu1  ;;  %v1662_v12 = vadd.f32 %v1576_v27, %v1201_v61  ;;  %v1202_v19 = vunpack.c.l.bf16 %v4781_v41 }
 0x330   :  { %v4834_v7 = vmul.f32 -1.442695, %v1634_v14  ;;  %v1635_v9 = vadd.f32 %v1578_v0, %v1203_v16  ;;  %v1580_v10 = vpop.f32.mrb[23].mxu0  ;;  %v5414_v11 = vpop.f32.mrb[23].mxu1  ;;  %v1205_v14 = vunpack.c.h.bf16 %v4781_v41  ;;  %v7160_v41 = vld [vmem:[%s7924_s1 + $0x108] ss:$12 sps:$4 sm:$0xff]  }
 0x331   :  { %v5415_v15 = vadd.f32 %v5414_v11, %v5413_v6  ;;  %v1663_v24 = vadd.f32 %v1580_v10, %v1204_v3  ;;  %v4838_v30 = vmul.f32 -1.442695, %v1662_v12  ;;  %v1694_v52 = vadd.f32 %v5412_v4, %v7002_v62 }
 0x332   :  { %v5958_v17 = vpop.eup %5957  ;;  %5965 = vpow2.f32 %v4834_v7  ;;  %v4835_v20 = vmul.f32 -1.442695, %v1635_v9 }
 0x333   :  { %v1648_v22 = vadd.f32 1.0, %v5958_v17  ;;  %v4839_v31 = vmul.f32 -1.442695, %v1663_v24  ;;  %v1695_v27 = vadd.f32 %v5415_v15, %v7011_v42 }
 0x334   :  { %v5960_v26 = vpop.eup %5959  ;;  %5967 = vpow2.f32 %v4835_v20 }
 0x335   :  { %5969 = vrcp.f32 %v1648_v22  ;;  %v1649_v28 = vadd.f32 1.0, %v5960_v26  ;;  %v5962_v33 = vpop.eup %5961 }
 0x336   :  { %v5964_v35 = vpop.eup %5963  ;;  %v1676_v18 = vadd.f32 1.0, %v5962_v33 }
 0x337   :  { %5971 = vrcp.f32 %v1649_v28  ;;  %v1677_v48 = vadd.f32 1.0, %v5964_v35 }
 0x338   :  { %5973 = vpow2.f32 %v4838_v30 }
 0x339   :  { %5975 = vpow2.f32 %v4839_v31 }
 0x33c   :  { %v5966_v39 = vpop.eup %5965 }
 0x33d   :  { %v1650_v44 = vadd.f32 1.0, %v5966_v39 }
 0x33e   :  { %v5968_v40 = vpop.eup %5967 }
 0x33f   :  { %v5970_v46 = vpop.eup %5969  ;;  %5977 = vrcp.f32 %v1650_v44  ;;  %v1651_v49 = vadd.f32 1.0, %v5968_v40 }
 0x340   :  { %5979 = vrcp.f32 %v1676_v18  ;;  %v1696_v50 = vmul.f32 %v5970_v46, %v1692_v47  ;;  %v5732_v47 = vld [vmem:[%s7924_s1 + $0xc8] ss:$12 sps:$4 sm:$0xff]  }
 0x341   :  { %v5972_v51 = vpop.eup %5971  ;;  %5981 = vrcp.f32 %v1651_v49  ;;  %v5733_v46 = vld [vmem:[%s7924_s1 + $0x8] ss:$12 sps:$4 sm:$0xff]   ;;  %5444 = vmatprep.subr.bf16.mxu1 %v5732_v47 }
 0x342   :  { %v1700_v55 = vadd.f32 %v1696_v50, %v1196_v43  ;;  %5983 = vrcp.f32 %v1677_v48  ;;  %v1697_v58 = vmul.f32 %v5972_v51, %v1693_v53  ;;  %v5974_v21 = vpop.eup %5973  ;;  %v7098_v43 = vld [vmem:[%s7924_s1 + $0xc4] ss:$12 sps:$4 sm:$0xff]   ;;  %v7106_v48 = vld [vmem:[%s7924_s1 + $0xc0] ss:$12 sps:$4 sm:$0xff]   ;;  %v7116_v49 = vld [vmem:[%s7924_s1 + $0xdc] ss:$12 sps:$4 sm:$0xff]  }
 0x343   :  { %v5976_v45 = vpop.eup %5975  ;;  %v1678_v2 = vadd.f32 1.0, %v5974_v21  ;;  %v5737_v50 = vld [vmem:[%s7924_s1 + $0xe0] ss:$12 sps:$4 sm:$0xff]   ;;  %v5743_v21 = vld [vmem:[%s7924_s1 + $0x38] ss:$12 sps:$4 sm:$0xff]  }
 0x344   :  { %5985 = vtanh.f32 %v1700_v55  ;;  %v1701_v56 = vadd.f32 %v1697_v58, %v1199_v5  ;;  %v1679_v16 = vadd.f32 1.0, %v5976_v45  ;;  %v7124_v5 = vld [vmem:[%s7924_s1 + $0xd8] ss:$12 sps:$4 sm:$0xff]   ;;  %v5738_v53 = vld [vmem:[%s7924_s1 + $0x20] ss:$12 sps:$4 sm:$0xff]  }
 0x345   :  { %v7134_v51 = vld [vmem:[%s7924_s1 + $0xf4] ss:$12 sps:$4 sm:$0xff]   ;;  %v5742_v55 = vld [vmem:[%s7924_s1 + $0xf8] ss:$12 sps:$4 sm:$0xff]   ;;  %v7142_v58 = vld [vmem:[%s7924_s1 + $0xf0] ss:$12 sps:$4 sm:$0xff]  }
 0x346   :  { %5987 = vtanh.f32 %v1701_v56  ;;  %v7152_v56 = vld [vmem:[%s7924_s1 + $0x10c] ss:$12 sps:$4 sm:$0xff]   ;;  %v5747_v45 = vld [vmem:[%s7924_s1 + $0x110] ss:$12 sps:$4 sm:$0xff]  }
 0x347   :  { %5989 = vrcp.f32 %v1678_v2  ;;  %v5748_v2 = vld [vmem:[%s7924_s1 + $0x50] ss:$12 sps:$4 sm:$0xff]  }
 0x348   :  { %5991 = vrcp.f32 %v1679_v16  ;;  %v5752_v16 = vld [vmem:[%s7924_s1 + $0x128] ss:$12 sps:$4 sm:$0xff]  }
 0x349   :  { %v5978_v8 = vpop.eup %5977 }
 0x34a   :  { %v5980_v61 = vpop.eup %5979  ;;  %v1698_v25 = vmul.f32 %v5978_v8, %v1694_v52  ;;  %v7170_v52 = vld [vmem:[%s7924_s1 + $0x124] ss:$12 sps:$4 sm:$0xff]   ;;  %v5753_v8 = vld [vmem:[%s7924_s1 + $0x68] ss:$12 sps:$4 sm:$0xff]  }
 0x34b   :  { %v5982_v34 = vpop.eup %5981  ;;  %v1708_v4 = vsub.f32 1.0, %v5980_v61  ;;  %v1720_v10 = vmul.f32 %v5980_v61, %v6843_v59  ;;  %v7188_v61 = vld [vmem:[%s7924_s1 + $0x13c] ss:$12 sps:$4 sm:$0xff]  }
 0x34c   :  { %v5984_v0 = vpop.eup %5983  ;;  %v1702_v3 = vadd.f32 %v1698_v25, %v1202_v19  ;;  %v1699_v6 = vmul.f32 %v5982_v34, %v1695_v27  ;;  %v7178_v19 = vld [vmem:[%s7924_s1 + $0x120] ss:$12 sps:$4 sm:$0xff]  }
 0x34d   :  { %v1709_v11 = vsub.f32 1.0, %v5984_v0  ;;  %v1721_v20 = vmul.f32 %v5984_v0, %v6845_v13  ;;  %v5757_v25 = vld [vmem:[%s7924_s1 + $0x140] ss:$12 sps:$4 sm:$0xff]   ;;  %v5762_v0 = vld [vmem:[%s7924_s1 + $0x158] ss:$12 sps:$4 sm:$0xff]  }
 0x34e   :  { %v5986_v7 = vpop.eup %5985  ;;  %5993 = vtanh.f32 %v1702_v3  ;;  %v1703_v9 = vadd.f32 %v1699_v6, %v1205_v14  ;;  %v7196_v14 = vld [vmem:[%s7924_s1 + $0x138] ss:$12 sps:$4 sm:$0xff]   ;;  %v5758_v27 = vld [vmem:[%s7924_s1 + $0x80] ss:$12 sps:$4 sm:$0xff]   ;;  %v7214_v3 = vld [vmem:[%s7924_s1 + $0x150] ss:$12 sps:$4 sm:$0xff]  }
 0x34f   :  { %v1712_v12 = vmul.f32 %v5986_v7, %v1708_v4  ;;  %v7206_v34 = vld [vmem:[%s7924_s1 + $0x154] ss:$12 sps:$4 sm:$0xff]   ;;  %v5763_v6 = vld [vmem:[%s7924_s1 + $0x98] ss:$12 sps:$4 sm:$0xff]  }
 0x350   :  { %v5988_v17 = vpop.eup %5987  ;;  %5995 = vtanh.f32 %v1703_v9  ;;  %v7224_v4 = vld [vmem:[%s7924_s1 + $0x168] ss:$12 sps:$4 sm:$0xff]   ;;  %v7229_v7 = vld [vmem:[%s7924_s1 + $0x16c] ss:$12 sps:$4 sm:$0xff]   ;;  %v5767_v9 = vld [vmem:[%s7924_s1 + $0x170] ss:$12 sps:$4 sm:$0xff]  }
 0x351   :  { %v1713_v22 = vmul.f32 %v5988_v17, %v1709_v11  ;;  %v7016_v24 = vadd.f32 %v1720_v10, %v1712_v12  ;;  %v5990_v26 = vpop.eup %5989  ;;  %v5768_v10 = vld [vmem:[%s7924_s1 + $0xb0] ss:$12 sps:$4 sm:$0xff]  }
 0x352   :  { %v5992_v30 = vpop.eup %5991  ;;  %v1710_v59 = vsub.f32 1.0, %v5990_v26  ;;  %v1722_v35 = vmul.f32 %v5990_v26, %v6876_v32  ;;  %v7067_v32 = vld [vmem:[%s7924_s1 + $0x78] ss:$12 sps:$4 sm:$0xff]   ;;  %v4848_v12 = vld [vmem:[%s7925_s0 + $0x90] sm:$0xff]  ;;  %v4850_v17 = vld [vmem:[%s7925_s0 + $0x9c] sm:$0xff] }
 0x353   :  { %v7018_v15 = vadd.f32 %v1721_v20, %v1713_v22  ;;  %v1711_v13 = vsub.f32 1.0, %v5992_v30  ;;  %v1723_v18 = vmul.f32 %v5992_v30, %v6878_v54  ;;  %v7074_v54 = vld [vmem:[%s7924_s1 + $0x94] ss:$12 sps:$4 sm:$0xff]   ;;  %v7242_v11 = vld [vmem:[%s7924_s1 + $0x4] ss:$12 sps:$4 sm:$0xff]   ;;  %v1765_v20 = vunpack.c.l.bf16 %v4848_v12 }
 0x354   :  { %v1766_v22 = vunpack.c.h.bf16 %v4848_v12  ;;  %v1768_v26 = vunpack.c.l.bf16 %v4850_v17 }
 0x355   :  { %v1732_v28 = vpack.c.bf16 %v7018_v15, %v7016_v24 }
 0x357   :  { %5321 = vst [vmem:[%s7927_s3 + $0x10] sm:$0xff] %v1732_v28   ;;  %2134 = vmatmul.mubr.bf16.vlgmr.msra.gmra.mrb[24].mxu1 %v1732_v28  ;;  %2187 = vmatmul.mubr.bf16.vlgmr.msra.gmra.mrb[24].mxu0 %v1732_v28 }
 0x358   :  { %v5994_v31 = vpop.eup %5993  ;;  %2673 = vmatpush1.bf16.msra.mxu0 %v6850_v60  ;;  %5445 = vmatpush3.bf16.msra.mxu1 %v5733_v46 }
 0x359   :  { %v1714_v33 = vmul.f32 %v5994_v31, %v1710_v59  ;;  %2674 = vmatprep.subr.bf16.mxu0 %v6857_v63  ;;  %v7050_v63 = vld [vmem:[%s7924_s1 + $0x64] ss:$12 sps:$4 sm:$0xff]   ;;  %5446 = vmatprep.subr.bf16.mxu1 %v5737_v50 }
 0x35a   :  { %v5996_v37 = vpop.eup %5995 }
 0x35b   :  { %v1715_v39 = vmul.f32 %v5996_v37, %v1711_v13  ;;  %v7029_v44 = vadd.f32 %v1722_v35, %v1714_v33 }
 0x35c   :  { %2675 = vmatpush1.bf16.msra.mxu0 %v6867_v23  ;;  %v7055_v23 = vld [vmem:[%s7924_s1 + $0x60] ss:$12 sps:$4 sm:$0xff]   ;;  %5447 = vmatpush3.bf16.msra.mxu1 %v5738_v53 }
 0x35d   :  { %v7032_v40 = vadd.f32 %v1723_v18, %v1715_v39  ;;  %2676 = vmatprep.subr.bf16.mxu0 %v6873_v29  ;;  %v7062_v29 = vld [vmem:[%s7924_s1 + $0x7c] ss:$12 sps:$4 sm:$0xff]   ;;  %5448 = vmatprep.subr.bf16.mxu1 %v5742_v55  ;;  %v1769_v39 = vunpack.c.h.bf16 %v4850_v17 }
 0x35f   :  { %v1733_v60 = vpack.c.bf16 %v7032_v40, %v7029_v44 }
 0x360   :  { %2677 = vmatpush1.bf16.msra.mxu0 %v6887_v36  ;;  %v7079_v36 = vld [vmem:[%s7924_s1 + $0x90] ss:$12 sps:$4 sm:$0xff]   ;;  %5449 = vmatpush3.bf16.msra.mxu1 %v5743_v21  ;;  %v4852_v21 = vld [vmem:[%s7925_s0 + $0xa8] sm:$0xff] }
 0x361   :  { %5322 = vst [vmem:[%s7928_s4 + $0x28] sm:$0xff] %v1733_v60   ;;  %2143 = vmatprep.mubr.bf16.mxu1 %v1733_v60  ;;  %2194 = vmatprep.mubr.bf16.mxu0 %v1733_v60 }
 0x362   :  { %2144 = vmatmul.mubr.bf16.gmra.mrb[28].mxu1 %v6205_v1  ;;  %2195 = vmatmul.mubr.bf16.gmra.mrb[28].mxu0 %v6205_v1 }
 0x363   :  { %2678 = vmatprep.subr.bf16.mxu0 %v6900_v57  ;;  %2704 = vmatprep.mubr.bf16.mxu0 %v6205_v1  ;;  %v7086_v57 = vld [vmem:[%s7924_s1 + $0xac] ss:$12 sps:$4 sm:$0xff]  }
 0x364   :  { %2679 = vmatpush1.bf16.msra.mxu0 %v6905_v38  ;;  %2757 = vmatprep.mubr.bf16.mxu1 %v6205_v1  ;;  %v7091_v38 = vld [vmem:[%s7924_s1 + $0xa8] ss:$12 sps:$4 sm:$0xff]  }
 0x365   :  { %2680 = vmatprep.subr.bf16.mxu0 %v7050_v63  ;;  %5450 = vmatprep.subr.bf16.mxu1 %v5747_v45 }
 0x366   :  { %5451 = vmatpush3.bf16.msra.mxu1 %v5748_v2 }
 0x367   :  { %5452 = vmatprep.subr.bf16.mxu1 %v5752_v16  ;;  %v4854_v16 = vld [vmem:[%s7925_s0 + $0xb4] sm:$0xff] }
 0x368   :  { %2681 = vmatpush1.bf16.msra.mxu0 %v7055_v23 }
 0x369   :  { %2682 = vmatprep.subr.bf16.mxu0 %v7062_v29 }
 0x36a   :  { %5453 = vmatpush3.bf16.msra.mxu1 %v5753_v8  ;;  %v1771_v8 = vunpack.c.l.bf16 %v4852_v21 }
 0x36b   :  { %5454 = vmatprep.subr.bf16.mxu1 %v5757_v25 }
 0x36c   :  { %2683 = vmatpush1.bf16.msra.mxu0 %v7067_v32 }
 0x36d   :  { %2684 = vmatprep.subr.bf16.mxu0 %v7074_v54 }
 0x36e   :  { %5455 = vmatpush3.bf16.msra.mxu1 %v5758_v27  ;;  %v1774_v27 = vunpack.c.l.bf16 %v4854_v16 }
 0x36f   :  { %5456 = vmatprep.subr.bf16.mxu1 %v5762_v0 }
 0x370   :  { %2685 = vmatpush1.bf16.msra.mxu0 %v7079_v36 }
 0x371   :  { %2686 = vmatprep.subr.bf16.mxu0 %v7086_v57 }
 0x372   :  { %5457 = vmatpush3.bf16.msra.mxu1 %v5763_v6  ;;  %v1772_v6 = vunpack.c.h.bf16 %v4852_v21 }
 0x373   :  { %5458 = vmatprep.subr.bf16.mxu1 %v5767_v9 }
 0x374   :  { %2687 = vmatpush1.bf16.msra.mxu0 %v7091_v38 }
 0x375   :  { %2688 = vmatprep.subr.bf16.mxu0 %v7098_v43 }
 0x376   :  { %5459 = vmatpush3.bf16.msra.mxu1 %v5768_v10 }
 0x377   :  { %3243 = vmatprep.subr.bf16.mxu1 %v7242_v11 }
 0x378   :  { %2689 = vmatpush1.bf16.msra.mxu0 %v7106_v48 }
 0x379   :  { %2690 = vmatprep.subr.bf16.mxu0 %v7116_v49 }
 0x37c   :  { %2691 = vmatpush1.bf16.msra.mxu0 %v7124_v5 }
 0x37d   :  { %2692 = vmatprep.subr.bf16.mxu0 %v7134_v51 }
 0x380   :  { %2693 = vmatpush1.bf16.msra.mxu0 %v7142_v58 }
 0x381   :  { %2694 = vmatprep.subr.bf16.mxu0 %v7152_v56 }
 0x384   :  { %2695 = vmatpush1.bf16.msra.mxu0 %v7160_v41 }
 0x385   :  { %2696 = vmatprep.subr.bf16.mxu0 %v7170_v52 }
 0x388   :  { %2697 = vmatpush1.bf16.msra.mxu0 %v7178_v19 }
 0x389   :  { %2698 = vmatprep.subr.bf16.mxu0 %v7188_v61 }
 0x38c   :  { %2699 = vmatpush1.bf16.msra.mxu0 %v7196_v14 }
 0x38d   :  { %2700 = vmatprep.subr.bf16.mxu0 %v7206_v34 }
 0x390   :  { %2701 = vmatpush1.bf16.msra.mxu0 %v7214_v3 }
 0x391   :  { %2702 = vmatprep.subr.bf16.mxu0 %v7229_v7 }
 0x394   :  { %2703 = vmatpush1.bf16.msra.mxu0 %v7224_v4 }
 0x42a   :  { %v2135_v28 = vpop.f32.mrb[24].mxu1  ;;  %v5432_v30 = vpop.f32.mrb[24].mxu0 }
 0x42b   :  { %v2203_v59 = vadd.f32 %v2135_v28, %v1765_v20  ;;  %v2137_v31 = vpop.f32.mrb[25].mxu1  ;;  %v5433_v13 = vpop.f32.mrb[25].mxu0 }
 0x42c   :  { %v5434_v33 = vadd.f32 %v5433_v13, %v5432_v30  ;;  %v2139_v35 = vpop.f32.mrb[26].mxu1  ;;  %v5435_v37 = vpop.f32.mrb[26].mxu0  ;;  %v2231_v60 = vadd.f32 %v2137_v31, %v1766_v22 }
 0x42d   :  { %v4904_v18 = vmul.f32 -1.442695, %v2203_v59  ;;  %v2204_v47 = vadd.f32 %v2139_v35, %v1768_v26  ;;  %v2141_v46 = vpop.f32.mrb[27].mxu1  ;;  %v5436_v50 = vpop.f32.mrb[27].mxu0 }
 0x42e   :  { %v5437_v53 = vadd.f32 %v5436_v50, %v5435_v37  ;;  %v2232_v45 = vadd.f32 %v2141_v46, %v1769_v39  ;;  %v4908_v2 = vmul.f32 -1.442695, %v2231_v60  ;;  %v1775_v46 = vunpack.c.h.bf16 %v4854_v16  ;;  %v7270_v16 = vld [vmem:[%s7926_s2 + $0x8] sm:$0xff] }
 0x42f   :  { %5997 = vpow2.f32 %v4904_v18  ;;  %v4905_v55 = vmul.f32 -1.442695, %v2204_v47 }
 0x430   :  { %v4909_v25 = vmul.f32 -1.442695, %v2232_v45 }
 0x431   :  { %5999 = vpow2.f32 %v4905_v55 }
 0x432   :  { %6001 = vpow2.f32 %v4908_v2 }
 0x433   :  { %6003 = vpow2.f32 %v4909_v25  ;;  %v7265_v25 = vld [vmem:[%s7926_s2] sm:$0xff] }
 0x435   :  { %v2145_v0 = vpop.f32.mrb[28].mxu1  ;;  %v5438_v9 = vpop.f32.mrb[28].mxu0 }
 0x436   :  { %v2205_v10 = vadd.f32 %v2145_v0, %v1771_v8  ;;  %v2147_v12 = vpop.f32.mrb[29].mxu1  ;;  %v5439_v17 = vpop.f32.mrb[29].mxu0  ;;  %v4849_v8 = vld [vmem:[%s7925_s0 + $0x98] ss:$12 sps:$4 sm:$0xff]  }
 0x437   :  { %v2149_v20 = vpop.f32.mrb[30].mxu1  ;;  %v5440_v22 = vadd.f32 %v5439_v17, %v5438_v9  ;;  %v5441_v26 = vpop.f32.mrb[30].mxu0  ;;  %v2233_v35 = vadd.f32 %v2147_v12, %v1772_v6  ;;  %v1767_v6 = vunpack.c.l.bf16 %v4849_v8  ;;  %v2263_v9 = vadd.f32 %v5434_v33, %v7265_v25  ;;  %v4853_v33 = vld [vmem:[%s7925_s0 + $0xb0] ss:$12 sps:$4 sm:$0xff]  }
 0x438   :  { %v4906_v28 = vmul.f32 -1.442695, %v2205_v10  ;;  %v2206_v30 = vadd.f32 %v2149_v20, %v1774_v27  ;;  %v2151_v59 = vpop.f32.mrb[31].mxu1  ;;  %v5442_v31 = vpop.f32.mrb[31].mxu0 }
 0x439   :  { %v5998_v13 = vpop.eup %5997  ;;  %v7257_v37 = vadd.f32 %v5442_v31, %v5441_v26  ;;  %v4910_v50 = vmul.f32 -1.442695, %v2233_v35  ;;  %v2234_v21 = vadd.f32 %v2151_v59, %v1775_v46  ;;  %v1770_v26 = vunpack.c.h.bf16 %v4849_v8 }
 0x43a   :  { %v2219_v39 = vadd.f32 1.0, %v5998_v13  ;;  %6005 = vpow2.f32 %v4906_v28  ;;  %v4907_v47 = vmul.f32 -1.442695, %v2206_v30  ;;  %v2264_v28 = vadd.f32 %v5437_v53, %v7270_v16 }
 0x43b   :  { %v6000_v18 = vpop.eup %5999  ;;  %v4911_v0 = vmul.f32 -1.442695, %v2234_v21  ;;  %v2265_v53 = vadd.f32 %v5440_v22, %v7002_v62  ;;  %v1773_v46 = vunpack.c.l.bf16 %v4853_v33  ;;  %v2266_v62 = vadd.f32 %v7257_v37, %v7011_v42 }
 0x43c   :  { %6007 = vrcp.f32 %v2219_v39  ;;  %v2220_v60 = vadd.f32 1.0, %v6000_v18  ;;  %v6002_v55 = vpop.eup %6001 }
 0x43d   :  { %v6004_v45 = vpop.eup %6003  ;;  %v2247_v2 = vadd.f32 1.0, %v6002_v55 }
 0x43e   :  { %6009 = vrcp.f32 %v2220_v60  ;;  %v2248_v10 = vadd.f32 1.0, %v6004_v45 }
 0x43f   :  { %6011 = vpow2.f32 %v4907_v47 }
 0x440   :  { %6013 = vpow2.f32 %v4910_v50 }
 0x441   :  { %6015 = vrcp.f32 %v2247_v2 }
 0x444   :  { %v6006_v27 = vpop.eup %6005 }
 0x445   :  { %v2221_v12 = vadd.f32 1.0, %v6006_v27 }
 0x446   :  { %v6008_v17 = vpop.eup %6007 }
 0x447   :  { %v2267_v20 = vmul.f32 %v6008_v17, %v2263_v9  ;;  %6017 = vrcp.f32 %v2221_v12  ;;  %v1776_v17 = vunpack.c.h.bf16 %v4853_v33 }
 0x448   :  { %v6010_v30 = vpop.eup %6009  ;;  %6019 = vpow2.f32 %v4911_v0 }
 0x449   :  { %v2271_v59 = vadd.f32 %v2267_v20, %v1767_v6  ;;  %6021 = vrcp.f32 %v2248_v10  ;;  %v2268_v31 = vmul.f32 %v6010_v30, %v2264_v28  ;;  %v6012_v13 = vpop.eup %6011 }
 0x44a   :  { %v6014_v35 = vpop.eup %6013  ;;  %v2222_v18 = vadd.f32 1.0, %v6012_v13 }
 0x44b   :  { %6023 = vtanh.f32 %v2271_v59  ;;  %v2272_v39 = vadd.f32 %v2268_v31, %v1770_v26  ;;  %v2249_v60 = vadd.f32 1.0, %v6014_v35  ;;  %v6016_v47 = vpop.eup %6015  ;;  %v7305_v35 = vld [vmem:[%s7924_s1 + $0x18] ss:$12 sps:$4 sm:$0xff]  }
 0x44c   :  { %v2279_v2 = vsub.f32 1.0, %v6016_v47  ;;  %v2291_v6 = vmul.f32 %v6016_v47, %v7016_v24  ;;  %v7289_v24 = vld [vmem:[%s7924_s1] ss:$12 sps:$4 sm:$0xff]  }
 0x44d   :  { %6025 = vtanh.f32 %v2272_v39 }
 0x44e   :  { %6027 = vrcp.f32 %v2222_v18  ;;  %v7311_v18 = vld [vmem:[%s7924_s1 + $0x34] ss:$12 sps:$4 sm:$0xff]  }
 0x44f   :  { %6029 = vrcp.f32 %v2249_v60 }
 0x451   :  { %v6018_v50 = vpop.eup %6017 }
 0x452   :  { %v6020_v55 = vpop.eup %6019  ;;  %v2269_v21 = vmul.f32 %v6018_v50, %v2265_v53 }
 0x453   :  { %v6022_v45 = vpop.eup %6021  ;;  %v2250_v0 = vadd.f32 1.0, %v6020_v55 }
 0x454   :  { %v2273_v8 = vadd.f32 %v2269_v21, %v1773_v46  ;;  %v2280_v9 = vsub.f32 1.0, %v6022_v45  ;;  %v2292_v20 = vmul.f32 %v6022_v45, %v7018_v15  ;;  %v7296_v15 = vld [vmem:[%s7924_s1 + $0x1c] ss:$12 sps:$4 sm:$0xff]  }
 0x455   :  { %v6024_v27 = vpop.eup %6023  ;;  %v7320_v46 = vld [vmem:[%s7924_s1 + $0x30] ss:$12 sps:$4 sm:$0xff]  }
 0x456   :  { %6031 = vtanh.f32 %v2273_v8  ;;  %v2283_v10 = vmul.f32 %v6024_v27, %v2279_v2  ;;  %v7344_v8 = vld [vmem:[%s7924_s1 + $0x48] ss:$12 sps:$4 sm:$0xff]  }
 0x457   :  { %v6026_v12 = vpop.eup %6025  ;;  %6033 = vrcp.f32 %v2250_v0 }
 0x458   :  { %v6028_v22 = vpop.eup %6027  ;;  %v2284_v26 = vmul.f32 %v6026_v12, %v2280_v9  ;;  %v7282_v28 = vadd.f32 %v2291_v6, %v2283_v10 }
 0x459   :  { %v2270_v30 = vmul.f32 %v6028_v22, %v2266_v62  ;;  %v6030_v13 = vpop.eup %6029 }
 0x45a   :  { %v7284_v59 = vadd.f32 %v2292_v20, %v2284_v26  ;;  %v2281_v37 = vsub.f32 1.0, %v6030_v13  ;;  %v2293_v60 = vmul.f32 %v6030_v13, %v7029_v44 }
 0x45b   :  { %v2274_v31 = vadd.f32 %v2270_v30, %v1776_v17 }
 0x45c   :  { %v2303_v42 = vpack.c.bf16 %v7284_v59, %v7282_v28 }
 0x45d   :  { %6035 = vtanh.f32 %v2274_v31 }
 0x45e   :  { %5323 = vst [vmem:[%s7927_s3 + $0x18] sm:$0xff] %v2303_v42   ;;  %2705 = vmatmul.mubr.bf16.vlgmr.msra.gmra.mrb[32].mxu0 %v2303_v42  ;;  %2758 = vmatmul.mubr.bf16.vlgmr.msra.gmra.mrb[32].mxu1 %v2303_v42 }
 0x45f   :  { %3244 = vmatpush1.bf16.msra.mxu1 %v7289_v24 }
 0x460   :  { %v6032_v39 = vpop.eup %6031  ;;  %3245 = vmatprep.subr.bf16.mxu1 %v7296_v15 }
 0x461   :  { %v2285_v33 = vmul.f32 %v6032_v39, %v2281_v37  ;;  %v6034_v53 = vpop.eup %6033  ;;  %v4924_v37 = vld [vmem:[%s7925_s0 + $0xd8] sm:$0xff]  ;;  %v4926_v39 = vld [vmem:[%s7925_s0 + $0xe4] sm:$0xff] }
 0x462   :  { %v2282_v50 = vsub.f32 1.0, %v6034_v53  ;;  %v2294_v45 = vmul.f32 %v6034_v53, %v7032_v40  ;;  %v7339_v40 = vld [vmem:[%s7924_s1 + $0x4c] ss:$12 sps:$4 sm:$0xff]  }
 0x463   :  { %v7314_v47 = vadd.f32 %v2293_v60, %v2285_v33  ;;  %3246 = vmatpush1.bf16.msra.mxu1 %v7305_v35  ;;  %v2342_v33 = vunpack.c.l.bf16 %v4924_v37 }
 0x464   :  { %3247 = vmatprep.subr.bf16.mxu1 %v7311_v18 }
 0x467   :  { %v6036_v55 = vpop.eup %6035  ;;  %3248 = vmatpush1.bf16.msra.mxu1 %v7320_v46 }
 0x468   :  { %v2286_v21 = vmul.f32 %v6036_v55, %v2282_v50  ;;  %3249 = vmatprep.subr.bf16.mxu1 %v7339_v40  ;;  %v2345_v50 = vunpack.c.l.bf16 %v4926_v39 }
 0x46a   :  { %v7325_v44 = vadd.f32 %v2294_v45, %v2286_v21 }
 0x46b   :  { %3250 = vmatpush1.bf16.msra.mxu1 %v7344_v8 }
 0x46c   :  { %v2304_v2 = vpack.c.bf16 %v7325_v44, %v7314_v47  ;;  %3251 = vmatprep.subr.bf16.mxu1 %v7050_v63  ;;  %v5781_v63 = vld [vmem:[%s7924_s1 + $0xc8] ss:$12 sps:$4 sm:$0xff]  }
 0x46d   :  { %5472 = vmatprep.subr.bf16.mxu0 %v5781_v63 }
 0x46e   :  { %5324 = vst [vmem:[%s7928_s4 + $0x20] sm:$0xff] %v2304_v2   ;;  %2714 = vmatprep.mubr.bf16.mxu0 %v2304_v2  ;;  %2765 = vmatprep.mubr.bf16.mxu1 %v2304_v2 }
 0x46f   :  { %2715 = vmatmul.mubr.bf16.gmra.mrb[36].mxu0 %v6205_v1  ;;  %2766 = vmatmul.mubr.bf16.gmra.mrb[36].mxu1 %v6205_v1 }
 0x470   :  { %3275 = vmatprep.mubr.bf16.mxu1 %v6205_v1  ;;  %3328 = vmatprep.mubr.bf16.mxu0 %v6205_v1 }
 0x471   :  { %3252 = vmatpush1.bf16.msra.mxu1 %v7055_v23  ;;  %v5782_v23 = vld [vmem:[%s7924_s1 + $0x8] ss:$12 sps:$4 sm:$0xff]  }
 0x472   :  { %3253 = vmatprep.subr.bf16.mxu1 %v7062_v29  ;;  %5473 = vmatpush3.bf16.msra.mxu0 %v5782_v23  ;;  %v5783_v29 = vld [vmem:[%s7924_s1 + $0xe0] ss:$12 sps:$4 sm:$0xff]   ;;  %v2343_v23 = vunpack.c.h.bf16 %v4924_v37 }
 0x473   :  { %5474 = vmatprep.subr.bf16.mxu0 %v5783_v29 }
 0x475   :  { %3254 = vmatpush1.bf16.msra.mxu1 %v7067_v32  ;;  %v5784_v32 = vld [vmem:[%s7924_s1 + $0x20] ss:$12 sps:$4 sm:$0xff]  }
 0x476   :  { %3255 = vmatprep.subr.bf16.mxu1 %v7074_v54  ;;  %5475 = vmatpush3.bf16.msra.mxu0 %v5784_v32  ;;  %v5785_v54 = vld [vmem:[%s7924_s1 + $0xf8] ss:$12 sps:$4 sm:$0xff]  }
 0x477   :  { %5476 = vmatprep.subr.bf16.mxu0 %v5785_v54 }
 0x479   :  { %3256 = vmatpush1.bf16.msra.mxu1 %v7079_v36  ;;  %v5786_v36 = vld [vmem:[%s7924_s1 + $0x38] ss:$12 sps:$4 sm:$0xff]  }
 0x47a   :  { %3257 = vmatprep.subr.bf16.mxu1 %v7086_v57  ;;  %5477 = vmatpush3.bf16.msra.mxu0 %v5786_v36  ;;  %v5787_v57 = vld [vmem:[%s7924_s1 + $0x110] ss:$12 sps:$4 sm:$0xff]  }
 0x47b   :  { %5478 = vmatprep.subr.bf16.mxu0 %v5787_v57 }
 0x47d   :  { %3258 = vmatpush1.bf16.msra.mxu1 %v7091_v38  ;;  %v5788_v38 = vld [vmem:[%s7924_s1 + $0x50] ss:$12 sps:$4 sm:$0xff]  }
 0x47e   :  { %3259 = vmatprep.subr.bf16.mxu1 %v7098_v43  ;;  %5479 = vmatpush3.bf16.msra.mxu0 %v5788_v38  ;;  %v5789_v43 = vld [vmem:[%s7924_s1 + $0x128] ss:$12 sps:$4 sm:$0xff]  }
 0x47f   :  { %5480 = vmatprep.subr.bf16.mxu0 %v5789_v43 }
 0x481   :  { %3260 = vmatpush1.bf16.msra.mxu1 %v7106_v48  ;;  %v5790_v48 = vld [vmem:[%s7924_s1 + $0x68] ss:$12 sps:$4 sm:$0xff]  }
 0x482   :  { %3261 = vmatprep.subr.bf16.mxu1 %v7116_v49  ;;  %5481 = vmatpush3.bf16.msra.mxu0 %v5790_v48  ;;  %v5791_v49 = vld [vmem:[%s7924_s1 + $0x140] ss:$12 sps:$4 sm:$0xff]   ;;  %v2346_v48 = vunpack.c.h.bf16 %v4926_v39 }
 0x483   :  { %5482 = vmatprep.subr.bf16.mxu0 %v5791_v49  ;;  %v4925_v39 = vld [vmem:[%s7925_s0 + $0xe0] ss:$12 sps:$4 sm:$0xff]  }
 0x485   :  { %3262 = vmatpush1.bf16.msra.mxu1 %v7124_v5  ;;  %v5792_v5 = vld [vmem:[%s7924_s1 + $0x80] ss:$12 sps:$4 sm:$0xff]  }
 0x486   :  { %3263 = vmatprep.subr.bf16.mxu1 %v7134_v51  ;;  %5483 = vmatpush3.bf16.msra.mxu0 %v5792_v5  ;;  %v5793_v51 = vld [vmem:[%s7924_s1 + $0x158] ss:$12 sps:$4 sm:$0xff]  }
 0x487   :  { %5484 = vmatprep.subr.bf16.mxu0 %v5793_v51 }
 0x489   :  { %3264 = vmatpush1.bf16.msra.mxu1 %v7142_v58  ;;  %v5794_v58 = vld [vmem:[%s7924_s1 + $0x98] ss:$12 sps:$4 sm:$0xff]  }
 0x48a   :  { %3265 = vmatprep.subr.bf16.mxu1 %v7152_v56  ;;  %5485 = vmatpush3.bf16.msra.mxu0 %v5794_v58  ;;  %v5795_v56 = vld [vmem:[%s7924_s1 + $0x170] ss:$12 sps:$4 sm:$0xff]  }
 0x48b   :  { %5486 = vmatprep.subr.bf16.mxu0 %v5795_v56 }
 0x48d   :  { %3266 = vmatpush1.bf16.msra.mxu1 %v7160_v41  ;;  %v5796_v41 = vld [vmem:[%s7924_s1 + $0xb0] ss:$12 sps:$4 sm:$0xff]  }
 0x48e   :  { %3267 = vmatprep.subr.bf16.mxu1 %v7170_v52  ;;  %5487 = vmatpush3.bf16.msra.mxu0 %v5796_v41  ;;  %v4920_v52 = vld [vmem:[%s7925_s0 + $0xc0] sm:$0xff] }
 0x48f   :  { %3814 = vmatprep.subr.bf16.mxu0 %v7242_v11 }
 0x491   :  { %3268 = vmatpush1.bf16.msra.mxu1 %v7178_v19  ;;  %v4922_v19 = vld [vmem:[%s7925_s0 + $0xcc] sm:$0xff] }
 0x492   :  { %3269 = vmatprep.subr.bf16.mxu1 %v7188_v61  ;;  %v2336_v61 = vunpack.c.l.bf16 %v4920_v52  ;;  %v2340_v11 = vunpack.c.h.bf16 %v4922_v19 }
 0x495   :  { %3270 = vmatpush1.bf16.msra.mxu1 %v7196_v14  ;;  %v2339_v14 = vunpack.c.l.bf16 %v4922_v19  ;;  %v4921_v19 = vld [vmem:[%s7925_s0 + $0xc8] ss:$12 sps:$4 sm:$0xff]  }
 0x496   :  { %3271 = vmatprep.subr.bf16.mxu1 %v7206_v34 }
 0x499   :  { %3272 = vmatpush1.bf16.msra.mxu1 %v7214_v3 }
 0x49a   :  { %3273 = vmatprep.subr.bf16.mxu1 %v7229_v7  ;;  %v2337_v7 = vunpack.c.h.bf16 %v4920_v52 }
 0x49d   :  { %3274 = vmatpush1.bf16.msra.mxu1 %v7224_v4 }
 0x531   :  { %v2706_v34 = vpop.f32.mrb[32].mxu0  ;;  %v5460_v3 = vpop.f32.mrb[32].mxu1 }
 0x532   :  { %v2774_v27 = vadd.f32 %v2706_v34, %v2336_v61  ;;  %v2708_v0 = vpop.f32.mrb[33].mxu0  ;;  %v5461_v6 = vpop.f32.mrb[33].mxu1 }
 0x533   :  { %v5462_v4 = vadd.f32 %v5461_v6, %v5460_v3  ;;  %v2710_v9 = vpop.f32.mrb[34].mxu0  ;;  %v5463_v10 = vpop.f32.mrb[34].mxu1  ;;  %v2802_v20 = vadd.f32 %v2708_v0, %v2337_v7  ;;  %v2338_v3 = vunpack.c.l.bf16 %v4921_v19 }
 0x534   :  { %v4976_v12 = vmul.f32 -1.442695, %v2774_v27  ;;  %v2775_v17 = vadd.f32 %v2710_v9, %v2339_v14  ;;  %v2712_v62 = vpop.f32.mrb[35].mxu0  ;;  %v5464_v22 = vpop.f32.mrb[35].mxu1 }
 0x535   :  { %v5465_v26 = vadd.f32 %v5464_v22, %v5463_v10  ;;  %v2803_v31 = vadd.f32 %v2712_v62, %v2340_v11  ;;  %v4980_v13 = vmul.f32 -1.442695, %v2802_v20  ;;  %v2834_v7 = vadd.f32 %v5462_v4, %v7265_v25 }
 0x536   :  { %6037 = vpow2.f32 %v4976_v12  ;;  %v4977_v30 = vmul.f32 -1.442695, %v2775_v17  ;;  %v2341_v10 = vunpack.c.h.bf16 %v4921_v19 }
 0x537   :  { %v4981_v42 = vmul.f32 -1.442695, %v2803_v31  ;;  %v2835_v11 = vadd.f32 %v5465_v26, %v7270_v16  ;;  %v7441_v16 = vld [vmem:[%s7926_s2 + $0x10] sm:$0xff] }
 0x538   :  { %6039 = vpow2.f32 %v4977_v30 }
 0x539   :  { %6041 = vpow2.f32 %v4980_v13 }
 0x53a   :  { %6043 = vpow2.f32 %v4981_v42 }
 0x540   :  { %v6038_v60 = vpop.eup %6037 }
 0x541   :  { %v2790_v53 = vadd.f32 1.0, %v6038_v60 }
 0x542   :  { %v6040_v55 = vpop.eup %6039  ;;  %v2716_v21 = vpop.f32.mrb[36].mxu0 }
 0x543   :  { %v5466_v45 = vpop.f32.mrb[36].mxu1  ;;  %6045 = vrcp.f32 %v2790_v53  ;;  %v2791_v2 = vadd.f32 1.0, %v6040_v55  ;;  %v2776_v63 = vadd.f32 %v2716_v21, %v2342_v33  ;;  %v2718_v29 = vpop.f32.mrb[37].mxu0  ;;  %v7451_v21 = vld [vmem:[%s7926_s2 + $0x18] sm:$0xff] }
 0x544   :  { %v5467_v32 = vpop.f32.mrb[37].mxu1  ;;  %v2720_v54 = vpop.f32.mrb[38].mxu0  ;;  %v2804_v58 = vadd.f32 %v2718_v29, %v2343_v23  ;;  %v2344_v23 = vunpack.c.l.bf16 %v4925_v39 }
 0x545   :  { %v5468_v36 = vadd.f32 %v5467_v32, %v5466_v45  ;;  %v5469_v57 = vpop.f32.mrb[38].mxu1  ;;  %6047 = vrcp.f32 %v2791_v2  ;;  %v4978_v38 = vmul.f32 -1.442695, %v2776_v63  ;;  %v2777_v43 = vadd.f32 %v2720_v54, %v2345_v50  ;;  %v2722_v49 = vpop.f32.mrb[39].mxu0 }
 0x546   :  { %v5470_v5 = vpop.f32.mrb[39].mxu1  ;;  %v6042_v51 = vpop.eup %6041  ;;  %v2805_v61 = vadd.f32 %v2722_v49, %v2346_v48  ;;  %v4982_v34 = vmul.f32 -1.442695, %v2804_v58 }
 0x547   :  { %6049 = vpow2.f32 %v4978_v38  ;;  %v4979_v56 = vmul.f32 -1.442695, %v2777_v43  ;;  %v5471_v41 = vadd.f32 %v5470_v5, %v5469_v57  ;;  %v6044_v52 = vpop.eup %6043  ;;  %v2818_v14 = vadd.f32 1.0, %v6042_v51 }
 0x548   :  { %v2819_v27 = vadd.f32 1.0, %v6044_v52  ;;  %v4983_v6 = vmul.f32 -1.442695, %v2805_v61  ;;  %v2836_v53 = vadd.f32 %v5468_v36, %v7441_v16  ;;  %v2347_v38 = vunpack.c.h.bf16 %v4925_v39  ;;  %v5832_v39 = vld [vmem:[%s7924_s1 + $0x128] ss:$12 sps:$4 sm:$0xff]  }
 0x549   :  { %6051 = vpow2.f32 %v4979_v56 }
 0x54a   :  { %6053 = vrcp.f32 %v2818_v14 }
 0x54b   :  { %6055 = vpow2.f32 %v4982_v34 }
 0x54c   :  { %6057 = vrcp.f32 %v2819_v27  ;;  %v7525_v27 = vld [vmem:[%s7924_s1 + $0xac] ss:$12 sps:$4 sm:$0xff]  }
 0x54d   :  { %v6046_v0 = vpop.eup %6045  ;;  %6059 = vpow2.f32 %v4983_v6  ;;  %v7537_v6 = vld [vmem:[%s7924_s1 + $0xc4] ss:$12 sps:$4 sm:$0xff]  }
 0x54e   :  { %v2838_v9 = vmul.f32 %v6046_v0, %v2834_v7  ;;  %v7518_v7 = vld [vmem:[%s7924_s1 + $0x90] ss:$12 sps:$4 sm:$0xff]   ;;  %v7530_v0 = vld [vmem:[%s7924_s1 + $0xa8] ss:$12 sps:$4 sm:$0xff]  }
 0x54f   :  { %v6048_v12 = vpop.eup %6047 }
 0x550   :  { %v2842_v17 = vadd.f32 %v2838_v9, %v2338_v3  ;;  %v2839_v62 = vmul.f32 %v6048_v12, %v2835_v11  ;;  %v5812_v9 = vld [vmem:[%s7924_s1 + $0xc8] ss:$12 sps:$4 sm:$0xff]  }
 0x551   :  { %v6050_v22 = vpop.eup %6049  ;;  %v5813_v11 = vld [vmem:[%s7924_s1 + $0x8] ss:$12 sps:$4 sm:$0xff]   ;;  %5500 = vmatprep.subr.bf16.mxu1 %v5812_v9 }
 0x552   :  { %6061 = vtanh.f32 %v2842_v17  ;;  %v2843_v20 = vadd.f32 %v2839_v62, %v2341_v10  ;;  %v2792_v30 = vadd.f32 1.0, %v6050_v22  ;;  %v7545_v10 = vld [vmem:[%s7924_s1 + $0xc0] ss:$12 sps:$4 sm:$0xff]   ;;  %v7555_v12 = vld [vmem:[%s7924_s1 + $0xdc] ss:$12 sps:$4 sm:$0xff]  }
 0x553   :  { %v6052_v31 = vpop.eup %6051  ;;  %v5817_v17 = vld [vmem:[%s7924_s1 + $0xe0] ss:$12 sps:$4 sm:$0xff]   ;;  %v7563_v62 = vld [vmem:[%s7924_s1 + $0xd8] ss:$12 sps:$4 sm:$0xff]  }
 0x554   :  { %6063 = vtanh.f32 %v2843_v20  ;;  %v2793_v25 = vadd.f32 1.0, %v6052_v31  ;;  %v6054_v4 = vpop.eup %6053  ;;  %v5818_v22 = vld [vmem:[%s7924_s1 + $0x20] ss:$12 sps:$4 sm:$0xff]   ;;  %v7581_v31 = vld [vmem:[%s7924_s1 + $0xf0] ss:$12 sps:$4 sm:$0xff]  }
 0x555   :  { %6065 = vrcp.f32 %v2792_v30  ;;  %v6056_v13 = vpop.eup %6055  ;;  %v2850_v37 = vsub.f32 1.0, %v6054_v4  ;;  %v2862_v50 = vmul.f32 %v6054_v4, %v7282_v28  ;;  %v2837_v28 = vadd.f32 %v5471_v41, %v7451_v21  ;;  %v7573_v20 = vld [vmem:[%s7924_s1 + $0xf4] ss:$12 sps:$4 sm:$0xff]   ;;  %v5822_v30 = vld [vmem:[%s7924_s1 + $0xf8] ss:$12 sps:$4 sm:$0xff]  }
 0x556   :  { %6067 = vrcp.f32 %v2793_v25  ;;  %v6058_v26 = vpop.eup %6057  ;;  %v2820_v60 = vadd.f32 1.0, %v6056_v13  ;;  %v5823_v25 = vld [vmem:[%s7924_s1 + $0x38] ss:$12 sps:$4 sm:$0xff]   ;;  %v5827_v13 = vld [vmem:[%s7924_s1 + $0x110] ss:$12 sps:$4 sm:$0xff]  }
 0x557   :  { %v6060_v42 = vpop.eup %6059  ;;  %v2851_v55 = vsub.f32 1.0, %v6058_v26  ;;  %v2863_v32 = vmul.f32 %v6058_v26, %v7284_v59  ;;  %v7591_v4 = vld [vmem:[%s7924_s1 + $0x10c] ss:$12 sps:$4 sm:$0xff]   ;;  %v7599_v26 = vld [vmem:[%s7924_s1 + $0x108] ss:$12 sps:$4 sm:$0xff]  }
 0x558   :  { %v2821_v63 = vadd.f32 1.0, %v6060_v42  ;;  %6069 = vrcp.f32 %v2820_v60  ;;  %v5828_v42 = vld [vmem:[%s7924_s1 + $0x50] ss:$12 sps:$4 sm:$0xff]   ;;  %v5833_v60 = vld [vmem:[%s7924_s1 + $0x68] ss:$12 sps:$4 sm:$0xff]  }
 0x55a   :  { %6071 = vrcp.f32 %v2821_v63  ;;  %v5842_v63 = vld [vmem:[%s7924_s1 + $0x158] ss:$12 sps:$4 sm:$0xff]  }
 0x55c   :  { %v6062_v33 = vpop.eup %6061 }
 0x55d   :  { %v2854_v45 = vmul.f32 %v6062_v33, %v2850_v37  ;;  %v7609_v37 = vld [vmem:[%s7924_s1 + $0x124] ss:$12 sps:$4 sm:$0xff]   ;;  %v7617_v33 = vld [vmem:[%s7924_s1 + $0x120] ss:$12 sps:$4 sm:$0xff]  }
 0x55e   :  { %v6064_v2 = vpop.eup %6063 }
 0x55f   :  { %v6066_v29 = vpop.eup %6065  ;;  %v2855_v54 = vmul.f32 %v6064_v2, %v2851_v55  ;;  %v7454_v57 = vadd.f32 %v2862_v50, %v2854_v45  ;;  %v5837_v50 = vld [vmem:[%s7924_s1 + $0x140] ss:$12 sps:$4 sm:$0xff]   ;;  %v7635_v55 = vld [vmem:[%s7924_s1 + $0x138] ss:$12 sps:$4 sm:$0xff]  }
 0x560   :  { %v2840_v36 = vmul.f32 %v6066_v29, %v2836_v53  ;;  %v6068_v43 = vpop.eup %6067  ;;  %v7627_v53 = vld [vmem:[%s7924_s1 + $0x13c] ss:$12 sps:$4 sm:$0xff]   ;;  %v5838_v45 = vld [vmem:[%s7924_s1 + $0x80] ss:$12 sps:$4 sm:$0xff]   ;;  %v5843_v29 = vld [vmem:[%s7924_s1 + $0x98] ss:$12 sps:$4 sm:$0xff]  }
 0x561   :  { %v7457_v48 = vadd.f32 %v2863_v32, %v2855_v54  ;;  %v2841_v5 = vmul.f32 %v6068_v43, %v2837_v28  ;;  %v7645_v2 = vld [vmem:[%s7924_s1 + $0x154] ss:$12 sps:$4 sm:$0xff]   ;;  %v7663_v32 = vld [vmem:[%s7924_s1 + $0x16c] ss:$12 sps:$4 sm:$0xff]   ;;  %v5847_v54 = vld [vmem:[%s7924_s1 + $0x170] ss:$12 sps:$4 sm:$0xff]  }
 0x562   :  { %v2844_v49 = vadd.f32 %v2840_v36, %v2344_v23  ;;  %v6070_v59 = vpop.eup %6069  ;;  %v7653_v23 = vld [vmem:[%s7924_s1 + $0x150] ss:$12 sps:$4 sm:$0xff]   ;;  %v7671_v36 = vld [vmem:[%s7924_s1 + $0x168] ss:$12 sps:$4 sm:$0xff]  }
 0x563   :  { %v2874_v51 = vpack.c.bf16 %v7457_v48, %v7454_v57  ;;  %v2845_v58 = vadd.f32 %v2841_v5, %v2347_v38  ;;  %v2852_v41 = vsub.f32 1.0, %v6070_v59  ;;  %v2864_v14 = vmul.f32 %v6070_v59, %v7314_v47  ;;  %v7489_v47 = vld [vmem:[%s7924_s1 + $0x64] ss:$12 sps:$4 sm:$0xff]  }
 0x564   :  { %6073 = vtanh.f32 %v2844_v49  ;;  %v6072_v56 = vpop.eup %6071  ;;  %v5848_v38 = vld [vmem:[%s7924_s1 + $0xb0] ss:$12 sps:$4 sm:$0xff]  }
 0x565   :  { %5325 = vst [vmem:[%s7927_s3 + $0x20] sm:$0xff] %v2874_v51   ;;  %3276 = vmatmul.mubr.bf16.vlgmr.msra.gmra.mrb[40].mxu1 %v2874_v51  ;;  %3329 = vmatmul.mubr.bf16.vlgmr.msra.gmra.mrb[40].mxu0 %v2874_v51  ;;  %6075 = vtanh.f32 %v2845_v58  ;;  %v2853_v19 = vsub.f32 1.0, %v6072_v56  ;;  %v5851_v28 = vld [vmem:[%s7924_s1 + $0x4] ss:$12 sps:$4 sm:$0xff]   ;;  %v4994_v49 = vld [vmem:[%s7925_s0 + $0xfc] sm:$0xff] }
 0x566   :  { %3815 = vmatpush1.bf16.msra.mxu0 %v7289_v24  ;;  %5501 = vmatpush3.bf16.msra.mxu1 %v5813_v11  ;;  %v4992_v43 = vld [vmem:[%s7925_s0 + $0xf0] sm:$0xff]  ;;  %v2910_v51 = vunpack.c.l.bf16 %v4994_v49 }
 0x567   :  { %3816 = vmatprep.subr.bf16.mxu0 %v7296_v15  ;;  %v2865_v15 = vmul.f32 %v6072_v56, %v7325_v44  ;;  %v7501_v44 = vld [vmem:[%s7924_s1 + $0x7c] ss:$12 sps:$4 sm:$0xff]   ;;  %5502 = vmatprep.subr.bf16.mxu1 %v5817_v17  ;;  %v2907_v5 = vunpack.c.l.bf16 %v4992_v43  ;;  %v2908_v56 = vunpack.c.h.bf16 %v4992_v43 }
 0x56a   :  { %3817 = vmatpush1.bf16.msra.mxu0 %v7305_v35  ;;  %5503 = vmatpush3.bf16.msra.mxu1 %v5818_v22 }
 0x56b   :  { %3818 = vmatprep.subr.bf16.mxu0 %v7311_v18  ;;  %5504 = vmatprep.subr.bf16.mxu1 %v5822_v30 }
 0x56e   :  { %v6074_v52 = vpop.eup %6073  ;;  %3819 = vmatpush1.bf16.msra.mxu0 %v7320_v46  ;;  %v7494_v46 = vld [vmem:[%s7924_s1 + $0x60] ss:$12 sps:$4 sm:$0xff]   ;;  %5505 = vmatpush3.bf16.msra.mxu1 %v5823_v25 }
 0x56f   :  { %v2856_v61 = vmul.f32 %v6074_v52, %v2852_v41  ;;  %3820 = vmatprep.subr.bf16.mxu0 %v7339_v40  ;;  %v6076_v34 = vpop.eup %6075  ;;  %v7506_v40 = vld [vmem:[%s7924_s1 + $0x78] ss:$12 sps:$4 sm:$0xff]   ;;  %5506 = vmatprep.subr.bf16.mxu1 %v5827_v13 }
 0x570   :  { %v2857_v24 = vmul.f32 %v6076_v34, %v2853_v19 }
 0x571   :  { %v7472_v3 = vadd.f32 %v2864_v14, %v2856_v61  ;;  %v2911_v61 = vunpack.c.h.bf16 %v4994_v49 }
 0x572   :  { %3821 = vmatpush1.bf16.msra.mxu0 %v7344_v8  ;;  %v7475_v35 = vadd.f32 %v2865_v15, %v2857_v24  ;;  %v7513_v8 = vld [vmem:[%s7924_s1 + $0x94] ss:$12 sps:$4 sm:$0xff]   ;;  %5507 = vmatpush3.bf16.msra.mxu1 %v5828_v42 }
 0x573   :  { %3822 = vmatprep.subr.bf16.mxu0 %v7489_v47  ;;  %5508 = vmatprep.subr.bf16.mxu1 %v5832_v39  ;;  %v4996_v39 = vld [vmem:[%s7925_s0 + $0x108] sm:$0xff] }
 0x574   :  { %v2875_v18 = vpack.c.bf16 %v7475_v35, %v7472_v3  ;;  %v2914_v43 = vunpack.c.h.bf16 %v4996_v39 }
 0x576   :  { %5326 = vst [vmem:[%s7928_s4 + $0x18] sm:$0xff] %v2875_v18   ;;  %3285 = vmatprep.mubr.bf16.mxu1 %v2875_v18  ;;  %3336 = vmatprep.mubr.bf16.mxu0 %v2875_v18 }
 0x577   :  { %3286 = vmatmul.mubr.bf16.gmra.mrb[44].mxu1 %v6205_v1  ;;  %3337 = vmatmul.mubr.bf16.gmra.mrb[44].mxu0 %v6205_v1 }
 0x578   :  { %3846 = vmatprep.mubr.bf16.mxu0 %v6205_v1  ;;  %3899 = vmatprep.mubr.bf16.mxu1 %v6205_v1 }
 0x579   :  { %3823 = vmatpush1.bf16.msra.mxu0 %v7494_v46  ;;  %5509 = vmatpush3.bf16.msra.mxu1 %v5833_v60 }
 0x57a   :  { %3824 = vmatprep.subr.bf16.mxu0 %v7501_v44  ;;  %5510 = vmatprep.subr.bf16.mxu1 %v5837_v50  ;;  %v4998_v50 = vld [vmem:[%s7925_s0 + $0x114] sm:$0xff] }
 0x57d   :  { %3825 = vmatpush1.bf16.msra.mxu0 %v7506_v40  ;;  %5511 = vmatpush3.bf16.msra.mxu1 %v5838_v45 }
 0x57e   :  { %3826 = vmatprep.subr.bf16.mxu0 %v7513_v8  ;;  %5512 = vmatprep.subr.bf16.mxu1 %v5842_v63  ;;  %v2913_v63 = vunpack.c.l.bf16 %v4996_v39 }
 0x581   :  { %3827 = vmatpush1.bf16.msra.mxu0 %v7518_v7  ;;  %5513 = vmatpush3.bf16.msra.mxu1 %v5843_v29 }
 0x582   :  { %3828 = vmatprep.subr.bf16.mxu0 %v7525_v27  ;;  %5514 = vmatprep.subr.bf16.mxu1 %v5847_v54 }
 0x585   :  { %3829 = vmatpush1.bf16.msra.mxu0 %v7530_v0  ;;  %5515 = vmatpush3.bf16.msra.mxu1 %v5848_v38  ;;  %v2916_v38 = vunpack.c.l.bf16 %v4998_v50 }
 0x586   :  { %3830 = vmatprep.subr.bf16.mxu0 %v7537_v6  ;;  %4385 = vmatprep.subr.bf16.mxu1 %v5851_v28 }
 0x589   :  { %3831 = vmatpush1.bf16.msra.mxu0 %v7545_v10 }
 0x58a   :  { %3832 = vmatprep.subr.bf16.mxu0 %v7555_v12 }
 0x58d   :  { %3833 = vmatpush1.bf16.msra.mxu0 %v7563_v62 }
 0x58e   :  { %3834 = vmatprep.subr.bf16.mxu0 %v7573_v20 }
 0x591   :  { %3835 = vmatpush1.bf16.msra.mxu0 %v7581_v31 }
 0x592   :  { %3836 = vmatprep.subr.bf16.mxu0 %v7591_v4 }
 0x595   :  { %3837 = vmatpush1.bf16.msra.mxu0 %v7599_v26 }
 0x596   :  { %3838 = vmatprep.subr.bf16.mxu0 %v7609_v37 }
 0x599   :  { %3839 = vmatpush1.bf16.msra.mxu0 %v7617_v33 }
 0x59a   :  { %3840 = vmatprep.subr.bf16.mxu0 %v7627_v53 }
 0x59d   :  { %3841 = vmatpush1.bf16.msra.mxu0 %v7635_v55 }
 0x59e   :  { %3842 = vmatprep.subr.bf16.mxu0 %v7645_v2 }
 0x5a1   :  { %3843 = vmatpush1.bf16.msra.mxu0 %v7653_v23 }
 0x5a2   :  { %3844 = vmatprep.subr.bf16.mxu0 %v7663_v32 }
 0x5a5   :  { %3845 = vmatpush1.bf16.msra.mxu0 %v7671_v36 }
 0x638   :  { %v3277_v58 = vpop.f32.mrb[40].mxu1  ;;  %v5488_v59 = vpop.f32.mrb[40].mxu0 }
 0x639   :  { %v3345_v41 = vadd.f32 %v3277_v58, %v2907_v5  ;;  %v3279_v52 = vpop.f32.mrb[41].mxu1  ;;  %v5489_v19 = vpop.f32.mrb[41].mxu0  ;;  %v2917_v58 = vunpack.c.h.bf16 %v4998_v50 }
 0x63a   :  { %v5490_v14 = vadd.f32 %v5489_v19, %v5488_v59  ;;  %v3281_v34 = vpop.f32.mrb[42].mxu1  ;;  %v5491_v24 = vpop.f32.mrb[42].mxu0  ;;  %v3373_v17 = vadd.f32 %v3279_v52, %v2908_v56 }
 0x63b   :  { %v5048_v15 = vmul.f32 -1.442695, %v3345_v41  ;;  %v3346_v18 = vadd.f32 %v3281_v34, %v2910_v51  ;;  %v3283_v9 = vpop.f32.mrb[43].mxu1  ;;  %v5492_v11 = vpop.f32.mrb[43].mxu0 }
 0x63c   :  { %v5493_v22 = vadd.f32 %v5492_v11, %v5491_v24  ;;  %v3374_v25 = vadd.f32 %v3283_v9, %v2911_v61  ;;  %v5052_v13 = vmul.f32 -1.442695, %v3373_v17  ;;  %v4993_v17 = vld [vmem:[%s7925_s0 + $0xf8] ss:$12 sps:$4 sm:$0xff]  }
 0x63d   :  { %6077 = vpow2.f32 %v5048_v15  ;;  %v5049_v30 = vmul.f32 -1.442695, %v3346_v18  ;;  %v2909_v50 = vunpack.c.l.bf16 %v4993_v17 }
 0x63e   :  { %v5053_v42 = vmul.f32 -1.442695, %v3374_v25 }
 0x63f   :  { %6079 = vpow2.f32 %v5049_v30  ;;  %v7699_v30 = vld [vmem:[%s7926_s2] sm:$0xff] }
 0x640   :  { %6081 = vpow2.f32 %v5052_v13 }
 0x641   :  { %6083 = vpow2.f32 %v5053_v42 }
 0x647   :  { %v6078_v60 = vpop.eup %6077 }
 0x648   :  { %v3361_v45 = vadd.f32 1.0, %v6078_v60  ;;  %v7704_v60 = vld [vmem:[%s7926_s2 + $0x8] sm:$0xff] }
 0x649   :  { %v6080_v29 = vpop.eup %6079 }
 0x64a   :  { %6085 = vrcp.f32 %v3361_v45  ;;  %v3362_v54 = vadd.f32 1.0, %v6080_v29  ;;  %v3287_v28 = vpop.f32.mrb[44].mxu1  ;;  %v5494_v49 = vpop.f32.mrb[44].mxu0  ;;  %v3405_v45 = vadd.f32 %v5490_v14, %v7699_v30 }
 0x64b   :  { %v3347_v5 = vadd.f32 %v3287_v28, %v2913_v63  ;;  %v3289_v51 = vpop.f32.mrb[45].mxu1  ;;  %v5495_v59 = vpop.f32.mrb[45].mxu0  ;;  %v2912_v28 = vunpack.c.h.bf16 %v4993_v17 }
 0x64c   :  { %6087 = vrcp.f32 %v3362_v54  ;;  %v3291_v56 = vpop.f32.mrb[46].mxu1  ;;  %v5496_v41 = vadd.f32 %v5495_v59, %v5494_v49  ;;  %v5497_v52 = vpop.f32.mrb[46].mxu0  ;;  %v3375_v9 = vadd.f32 %v3289_v51, %v2914_v43  ;;  %v3406_v43 = vadd.f32 %v5493_v22, %v7704_v60 }
 0x64d   :  { %v6082_v19 = vpop.eup %6081  ;;  %v5050_v61 = vmul.f32 -1.442695, %v3347_v5  ;;  %v3348_v34 = vadd.f32 %v3291_v56, %v2916_v38  ;;  %v3293_v24 = vpop.f32.mrb[47].mxu1 }
 0x64e   :  { %v5498_v15 = vpop.f32.mrb[47].mxu0  ;;  %v6084_v18 = vpop.eup %6083  ;;  %v3376_v13 = vadd.f32 %v3293_v24, %v2917_v58  ;;  %v3389_v42 = vadd.f32 1.0, %v6082_v19  ;;  %v5054_v63 = vmul.f32 -1.442695, %v3375_v9  ;;  %v3407_v9 = vadd.f32 %v5496_v41, %v7441_v16  ;;  %v5849_v41 = vld [vmem:[%s7924_s1] ss:$12 sps:$4 sm:$0xff]  }
 0x64f   :  { %v5499_v11 = vadd.f32 %v5498_v15, %v5497_v52  ;;  %6089 = vpow2.f32 %v5050_v61  ;;  %v5051_v25 = vmul.f32 -1.442695, %v3348_v34  ;;  %v3390_v39 = vadd.f32 1.0, %v6084_v18  ;;  %v4997_v15 = vld [vmem:[%s7925_s0 + $0x110] ss:$12 sps:$4 sm:$0xff]  }
 0x650   :  { %v5055_v54 = vmul.f32 -1.442695, %v3376_v13 }
 0x651   :  { %6091 = vpow2.f32 %v5051_v25 }
 0x652   :  { %6093 = vrcp.f32 %v3389_v42 }
 0x653   :  { %6095 = vrcp.f32 %v3390_v39 }
 0x654   :  { %v6086_v29 = vpop.eup %6085  ;;  %6097 = vpow2.f32 %v5054_v63 }
 0x655   :  { %v3409_v38 = vmul.f32 %v6086_v29, %v3405_v45  ;;  %6099 = vpow2.f32 %v5055_v54 }
 0x656   :  { %v6088_v49 = vpop.eup %6087 }
 0x657   :  { %v3413_v5 = vadd.f32 %v3409_v38, %v2909_v50  ;;  %v3410_v51 = vmul.f32 %v6088_v49, %v3406_v43  ;;  %v2915_v50 = vunpack.c.l.bf16 %v4997_v15  ;;  %v3408_v49 = vadd.f32 %v5499_v11, %v7451_v21  ;;  %v5852_v21 = vld [vmem:[%s7924_s1 + $0x18] ss:$12 sps:$4 sm:$0xff]   ;;  %v5857_v11 = vld [vmem:[%s7924_s1 + $0x34] ss:$12 sps:$4 sm:$0xff]  }
 0x659   :  { %6101 = vtanh.f32 %v3413_v5  ;;  %v3414_v58 = vadd.f32 %v3410_v51, %v2912_v28  ;;  %v6090_v59 = vpop.eup %6089  ;;  %v2918_v28 = vunpack.c.h.bf16 %v4997_v15 }
 0x65a   :  { %v3363_v56 = vadd.f32 1.0, %v6090_v59 }
 0x65b   :  { %6103 = vtanh.f32 %v3414_v58  ;;  %v6092_v14 = vpop.eup %6091  ;;  %v5854_v58 = vld [vmem:[%s7924_s1 + $0x1c] ss:$12 sps:$4 sm:$0xff]  }
 0x65c   :  { %6105 = vrcp.f32 %v3363_v56  ;;  %v3364_v52 = vadd.f32 1.0, %v6092_v14  ;;  %v6094_v19 = vpop.eup %6093  ;;  %v5855_v56 = vld [vmem:[%s7924_s1 + $0x30] ss:$12 sps:$4 sm:$0xff]  }
 0x65d   :  { %v6096_v61 = vpop.eup %6095  ;;  %v3421_v22 = vsub.f32 1.0, %v6094_v19  ;;  %v3433_v17 = vmul.f32 %v6094_v19, %v7454_v57 }
 0x65e   :  { %6107 = vrcp.f32 %v3364_v52  ;;  %v6098_v34 = vpop.eup %6097  ;;  %v3422_v25 = vsub.f32 1.0, %v6096_v61  ;;  %v3434_v45 = vmul.f32 %v6096_v61, %v7457_v48 }
 0x65f   :  { %v6100_v24 = vpop.eup %6099  ;;  %v3391_v13 = vadd.f32 1.0, %v6098_v34 }
 0x660   :  { %v3392_v63 = vadd.f32 1.0, %v6100_v24 }
 0x661   :  { %6109 = vrcp.f32 %v3391_v13 }
 0x662   :  { %6111 = vrcp.f32 %v3392_v63 }
 0x663   :  { %v6102_v18 = vpop.eup %6101 }
 0x664   :  { %v3425_v42 = vmul.f32 %v6102_v18, %v3421_v22 }
 0x665   :  { %v6104_v39 = vpop.eup %6103 }
 0x666   :  { %v3426_v29 = vmul.f32 %v6104_v39, %v3422_v25  ;;  %v7714_v54 = vadd.f32 %v3433_v17, %v3425_v42  ;;  %v6106_v38 = vpop.eup %6105 }
 0x667   :  { %v3411_v43 = vmul.f32 %v6106_v38, %v3407_v9 }
 0x668   :  { %v7717_v16 = vadd.f32 %v3434_v45, %v3426_v29  ;;  %v6108_v57 = vpop.eup %6107 }
 0x669   :  { %v3415_v5 = vadd.f32 %v3411_v43, %v2915_v50  ;;  %v3412_v48 = vmul.f32 %v6108_v57, %v3408_v49 }
 0x66a   :  { %v3445_v51 = vpack.c.bf16 %v7717_v16, %v7714_v54 }
 0x66b   :  { %6113 = vtanh.f32 %v3415_v5  ;;  %v3416_v59 = vadd.f32 %v3412_v48, %v2918_v28  ;;  %v6110_v14 = vpop.eup %6109 }
 0x66c   :  { %5327 = vst [vmem:[%s7927_s3 + $0x28] sm:$0xff] %v3445_v51   ;;  %3847 = vmatmul.mubr.bf16.vlgmr.msra.gmra.mrb[48].mxu0 %v3445_v51  ;;  %3900 = vmatmul.mubr.bf16.vlgmr.msra.gmra.mrb[48].mxu1 %v3445_v51  ;;  %v6112_v52 = vpop.eup %6111  ;;  %v3423_v19 = vsub.f32 1.0, %v6110_v14  ;;  %v3435_v22 = vmul.f32 %v6110_v14, %v7472_v3  ;;  %v5860_v3 = vld [vmem:[%s7924_s1 + $0x4c] ss:$12 sps:$4 sm:$0xff]  }
 0x66d   :  { %4386 = vmatpush1.bf16.msra.mxu1 %v5849_v41  ;;  %6115 = vtanh.f32 %v3416_v59  ;;  %v3424_v34 = vsub.f32 1.0, %v6112_v52  ;;  %v3436_v9 = vmul.f32 %v6112_v52, %v7475_v35  ;;  %v5858_v35 = vld [vmem:[%s7924_s1 + $0x48] ss:$12 sps:$4 sm:$0xff]   ;;  %v5068_v59 = vld [vmem:[%s7925_s0 + $0x138] sm:$0xff] }
 0x66e   :  { %4387 = vmatprep.subr.bf16.mxu1 %v5854_v58  ;;  %v3484_v52 = vunpack.c.l.bf16 %v5068_v59 }
 0x671   :  { %4388 = vmatpush1.bf16.msra.mxu1 %v5852_v21 }
 0x672   :  { %4389 = vmatprep.subr.bf16.mxu1 %v5857_v11 }
 0x675   :  { %4390 = vmatpush1.bf16.msra.mxu1 %v5855_v56  ;;  %v6114_v61 = vpop.eup %6113  ;;  %v5070_v56 = vld [vmem:[%s7925_s0 + $0x144] sm:$0xff] }
 0x676   :  { %v3427_v24 = vmul.f32 %v6114_v61, %v3423_v19  ;;  %4391 = vmatprep.subr.bf16.mxu1 %v5860_v3  ;;  %v3487_v61 = vunpack.c.l.bf16 %v5070_v56 }
 0x677   :  { %v6116_v15 = vpop.eup %6115 }
 0x678   :  { %v3428_v18 = vmul.f32 %v6116_v15, %v3424_v34  ;;  %v7741_v17 = vadd.f32 %v3435_v22, %v3427_v24  ;;  %v3485_v24 = vunpack.c.h.bf16 %v5068_v59 }
 0x679   :  { %4392 = vmatpush1.bf16.msra.mxu1 %v5858_v35  ;;  %v3488_v35 = vunpack.c.h.bf16 %v5070_v56  ;;  %v7863_v56 = vld [vmem:[%s7926_s2 + $0x18] sm:$0xff] }
 0x67a   :  { %v7743_v25 = vadd.f32 %v3436_v9, %v3428_v18  ;;  %4393 = vmatprep.subr.bf16.mxu1 %v7489_v47  ;;  %v5861_v47 = vld [vmem:[%s7924_s1 + $0xc8] ss:$12 sps:$4 sm:$0xff]  }
 0x67b   :  { %5528 = vmatprep.subr.bf16.mxu0 %v5861_v47 }
 0x67c   :  { %v3446_v13 = vpack.c.bf16 %v7743_v25, %v7741_v17 }
 0x67d   :  { %4394 = vmatpush1.bf16.msra.mxu1 %v7494_v46  ;;  %v5862_v46 = vld [vmem:[%s7924_s1 + $0x8] ss:$12 sps:$4 sm:$0xff]  }
 0x67e   :  { %5328 = vst [vmem:[%s7928_s4 + $0x10] sm:$0xff] %v3446_v13   ;;  %3856 = vmatprep.mubr.bf16.mxu0 %v3446_v13  ;;  %3907 = vmatprep.mubr.bf16.mxu1 %v3446_v13 }
 0x67f   :  { %3857 = vmatmul.mubr.bf16.gmra.mrb[52].mxu0 %v6205_v1  ;;  %3908 = vmatmul.mubr.bf16.gmra.mrb[52].mxu1 %v6205_v1 }
 0x680   :  { %4417 = vmatprep.mubr.bf16.mxu1 %v6205_v1  ;;  %4470 = vmatprep.mubr.bf16.mxu0 %v6205_v1 }
 0x681   :  { %4395 = vmatprep.subr.bf16.mxu1 %v7501_v44  ;;  %5529 = vmatpush3.bf16.msra.mxu0 %v5862_v46  ;;  %v5863_v44 = vld [vmem:[%s7924_s1 + $0xe0] ss:$12 sps:$4 sm:$0xff]  }
 0x682   :  { %4396 = vmatpush1.bf16.msra.mxu1 %v7506_v40  ;;  %v5864_v40 = vld [vmem:[%s7924_s1 + $0x20] ss:$12 sps:$4 sm:$0xff]   ;;  %5530 = vmatprep.subr.bf16.mxu0 %v5863_v44 }
 0x683   :  { %4397 = vmatprep.subr.bf16.mxu1 %v7513_v8  ;;  %v5865_v8 = vld [vmem:[%s7924_s1 + $0xf8] ss:$12 sps:$4 sm:$0xff]  }
 0x685   :  { %5531 = vmatpush3.bf16.msra.mxu0 %v5864_v40 }
 0x686   :  { %4398 = vmatpush1.bf16.msra.mxu1 %v7518_v7  ;;  %v5866_v7 = vld [vmem:[%s7924_s1 + $0x38] ss:$12 sps:$4 sm:$0xff]   ;;  %5532 = vmatprep.subr.bf16.mxu0 %v5865_v8 }
 0x687   :  { %4399 = vmatprep.subr.bf16.mxu1 %v7525_v27  ;;  %v5867_v27 = vld [vmem:[%s7924_s1 + $0x110] ss:$12 sps:$4 sm:$0xff]  }
 0x689   :  { %5533 = vmatpush3.bf16.msra.mxu0 %v5866_v7 }
 0x68a   :  { %4400 = vmatpush1.bf16.msra.mxu1 %v7530_v0  ;;  %v5868_v0 = vld [vmem:[%s7924_s1 + $0x50] ss:$12 sps:$4 sm:$0xff]   ;;  %5534 = vmatprep.subr.bf16.mxu0 %v5867_v27 }
 0x68b   :  { %4401 = vmatprep.subr.bf16.mxu1 %v7537_v6  ;;  %v5869_v6 = vld [vmem:[%s7924_s1 + $0x128] ss:$12 sps:$4 sm:$0xff]  }
 0x68d   :  { %5535 = vmatpush3.bf16.msra.mxu0 %v5868_v0  ;;  %v5065_v0 = vld [vmem:[%s7925_s0 + $0x128] ss:$12 sps:$4 sm:$0xff]  }
 0x68e   :  { %4402 = vmatpush1.bf16.msra.mxu1 %v7545_v10  ;;  %v5870_v10 = vld [vmem:[%s7924_s1 + $0x68] ss:$12 sps:$4 sm:$0xff]   ;;  %5536 = vmatprep.subr.bf16.mxu0 %v5869_v6 }
 0x68f   :  { %4403 = vmatprep.subr.bf16.mxu1 %v7555_v12  ;;  %v5871_v12 = vld [vmem:[%s7924_s1 + $0x140] ss:$12 sps:$4 sm:$0xff]  }
 0x691   :  { %5537 = vmatpush3.bf16.msra.mxu0 %v5870_v10 }
 0x692   :  { %4404 = vmatpush1.bf16.msra.mxu1 %v7563_v62  ;;  %v5872_v62 = vld [vmem:[%s7924_s1 + $0x80] ss:$12 sps:$4 sm:$0xff]   ;;  %5538 = vmatprep.subr.bf16.mxu0 %v5871_v12 }
 0x693   :  { %4405 = vmatprep.subr.bf16.mxu1 %v7573_v20  ;;  %v5873_v20 = vld [vmem:[%s7924_s1 + $0x158] ss:$12 sps:$4 sm:$0xff]  }
 0x695   :  { %5539 = vmatpush3.bf16.msra.mxu0 %v5872_v62 }
 0x696   :  { %4406 = vmatpush1.bf16.msra.mxu1 %v7581_v31  ;;  %v5874_v31 = vld [vmem:[%s7924_s1 + $0x98] ss:$12 sps:$4 sm:$0xff]   ;;  %5540 = vmatprep.subr.bf16.mxu0 %v5873_v20 }
 0x697   :  { %4407 = vmatprep.subr.bf16.mxu1 %v7591_v4  ;;  %v5875_v4 = vld [vmem:[%s7924_s1 + $0x170] ss:$12 sps:$4 sm:$0xff]  }
 0x699   :  { %5541 = vmatpush3.bf16.msra.mxu0 %v5874_v31  ;;  %v3480_v31 = vunpack.c.l.bf16 %v5065_v0 }
 0x69a   :  { %4408 = vmatpush1.bf16.msra.mxu1 %v7599_v26  ;;  %v5876_v26 = vld [vmem:[%s7924_s1 + $0xb0] ss:$12 sps:$4 sm:$0xff]   ;;  %5542 = vmatprep.subr.bf16.mxu0 %v5875_v4 }
 0x69b   :  { %4409 = vmatprep.subr.bf16.mxu1 %v7609_v37  ;;  %v5064_v37 = vld [vmem:[%s7925_s0 + $0x120] sm:$0xff] }
 0x69d   :  { %5543 = vmatpush3.bf16.msra.mxu0 %v5876_v26 }
 0x69e   :  { %4410 = vmatpush1.bf16.msra.mxu1 %v7617_v33  ;;  %v5066_v33 = vld [vmem:[%s7925_s0 + $0x12c] sm:$0xff] }
 0x69f   :  { %4411 = vmatprep.subr.bf16.mxu1 %v7627_v53  ;;  %v3478_v53 = vunpack.c.l.bf16 %v5064_v37  ;;  %v3482_v29 = vunpack.c.h.bf16 %v5066_v33 }
 0x6a2   :  { %4412 = vmatpush1.bf16.msra.mxu1 %v7635_v55  ;;  %v3481_v55 = vunpack.c.l.bf16 %v5066_v33 }
 0x6a3   :  { %4413 = vmatprep.subr.bf16.mxu1 %v7645_v2 }
 0x6a6   :  { %4414 = vmatpush1.bf16.msra.mxu1 %v7653_v23 }
 0x6a7   :  { %4415 = vmatprep.subr.bf16.mxu1 %v7663_v32  ;;  %v3479_v32 = vunpack.c.h.bf16 %v5064_v37 }
 0x6aa   :  { %4416 = vmatpush1.bf16.msra.mxu1 %v7671_v36 }
 0x73f   :  { %v3848_v2 = vpop.f32.mrb[48].mxu0  ;;  %v5516_v23 = vpop.f32.mrb[48].mxu1 }
 0x740   :  { %v3916_v42 = vadd.f32 %v3848_v2, %v3478_v53  ;;  %v3850_v39 = vpop.f32.mrb[49].mxu0  ;;  %v5517_v50 = vpop.f32.mrb[49].mxu1 }
 0x741   :  { %v5518_v45 = vadd.f32 %v5517_v50, %v5516_v23  ;;  %v3852_v63 = vpop.f32.mrb[50].mxu0  ;;  %v5519_v36 = vpop.f32.mrb[50].mxu1  ;;  %v3944_v57 = vadd.f32 %v3850_v39, %v3479_v32 }
 0x742   :  { %v5120_v38 = vmul.f32 -1.442695, %v3916_v42  ;;  %v3917_v28 = vadd.f32 %v3852_v63, %v3481_v55  ;;  %v3854_v43 = vpop.f32.mrb[51].mxu0  ;;  %v5520_v49 = vpop.f32.mrb[51].mxu1  ;;  %v3483_v55 = vunpack.c.h.bf16 %v5065_v0 }
 0x743   :  { %v5521_v41 = vadd.f32 %v5520_v49, %v5519_v36  ;;  %v3945_v48 = vadd.f32 %v3854_v43, %v3482_v29  ;;  %v5124_v51 = vmul.f32 -1.442695, %v3944_v57  ;;  %v3976_v4 = vadd.f32 %v5518_v45, %v7699_v30  ;;  %v7852_v43 = vld [vmem:[%s7926_s2 + $0x10] sm:$0xff] }
 0x744   :  { %6117 = vpow2.f32 %v5120_v38  ;;  %v5121_v5 = vmul.f32 -1.442695, %v3917_v28 }
 0x745   :  { %v5125_v58 = vmul.f32 -1.442695, %v3945_v48  ;;  %v3977_v2 = vadd.f32 %v5521_v41, %v7704_v60  ;;  %v5069_v48 = vld [vmem:[%s7925_s0 + $0x140] ss:$12 sps:$4 sm:$0xff]  }
 0x746   :  { %6119 = vpow2.f32 %v5121_v5 }
 0x747   :  { %6121 = vpow2.f32 %v5124_v51 }
 0x748   :  { %6123 = vpow2.f32 %v5125_v58 }
 0x74e   :  { %v6118_v21 = vpop.eup %6117 }
 0x74f   :  { %v3932_v11 = vadd.f32 1.0, %v6118_v21 }
 0x750   :  { %v6120_v14 = vpop.eup %6119 }
 0x751   :  { %6125 = vrcp.f32 %v3932_v11  ;;  %v3933_v19 = vadd.f32 1.0, %v6120_v14  ;;  %v6122_v13 = vpop.eup %6121 }
 0x752   :  { %v3858_v34 = vpop.f32.mrb[52].mxu0  ;;  %v5522_v22 = vpop.f32.mrb[52].mxu1  ;;  %v3960_v12 = vadd.f32 1.0, %v6122_v13 }
 0x753   :  { %6127 = vrcp.f32 %v3933_v19  ;;  %v3918_v15 = vadd.f32 %v3858_v34, %v3484_v52  ;;  %v3860_v18 = vpop.f32.mrb[53].mxu0  ;;  %v5523_v9 = vpop.f32.mrb[53].mxu1  ;;  %v3486_v19 = vunpack.c.l.bf16 %v5069_v48 }
 0x754   :  { %v3862_v3 = vpop.f32.mrb[54].mxu0  ;;  %v5524_v47 = vadd.f32 %v5523_v9, %v5522_v22  ;;  %v5525_v46 = vpop.f32.mrb[54].mxu1  ;;  %v3946_v6 = vadd.f32 %v3860_v18, %v3485_v24  ;;  %v3489_v22 = vunpack.c.h.bf16 %v5069_v48 }
 0x755   :  { %v5122_v44 = vmul.f32 -1.442695, %v3918_v15  ;;  %v3919_v40 = vadd.f32 %v3862_v3, %v3487_v61  ;;  %v3864_v8 = vpop.f32.mrb[55].mxu0  ;;  %v5526_v7 = vpop.f32.mrb[55].mxu1 }
 0x756   :  { %v6124_v27 = vpop.eup %6123  ;;  %v5527_v10 = vadd.f32 %v5526_v7, %v5525_v46  ;;  %v3947_v20 = vadd.f32 %v3864_v8, %v3488_v35  ;;  %v5126_v33 = vmul.f32 -1.442695, %v3946_v6  ;;  %v3978_v21 = vadd.f32 %v5524_v47, %v7852_v43 }
 0x757   :  { %6129 = vpow2.f32 %v5122_v44  ;;  %v5123_v62 = vmul.f32 -1.442695, %v3919_v40  ;;  %v3961_v26 = vadd.f32 1.0, %v6124_v27 }
 0x758   :  { %v5127_v32 = vmul.f32 -1.442695, %v3947_v20  ;;  %v3979_v15 = vadd.f32 %v5527_v10, %v7863_v56 }
 0x759   :  { %6131 = vpow2.f32 %v5123_v62 }
 0x75a   :  { %6133 = vrcp.f32 %v3960_v12 }
 0x75b   :  { %v6126_v37 = vpop.eup %6125  ;;  %6135 = vrcp.f32 %v3961_v26 }
 0x75c   :  { %v3980_v53 = vmul.f32 %v6126_v37, %v3976_v4  ;;  %6137 = vpow2.f32 %v5126_v33 }
 0x75d   :  { %v6128_v23 = vpop.eup %6127 }
 0x75e   :  { %v3984_v42 = vadd.f32 %v3980_v53, %v3480_v31  ;;  %v3981_v39 = vmul.f32 %v6128_v23, %v3977_v2 }
 0x760   :  { %6139 = vtanh.f32 %v3984_v42  ;;  %v3985_v50 = vadd.f32 %v3981_v39, %v3483_v55 }
 0x761   :  { %6141 = vpow2.f32 %v5127_v32  ;;  %v6130_v63 = vpop.eup %6129 }
 0x762   :  { %6143 = vtanh.f32 %v3985_v50  ;;  %v3934_v30 = vadd.f32 1.0, %v6130_v63 }
 0x763   :  { %v6132_v45 = vpop.eup %6131 }
 0x764   :  { %6145 = vrcp.f32 %v3934_v30  ;;  %v3935_v36 = vadd.f32 1.0, %v6132_v45  ;;  %v6134_v29 = vpop.eup %6133 }
 0x765   :  { %v6136_v38 = vpop.eup %6135  ;;  %v3992_v60 = vsub.f32 1.0, %v6134_v29  ;;  %v4004_v41 = vmul.f32 %v6134_v29, %v7714_v54 }
 0x766   :  { %6147 = vrcp.f32 %v3935_v36  ;;  %v6138_v28 = vpop.eup %6137  ;;  %v3993_v5 = vsub.f32 1.0, %v6136_v38  ;;  %v4005_v11 = vmul.f32 %v6136_v38, %v7717_v16 }
 0x767   :  { %v3962_v59 = vadd.f32 1.0, %v6138_v28 }
 0x769   :  { %6149 = vrcp.f32 %v3962_v59 }
 0x76a   :  { %v6140_v49 = vpop.eup %6139 }
 0x76b   :  { %v6142_v57 = vpop.eup %6141  ;;  %v3996_v51 = vmul.f32 %v6140_v49, %v3992_v60  ;;  %v5140_v49 = vld [vmem:[%s7925_s0 + $0x168] sm:$0xff] }
 0x76c   :  { %v6144_v58 = vpop.eup %6143  ;;  %v3963_v54 = vadd.f32 1.0, %v6142_v57 }
 0x76d   :  { %v3997_v14 = vmul.f32 %v6144_v58, %v3993_v5  ;;  %v7865_v52 = vadd.f32 %v4004_v41, %v3996_v51  ;;  %v5142_v5 = vld [vmem:[%s7925_s0 + $0x174] sm:$0xff]  ;;  %v4055_v51 = vunpack.c.l.bf16 %v5140_v49  ;;  %v4056_v58 = vunpack.c.h.bf16 %v5140_v49  ;;  %v5141_v49 = vld [vmem:[%s7925_s0 + $0x170] ss:$12 sps:$4 sm:$0xff]  }
 0x76e   :  { %v6146_v61 = vpop.eup %6145  ;;  %6151 = vrcp.f32 %v3963_v54  ;;  %v4058_v59 = vunpack.c.l.bf16 %v5142_v5 }
 0x76f   :  { %v7867_v34 = vadd.f32 %v4005_v11, %v3997_v14  ;;  %v3982_v24 = vmul.f32 %v6146_v61, %v3978_v21  ;;  %v4059_v61 = vunpack.c.h.bf16 %v5142_v5 }
 0x770   :  { %v6148_v18 = vpop.eup %6147 }
 0x771   :  { %v4016_v16 = vpack.c.bf16 %v7867_v34, %v7865_v52  ;;  %v3986_v9 = vadd.f32 %v3982_v24, %v3486_v19  ;;  %v3983_v13 = vmul.f32 %v6148_v18, %v3979_v15 }
 0x773   :  { %5329 = vst [vmem:[%s7927_s3 + $0x30] sm:$0xff] %v4016_v16   ;;  %4418 = vmatmul.mubr.bf16.vlgmr.msra.gmra.mrb[56].mxu1 %v4016_v16  ;;  %4471 = vmatmul.mubr.bf16.vlgmr.msra.gmra.mrb[56].mxu0 %v4016_v16  ;;  %6153 = vtanh.f32 %v3986_v9  ;;  %v3987_v3 = vadd.f32 %v3983_v13, %v3489_v22  ;;  %v6150_v35 = vpop.eup %6149  ;;  %v4543_v22 = vld [vmem:[%s7926_s2] sm:$0xff] }
 0x774   :  { %v3994_v46 = vsub.f32 1.0, %v6150_v35  ;;  %v4006_v7 = vmul.f32 %v6150_v35, %v7741_v17  ;;  %v5136_v17 = vld [vmem:[%s7925_s0 + $0x150] sm:$0xff]  ;;  %v5137_v13 = vld [vmem:[%s7925_s0 + $0x158] ss:$12 sps:$4 sm:$0xff]  }
 0x775   :  { %6155 = vtanh.f32 %v3987_v3  ;;  %v4049_v20 = vunpack.c.l.bf16 %v5136_v17  ;;  %v4050_v37 = vunpack.c.h.bf16 %v5136_v17 }
 0x778   :  { %v6152_v47 = vpop.eup %6151 }
 0x779   :  { %v3995_v40 = vsub.f32 1.0, %v6152_v47  ;;  %v4007_v6 = vmul.f32 %v6152_v47, %v7743_v25  ;;  %v5138_v25 = vld [vmem:[%s7925_s0 + $0x15c] sm:$0xff] }
 0x77a   :  { %v4052_v31 = vunpack.c.l.bf16 %v5138_v25 }
 0x77d   :  { %v6154_v44 = vpop.eup %6153 }
 0x77e   :  { %v3998_v8 = vmul.f32 %v6154_v44, %v3994_v46 }
 0x77f   :  { %v6156_v27 = vpop.eup %6155 }
 0x780   :  { %v3999_v0 = vmul.f32 %v6156_v27, %v3995_v40  ;;  %v7877_v10 = vadd.f32 %v4006_v7, %v3998_v8  ;;  %v4544_v7 = vld [vmem:[%s7926_s2 + $0x8] sm:$0xff] }
 0x782   :  { %v7879_v12 = vadd.f32 %v4007_v6, %v3999_v0  ;;  %v4051_v6 = vunpack.c.l.bf16 %v5137_v13 }
 0x784   :  { %v4017_v62 = vpack.c.bf16 %v7879_v12, %v7877_v10 }
 0x786   :  { %5330 = vst [vmem:[%s7928_s4 + $0x8] sm:$0xff] %v4017_v62   ;;  %4427 = vmatprep.mubr.bf16.mxu1 %v4017_v62  ;;  %4478 = vmatprep.mubr.bf16.mxu0 %v4017_v62 }
 0x787   :  { %4428 = vmatmul.mubr.bf16.gmra.mrb[60].mxu1 %v6205_v1  ;;  %4479 = vmatmul.mubr.bf16.gmra.mrb[60].mxu0 %v6205_v1  ;;  %v4053_v1 = vunpack.c.h.bf16 %v5138_v25 }
 0x846   :  { %v4419_v4 = vpop.f32.mrb[56].mxu1  ;;  %v5544_v26 = vpop.f32.mrb[56].mxu0 }
 0x847   :  { %v4487_v33 = vadd.f32 %v4419_v4, %v4049_v20  ;;  %v4421_v53 = vpop.f32.mrb[57].mxu1  ;;  %v5545_v55 = vpop.f32.mrb[57].mxu0  ;;  %v4054_v4 = vunpack.c.h.bf16 %v5137_v13 }
 0x848   :  { %v5546_v2 = vadd.f32 %v5545_v55, %v5544_v26  ;;  %v4423_v23 = vpop.f32.mrb[58].mxu1  ;;  %v5547_v32 = vpop.f32.mrb[58].mxu0  ;;  %v4515_v30 = vadd.f32 %v4421_v53, %v4050_v37 }
 0x849   :  { %v5192_v42 = vmul.f32 -1.442695, %v4487_v33  ;;  %v4488_v39 = vadd.f32 %v4423_v23, %v4052_v31  ;;  %v4425_v50 = vpop.f32.mrb[59].mxu1  ;;  %v5548_v63 = vpop.f32.mrb[59].mxu0 }
 0x84a   :  { %v5549_v45 = vadd.f32 %v5548_v63, %v5547_v32  ;;  %v4516_v29 = vadd.f32 %v4425_v50, %v4053_v1  ;;  %v5196_v38 = vmul.f32 -1.442695, %v4515_v30  ;;  %v4547_v62 = vadd.f32 %v5546_v2, %v4543_v22 }
 0x84b   :  { %6157 = vpow2.f32 %v5192_v42  ;;  %v5193_v36 = vmul.f32 -1.442695, %v4488_v39 }
 0x84c   :  { %v5197_v28 = vmul.f32 -1.442695, %v4516_v29  ;;  %v4548_v26 = vadd.f32 %v5549_v45, %v4544_v7 }
 0x84d   :  { %6159 = vpow2.f32 %v5193_v36 }
 0x84e   :  { %6161 = vpow2.f32 %v5196_v38 }
 0x84f   :  { %6163 = vpow2.f32 %v5197_v28 }
 0x855   :  { %v6158_v60 = vpop.eup %6157 }
 0x856   :  { %v4503_v57 = vadd.f32 1.0, %v6158_v60 }
 0x857   :  { %v6160_v41 = vpop.eup %6159 }
 0x858   :  { %6165 = vrcp.f32 %v4503_v57  ;;  %v4504_v48 = vadd.f32 1.0, %v6160_v41  ;;  %v6162_v14 = vpop.eup %6161 }
 0x859   :  { %v6164_v9 = vpop.eup %6163  ;;  %v4531_v40 = vadd.f32 1.0, %v6162_v14  ;;  %v4060_v14 = vunpack.c.h.bf16 %v5141_v49 }
 0x85a   :  { %6167 = vrcp.f32 %v4504_v48  ;;  %v4429_v21 = vpop.f32.mrb[60].mxu1  ;;  %v5550_v11 = vpop.f32.mrb[60].mxu0  ;;  %v4532_v17 = vadd.f32 1.0, %v6164_v9 }
 0x85b   :  { %v4489_v54 = vadd.f32 %v4429_v21, %v4055_v51  ;;  %v4431_v19 = vpop.f32.mrb[61].mxu1  ;;  %v5551_v24 = vpop.f32.mrb[61].mxu0  ;;  %v4057_v21 = vunpack.c.l.bf16 %v5141_v49 }
 0x85c   :  { %v4433_v15 = vpop.f32.mrb[62].mxu1  ;;  %v5552_v18 = vadd.f32 %v5551_v24, %v5550_v11  ;;  %v5553_v16 = vpop.f32.mrb[62].mxu0  ;;  %v4517_v35 = vadd.f32 %v4431_v19, %v4056_v58 }
 0x85d   :  { %v5194_v3 = vmul.f32 -1.442695, %v4489_v54  ;;  %v4490_v47 = vadd.f32 %v4433_v15, %v4058_v59  ;;  %v4435_v46 = vpop.f32.mrb[63].mxu1  ;;  %v5554_v44 = vpop.f32.mrb[63].mxu0 }
 0x85e   :  { %v5555_v8 = vadd.f32 %v5554_v44, %v5553_v16  ;;  %v4518_v0 = vadd.f32 %v4435_v46, %v4059_v61  ;;  %v5198_v20 = vmul.f32 -1.442695, %v4517_v35  ;;  %v4549_v57 = vadd.f32 %v5552_v18, %v7852_v43 }
 0x85f   :  { %6169 = vpow2.f32 %v5194_v3  ;;  %v5195_v27 = vmul.f32 -1.442695, %v4490_v47 }
 0x860   :  { %v5199_v33 = vmul.f32 -1.442695, %v4518_v0  ;;  %v4550_v19 = vadd.f32 %v5555_v8, %v7863_v56 }
 0x861   :  { %6171 = vpow2.f32 %v5195_v27 }
 0x862   :  { %v6166_v25 = vpop.eup %6165  ;;  %6173 = vrcp.f32 %v4531_v40 }
 0x863   :  { %v4551_v31 = vmul.f32 %v6166_v25, %v4547_v62  ;;  %6175 = vrcp.f32 %v4532_v17 }
 0x864   :  { %v6168_v37 = vpop.eup %6167  ;;  %6177 = vpow2.f32 %v5198_v20 }
 0x865   :  { %v4555_v53 = vadd.f32 %v4551_v31, %v4051_v6  ;;  %v4552_v55 = vmul.f32 %v6168_v37, %v4548_v26 }
 0x867   :  { %6179 = vtanh.f32 %v4555_v53  ;;  %v4556_v23 = vadd.f32 %v4552_v55, %v4054_v4 }
 0x868   :  { %6181 = vpow2.f32 %v5199_v33 }
 0x869   :  { %6183 = vtanh.f32 %v4556_v23  ;;  %v6170_v32 = vpop.eup %6169 }
 0x86a   :  { %v4505_v2 = vadd.f32 1.0, %v6170_v32 }
 0x86b   :  { %v6172_v1 = vpop.eup %6171 }
 0x86c   :  { %v6174_v42 = vpop.eup %6173  ;;  %6185 = vrcp.f32 %v4505_v2  ;;  %v4506_v39 = vadd.f32 1.0, %v6172_v1 }
 0x86d   :  { %v6176_v50 = vpop.eup %6175  ;;  %v4563_v30 = vsub.f32 1.0, %v6174_v42  ;;  %v4575_v29 = vmul.f32 %v6174_v42, %v7865_v52 }
 0x86e   :  { %6187 = vrcp.f32 %v4506_v39  ;;  %v6178_v63 = vpop.eup %6177  ;;  %v4564_v28 = vsub.f32 1.0, %v6176_v50  ;;  %v4576_v5 = vmul.f32 %v6176_v50, %v7867_v34 }
 0x86f   :  { %v4533_v51 = vadd.f32 1.0, %v6178_v63 }
 0x871   :  { %v6180_v45 = vpop.eup %6179  ;;  %6189 = vrcp.f32 %v4533_v51 }
 0x872   :  { %v6182_v36 = vpop.eup %6181  ;;  %v4567_v38 = vmul.f32 %v6180_v45, %v4563_v30 }
 0x873   :  { %v6184_v60 = vpop.eup %6183  ;;  %v4534_v59 = vadd.f32 1.0, %v6182_v36 }
 0x874   :  { %v4579_v41 = vadd.f32 %v4575_v29, %v4567_v38  ;;  %v4568_v48 = vmul.f32 %v6184_v60, %v4564_v28 }
 0x875   :  { %6191 = vrcp.f32 %v4534_v59 }
 0x876   :  { %v4580_v58 = vadd.f32 %v4576_v5, %v4568_v48  ;;  %v6186_v11 = vpop.eup %6185 }
 0x877   :  { %v4553_v54 = vmul.f32 %v6186_v11, %v4549_v57 }
 0x878   :  { %v4587_v52 = vpack.c.bf16 %v4580_v58, %v4579_v41  ;;  %v6188_v61 = vpop.eup %6187 }
 0x879   :  { %v4557_v43 = vadd.f32 %v4553_v54, %v4057_v21  ;;  %v4554_v34 = vmul.f32 %v6188_v61, %v4550_v19 }
 0x87a   :  { %5331 = vst [vmem:[%s7927_s3 + $0x38] sm:$0xff] %v4587_v52  }
 0x87b   :  { %6193 = vtanh.f32 %v4557_v43  ;;  %v4558_v24 = vadd.f32 %v4554_v34, %v4060_v14  ;;  %v6190_v22 = vpop.eup %6189 }
 0x87c   :  { %v4565_v18 = vsub.f32 1.0, %v6190_v22  ;;  %v4577_v9 = vmul.f32 %v6190_v22, %v7877_v10 }
 0x87d   :  { %6195 = vtanh.f32 %v4558_v24 }
 0x87f   :  { %v6192_v15 = vpop.eup %6191 }
 0x880   :  { %v4566_v13 = vsub.f32 1.0, %v6192_v15  ;;  %v4578_v35 = vmul.f32 %v6192_v15, %v7879_v12 }
 0x885   :  { %v6194_v16 = vpop.eup %6193 }
 0x886   :  { %v4569_v3 = vmul.f32 %v6194_v16, %v4565_v18 }
 0x887   :  { %v6196_v56 = vpop.eup %6195 }
 0x888   :  { %v4581_v47 = vadd.f32 %v4577_v9, %v4569_v3  ;;  %v4570_v46 = vmul.f32 %v6196_v56, %v4566_v13 }
 0x88a   :  { %v4582_v44 = vadd.f32 %v4578_v35, %v4570_v46 }
 0x88c   :  { %v4588_v40 = vpack.c.bf16 %v4582_v44, %v4581_v47 }
 0x88e   :  { %5317 = vst [vmem:[%s7928_s4] sm:$0xff] %v4588_v40  }

</bundles_post_ra>
